<compile_context>
chip_gen: v7x
topology: tpu7x:2x2x1
jax: 0.10.0
libtpu: 0.0.40
codegen_flags: <defaults>
</compile_context>

<pallas_src>
import functools
import math

import jax
import jax.numpy as jnp
from jax.experimental import pallas as pl
from jax.experimental.pallas import tpu as pltpu


def _round_up(x, m):
    return -(-x // m) * m


def _layer_norm(x, g, b, eps=1e-5):
    m = jnp.mean(x, axis=-1, keepdims=True)
    v = jnp.mean((x - m) ** 2, axis=-1, keepdims=True)
    return (x - m) * jax.lax.rsqrt(v + eps) * g + b


def _gelu_exact(x):
    # exact (erf) GELU, matching PyTorch F.gelu default
    return 0.5 * x * (1.0 + jax.lax.erf(x / jnp.sqrt(jnp.float32(2.0))))


def _rep_spec(shape):
    """Full-array BlockSpec replicated across the 1-D grid."""
    n = len(shape)
    return pl.BlockSpec(shape, lambda i, _n=n: (0,) * _n)


_LAYER_PARAM_NAMES = ["wq", "bq", "wk", "bk", "wv", "bv", "wo", "bo",
                      "ln1g", "ln1b", "w1", "b1", "w2", "b2", "ln2g", "ln2b"]


# ----------------------------------------------------------------------------
# Fused kernel: patch embed + pos enc + n_layers encoder layers + flatten head
# on one resident (bn_tile * patch_pad, d_model) block.
# ----------------------------------------------------------------------------
def backbone_head_kernel(x_ref, wp_ref, bp_ref, pos_ref,
                         wq_ref, bq_ref, wk_ref, bk_ref, wv_ref, bv_ref,
                         wo_ref, bo_ref, ln1g_ref, ln1b_ref,
                         w1_ref, b1_ref, w2_ref, b2_ref, ln2g_ref, ln2b_ref,
                         wh_ref, bh_ref,
                         o_ref, z_scr,
                         *, bn_tile, patch_num, patch_pad, n_heads, n_layers):
    D = wp_ref.shape[1]
    hd = D // n_heads
    M = bn_tile * patch_pad
    scale = 1.0 / math.sqrt(hd)

    # ---- patch embedding + positional encoding (pos tiled in-kernel) -------
    z = jnp.dot(x_ref[...], wp_ref[...], preferred_element_type=jnp.float32)
    pos = jnp.broadcast_to(pos_ref[...].reshape(1, patch_pad, D),
                           (bn_tile, patch_pad, D)).reshape(M, D)
    z = z + pos + bp_ref[...]

    # key-padding mask for the padded patch slots (generated in-kernel)
    if patch_num < patch_pad:
        col = jax.lax.broadcasted_iota(jnp.int32, (patch_pad, patch_pad), 1)
        kmask = jnp.where(col < patch_num, 0.0, -1e30).astype(jnp.float32)
    else:
        kmask = None

    def layer_body(l, z):
        xb = z.astype(jnp.bfloat16)
        q = jnp.dot(xb, wq_ref[l], preferred_element_type=jnp.float32) + bq_ref[l]
        k = jnp.dot(xb, wk_ref[l], preferred_element_type=jnp.float32) + bk_ref[l]
        v = jnp.dot(xb, wv_ref[l], preferred_element_type=jnp.float32) + bv_ref[l]

        # block-diagonal attention: per-series batched (bn, P_pad, P_pad)
        heads = []
        for h in range(n_heads):                 # static unroll over heads
            sl = slice(h * hd, (h + 1) * hd)
            qh = q[:, sl].astype(jnp.bfloat16).reshape(bn_tile, patch_pad, hd)
            kh = k[:, sl].astype(jnp.bfloat16).reshape(bn_tile, patch_pad, hd)
            vh = v[:, sl].astype(jnp.bfloat16).reshape(bn_tile, patch_pad, hd)
            s = jnp.einsum("bqd,bkd->bqk", qh, kh,
                           preferred_element_type=jnp.float32) * scale
            if kmask is not None:
                s = s + kmask
            s = s - jnp.max(s, axis=-1, keepdims=True)
            e = jnp.exp(s)
            p = e * pl.reciprocal(jnp.sum(e, axis=-1, keepdims=True),
                                  approx=True)
            oh = jnp.einsum("bqk,bkd->bqd", p.astype(jnp.bfloat16), vh,
                            preferred_element_type=jnp.float32)
            heads.append(oh.reshape(M, hd))

        # single full-depth W_O matmul over the concatenated heads
        attn_cat = jnp.concatenate(heads, axis=-1).astype(jnp.bfloat16)
        attn = (jnp.dot(attn_cat, wo_ref[l], preferred_element_type=jnp.float32)
                + bo_ref[l])

        x1 = _layer_norm(z + attn, ln1g_ref[l], ln1b_ref[l])

        ff = jnp.dot(x1.astype(jnp.bfloat16), w1_ref[l],
                     preferred_element_type=jnp.float32) + b1_ref[l]
        ff = _gelu_exact(ff)
        ff = jnp.dot(ff.astype(jnp.bfloat16), w2_ref[l],
                     preferred_element_type=jnp.float32) + b2_ref[l]

        return _layer_norm(x1 + ff, ln2g_ref[l], ln2b_ref[l])

    if n_layers <= 3:                            # shallow: static unroll
        for l in range(n_layers):
            z = layer_body(l, z)
    else:                                        # deep: bound live ranges
        z = jax.lax.fori_loop(0, n_layers, layer_body, z)

    # ---- fused Flatten_Head (lane-dense, padded-to-128 output) -------------
    twp = wh_ref.shape[2]
    z_scr[...] = z                                # (M, D) f32 resident scratch
    acc = jnp.zeros((bn_tile, twp), jnp.float32) + bh_ref[...]
    for p in range(patch_num):                    # only real patches contribute
        zp = z_scr[pl.ds(p, bn_tile, stride=patch_pad), :].astype(jnp.bfloat16)
        acc = acc + jnp.dot(zp, wh_ref[p], preferred_element_type=jnp.float32)
    o_ref[...] = acc


# ----------------------------------------------------------------------------
# Parameter init
# ----------------------------------------------------------------------------
def init_params(key, *, patch_len, d_model, d_ff, n_layers, patch_num,
                target_window):
    ks = jax.random.split(key, 9)

    def nrm(k, shape, scale=0.02):
        return scale * jax.random.normal(k, shape, dtype=jnp.float32)

    bf = jnp.bfloat16
    params = {
        # MXU operands in bf16; biases / LN params / pos in f32.
        "W_P": nrm(ks[0], (patch_len, d_model)).astype(bf),
        "b_P": jnp.zeros((1, d_model), jnp.float32),
        # pe='zeros', learn_pe=True -> uniform(-0.02, 0.02) init (PatchTST)
        "pos": 0.02 * (2.0 * jax.random.uniform(
            ks[1], (patch_num, d_model), dtype=jnp.float32) - 1.0),
        "wq": nrm(ks[2], (n_layers, d_model, d_model)).astype(bf),
        "wk": nrm(ks[3], (n_layers, d_model, d_model)).astype(bf),
        "wv": nrm(ks[4], (n_layers, d_model, d_model)).astype(bf),
        "wo": nrm(ks[5], (n_layers, d_model, d_model)).astype(bf),
        "bq": jnp.zeros((n_layers, 1, d_model), jnp.float32),
        "bk": jnp.zeros((n_layers, 1, d_model), jnp.float32),
        "bv": jnp.zeros((n_layers, 1, d_model), jnp.float32),
        "bo": jnp.zeros((n_layers, 1, d_model), jnp.float32),
        "ln1g": jnp.ones((n_layers, 1, d_model), jnp.float32),
        "ln1b": jnp.zeros((n_layers, 1, d_model), jnp.float32),
        "w1": nrm(ks[6], (n_layers, d_model, d_ff)).astype(bf),
        "b1": jnp.zeros((n_layers, 1, d_ff), jnp.float32),
        "w2": nrm(ks[7], (n_layers, d_ff, d_model)).astype(bf),
        "b2": jnp.zeros((n_layers, 1, d_model), jnp.float32),
        "ln2g": jnp.ones((n_layers, 1, d_model), jnp.float32),
        "ln2b": jnp.zeros((n_layers, 1, d_model), jnp.float32),
        # Flatten_Head weight stored (patch, d_model, target_window).  Torch
        # Linear weight W of shape (Tw, d_model*patch_num) (flatten is
        # d_model-major) maps via W.reshape(Tw, D, P).transpose(2, 1, 0).
        "W_head": nrm(ks[8], (patch_num, d_model, target_window)).astype(bf),
        "b_head": jnp.zeros((1, target_window), jnp.float32),
    }
    return params


# ----------------------------------------------------------------------------
# Forward
# ----------------------------------------------------------------------------
def swin_patchtst_forward(x, params, *, patch_len, stride, n_heads,
                          bn_tile=None):
    """x: [B, seq_len, n_vars]  ->  [B, n_vars, target_window]"""
    B, S, C = x.shape
    P = (S - patch_len) // stride + 1
    P_pad = _round_up(P, 8)
    D = params["W_P"].shape[1]
    d_ff = params["w1"].shape[2]
    n_layers = params["wq"].shape[0]
    Tw = params["b_head"].shape[1]
    TWP = _round_up(Tw, 128)
    BN = B * C
    L = patch_len

    # x.permute(0, 2, 1) then unfold patching (padding_patch=None default).
    xc = jnp.transpose(x, (0, 2, 1)).reshape(BN, S).astype(jnp.float32)
    patches = jnp.stack(
        [xc[:, i * stride:i * stride + patch_len] for i in range(P)], axis=1)
    if P_pad != P:
        patches = jnp.pad(patches, ((0, 0), (0, P_pad - P), (0, 0)))

    # --- tiling: bn_tile series per grid step, always >= 2 grid steps --------
    if bn_tile is None:
        bn_tile = max(8, ((512 // P_pad) // 8) * 8)
    bn_tile = max(8, (bn_tile // 8) * 8)
    cap = max(8, _round_up(-(-BN // 2), 8))       # force >= 2 tiles (megacore)
    bn_tile = min(bn_tile, cap)
    n_tiles = max(2, -(-BN // bn_tile))
    BN_pad = n_tiles * bn_tile
    if BN_pad != BN:
        patches = jnp.pad(patches, ((0, BN_pad - BN), (0, 0), (0, 0)))
    patches = patches.reshape(BN_pad * P_pad, L).astype(jnp.bfloat16)
    M = bn_tile * P_pad

    # --- pad params to kernel-friendly shapes ---------------------------------
    pos = params["pos"]
    if P_pad != P:
        pos = jnp.pad(pos, ((0, P_pad - P), (0, 0)))
    wh, bh = params["W_head"], params["b_head"]
    if TWP != Tw:
        wh = jnp.pad(wh, ((0, 0), (0, 0), (0, TWP - Tw)))
        bh = jnp.pad(bh, ((0, 0), (0, TWP - Tw)))

    operands = ([patches, params["W_P"], params["b_P"], pos]
                + [params[n] for n in _LAYER_PARAM_NAMES] + [wh, bh])
    in_specs = ([pl.BlockSpec((M, L), lambda i: (i, 0))]
                + [_rep_spec(a.shape) for a in operands[1:]])

    # --- advisory cost estimate + explicit VMEM budget ------------------------
    flops_tile = (2 * M * L * D
                  + n_layers * (8 * M * D * D + 4 * M * D * d_ff
                                + 4 * bn_tile * P_pad * P_pad * D)
                  + 2 * bn_tile * P * D * TWP)
    trans_tile = n_layers * (n_heads * bn_tile * P_pad * P_pad + M * d_ff + 2 * M)
    param_bytes = sum(int(a.size) * a.dtype.itemsize for a in operands[1:])
    bytes_accessed = int(patches.size) * 2 + param_bytes + BN_pad * TWP * 4
    cost = pl.CostEstimate(flops=int(n_tiles * flops_tile),
                           transcendentals=int(n_tiles * trans_tile),
                           bytes_accessed=int(bytes_accessed))
    est_vmem = (2 * (param_bytes + M * L * 2 + bn_tile * TWP * 4)
                + 12 * M * max(D, d_ff) * 4 + M * D * 4)
    vmem_limit = int(min(56 * 2 ** 20, max(32 * 2 ** 20, 2 * est_vmem)))

    kern = functools.partial(backbone_head_kernel, bn_tile=bn_tile,
                             patch_num=P, patch_pad=P_pad,
                             n_heads=n_heads, n_layers=n_layers)

    out = pl.pallas_call(
        kern,
        out_shape=jax.ShapeDtypeStruct((BN_pad, TWP), jnp.float32),
        grid=(n_tiles,),
        in_specs=in_specs,
        out_specs=pl.BlockSpec((bn_tile, TWP), lambda i: (i, 0)),
        scratch_shapes=[pltpu.VMEM((M, D), jnp.float32)],
        compiler_params=pltpu.CompilerParams(
            dimension_semantics=("parallel",),
            vmem_limit_bytes=vmem_limit),
        cost_estimate=cost,
    )(*operands)

    return out[:BN, :Tw].reshape(B, C, Tw)


# ----------------------------------------------------------------------------
if __name__ == "__main__":
    # small config consistent with the module (head_type='flatten' default)
    B, seq_len, c_in = 2, 64, 4
    patch_len, stride = 16, 8
    d_model, d_ff = 32, 64
    n_layers, n_heads = 2, 4
    target_window = 16
    patch_num = (seq_len - patch_len) // stride + 1  # 7

    key = jax.random.PRNGKey(0)
    kx, kp = jax.random.split(key)
    x = jax.random.normal(kx, (B, seq_len, c_in), dtype=jnp.float32)
    params = init_params(kp, patch_len=patch_len, d_model=d_model, d_ff=d_ff,
                         n_layers=n_layers, patch_num=patch_num,
                         target_window=target_window)

    fwd = jax.jit(functools.partial(swin_patchtst_forward,
                                    patch_len=patch_len, stride=stride,
                                    n_heads=n_heads))
    out = fwd(x, params)
    out = jax.block_until_ready(out)
    assert out.shape == (B, c_in, target_window)
    assert bool(jnp.all(jnp.isfinite(out)))
    print("KERNEL_OK")
</pallas_src>

<mosaic_0001>
module attributes {stable_mosaic.version = 11 : i64} {
  func.func @backbone_head_kernel(%arg0: i32, %arg1: memref<64x16xbf16, #tpu.memory_space<vmem>>, %arg2: memref<16x32xbf16, #tpu.memory_space<vmem>>, %arg3: memref<1x32xf32, #tpu.memory_space<vmem>>, %arg4: memref<8x32xf32, #tpu.memory_space<vmem>>, %arg5: memref<2x32x32xbf16, #tpu.memory_space<vmem>>, %arg6: memref<2x1x32xf32, #tpu.memory_space<vmem>>, %arg7: memref<2x32x32xbf16, #tpu.memory_space<vmem>>, %arg8: memref<2x1x32xf32, #tpu.memory_space<vmem>>, %arg9: memref<2x32x32xbf16, #tpu.memory_space<vmem>>, %arg10: memref<2x1x32xf32, #tpu.memory_space<vmem>>, %arg11: memref<2x32x32xbf16, #tpu.memory_space<vmem>>, %arg12: memref<2x1x32xf32, #tpu.memory_space<vmem>>, %arg13: memref<2x1x32xf32, #tpu.memory_space<vmem>>, %arg14: memref<2x1x32xf32, #tpu.memory_space<vmem>>, %arg15: memref<2x32x64xbf16, #tpu.memory_space<vmem>>, %arg16: memref<2x1x64xf32, #tpu.memory_space<vmem>>, %arg17: memref<2x64x32xbf16, #tpu.memory_space<vmem>>, %arg18: memref<2x1x32xf32, #tpu.memory_space<vmem>>, %arg19: memref<2x1x32xf32, #tpu.memory_space<vmem>>, %arg20: memref<2x1x32xf32, #tpu.memory_space<vmem>>, %arg21: memref<7x32x128xbf16, #tpu.memory_space<vmem>>, %arg22: memref<1x128xf32, #tpu.memory_space<vmem>>, %arg23: memref<8x128xf32, #tpu.memory_space<vmem>>, %arg24: memref<64x32xf32, #tpu.memory_space<vmem>>) attributes {dimension_semantics = [#tpu.dimension_semantics<parallel>], iteration_bounds = array<i64: 2>, scalar_prefetch = 0 : i64, scratch_operands = 1 : i64, tpu.core_type = #tpu.core_type<tc>, window_params = [{transform_indices = @transform_0, window_bounds = array<i64: 64, 16>}, {pipeline_mode = #tpu.pipeline_mode<synchronous>, transform_indices = @transform_1, window_bounds = array<i64: 16, 32>}, {pipeline_mode = #tpu.pipeline_mode<synchronous>, transform_indices = @transform_2, window_bounds = array<i64: 1, 32>}, {pipeline_mode = #tpu.pipeline_mode<synchronous>, transform_indices = @transform_3, window_bounds = array<i64: 8, 32>}, {pipeline_mode = #tpu.pipeline_mode<synchronous>, transform_indices = @transform_4, window_bounds = array<i64: 2, 32, 32>}, {pipeline_mode = #tpu.pipeline_mode<synchronous>, transform_indices = @transform_5, window_bounds = array<i64: 2, 1, 32>}, {pipeline_mode = #tpu.pipeline_mode<synchronous>, transform_indices = @transform_6, window_bounds = array<i64: 2, 32, 32>}, {pipeline_mode = #tpu.pipeline_mode<synchronous>, transform_indices = @transform_7, window_bounds = array<i64: 2, 1, 32>}, {pipeline_mode = #tpu.pipeline_mode<synchronous>, transform_indices = @transform_8, window_bounds = array<i64: 2, 32, 32>}, {pipeline_mode = #tpu.pipeline_mode<synchronous>, transform_indices = @transform_9, window_bounds = array<i64: 2, 1, 32>}, {pipeline_mode = #tpu.pipeline_mode<synchronous>, transform_indices = @transform_10, window_bounds = array<i64: 2, 32, 32>}, {pipeline_mode = #tpu.pipeline_mode<synchronous>, transform_indices = @transform_11, window_bounds = array<i64: 2, 1, 32>}, {pipeline_mode = #tpu.pipeline_mode<synchronous>, transform_indices = @transform_12, window_bounds = array<i64: 2, 1, 32>}, {pipeline_mode = #tpu.pipeline_mode<synchronous>, transform_indices = @transform_13, window_bounds = array<i64: 2, 1, 32>}, {pipeline_mode = #tpu.pipeline_mode<synchronous>, transform_indices = @transform_14, window_bounds = array<i64: 2, 32, 64>}, {pipeline_mode = #tpu.pipeline_mode<synchronous>, transform_indices = @transform_15, window_bounds = array<i64: 2, 1, 64>}, {pipeline_mode = #tpu.pipeline_mode<synchronous>, transform_indices = @transform_16, window_bounds = array<i64: 2, 64, 32>}, {pipeline_mode = #tpu.pipeline_mode<synchronous>, transform_indices = @transform_17, window_bounds = array<i64: 2, 1, 32>}, {pipeline_mode = #tpu.pipeline_mode<synchronous>, transform_indices = @transform_18, window_bounds = array<i64: 2, 1, 32>}, {pipeline_mode = #tpu.pipeline_mode<synchronous>, transform_indices = @transform_19, window_bounds = array<i64: 2, 1, 32>}, {pipeline_mode = #tpu.pipeline_mode<synchronous>, transform_indices = @transform_20, window_bounds = array<i64: 7, 32, 128>}, {pipeline_mode = #tpu.pipeline_mode<synchronous>, transform_indices = @transform_21, window_bounds = array<i64: 1, 128>}, {transform_indices = @transform_22, window_bounds = array<i64: 8, 128>}]} {
    %c0 = arith.constant 0 : index
    %c0_0 = arith.constant 0 : index
    %0 = vector.load %arg1[%c0, %c0_0] : memref<64x16xbf16, #tpu.memory_space<vmem>>, vector<64x16xbf16>
    %c0_1 = arith.constant 0 : index
    %c0_2 = arith.constant 0 : index
    %1 = vector.load %arg2[%c0_1, %c0_2] : memref<16x32xbf16, #tpu.memory_space<vmem>>, vector<16x32xbf16>
    %cst = arith.constant dense<0.000000e+00> : vector<64x32xf32>
    %2 = tpu.matmul %0, %1, %cst {dimension_numbers = #tpu.dot_dimension_numbers<[1], [0], [0], [1], [0, 0, 1, 1], [], []>} : vector<64x16xbf16>, vector<16x32xbf16>, vector<64x32xf32> -> vector<64x32xf32>
    %c0_3 = arith.constant 0 : index
    %c0_4 = arith.constant 0 : index
    %3 = vector.load %arg4[%c0_3, %c0_4] : memref<8x32xf32, #tpu.memory_space<vmem>>, vector<8x32xf32>
    %4 = vector.shape_cast %3 : vector<8x32xf32> to vector<1x8x32xf32>
    %5 = vector.shape_cast %4 : vector<1x8x32xf32> to vector<1x8x32xf32>
    %6 = vector.broadcast %5 : vector<1x8x32xf32> to vector<8x8x32xf32>
    %7 = vector.shape_cast %6 : vector<8x8x32xf32> to vector<64x32xf32>
    %8 = arith.addf %2, %7 : vector<64x32xf32>
    %c0_5 = arith.constant 0 : index
    %c0_6 = arith.constant 0 : index
    %9 = vector.load %arg3[%c0_5, %c0_6] : memref<1x32xf32, #tpu.memory_space<vmem>>, vector<1x32xf32>
    %10 = vector.broadcast %9 : vector<1x32xf32> to vector<64x32xf32>
    %11 = arith.addf %8, %10 : vector<64x32xf32>
    %12 = tpu.iota {dimensions = array<i32: 1>} : vector<8x8xi32>
    %c7_i32 = arith.constant 7 : i32
    %13 = vector.broadcast %c7_i32 : i32 to vector<8x8xi32>
    %14 = arith.cmpi slt, %12, %13 : vector<8x8xi32>
    %cst_7 = arith.constant 0.000000e+00 : f32
    %cst_8 = arith.constant -1.000000e+30 : f32
    %15 = vector.broadcast %cst_7 : f32 to vector<8x8xf32>
    %16 = vector.broadcast %cst_8 : f32 to vector<8x8xf32>
    %17 = arith.select %14, %15, %16 : vector<8x8xi1>, vector<8x8xf32>
    %18 = arith.truncf %11 : vector<64x32xf32> to vector<64x32xbf16>
    %c0_9 = arith.constant 0 : index
    %c0_10 = arith.constant 0 : index
    %c0_11 = arith.constant 0 : index
    %19 = vector.load %arg5[%c0_9, %c0_10, %c0_11] : memref<2x32x32xbf16, #tpu.memory_space<vmem>>, vector<1x32x32xbf16>
    %20 = vector.shape_cast %19 : vector<1x32x32xbf16> to vector<32x32xbf16>
    %cst_12 = arith.constant dense<0.000000e+00> : vector<64x32xf32>
    %21 = tpu.matmul %18, %20, %cst_12 {dimension_numbers = #tpu.dot_dimension_numbers<[1], [0], [0], [1], [0, 0, 1, 1], [], []>} : vector<64x32xbf16>, vector<32x32xbf16>, vector<64x32xf32> -> vector<64x32xf32>
    %c0_13 = arith.constant 0 : index
    %c0_14 = arith.constant 0 : index
    %c0_15 = arith.constant 0 : index
    %22 = vector.load %arg6[%c0_13, %c0_14, %c0_15] : memref<2x1x32xf32, #tpu.memory_space<vmem>>, vector<1x1x32xf32>
    %23 = vector.shape_cast %22 : vector<1x1x32xf32> to vector<1x32xf32>
    %24 = vector.broadcast %23 : vector<1x32xf32> to vector<64x32xf32>
    %25 = arith.addf %21, %24 : vector<64x32xf32>
    %c0_16 = arith.constant 0 : index
    %c0_17 = arith.constant 0 : index
    %c0_18 = arith.constant 0 : index
    %26 = vector.load %arg7[%c0_16, %c0_17, %c0_18] : memref<2x32x32xbf16, #tpu.memory_space<vmem>>, vector<1x32x32xbf16>
    %27 = vector.shape_cast %26 : vector<1x32x32xbf16> to vector<32x32xbf16>
    %cst_19 = arith.constant dense<0.000000e+00> : vector<64x32xf32>
    %28 = tpu.matmul %18, %27, %cst_19 {dimension_numbers = #tpu.dot_dimension_numbers<[1], [0], [0], [1], [0, 0, 1, 1], [], []>} : vector<64x32xbf16>, vector<32x32xbf16>, vector<64x32xf32> -> vector<64x32xf32>
    %c0_20 = arith.constant 0 : index
    %c0_21 = arith.constant 0 : index
    %c0_22 = arith.constant 0 : index
    %29 = vector.load %arg8[%c0_20, %c0_21, %c0_22] : memref<2x1x32xf32, #tpu.memory_space<vmem>>, vector<1x1x32xf32>
    %30 = vector.shape_cast %29 : vector<1x1x32xf32> to vector<1x32xf32>
    %31 = vector.broadcast %30 : vector<1x32xf32> to vector<64x32xf32>
    %32 = arith.addf %28, %31 : vector<64x32xf32>
    %c0_23 = arith.constant 0 : index
    %c0_24 = arith.constant 0 : index
    %c0_25 = arith.constant 0 : index
    %33 = vector.load %arg9[%c0_23, %c0_24, %c0_25] : memref<2x32x32xbf16, #tpu.memory_space<vmem>>, vector<1x32x32xbf16>
    %34 = vector.shape_cast %33 : vector<1x32x32xbf16> to vector<32x32xbf16>
    %cst_26 = arith.constant dense<0.000000e+00> : vector<64x32xf32>
    %35 = tpu.matmul %18, %34, %cst_26 {dimension_numbers = #tpu.dot_dimension_numbers<[1], [0], [0], [1], [0, 0, 1, 1], [], []>} : vector<64x32xbf16>, vector<32x32xbf16>, vector<64x32xf32> -> vector<64x32xf32>
    %c0_27 = arith.constant 0 : index
    %c0_28 = arith.constant 0 : index
    %c0_29 = arith.constant 0 : index
    %36 = vector.load %arg10[%c0_27, %c0_28, %c0_29] : memref<2x1x32xf32, #tpu.memory_space<vmem>>, vector<1x1x32xf32>
    %37 = vector.shape_cast %36 : vector<1x1x32xf32> to vector<1x32xf32>
    %38 = vector.broadcast %37 : vector<1x32xf32> to vector<64x32xf32>
    %39 = arith.addf %35, %38 : vector<64x32xf32>
    %40 = vector.extract_strided_slice %25 {offsets = [0, 0], sizes = [64, 8], strides = [1, 1]} : vector<64x32xf32> to vector<64x8xf32>
    %41 = arith.truncf %40 : vector<64x8xf32> to vector<64x8xbf16>
    %42 = vector.shape_cast %41 : vector<64x8xbf16> to vector<8x8x8xbf16>
    %43 = vector.extract_strided_slice %32 {offsets = [0, 0], sizes = [64, 8], strides = [1, 1]} : vector<64x32xf32> to vector<64x8xf32>
    %44 = arith.truncf %43 : vector<64x8xf32> to vector<64x8xbf16>
    %45 = vector.shape_cast %44 : vector<64x8xbf16> to vector<8x8x8xbf16>
    %46 = vector.extract_strided_slice %39 {offsets = [0, 0], sizes = [64, 8], strides = [1, 1]} : vector<64x32xf32> to vector<64x8xf32>
    %47 = arith.truncf %46 : vector<64x8xf32> to vector<64x8xbf16>
    %48 = vector.shape_cast %47 : vector<64x8xbf16> to vector<8x8x8xbf16>
    "tpu.trace_start"() <{level = 10 : i32, message = "bqd,bkd->bqk"}> : () -> ()
    %cst_30 = arith.constant dense<0.000000e+00> : vector<8x8x8xf32>
    %49 = tpu.matmul %42, %45, %cst_30 {dimension_numbers = #tpu.dot_dimension_numbers<[2], [2], [1], [1], [0, 0, 0, 1, 1, 1], [0], [0]>} : vector<8x8x8xbf16>, vector<8x8x8xbf16>, vector<8x8x8xf32> -> vector<8x8x8xf32>
    "tpu.trace_stop"() : () -> ()
    %cst_31 = arith.constant 0.353553385 : f32
    %50 = vector.broadcast %cst_31 : f32 to vector<8x8x8xf32>
    %51 = arith.mulf %49, %50 : vector<8x8x8xf32>
    %52 = vector.shape_cast %17 : vector<8x8xf32> to vector<1x8x8xf32>
    %53 = vector.broadcast %52 : vector<1x8x8xf32> to vector<8x8x8xf32>
    %54 = arith.addf %51, %53 : vector<8x8x8xf32>
    %cst_32 = arith.constant dense<0xFF800000> : vector<8x8xf32>
    %55 = vector.multi_reduction <maximumf>, %54, %cst_32 [2] : vector<8x8x8xf32> to vector<8x8xf32>
    %56 = vector.shape_cast %55 : vector<8x8xf32> to vector<8x8x1xf32>
    %57 = vector.broadcast %56 : vector<8x8x1xf32> to vector<8x8x8xf32>
    %58 = arith.subf %54, %57 : vector<8x8x8xf32>
    %59 = math.exp %58 : vector<8x8x8xf32>
    %cst_33 = arith.constant dense<0.000000e+00> : vector<8x8xf32>
    %60 = vector.multi_reduction <add>, %59, %cst_33 [2] : vector<8x8x8xf32> to vector<8x8xf32>
    %61 = vector.shape_cast %60 : vector<8x8xf32> to vector<8x8x1xf32>
    %62 = tpu.reciprocal %61 {approx = true} : vector<8x8x1xf32> -> vector<8x8x1xf32>
    %63 = vector.broadcast %62 : vector<8x8x1xf32> to vector<8x8x8xf32>
    %64 = arith.mulf %59, %63 : vector<8x8x8xf32>
    %65 = arith.truncf %64 : vector<8x8x8xf32> to vector<8x8x8xbf16>
    "tpu.trace_start"() <{level = 10 : i32, message = "bqk,bkd->bqd"}> : () -> ()
    %cst_34 = arith.constant dense<0.000000e+00> : vector<8x8x8xf32>
    %66 = tpu.matmul %65, %48, %cst_34 {dimension_numbers = #tpu.dot_dimension_numbers<[2], [1], [1], [2], [0, 0, 0, 1, 1, 2], [0], [0]>} : vector<8x8x8xbf16>, vector<8x8x8xbf16>, vector<8x8x8xf32> -> vector<8x8x8xf32>
    "tpu.trace_stop"() : () -> ()
    %67 = vector.shape_cast %66 : vector<8x8x8xf32> to vector<64x8xf32>
    %68 = vector.extract_strided_slice %25 {offsets = [0, 8], sizes = [64, 8], strides = [1, 1]} : vector<64x32xf32> to vector<64x8xf32>
    %69 = arith.truncf %68 : vector<64x8xf32> to vector<64x8xbf16>
    %70 = vector.shape_cast %69 : vector<64x8xbf16> to vector<8x8x8xbf16>
    %71 = vector.extract_strided_slice %32 {offsets = [0, 8], sizes = [64, 8], strides = [1, 1]} : vector<64x32xf32> to vector<64x8xf32>
    %72 = arith.truncf %71 : vector<64x8xf32> to vector<64x8xbf16>
    %73 = vector.shape_cast %72 : vector<64x8xbf16> to vector<8x8x8xbf16>
    %74 = vector.extract_strided_slice %39 {offsets = [0, 8], sizes = [64, 8], strides = [1, 1]} : vector<64x32xf32> to vector<64x8xf32>
    %75 = arith.truncf %74 : vector<64x8xf32> to vector<64x8xbf16>
    %76 = vector.shape_cast %75 : vector<64x8xbf16> to vector<8x8x8xbf16>
    "tpu.trace_start"() <{level = 10 : i32, message = "bqd,bkd->bqk"}> : () -> ()
    %cst_35 = arith.constant dense<0.000000e+00> : vector<8x8x8xf32>
    %77 = tpu.matmul %70, %73, %cst_35 {dimension_numbers = #tpu.dot_dimension_numbers<[2], [2], [1], [1], [0, 0, 0, 1, 1, 1], [0], [0]>} : vector<8x8x8xbf16>, vector<8x8x8xbf16>, vector<8x8x8xf32> -> vector<8x8x8xf32>
    "tpu.trace_stop"() : () -> ()
    %cst_36 = arith.constant 0.353553385 : f32
    %78 = vector.broadcast %cst_36 : f32 to vector<8x8x8xf32>
    %79 = arith.mulf %77, %78 : vector<8x8x8xf32>
    %80 = vector.shape_cast %17 : vector<8x8xf32> to vector<1x8x8xf32>
    %81 = vector.broadcast %80 : vector<1x8x8xf32> to vector<8x8x8xf32>
    %82 = arith.addf %79, %81 : vector<8x8x8xf32>
    %cst_37 = arith.constant dense<0xFF800000> : vector<8x8xf32>
    %83 = vector.multi_reduction <maximumf>, %82, %cst_37 [2] : vector<8x8x8xf32> to vector<8x8xf32>
    %84 = vector.shape_cast %83 : vector<8x8xf32> to vector<8x8x1xf32>
    %85 = vector.broadcast %84 : vector<8x8x1xf32> to vector<8x8x8xf32>
    %86 = arith.subf %82, %85 : vector<8x8x8xf32>
    %87 = math.exp %86 : vector<8x8x8xf32>
    %cst_38 = arith.constant dense<0.000000e+00> : vector<8x8xf32>
    %88 = vector.multi_reduction <add>, %87, %cst_38 [2] : vector<8x8x8xf32> to vector<8x8xf32>
    %89 = vector.shape_cast %88 : vector<8x8xf32> to vector<8x8x1xf32>
    %90 = tpu.reciprocal %89 {approx = true} : vector<8x8x1xf32> -> vector<8x8x1xf32>
    %91 = vector.broadcast %90 : vector<8x8x1xf32> to vector<8x8x8xf32>
    %92 = arith.mulf %87, %91 : vector<8x8x8xf32>
    %93 = arith.truncf %92 : vector<8x8x8xf32> to vector<8x8x8xbf16>
    "tpu.trace_start"() <{level = 10 : i32, message = "bqk,bkd->bqd"}> : () -> ()
    %cst_39 = arith.constant dense<0.000000e+00> : vector<8x8x8xf32>
    %94 = tpu.matmul %93, %76, %cst_39 {dimension_numbers = #tpu.dot_dimension_numbers<[2], [1], [1], [2], [0, 0, 0, 1, 1, 2], [0], [0]>} : vector<8x8x8xbf16>, vector<8x8x8xbf16>, vector<8x8x8xf32> -> vector<8x8x8xf32>
    "tpu.trace_stop"() : () -> ()
    %95 = vector.shape_cast %94 : vector<8x8x8xf32> to vector<64x8xf32>
    %96 = vector.extract_strided_slice %25 {offsets = [0, 16], sizes = [64, 8], strides = [1, 1]} : vector<64x32xf32> to vector<64x8xf32>
    %97 = arith.truncf %96 : vector<64x8xf32> to vector<64x8xbf16>
    %98 = vector.shape_cast %97 : vector<64x8xbf16> to vector<8x8x8xbf16>
    %99 = vector.extract_strided_slice %32 {offsets = [0, 16], sizes = [64, 8], strides = [1, 1]} : vector<64x32xf32> to vector<64x8xf32>
    %100 = arith.truncf %99 : vector<64x8xf32> to vector<64x8xbf16>
    %101 = vector.shape_cast %100 : vector<64x8xbf16> to vector<8x8x8xbf16>
    %102 = vector.extract_strided_slice %39 {offsets = [0, 16], sizes = [64, 8], strides = [1, 1]} : vector<64x32xf32> to vector<64x8xf32>
    %103 = arith.truncf %102 : vector<64x8xf32> to vector<64x8xbf16>
    %104 = vector.shape_cast %103 : vector<64x8xbf16> to vector<8x8x8xbf16>
    "tpu.trace_start"() <{level = 10 : i32, message = "bqd,bkd->bqk"}> : () -> ()
    %cst_40 = arith.constant dense<0.000000e+00> : vector<8x8x8xf32>
    %105 = tpu.matmul %98, %101, %cst_40 {dimension_numbers = #tpu.dot_dimension_numbers<[2], [2], [1], [1], [0, 0, 0, 1, 1, 1], [0], [0]>} : vector<8x8x8xbf16>, vector<8x8x8xbf16>, vector<8x8x8xf32> -> vector<8x8x8xf32>
    "tpu.trace_stop"() : () -> ()
    %cst_41 = arith.constant 0.353553385 : f32
    %106 = vector.broadcast %cst_41 : f32 to vector<8x8x8xf32>
    %107 = arith.mulf %105, %106 : vector<8x8x8xf32>
    %108 = vector.shape_cast %17 : vector<8x8xf32> to vector<1x8x8xf32>
    %109 = vector.broadcast %108 : vector<1x8x8xf32> to vector<8x8x8xf32>
    %110 = arith.addf %107, %109 : vector<8x8x8xf32>
    %cst_42 = arith.constant dense<0xFF800000> : vector<8x8xf32>
    %111 = vector.multi_reduction <maximumf>, %110, %cst_42 [2] : vector<8x8x8xf32> to vector<8x8xf32>
    %112 = vector.shape_cast %111 : vector<8x8xf32> to vector<8x8x1xf32>
    %113 = vector.broadcast %112 : vector<8x8x1xf32> to vector<8x8x8xf32>
    %114 = arith.subf %110, %113 : vector<8x8x8xf32>
    %115 = math.exp %114 : vector<8x8x8xf32>
    %cst_43 = arith.constant dense<0.000000e+00> : vector<8x8xf32>
    %116 = vector.multi_reduction <add>, %115, %cst_43 [2] : vector<8x8x8xf32> to vector<8x8xf32>
    %117 = vector.shape_cast %116 : vector<8x8xf32> to vector<8x8x1xf32>
    %118 = tpu.reciprocal %117 {approx = true} : vector<8x8x1xf32> -> vector<8x8x1xf32>
    %119 = vector.broadcast %118 : vector<8x8x1xf32> to vector<8x8x8xf32>
    %120 = arith.mulf %115, %119 : vector<8x8x8xf32>
    %121 = arith.truncf %120 : vector<8x8x8xf32> to vector<8x8x8xbf16>
    "tpu.trace_start"() <{level = 10 : i32, message = "bqk,bkd->bqd"}> : () -> ()
    %cst_44 = arith.constant dense<0.000000e+00> : vector<8x8x8xf32>
    %122 = tpu.matmul %121, %104, %cst_44 {dimension_numbers = #tpu.dot_dimension_numbers<[2], [1], [1], [2], [0, 0, 0, 1, 1, 2], [0], [0]>} : vector<8x8x8xbf16>, vector<8x8x8xbf16>, vector<8x8x8xf32> -> vector<8x8x8xf32>
    "tpu.trace_stop"() : () -> ()
    %123 = vector.shape_cast %122 : vector<8x8x8xf32> to vector<64x8xf32>
    %124 = vector.extract_strided_slice %25 {offsets = [0, 24], sizes = [64, 8], strides = [1, 1]} : vector<64x32xf32> to vector<64x8xf32>
    %125 = arith.truncf %124 : vector<64x8xf32> to vector<64x8xbf16>
    %126 = vector.shape_cast %125 : vector<64x8xbf16> to vector<8x8x8xbf16>
    %127 = vector.extract_strided_slice %32 {offsets = [0, 24], sizes = [64, 8], strides = [1, 1]} : vector<64x32xf32> to vector<64x8xf32>
    %128 = arith.truncf %127 : vector<64x8xf32> to vector<64x8xbf16>
    %129 = vector.shape_cast %128 : vector<64x8xbf16> to vector<8x8x8xbf16>
    %130 = vector.extract_strided_slice %39 {offsets = [0, 24], sizes = [64, 8], strides = [1, 1]} : vector<64x32xf32> to vector<64x8xf32>
    %131 = arith.truncf %130 : vector<64x8xf32> to vector<64x8xbf16>
    %132 = vector.shape_cast %131 : vector<64x8xbf16> to vector<8x8x8xbf16>
    "tpu.trace_start"() <{level = 10 : i32, message = "bqd,bkd->bqk"}> : () -> ()
    %cst_45 = arith.constant dense<0.000000e+00> : vector<8x8x8xf32>
    %133 = tpu.matmul %126, %129, %cst_45 {dimension_numbers = #tpu.dot_dimension_numbers<[2], [2], [1], [1], [0, 0, 0, 1, 1, 1], [0], [0]>} : vector<8x8x8xbf16>, vector<8x8x8xbf16>, vector<8x8x8xf32> -> vector<8x8x8xf32>
    "tpu.trace_stop"() : () -> ()
    %cst_46 = arith.constant 0.353553385 : f32
    %134 = vector.broadcast %cst_46 : f32 to vector<8x8x8xf32>
    %135 = arith.mulf %133, %134 : vector<8x8x8xf32>
    %136 = vector.shape_cast %17 : vector<8x8xf32> to vector<1x8x8xf32>
    %137 = vector.broadcast %136 : vector<1x8x8xf32> to vector<8x8x8xf32>
    %138 = arith.addf %135, %137 : vector<8x8x8xf32>
    %cst_47 = arith.constant dense<0xFF800000> : vector<8x8xf32>
    %139 = vector.multi_reduction <maximumf>, %138, %cst_47 [2] : vector<8x8x8xf32> to vector<8x8xf32>
    %140 = vector.shape_cast %139 : vector<8x8xf32> to vector<8x8x1xf32>
    %141 = vector.broadcast %140 : vector<8x8x1xf32> to vector<8x8x8xf32>
    %142 = arith.subf %138, %141 : vector<8x8x8xf32>
    %143 = math.exp %142 : vector<8x8x8xf32>
    %cst_48 = arith.constant dense<0.000000e+00> : vector<8x8xf32>
    %144 = vector.multi_reduction <add>, %143, %cst_48 [2] : vector<8x8x8xf32> to vector<8x8xf32>
    %145 = vector.shape_cast %144 : vector<8x8xf32> to vector<8x8x1xf32>
    %146 = tpu.reciprocal %145 {approx = true} : vector<8x8x1xf32> -> vector<8x8x1xf32>
    %147 = vector.broadcast %146 : vector<8x8x1xf32> to vector<8x8x8xf32>
    %148 = arith.mulf %143, %147 : vector<8x8x8xf32>
    %149 = arith.truncf %148 : vector<8x8x8xf32> to vector<8x8x8xbf16>
    "tpu.trace_start"() <{level = 10 : i32, message = "bqk,bkd->bqd"}> : () -> ()
    %cst_49 = arith.constant dense<0.000000e+00> : vector<8x8x8xf32>
    %150 = tpu.matmul %149, %132, %cst_49 {dimension_numbers = #tpu.dot_dimension_numbers<[2], [1], [1], [2], [0, 0, 0, 1, 1, 2], [0], [0]>} : vector<8x8x8xbf16>, vector<8x8x8xbf16>, vector<8x8x8xf32> -> vector<8x8x8xf32>
    "tpu.trace_stop"() : () -> ()
    %151 = vector.shape_cast %150 : vector<8x8x8xf32> to vector<64x8xf32>
    %152 = tpu.concatenate %67, %95, %123, %151 in 1 : vector<64x8xf32>, vector<64x8xf32>, vector<64x8xf32>, vector<64x8xf32> -> vector<64x32xf32>
    %153 = arith.truncf %152 : vector<64x32xf32> to vector<64x32xbf16>
    %c0_50 = arith.constant 0 : index
    %c0_51 = arith.constant 0 : index
    %c0_52 = arith.constant 0 : index
    %154 = vector.load %arg11[%c0_50, %c0_51, %c0_52] : memref<2x32x32xbf16, #tpu.memory_space<vmem>>, vector<1x32x32xbf16>
    %155 = vector.shape_cast %154 : vector<1x32x32xbf16> to vector<32x32xbf16>
    %cst_53 = arith.constant dense<0.000000e+00> : vector<64x32xf32>
    %156 = tpu.matmul %153, %155, %cst_53 {dimension_numbers = #tpu.dot_dimension_numbers<[1], [0], [0], [1], [0, 0, 1, 1], [], []>} : vector<64x32xbf16>, vector<32x32xbf16>, vector<64x32xf32> -> vector<64x32xf32>
    %c0_54 = arith.constant 0 : index
    %c0_55 = arith.constant 0 : index
    %c0_56 = arith.constant 0 : index
    %157 = vector.load %arg12[%c0_54, %c0_55, %c0_56] : memref<2x1x32xf32, #tpu.memory_space<vmem>>, vector<1x1x32xf32>
    %158 = vector.shape_cast %157 : vector<1x1x32xf32> to vector<1x32xf32>
    %159 = vector.broadcast %158 : vector<1x32xf32> to vector<64x32xf32>
    %160 = arith.addf %156, %159 : vector<64x32xf32>
    %161 = arith.addf %11, %160 : vector<64x32xf32>
    %c0_57 = arith.constant 0 : index
    %c0_58 = arith.constant 0 : index
    %c0_59 = arith.constant 0 : index
    %162 = vector.load %arg13[%c0_57, %c0_58, %c0_59] : memref<2x1x32xf32, #tpu.memory_space<vmem>>, vector<1x1x32xf32>
    %163 = vector.shape_cast %162 : vector<1x1x32xf32> to vector<1x32xf32>
    %c0_60 = arith.constant 0 : index
    %c0_61 = arith.constant 0 : index
    %c0_62 = arith.constant 0 : index
    %164 = vector.load %arg14[%c0_60, %c0_61, %c0_62] : memref<2x1x32xf32, #tpu.memory_space<vmem>>, vector<1x1x32xf32>
    %165 = vector.shape_cast %164 : vector<1x1x32xf32> to vector<1x32xf32>
    %cst_63 = arith.constant dense<0.000000e+00> : vector<64xf32>
    %166 = vector.multi_reduction <add>, %161, %cst_63 [1] : vector<64x32xf32> to vector<64xf32>
    %167 = vector.shape_cast %166 : vector<64xf32> to vector<64x1xf32>
    %cst_64 = arith.constant 3.200000e+01 : f32
    %168 = vector.broadcast %cst_64 : f32 to vector<64x1xf32>
    %169 = arith.divf %167, %168 : vector<64x1xf32>
    %170 = vector.broadcast %169 : vector<64x1xf32> to vector<64x32xf32>
    %171 = arith.subf %161, %170 : vector<64x32xf32>
    %172 = arith.mulf %171, %171 : vector<64x32xf32>
    %cst_65 = arith.constant dense<0.000000e+00> : vector<64xf32>
    %173 = vector.multi_reduction <add>, %172, %cst_65 [1] : vector<64x32xf32> to vector<64xf32>
    %174 = vector.shape_cast %173 : vector<64xf32> to vector<64x1xf32>
    %cst_66 = arith.constant 3.200000e+01 : f32
    %175 = vector.broadcast %cst_66 : f32 to vector<64x1xf32>
    %176 = arith.divf %174, %175 : vector<64x1xf32>
    %177 = vector.broadcast %169 : vector<64x1xf32> to vector<64x32xf32>
    %178 = arith.subf %161, %177 : vector<64x32xf32>
    %cst_67 = arith.constant 9.99999974E-6 : f32
    %179 = vector.broadcast %cst_67 : f32 to vector<64x1xf32>
    %180 = arith.addf %176, %179 : vector<64x1xf32>
    %181 = math.rsqrt %180 : vector<64x1xf32>
    %182 = vector.broadcast %181 : vector<64x1xf32> to vector<64x32xf32>
    %183 = arith.mulf %178, %182 : vector<64x32xf32>
    %184 = vector.broadcast %163 : vector<1x32xf32> to vector<64x32xf32>
    %185 = arith.mulf %183, %184 : vector<64x32xf32>
    %186 = vector.broadcast %165 : vector<1x32xf32> to vector<64x32xf32>
    %187 = arith.addf %185, %186 : vector<64x32xf32>
    %188 = arith.truncf %187 : vector<64x32xf32> to vector<64x32xbf16>
    %c0_68 = arith.constant 0 : index
    %c0_69 = arith.constant 0 : index
    %c0_70 = arith.constant 0 : index
    %189 = vector.load %arg15[%c0_68, %c0_69, %c0_70] : memref<2x32x64xbf16, #tpu.memory_space<vmem>>, vector<1x32x64xbf16>
    %190 = vector.shape_cast %189 : vector<1x32x64xbf16> to vector<32x64xbf16>
    %cst_71 = arith.constant dense<0.000000e+00> : vector<64x64xf32>
    %191 = tpu.matmul %188, %190, %cst_71 {dimension_numbers = #tpu.dot_dimension_numbers<[1], [0], [0], [1], [0, 0, 1, 1], [], []>} : vector<64x32xbf16>, vector<32x64xbf16>, vector<64x64xf32> -> vector<64x64xf32>
    %c0_72 = arith.constant 0 : index
    %c0_73 = arith.constant 0 : index
    %c0_74 = arith.constant 0 : index
    %192 = vector.load %arg16[%c0_72, %c0_73, %c0_74] : memref<2x1x64xf32, #tpu.memory_space<vmem>>, vector<1x1x64xf32>
    %193 = vector.shape_cast %192 : vector<1x1x64xf32> to vector<1x64xf32>
    %194 = vector.broadcast %193 : vector<1x64xf32> to vector<64x64xf32>
    %195 = arith.addf %191, %194 : vector<64x64xf32>
    %cst_75 = arith.constant 5.000000e-01 : f32
    %196 = vector.broadcast %cst_75 : f32 to vector<64x64xf32>
    %197 = arith.mulf %196, %195 : vector<64x64xf32>
    %cst_76 = arith.constant 2.000000e+00 : f32
    %198 = math.sqrt %cst_76 : f32
    %199 = vector.broadcast %198 : f32 to vector<64x64xf32>
    %200 = arith.divf %195, %199 : vector<64x64xf32>
    %201 = math.erf %200 : vector<64x64xf32>
    %cst_77 = arith.constant 1.000000e+00 : f32
    %202 = vector.broadcast %cst_77 : f32 to vector<64x64xf32>
    %203 = arith.addf %202, %201 : vector<64x64xf32>
    %204 = arith.mulf %197, %203 : vector<64x64xf32>
    %205 = arith.truncf %204 : vector<64x64xf32> to vector<64x64xbf16>
    %c0_78 = arith.constant 0 : index
    %c0_79 = arith.constant 0 : index
    %c0_80 = arith.constant 0 : index
    %206 = vector.load %arg17[%c0_78, %c0_79, %c0_80] : memref<2x64x32xbf16, #tpu.memory_space<vmem>>, vector<1x64x32xbf16>
    %207 = vector.shape_cast %206 : vector<1x64x32xbf16> to vector<64x32xbf16>
    %cst_81 = arith.constant dense<0.000000e+00> : vector<64x32xf32>
    %208 = tpu.matmul %205, %207, %cst_81 {dimension_numbers = #tpu.dot_dimension_numbers<[1], [0], [0], [1], [0, 0, 1, 1], [], []>} : vector<64x64xbf16>, vector<64x32xbf16>, vector<64x32xf32> -> vector<64x32xf32>
    %c0_82 = arith.constant 0 : index
    %c0_83 = arith.constant 0 : index
    %c0_84 = arith.constant 0 : index
    %209 = vector.load %arg18[%c0_82, %c0_83, %c0_84] : memref<2x1x32xf32, #tpu.memory_space<vmem>>, vector<1x1x32xf32>
    %210 = vector.shape_cast %209 : vector<1x1x32xf32> to vector<1x32xf32>
    %211 = vector.broadcast %210 : vector<1x32xf32> to vector<64x32xf32>
    %212 = arith.addf %208, %211 : vector<64x32xf32>
    %213 = arith.addf %187, %212 : vector<64x32xf32>
    %c0_85 = arith.constant 0 : index
    %c0_86 = arith.constant 0 : index
    %c0_87 = arith.constant 0 : index
    %214 = vector.load %arg19[%c0_85, %c0_86, %c0_87] : memref<2x1x32xf32, #tpu.memory_space<vmem>>, vector<1x1x32xf32>
    %215 = vector.shape_cast %214 : vector<1x1x32xf32> to vector<1x32xf32>
    %c0_88 = arith.constant 0 : index
    %c0_89 = arith.constant 0 : index
    %c0_90 = arith.constant 0 : index
    %216 = vector.load %arg20[%c0_88, %c0_89, %c0_90] : memref<2x1x32xf32, #tpu.memory_space<vmem>>, vector<1x1x32xf32>
    %217 = vector.shape_cast %216 : vector<1x1x32xf32> to vector<1x32xf32>
    %cst_91 = arith.constant dense<0.000000e+00> : vector<64xf32>
    %218 = vector.multi_reduction <add>, %213, %cst_91 [1] : vector<64x32xf32> to vector<64xf32>
    %219 = vector.shape_cast %218 : vector<64xf32> to vector<64x1xf32>
    %cst_92 = arith.constant 3.200000e+01 : f32
    %220 = vector.broadcast %cst_92 : f32 to vector<64x1xf32>
    %221 = arith.divf %219, %220 : vector<64x1xf32>
    %222 = vector.broadcast %221 : vector<64x1xf32> to vector<64x32xf32>
    %223 = arith.subf %213, %222 : vector<64x32xf32>
    %224 = arith.mulf %223, %223 : vector<64x32xf32>
    %cst_93 = arith.constant dense<0.000000e+00> : vector<64xf32>
    %225 = vector.multi_reduction <add>, %224, %cst_93 [1] : vector<64x32xf32> to vector<64xf32>
    %226 = vector.shape_cast %225 : vector<64xf32> to vector<64x1xf32>
    %cst_94 = arith.constant 3.200000e+01 : f32
    %227 = vector.broadcast %cst_94 : f32 to vector<64x1xf32>
    %228 = arith.divf %226, %227 : vector<64x1xf32>
    %229 = vector.broadcast %221 : vector<64x1xf32> to vector<64x32xf32>
    %230 = arith.subf %213, %229 : vector<64x32xf32>
    %cst_95 = arith.constant 9.99999974E-6 : f32
    %231 = vector.broadcast %cst_95 : f32 to vector<64x1xf32>
    %232 = arith.addf %228, %231 : vector<64x1xf32>
    %233 = math.rsqrt %232 : vector<64x1xf32>
    %234 = vector.broadcast %233 : vector<64x1xf32> to vector<64x32xf32>
    %235 = arith.mulf %230, %234 : vector<64x32xf32>
    %236 = vector.broadcast %215 : vector<1x32xf32> to vector<64x32xf32>
    %237 = arith.mulf %235, %236 : vector<64x32xf32>
    %238 = vector.broadcast %217 : vector<1x32xf32> to vector<64x32xf32>
    %239 = arith.addf %237, %238 : vector<64x32xf32>
    %240 = arith.truncf %239 : vector<64x32xf32> to vector<64x32xbf16>
    %c1 = arith.constant 1 : index
    %c0_96 = arith.constant 0 : index
    %c0_97 = arith.constant 0 : index
    %241 = vector.load %arg5[%c1, %c0_96, %c0_97] : memref<2x32x32xbf16, #tpu.memory_space<vmem>>, vector<1x32x32xbf16>
    %242 = vector.shape_cast %241 : vector<1x32x32xbf16> to vector<32x32xbf16>
    %cst_98 = arith.constant dense<0.000000e+00> : vector<64x32xf32>
    %243 = tpu.matmul %240, %242, %cst_98 {dimension_numbers = #tpu.dot_dimension_numbers<[1], [0], [0], [1], [0, 0, 1, 1], [], []>} : vector<64x32xbf16>, vector<32x32xbf16>, vector<64x32xf32> -> vector<64x32xf32>
    %c1_99 = arith.constant 1 : index
    %c0_100 = arith.constant 0 : index
    %c0_101 = arith.constant 0 : index
    %244 = vector.load %arg6[%c1_99, %c0_100, %c0_101] : memref<2x1x32xf32, #tpu.memory_space<vmem>>, vector<1x1x32xf32>
    %245 = vector.shape_cast %244 : vector<1x1x32xf32> to vector<1x32xf32>
    %246 = vector.broadcast %245 : vector<1x32xf32> to vector<64x32xf32>
    %247 = arith.addf %243, %246 : vector<64x32xf32>
    %c1_102 = arith.constant 1 : index
    %c0_103 = arith.constant 0 : index
    %c0_104 = arith.constant 0 : index
    %248 = vector.load %arg7[%c1_102, %c0_103, %c0_104] : memref<2x32x32xbf16, #tpu.memory_space<vmem>>, vector<1x32x32xbf16>
    %249 = vector.shape_cast %248 : vector<1x32x32xbf16> to vector<32x32xbf16>
    %cst_105 = arith.constant dense<0.000000e+00> : vector<64x32xf32>
    %250 = tpu.matmul %240, %249, %cst_105 {dimension_numbers = #tpu.dot_dimension_numbers<[1], [0], [0], [1], [0, 0, 1, 1], [], []>} : vector<64x32xbf16>, vector<32x32xbf16>, vector<64x32xf32> -> vector<64x32xf32>
    %c1_106 = arith.constant 1 : index
    %c0_107 = arith.constant 0 : index
    %c0_108 = arith.constant 0 : index
    %251 = vector.load %arg8[%c1_106, %c0_107, %c0_108] : memref<2x1x32xf32, #tpu.memory_space<vmem>>, vector<1x1x32xf32>
    %252 = vector.shape_cast %251 : vector<1x1x32xf32> to vector<1x32xf32>
    %253 = vector.broadcast %252 : vector<1x32xf32> to vector<64x32xf32>
    %254 = arith.addf %250, %253 : vector<64x32xf32>
    %c1_109 = arith.constant 1 : index
    %c0_110 = arith.constant 0 : index
    %c0_111 = arith.constant 0 : index
    %255 = vector.load %arg9[%c1_109, %c0_110, %c0_111] : memref<2x32x32xbf16, #tpu.memory_space<vmem>>, vector<1x32x32xbf16>
    %256 = vector.shape_cast %255 : vector<1x32x32xbf16> to vector<32x32xbf16>
    %cst_112 = arith.constant dense<0.000000e+00> : vector<64x32xf32>
    %257 = tpu.matmul %240, %256, %cst_112 {dimension_numbers = #tpu.dot_dimension_numbers<[1], [0], [0], [1], [0, 0, 1, 1], [], []>} : vector<64x32xbf16>, vector<32x32xbf16>, vector<64x32xf32> -> vector<64x32xf32>
    %c1_113 = arith.constant 1 : index
    %c0_114 = arith.constant 0 : index
    %c0_115 = arith.constant 0 : index
    %258 = vector.load %arg10[%c1_113, %c0_114, %c0_115] : memref<2x1x32xf32, #tpu.memory_space<vmem>>, vector<1x1x32xf32>
    %259 = vector.shape_cast %258 : vector<1x1x32xf32> to vector<1x32xf32>
    %260 = vector.broadcast %259 : vector<1x32xf32> to vector<64x32xf32>
    %261 = arith.addf %257, %260 : vector<64x32xf32>
    %262 = vector.extract_strided_slice %247 {offsets = [0, 0], sizes = [64, 8], strides = [1, 1]} : vector<64x32xf32> to vector<64x8xf32>
    %263 = arith.truncf %262 : vector<64x8xf32> to vector<64x8xbf16>
    %264 = vector.shape_cast %263 : vector<64x8xbf16> to vector<8x8x8xbf16>
    %265 = vector.extract_strided_slice %254 {offsets = [0, 0], sizes = [64, 8], strides = [1, 1]} : vector<64x32xf32> to vector<64x8xf32>
    %266 = arith.truncf %265 : vector<64x8xf32> to vector<64x8xbf16>
    %267 = vector.shape_cast %266 : vector<64x8xbf16> to vector<8x8x8xbf16>
    %268 = vector.extract_strided_slice %261 {offsets = [0, 0], sizes = [64, 8], strides = [1, 1]} : vector<64x32xf32> to vector<64x8xf32>
    %269 = arith.truncf %268 : vector<64x8xf32> to vector<64x8xbf16>
    %270 = vector.shape_cast %269 : vector<64x8xbf16> to vector<8x8x8xbf16>
    "tpu.trace_start"() <{level = 10 : i32, message = "bqd,bkd->bqk"}> : () -> ()
    %cst_116 = arith.constant dense<0.000000e+00> : vector<8x8x8xf32>
    %271 = tpu.matmul %264, %267, %cst_116 {dimension_numbers = #tpu.dot_dimension_numbers<[2], [2], [1], [1], [0, 0, 0, 1, 1, 1], [0], [0]>} : vector<8x8x8xbf16>, vector<8x8x8xbf16>, vector<8x8x8xf32> -> vector<8x8x8xf32>
    "tpu.trace_stop"() : () -> ()
    %cst_117 = arith.constant 0.353553385 : f32
    %272 = vector.broadcast %cst_117 : f32 to vector<8x8x8xf32>
    %273 = arith.mulf %271, %272 : vector<8x8x8xf32>
    %274 = vector.shape_cast %17 : vector<8x8xf32> to vector<1x8x8xf32>
    %275 = vector.broadcast %274 : vector<1x8x8xf32> to vector<8x8x8xf32>
    %276 = arith.addf %273, %275 : vector<8x8x8xf32>
    %cst_118 = arith.constant dense<0xFF800000> : vector<8x8xf32>
    %277 = vector.multi_reduction <maximumf>, %276, %cst_118 [2] : vector<8x8x8xf32> to vector<8x8xf32>
    %278 = vector.shape_cast %277 : vector<8x8xf32> to vector<8x8x1xf32>
    %279 = vector.broadcast %278 : vector<8x8x1xf32> to vector<8x8x8xf32>
    %280 = arith.subf %276, %279 : vector<8x8x8xf32>
    %281 = math.exp %280 : vector<8x8x8xf32>
    %cst_119 = arith.constant dense<0.000000e+00> : vector<8x8xf32>
    %282 = vector.multi_reduction <add>, %281, %cst_119 [2] : vector<8x8x8xf32> to vector<8x8xf32>
    %283 = vector.shape_cast %282 : vector<8x8xf32> to vector<8x8x1xf32>
    %284 = tpu.reciprocal %283 {approx = true} : vector<8x8x1xf32> -> vector<8x8x1xf32>
    %285 = vector.broadcast %284 : vector<8x8x1xf32> to vector<8x8x8xf32>
    %286 = arith.mulf %281, %285 : vector<8x8x8xf32>
    %287 = arith.truncf %286 : vector<8x8x8xf32> to vector<8x8x8xbf16>
    "tpu.trace_start"() <{level = 10 : i32, message = "bqk,bkd->bqd"}> : () -> ()
    %cst_120 = arith.constant dense<0.000000e+00> : vector<8x8x8xf32>
    %288 = tpu.matmul %287, %270, %cst_120 {dimension_numbers = #tpu.dot_dimension_numbers<[2], [1], [1], [2], [0, 0, 0, 1, 1, 2], [0], [0]>} : vector<8x8x8xbf16>, vector<8x8x8xbf16>, vector<8x8x8xf32> -> vector<8x8x8xf32>
    "tpu.trace_stop"() : () -> ()
    %289 = vector.shape_cast %288 : vector<8x8x8xf32> to vector<64x8xf32>
    %290 = vector.extract_strided_slice %247 {offsets = [0, 8], sizes = [64, 8], strides = [1, 1]} : vector<64x32xf32> to vector<64x8xf32>
    %291 = arith.truncf %290 : vector<64x8xf32> to vector<64x8xbf16>
    %292 = vector.shape_cast %291 : vector<64x8xbf16> to vector<8x8x8xbf16>
    %293 = vector.extract_strided_slice %254 {offsets = [0, 8], sizes = [64, 8], strides = [1, 1]} : vector<64x32xf32> to vector<64x8xf32>
    %294 = arith.truncf %293 : vector<64x8xf32> to vector<64x8xbf16>
    %295 = vector.shape_cast %294 : vector<64x8xbf16> to vector<8x8x8xbf16>
    %296 = vector.extract_strided_slice %261 {offsets = [0, 8], sizes = [64, 8], strides = [1, 1]} : vector<64x32xf32> to vector<64x8xf32>
    %297 = arith.truncf %296 : vector<64x8xf32> to vector<64x8xbf16>
    %298 = vector.shape_cast %297 : vector<64x8xbf16> to vector<8x8x8xbf16>
    "tpu.trace_start"() <{level = 10 : i32, message = "bqd,bkd->bqk"}> : () -> ()
    %cst_121 = arith.constant dense<0.000000e+00> : vector<8x8x8xf32>
    %299 = tpu.matmul %292, %295, %cst_121 {dimension_numbers = #tpu.dot_dimension_numbers<[2], [2], [1], [1], [0, 0, 0, 1, 1, 1], [0], [0]>} : vector<8x8x8xbf16>, vector<8x8x8xbf16>, vector<8x8x8xf32> -> vector<8x8x8xf32>
    "tpu.trace_stop"() : () -> ()
    %cst_122 = arith.constant 0.353553385 : f32
    %300 = vector.broadcast %cst_122 : f32 to vector<8x8x8xf32>
    %301 = arith.mulf %299, %300 : vector<8x8x8xf32>
    %302 = vector.shape_cast %17 : vector<8x8xf32> to vector<1x8x8xf32>
    %303 = vector.broadcast %302 : vector<1x8x8xf32> to vector<8x8x8xf32>
    %304 = arith.addf %301, %303 : vector<8x8x8xf32>
    %cst_123 = arith.constant dense<0xFF800000> : vector<8x8xf32>
    %305 = vector.multi_reduction <maximumf>, %304, %cst_123 [2] : vector<8x8x8xf32> to vector<8x8xf32>
    %306 = vector.shape_cast %305 : vector<8x8xf32> to vector<8x8x1xf32>
    %307 = vector.broadcast %306 : vector<8x8x1xf32> to vector<8x8x8xf32>
    %308 = arith.subf %304, %307 : vector<8x8x8xf32>
    %309 = math.exp %308 : vector<8x8x8xf32>
    %cst_124 = arith.constant dense<0.000000e+00> : vector<8x8xf32>
    %310 = vector.multi_reduction <add>, %309, %cst_124 [2] : vector<8x8x8xf32> to vector<8x8xf32>
    %311 = vector.shape_cast %310 : vector<8x8xf32> to vector<8x8x1xf32>
    %312 = tpu.reciprocal %311 {approx = true} : vector<8x8x1xf32> -> vector<8x8x1xf32>
    %313 = vector.broadcast %312 : vector<8x8x1xf32> to vector<8x8x8xf32>
    %314 = arith.mulf %309, %313 : vector<8x8x8xf32>
    %315 = arith.truncf %314 : vector<8x8x8xf32> to vector<8x8x8xbf16>
    "tpu.trace_start"() <{level = 10 : i32, message = "bqk,bkd->bqd"}> : () -> ()
    %cst_125 = arith.constant dense<0.000000e+00> : vector<8x8x8xf32>
    %316 = tpu.matmul %315, %298, %cst_125 {dimension_numbers = #tpu.dot_dimension_numbers<[2], [1], [1], [2], [0, 0, 0, 1, 1, 2], [0], [0]>} : vector<8x8x8xbf16>, vector<8x8x8xbf16>, vector<8x8x8xf32> -> vector<8x8x8xf32>
    "tpu.trace_stop"() : () -> ()
    %317 = vector.shape_cast %316 : vector<8x8x8xf32> to vector<64x8xf32>
    %318 = vector.extract_strided_slice %247 {offsets = [0, 16], sizes = [64, 8], strides = [1, 1]} : vector<64x32xf32> to vector<64x8xf32>
    %319 = arith.truncf %318 : vector<64x8xf32> to vector<64x8xbf16>
    %320 = vector.shape_cast %319 : vector<64x8xbf16> to vector<8x8x8xbf16>
    %321 = vector.extract_strided_slice %254 {offsets = [0, 16], sizes = [64, 8], strides = [1, 1]} : vector<64x32xf32> to vector<64x8xf32>
    %322 = arith.truncf %321 : vector<64x8xf32> to vector<64x8xbf16>
    %323 = vector.shape_cast %322 : vector<64x8xbf16> to vector<8x8x8xbf16>
    %324 = vector.extract_strided_slice %261 {offsets = [0, 16], sizes = [64, 8], strides = [1, 1]} : vector<64x32xf32> to vector<64x8xf32>
    %325 = arith.truncf %324 : vector<64x8xf32> to vector<64x8xbf16>
    %326 = vector.shape_cast %325 : vector<64x8xbf16> to vector<8x8x8xbf16>
    "tpu.trace_start"() <{level = 10 : i32, message = "bqd,bkd->bqk"}> : () -> ()
    %cst_126 = arith.constant dense<0.000000e+00> : vector<8x8x8xf32>
    %327 = tpu.matmul %320, %323, %cst_126 {dimension_numbers = #tpu.dot_dimension_numbers<[2], [2], [1], [1], [0, 0, 0, 1, 1, 1], [0], [0]>} : vector<8x8x8xbf16>, vector<8x8x8xbf16>, vector<8x8x8xf32> -> vector<8x8x8xf32>
    "tpu.trace_stop"() : () -> ()
    %cst_127 = arith.constant 0.353553385 : f32
    %328 = vector.broadcast %cst_127 : f32 to vector<8x8x8xf32>
    %329 = arith.mulf %327, %328 : vector<8x8x8xf32>
    %330 = vector.shape_cast %17 : vector<8x8xf32> to vector<1x8x8xf32>
    %331 = vector.broadcast %330 : vector<1x8x8xf32> to vector<8x8x8xf32>
    %332 = arith.addf %329, %331 : vector<8x8x8xf32>
    %cst_128 = arith.constant dense<0xFF800000> : vector<8x8xf32>
    %333 = vector.multi_reduction <maximumf>, %332, %cst_128 [2] : vector<8x8x8xf32> to vector<8x8xf32>
    %334 = vector.shape_cast %333 : vector<8x8xf32> to vector<8x8x1xf32>
    %335 = vector.broadcast %334 : vector<8x8x1xf32> to vector<8x8x8xf32>
    %336 = arith.subf %332, %335 : vector<8x8x8xf32>
    %337 = math.exp %336 : vector<8x8x8xf32>
    %cst_129 = arith.constant dense<0.000000e+00> : vector<8x8xf32>
    %338 = vector.multi_reduction <add>, %337, %cst_129 [2] : vector<8x8x8xf32> to vector<8x8xf32>
    %339 = vector.shape_cast %338 : vector<8x8xf32> to vector<8x8x1xf32>
    %340 = tpu.reciprocal %339 {approx = true} : vector<8x8x1xf32> -> vector<8x8x1xf32>
    %341 = vector.broadcast %340 : vector<8x8x1xf32> to vector<8x8x8xf32>
    %342 = arith.mulf %337, %341 : vector<8x8x8xf32>
    %343 = arith.truncf %342 : vector<8x8x8xf32> to vector<8x8x8xbf16>
    "tpu.trace_start"() <{level = 10 : i32, message = "bqk,bkd->bqd"}> : () -> ()
    %cst_130 = arith.constant dense<0.000000e+00> : vector<8x8x8xf32>
    %344 = tpu.matmul %343, %326, %cst_130 {dimension_numbers = #tpu.dot_dimension_numbers<[2], [1], [1], [2], [0, 0, 0, 1, 1, 2], [0], [0]>} : vector<8x8x8xbf16>, vector<8x8x8xbf16>, vector<8x8x8xf32> -> vector<8x8x8xf32>
    "tpu.trace_stop"() : () -> ()
    %345 = vector.shape_cast %344 : vector<8x8x8xf32> to vector<64x8xf32>
    %346 = vector.extract_strided_slice %247 {offsets = [0, 24], sizes = [64, 8], strides = [1, 1]} : vector<64x32xf32> to vector<64x8xf32>
    %347 = arith.truncf %346 : vector<64x8xf32> to vector<64x8xbf16>
    %348 = vector.shape_cast %347 : vector<64x8xbf16> to vector<8x8x8xbf16>
    %349 = vector.extract_strided_slice %254 {offsets = [0, 24], sizes = [64, 8], strides = [1, 1]} : vector<64x32xf32> to vector<64x8xf32>
    %350 = arith.truncf %349 : vector<64x8xf32> to vector<64x8xbf16>
    %351 = vector.shape_cast %350 : vector<64x8xbf16> to vector<8x8x8xbf16>
    %352 = vector.extract_strided_slice %261 {offsets = [0, 24], sizes = [64, 8], strides = [1, 1]} : vector<64x32xf32> to vector<64x8xf32>
    %353 = arith.truncf %352 : vector<64x8xf32> to vector<64x8xbf16>
    %354 = vector.shape_cast %353 : vector<64x8xbf16> to vector<8x8x8xbf16>
    "tpu.trace_start"() <{level = 10 : i32, message = "bqd,bkd->bqk"}> : () -> ()
    %cst_131 = arith.constant dense<0.000000e+00> : vector<8x8x8xf32>
    %355 = tpu.matmul %348, %351, %cst_131 {dimension_numbers = #tpu.dot_dimension_numbers<[2], [2], [1], [1], [0, 0, 0, 1, 1, 1], [0], [0]>} : vector<8x8x8xbf16>, vector<8x8x8xbf16>, vector<8x8x8xf32> -> vector<8x8x8xf32>
    "tpu.trace_stop"() : () -> ()
    %cst_132 = arith.constant 0.353553385 : f32
    %356 = vector.broadcast %cst_132 : f32 to vector<8x8x8xf32>
    %357 = arith.mulf %355, %356 : vector<8x8x8xf32>
    %358 = vector.shape_cast %17 : vector<8x8xf32> to vector<1x8x8xf32>
    %359 = vector.broadcast %358 : vector<1x8x8xf32> to vector<8x8x8xf32>
    %360 = arith.addf %357, %359 : vector<8x8x8xf32>
    %cst_133 = arith.constant dense<0xFF800000> : vector<8x8xf32>
    %361 = vector.multi_reduction <maximumf>, %360, %cst_133 [2] : vector<8x8x8xf32> to vector<8x8xf32>
    %362 = vector.shape_cast %361 : vector<8x8xf32> to vector<8x8x1xf32>
    %363 = vector.broadcast %362 : vector<8x8x1xf32> to vector<8x8x8xf32>
    %364 = arith.subf %360, %363 : vector<8x8x8xf32>
    %365 = math.exp %364 : vector<8x8x8xf32>
    %cst_134 = arith.constant dense<0.000000e+00> : vector<8x8xf32>
    %366 = vector.multi_reduction <add>, %365, %cst_134 [2] : vector<8x8x8xf32> to vector<8x8xf32>
    %367 = vector.shape_cast %366 : vector<8x8xf32> to vector<8x8x1xf32>
    %368 = tpu.reciprocal %367 {approx = true} : vector<8x8x1xf32> -> vector<8x8x1xf32>
    %369 = vector.broadcast %368 : vector<8x8x1xf32> to vector<8x8x8xf32>
    %370 = arith.mulf %365, %369 : vector<8x8x8xf32>
    %371 = arith.truncf %370 : vector<8x8x8xf32> to vector<8x8x8xbf16>
    "tpu.trace_start"() <{level = 10 : i32, message = "bqk,bkd->bqd"}> : () -> ()
    %cst_135 = arith.constant dense<0.000000e+00> : vector<8x8x8xf32>
    %372 = tpu.matmul %371, %354, %cst_135 {dimension_numbers = #tpu.dot_dimension_numbers<[2], [1], [1], [2], [0, 0, 0, 1, 1, 2], [0], [0]>} : vector<8x8x8xbf16>, vector<8x8x8xbf16>, vector<8x8x8xf32> -> vector<8x8x8xf32>
    "tpu.trace_stop"() : () -> ()
    %373 = vector.shape_cast %372 : vector<8x8x8xf32> to vector<64x8xf32>
    %374 = tpu.concatenate %289, %317, %345, %373 in 1 : vector<64x8xf32>, vector<64x8xf32>, vector<64x8xf32>, vector<64x8xf32> -> vector<64x32xf32>
    %375 = arith.truncf %374 : vector<64x32xf32> to vector<64x32xbf16>
    %c1_136 = arith.constant 1 : index
    %c0_137 = arith.constant 0 : index
    %c0_138 = arith.constant 0 : index
    %376 = vector.load %arg11[%c1_136, %c0_137, %c0_138] : memref<2x32x32xbf16, #tpu.memory_space<vmem>>, vector<1x32x32xbf16>
    %377 = vector.shape_cast %376 : vector<1x32x32xbf16> to vector<32x32xbf16>
    %cst_139 = arith.constant dense<0.000000e+00> : vector<64x32xf32>
    %378 = tpu.matmul %375, %377, %cst_139 {dimension_numbers = #tpu.dot_dimension_numbers<[1], [0], [0], [1], [0, 0, 1, 1], [], []>} : vector<64x32xbf16>, vector<32x32xbf16>, vector<64x32xf32> -> vector<64x32xf32>
    %c1_140 = arith.constant 1 : index
    %c0_141 = arith.constant 0 : index
    %c0_142 = arith.constant 0 : index
    %379 = vector.load %arg12[%c1_140, %c0_141, %c0_142] : memref<2x1x32xf32, #tpu.memory_space<vmem>>, vector<1x1x32xf32>
    %380 = vector.shape_cast %379 : vector<1x1x32xf32> to vector<1x32xf32>
    %381 = vector.broadcast %380 : vector<1x32xf32> to vector<64x32xf32>
    %382 = arith.addf %378, %381 : vector<64x32xf32>
    %383 = arith.addf %239, %382 : vector<64x32xf32>
    %c1_143 = arith.constant 1 : index
    %c0_144 = arith.constant 0 : index
    %c0_145 = arith.constant 0 : index
    %384 = vector.load %arg13[%c1_143, %c0_144, %c0_145] : memref<2x1x32xf32, #tpu.memory_space<vmem>>, vector<1x1x32xf32>
    %385 = vector.shape_cast %384 : vector<1x1x32xf32> to vector<1x32xf32>
    %c1_146 = arith.constant 1 : index
    %c0_147 = arith.constant 0 : index
    %c0_148 = arith.constant 0 : index
    %386 = vector.load %arg14[%c1_146, %c0_147, %c0_148] : memref<2x1x32xf32, #tpu.memory_space<vmem>>, vector<1x1x32xf32>
    %387 = vector.shape_cast %386 : vector<1x1x32xf32> to vector<1x32xf32>
    %cst_149 = arith.constant dense<0.000000e+00> : vector<64xf32>
    %388 = vector.multi_reduction <add>, %383, %cst_149 [1] : vector<64x32xf32> to vector<64xf32>
    %389 = vector.shape_cast %388 : vector<64xf32> to vector<64x1xf32>
    %cst_150 = arith.constant 3.200000e+01 : f32
    %390 = vector.broadcast %cst_150 : f32 to vector<64x1xf32>
    %391 = arith.divf %389, %390 : vector<64x1xf32>
    %392 = vector.broadcast %391 : vector<64x1xf32> to vector<64x32xf32>
    %393 = arith.subf %383, %392 : vector<64x32xf32>
    %394 = arith.mulf %393, %393 : vector<64x32xf32>
    %cst_151 = arith.constant dense<0.000000e+00> : vector<64xf32>
    %395 = vector.multi_reduction <add>, %394, %cst_151 [1] : vector<64x32xf32> to vector<64xf32>
    %396 = vector.shape_cast %395 : vector<64xf32> to vector<64x1xf32>
    %cst_152 = arith.constant 3.200000e+01 : f32
    %397 = vector.broadcast %cst_152 : f32 to vector<64x1xf32>
    %398 = arith.divf %396, %397 : vector<64x1xf32>
    %399 = vector.broadcast %391 : vector<64x1xf32> to vector<64x32xf32>
    %400 = arith.subf %383, %399 : vector<64x32xf32>
    %cst_153 = arith.constant 9.99999974E-6 : f32
    %401 = vector.broadcast %cst_153 : f32 to vector<64x1xf32>
    %402 = arith.addf %398, %401 : vector<64x1xf32>
    %403 = math.rsqrt %402 : vector<64x1xf32>
    %404 = vector.broadcast %403 : vector<64x1xf32> to vector<64x32xf32>
    %405 = arith.mulf %400, %404 : vector<64x32xf32>
    %406 = vector.broadcast %385 : vector<1x32xf32> to vector<64x32xf32>
    %407 = arith.mulf %405, %406 : vector<64x32xf32>
    %408 = vector.broadcast %387 : vector<1x32xf32> to vector<64x32xf32>
    %409 = arith.addf %407, %408 : vector<64x32xf32>
    %410 = arith.truncf %409 : vector<64x32xf32> to vector<64x32xbf16>
    %c1_154 = arith.constant 1 : index
    %c0_155 = arith.constant 0 : index
    %c0_156 = arith.constant 0 : index
    %411 = vector.load %arg15[%c1_154, %c0_155, %c0_156] : memref<2x32x64xbf16, #tpu.memory_space<vmem>>, vector<1x32x64xbf16>
    %412 = vector.shape_cast %411 : vector<1x32x64xbf16> to vector<32x64xbf16>
    %cst_157 = arith.constant dense<0.000000e+00> : vector<64x64xf32>
    %413 = tpu.matmul %410, %412, %cst_157 {dimension_numbers = #tpu.dot_dimension_numbers<[1], [0], [0], [1], [0, 0, 1, 1], [], []>} : vector<64x32xbf16>, vector<32x64xbf16>, vector<64x64xf32> -> vector<64x64xf32>
    %c1_158 = arith.constant 1 : index
    %c0_159 = arith.constant 0 : index
    %c0_160 = arith.constant 0 : index
    %414 = vector.load %arg16[%c1_158, %c0_159, %c0_160] : memref<2x1x64xf32, #tpu.memory_space<vmem>>, vector<1x1x64xf32>
    %415 = vector.shape_cast %414 : vector<1x1x64xf32> to vector<1x64xf32>
    %416 = vector.broadcast %415 : vector<1x64xf32> to vector<64x64xf32>
    %417 = arith.addf %413, %416 : vector<64x64xf32>
    %cst_161 = arith.constant 5.000000e-01 : f32
    %418 = vector.broadcast %cst_161 : f32 to vector<64x64xf32>
    %419 = arith.mulf %418, %417 : vector<64x64xf32>
    %cst_162 = arith.constant 2.000000e+00 : f32
    %420 = math.sqrt %cst_162 : f32
    %421 = vector.broadcast %420 : f32 to vector<64x64xf32>
    %422 = arith.divf %417, %421 : vector<64x64xf32>
    %423 = math.erf %422 : vector<64x64xf32>
    %cst_163 = arith.constant 1.000000e+00 : f32
    %424 = vector.broadcast %cst_163 : f32 to vector<64x64xf32>
    %425 = arith.addf %424, %423 : vector<64x64xf32>
    %426 = arith.mulf %419, %425 : vector<64x64xf32>
    %427 = arith.truncf %426 : vector<64x64xf32> to vector<64x64xbf16>
    %c1_164 = arith.constant 1 : index
    %c0_165 = arith.constant 0 : index
    %c0_166 = arith.constant 0 : index
    %428 = vector.load %arg17[%c1_164, %c0_165, %c0_166] : memref<2x64x32xbf16, #tpu.memory_space<vmem>>, vector<1x64x32xbf16>
    %429 = vector.shape_cast %428 : vector<1x64x32xbf16> to vector<64x32xbf16>
    %cst_167 = arith.constant dense<0.000000e+00> : vector<64x32xf32>
    %430 = tpu.matmul %427, %429, %cst_167 {dimension_numbers = #tpu.dot_dimension_numbers<[1], [0], [0], [1], [0, 0, 1, 1], [], []>} : vector<64x64xbf16>, vector<64x32xbf16>, vector<64x32xf32> -> vector<64x32xf32>
    %c1_168 = arith.constant 1 : index
    %c0_169 = arith.constant 0 : index
    %c0_170 = arith.constant 0 : index
    %431 = vector.load %arg18[%c1_168, %c0_169, %c0_170] : memref<2x1x32xf32, #tpu.memory_space<vmem>>, vector<1x1x32xf32>
    %432 = vector.shape_cast %431 : vector<1x1x32xf32> to vector<1x32xf32>
    %433 = vector.broadcast %432 : vector<1x32xf32> to vector<64x32xf32>
    %434 = arith.addf %430, %433 : vector<64x32xf32>
    %435 = arith.addf %409, %434 : vector<64x32xf32>
    %c1_171 = arith.constant 1 : index
    %c0_172 = arith.constant 0 : index
    %c0_173 = arith.constant 0 : index
    %436 = vector.load %arg19[%c1_171, %c0_172, %c0_173] : memref<2x1x32xf32, #tpu.memory_space<vmem>>, vector<1x1x32xf32>
    %437 = vector.shape_cast %436 : vector<1x1x32xf32> to vector<1x32xf32>
    %c1_174 = arith.constant 1 : index
    %c0_175 = arith.constant 0 : index
    %c0_176 = arith.constant 0 : index
    %438 = vector.load %arg20[%c1_174, %c0_175, %c0_176] : memref<2x1x32xf32, #tpu.memory_space<vmem>>, vector<1x1x32xf32>
    %439 = vector.shape_cast %438 : vector<1x1x32xf32> to vector<1x32xf32>
    %cst_177 = arith.constant dense<0.000000e+00> : vector<64xf32>
    %440 = vector.multi_reduction <add>, %435, %cst_177 [1] : vector<64x32xf32> to vector<64xf32>
    %441 = vector.shape_cast %440 : vector<64xf32> to vector<64x1xf32>
    %cst_178 = arith.constant 3.200000e+01 : f32
    %442 = vector.broadcast %cst_178 : f32 to vector<64x1xf32>
    %443 = arith.divf %441, %442 : vector<64x1xf32>
    %444 = vector.broadcast %443 : vector<64x1xf32> to vector<64x32xf32>
    %445 = arith.subf %435, %444 : vector<64x32xf32>
    %446 = arith.mulf %445, %445 : vector<64x32xf32>
    %cst_179 = arith.constant dense<0.000000e+00> : vector<64xf32>
    %447 = vector.multi_reduction <add>, %446, %cst_179 [1] : vector<64x32xf32> to vector<64xf32>
    %448 = vector.shape_cast %447 : vector<64xf32> to vector<64x1xf32>
    %cst_180 = arith.constant 3.200000e+01 : f32
    %449 = vector.broadcast %cst_180 : f32 to vector<64x1xf32>
    %450 = arith.divf %448, %449 : vector<64x1xf32>
    %451 = vector.broadcast %443 : vector<64x1xf32> to vector<64x32xf32>
    %452 = arith.subf %435, %451 : vector<64x32xf32>
    %cst_181 = arith.constant 9.99999974E-6 : f32
    %453 = vector.broadcast %cst_181 : f32 to vector<64x1xf32>
    %454 = arith.addf %450, %453 : vector<64x1xf32>
    %455 = math.rsqrt %454 : vector<64x1xf32>
    %456 = vector.broadcast %455 : vector<64x1xf32> to vector<64x32xf32>
    %457 = arith.mulf %452, %456 : vector<64x32xf32>
    %458 = vector.broadcast %437 : vector<1x32xf32> to vector<64x32xf32>
    %459 = arith.mulf %457, %458 : vector<64x32xf32>
    %460 = vector.broadcast %439 : vector<1x32xf32> to vector<64x32xf32>
    %461 = arith.addf %459, %460 : vector<64x32xf32>
    %c0_182 = arith.constant 0 : index
    %c0_183 = arith.constant 0 : index
    %462 = vector.load %arg24[%c0_182, %c0_183] : memref<64x32xf32, #tpu.memory_space<vmem>>, vector<64x32xf32>
    tpu.vector_store %arg24[%c0_182, %c0_183], %461 {strides = array<i32>} : memref<64x32xf32, #tpu.memory_space<vmem>>, vector<64x32xf32>,
    %cst_184 = arith.constant 0.000000e+00 : f32
    %463 = vector.broadcast %cst_184 : f32 to vector<8x128xf32>
    %c0_185 = arith.constant 0 : index
    %c0_186 = arith.constant 0 : index
    %464 = vector.load %arg22[%c0_185, %c0_186] : memref<1x128xf32, #tpu.memory_space<vmem>>, vector<1x128xf32>
    %465 = vector.broadcast %464 : vector<1x128xf32> to vector<8x128xf32>
    %466 = arith.addf %463, %465 : vector<8x128xf32>
    %c0_187 = arith.constant 0 : index
    %c0_188 = arith.constant 0 : index
    %467 = tpu.strided_load %arg24[%c0_187, %c0_188] {strides = array<i32: 8, 1>} : memref<64x32xf32, #tpu.memory_space<vmem>>, vector<8x32xf32>
    %468 = arith.truncf %467 : vector<8x32xf32> to vector<8x32xbf16>
    %c0_189 = arith.constant 0 : index
    %c0_190 = arith.constant 0 : index
    %c0_191 = arith.constant 0 : index
    %469 = vector.load %arg21[%c0_189, %c0_190, %c0_191] : memref<7x32x128xbf16, #tpu.memory_space<vmem>>, vector<1x32x128xbf16>
    %470 = vector.shape_cast %469 : vector<1x32x128xbf16> to vector<32x128xbf16>
    %cst_192 = arith.constant dense<0.000000e+00> : vector<8x128xf32>
    %471 = tpu.matmul %468, %470, %cst_192 {dimension_numbers = #tpu.dot_dimension_numbers<[1], [0], [0], [1], [0, 0, 1, 1], [], []>} : vector<8x32xbf16>, vector<32x128xbf16>, vector<8x128xf32> -> vector<8x128xf32>
    %472 = arith.addf %466, %471 : vector<8x128xf32>
    %c1_193 = arith.constant 1 : index
    %c0_194 = arith.constant 0 : index
    %473 = tpu.strided_load %arg24[%c1_193, %c0_194] {strides = array<i32: 8, 1>} : memref<64x32xf32, #tpu.memory_space<vmem>>, vector<8x32xf32>
    %474 = arith.truncf %473 : vector<8x32xf32> to vector<8x32xbf16>
    %c1_195 = arith.constant 1 : index
    %c0_196 = arith.constant 0 : index
    %c0_197 = arith.constant 0 : index
    %475 = vector.load %arg21[%c1_195, %c0_196, %c0_197] : memref<7x32x128xbf16, #tpu.memory_space<vmem>>, vector<1x32x128xbf16>
    %476 = vector.shape_cast %475 : vector<1x32x128xbf16> to vector<32x128xbf16>
    %cst_198 = arith.constant dense<0.000000e+00> : vector<8x128xf32>
    %477 = tpu.matmul %474, %476, %cst_198 {dimension_numbers = #tpu.dot_dimension_numbers<[1], [0], [0], [1], [0, 0, 1, 1], [], []>} : vector<8x32xbf16>, vector<32x128xbf16>, vector<8x128xf32> -> vector<8x128xf32>
    %478 = arith.addf %472, %477 : vector<8x128xf32>
    %c2 = arith.constant 2 : index
    %c0_199 = arith.constant 0 : index
    %479 = tpu.strided_load %arg24[%c2, %c0_199] {strides = array<i32: 8, 1>} : memref<64x32xf32, #tpu.memory_space<vmem>>, vector<8x32xf32>
    %480 = arith.truncf %479 : vector<8x32xf32> to vector<8x32xbf16>
    %c2_200 = arith.constant 2 : index
    %c0_201 = arith.constant 0 : index
    %c0_202 = arith.constant 0 : index
    %481 = vector.load %arg21[%c2_200, %c0_201, %c0_202] : memref<7x32x128xbf16, #tpu.memory_space<vmem>>, vector<1x32x128xbf16>
    %482 = vector.shape_cast %481 : vector<1x32x128xbf16> to vector<32x128xbf16>
    %cst_203 = arith.constant dense<0.000000e+00> : vector<8x128xf32>
    %483 = tpu.matmul %480, %482, %cst_203 {dimension_numbers = #tpu.dot_dimension_numbers<[1], [0], [0], [1], [0, 0, 1, 1], [], []>} : vector<8x32xbf16>, vector<32x128xbf16>, vector<8x128xf32> -> vector<8x128xf32>
    %484 = arith.addf %478, %483 : vector<8x128xf32>
    %c3 = arith.constant 3 : index
    %c0_204 = arith.constant 0 : index
    %485 = tpu.strided_load %arg24[%c3, %c0_204] {strides = array<i32: 8, 1>} : memref<64x32xf32, #tpu.memory_space<vmem>>, vector<8x32xf32>
    %486 = arith.truncf %485 : vector<8x32xf32> to vector<8x32xbf16>
    %c3_205 = arith.constant 3 : index
    %c0_206 = arith.constant 0 : index
    %c0_207 = arith.constant 0 : index
    %487 = vector.load %arg21[%c3_205, %c0_206, %c0_207] : memref<7x32x128xbf16, #tpu.memory_space<vmem>>, vector<1x32x128xbf16>
    %488 = vector.shape_cast %487 : vector<1x32x128xbf16> to vector<32x128xbf16>
    %cst_208 = arith.constant dense<0.000000e+00> : vector<8x128xf32>
    %489 = tpu.matmul %486, %488, %cst_208 {dimension_numbers = #tpu.dot_dimension_numbers<[1], [0], [0], [1], [0, 0, 1, 1], [], []>} : vector<8x32xbf16>, vector<32x128xbf16>, vector<8x128xf32> -> vector<8x128xf32>
    %490 = arith.addf %484, %489 : vector<8x128xf32>
    %c4 = arith.constant 4 : index
    %c0_209 = arith.constant 0 : index
    %491 = tpu.strided_load %arg24[%c4, %c0_209] {strides = array<i32: 8, 1>} : memref<64x32xf32, #tpu.memory_space<vmem>>, vector<8x32xf32>
    %492 = arith.truncf %491 : vector<8x32xf32> to vector<8x32xbf16>
    %c4_210 = arith.constant 4 : index
    %c0_211 = arith.constant 0 : index
    %c0_212 = arith.constant 0 : index
    %493 = vector.load %arg21[%c4_210, %c0_211, %c0_212] : memref<7x32x128xbf16, #tpu.memory_space<vmem>>, vector<1x32x128xbf16>
    %494 = vector.shape_cast %493 : vector<1x32x128xbf16> to vector<32x128xbf16>
    %cst_213 = arith.constant dense<0.000000e+00> : vector<8x128xf32>
    %495 = tpu.matmul %492, %494, %cst_213 {dimension_numbers = #tpu.dot_dimension_numbers<[1], [0], [0], [1], [0, 0, 1, 1], [], []>} : vector<8x32xbf16>, vector<32x128xbf16>, vector<8x128xf32> -> vector<8x128xf32>
    %496 = arith.addf %490, %495 : vector<8x128xf32>
    %c5 = arith.constant 5 : index
    %c0_214 = arith.constant 0 : index
    %497 = tpu.strided_load %arg24[%c5, %c0_214] {strides = array<i32: 8, 1>} : memref<64x32xf32, #tpu.memory_space<vmem>>, vector<8x32xf32>
    %498 = arith.truncf %497 : vector<8x32xf32> to vector<8x32xbf16>
    %c5_215 = arith.constant 5 : index
    %c0_216 = arith.constant 0 : index
    %c0_217 = arith.constant 0 : index
    %499 = vector.load %arg21[%c5_215, %c0_216, %c0_217] : memref<7x32x128xbf16, #tpu.memory_space<vmem>>, vector<1x32x128xbf16>
    %500 = vector.shape_cast %499 : vector<1x32x128xbf16> to vector<32x128xbf16>
    %cst_218 = arith.constant dense<0.000000e+00> : vector<8x128xf32>
    %501 = tpu.matmul %498, %500, %cst_218 {dimension_numbers = #tpu.dot_dimension_numbers<[1], [0], [0], [1], [0, 0, 1, 1], [], []>} : vector<8x32xbf16>, vector<32x128xbf16>, vector<8x128xf32> -> vector<8x128xf32>
    %502 = arith.addf %496, %501 : vector<8x128xf32>
    %c6 = arith.constant 6 : index
    %c0_219 = arith.constant 0 : index
    %503 = tpu.strided_load %arg24[%c6, %c0_219] {strides = array<i32: 8, 1>} : memref<64x32xf32, #tpu.memory_space<vmem>>, vector<8x32xf32>
    %504 = arith.truncf %503 : vector<8x32xf32> to vector<8x32xbf16>
    %c6_220 = arith.constant 6 : index
    %c0_221 = arith.constant 0 : index
    %c0_222 = arith.constant 0 : index
    %505 = vector.load %arg21[%c6_220, %c0_221, %c0_222] : memref<7x32x128xbf16, #tpu.memory_space<vmem>>, vector<1x32x128xbf16>
    %506 = vector.shape_cast %505 : vector<1x32x128xbf16> to vector<32x128xbf16>
    %cst_223 = arith.constant dense<0.000000e+00> : vector<8x128xf32>
    %507 = tpu.matmul %504, %506, %cst_223 {dimension_numbers = #tpu.dot_dimension_numbers<[1], [0], [0], [1], [0, 0, 1, 1], [], []>} : vector<8x32xbf16>, vector<32x128xbf16>, vector<8x128xf32> -> vector<8x128xf32>
    %508 = arith.addf %502, %507 : vector<8x128xf32>
    %c0_224 = arith.constant 0 : index
    %c0_225 = arith.constant 0 : index
    %509 = vector.load %arg23[%c0_224, %c0_225] : memref<8x128xf32, #tpu.memory_space<vmem>>, vector<8x128xf32>
    tpu.vector_store %arg23[%c0_224, %c0_225], %508 {strides = array<i32>} : memref<8x128xf32, #tpu.memory_space<vmem>>, vector<8x128xf32>,
    return
  }
  func.func @transform_0(%arg0: i32) -> (i32, i32) {
    %c0_i32 = arith.constant 0 : i32
    %c0_i32_0 = arith.constant 0 : i32
    return %arg0, %c0_i32 : i32, i32
  }
  func.func @transform_1(%arg0: i32) -> (i32, i32) {
    %c0_i32 = arith.constant 0 : i32
    %c0_i32_0 = arith.constant 0 : i32
    %c0_i32_1 = arith.constant 0 : i32
    return %c0_i32, %c0_i32_0 : i32, i32
  }
  func.func @transform_2(%arg0: i32) -> (i32, i32) {
    %c0_i32 = arith.constant 0 : i32
    %c0_i32_0 = arith.constant 0 : i32
    %c0_i32_1 = arith.constant 0 : i32
    return %c0_i32, %c0_i32_0 : i32, i32
  }
  func.func @transform_3(%arg0: i32) -> (i32, i32) {
    %c0_i32 = arith.constant 0 : i32
    %c0_i32_0 = arith.constant 0 : i32
    %c0_i32_1 = arith.constant 0 : i32
    return %c0_i32, %c0_i32_0 : i32, i32
  }
  func.func @transform_4(%arg0: i32) -> (i32, i32, i32) {
    %c0_i32 = arith.constant 0 : i32
    %c0_i32_0 = arith.constant 0 : i32
    %c0_i32_1 = arith.constant 0 : i32
    %c0_i32_2 = arith.constant 0 : i32
    return %c0_i32, %c0_i32_0, %c0_i32_1 : i32, i32, i32
  }
  func.func @transform_5(%arg0: i32) -> (i32, i32, i32) {
    %c0_i32 = arith.constant 0 : i32
    %c0_i32_0 = arith.constant 0 : i32
    %c0_i32_1 = arith.constant 0 : i32
    %c0_i32_2 = arith.constant 0 : i32
    return %c0_i32, %c0_i32_0, %c0_i32_1 : i32, i32, i32
  }
  func.func @transform_6(%arg0: i32) -> (i32, i32, i32) {
    %c0_i32 = arith.constant 0 : i32
    %c0_i32_0 = arith.constant 0 : i32
    %c0_i32_1 = arith.constant 0 : i32
    %c0_i32_2 = arith.constant 0 : i32
    return %c0_i32, %c0_i32_0, %c0_i32_1 : i32, i32, i32
  }
  func.func @transform_7(%arg0: i32) -> (i32, i32, i32) {
    %c0_i32 = arith.constant 0 : i32
    %c0_i32_0 = arith.constant 0 : i32
    %c0_i32_1 = arith.constant 0 : i32
    %c0_i32_2 = arith.constant 0 : i32
    return %c0_i32, %c0_i32_0, %c0_i32_1 : i32, i32, i32
  }
  func.func @transform_8(%arg0: i32) -> (i32, i32, i32) {
    %c0_i32 = arith.constant 0 : i32
    %c0_i32_0 = arith.constant 0 : i32
    %c0_i32_1 = arith.constant 0 : i32
    %c0_i32_2 = arith.constant 0 : i32
    return %c0_i32, %c0_i32_0, %c0_i32_1 : i32, i32, i32
  }
  func.func @transform_9(%arg0: i32) -> (i32, i32, i32) {
    %c0_i32 = arith.constant 0 : i32
    %c0_i32_0 = arith.constant 0 : i32
    %c0_i32_1 = arith.constant 0 : i32
    %c0_i32_2 = arith.constant 0 : i32
    return %c0_i32, %c0_i32_0, %c0_i32_1 : i32, i32, i32
  }
  func.func @transform_10(%arg0: i32) -> (i32, i32, i32) {
    %c0_i32 = arith.constant 0 : i32
    %c0_i32_0 = arith.constant 0 : i32
    %c0_i32_1 = arith.constant 0 : i32
    %c0_i32_2 = arith.constant 0 : i32
    return %c0_i32, %c0_i32_0, %c0_i32_1 : i32, i32, i32
  }
  func.func @transform_11(%arg0: i32) -> (i32, i32, i32) {
    %c0_i32 = arith.constant 0 : i32
    %c0_i32_0 = arith.constant 0 : i32
    %c0_i32_1 = arith.constant 0 : i32
    %c0_i32_2 = arith.constant 0 : i32
    return %c0_i32, %c0_i32_0, %c0_i32_1 : i32, i32, i32
  }
  func.func @transform_12(%arg0: i32) -> (i32, i32, i32) {
    %c0_i32 = arith.constant 0 : i32
    %c0_i32_0 = arith.constant 0 : i32
    %c0_i32_1 = arith.constant 0 : i32
    %c0_i32_2 = arith.constant 0 : i32
    return %c0_i32, %c0_i32_0, %c0_i32_1 : i32, i32, i32
  }
  func.func @transform_13(%arg0: i32) -> (i32, i32, i32) {
    %c0_i32 = arith.constant 0 : i32
    %c0_i32_0 = arith.constant 0 : i32
    %c0_i32_1 = arith.constant 0 : i32
    %c0_i32_2 = arith.constant 0 : i32
    return %c0_i32, %c0_i32_0, %c0_i32_1 : i32, i32, i32
  }
  func.func @transform_14(%arg0: i32) -> (i32, i32, i32) {
    %c0_i32 = arith.constant 0 : i32
    %c0_i32_0 = arith.constant 0 : i32
    %c0_i32_1 = arith.constant 0 : i32
    %c0_i32_2 = arith.constant 0 : i32
    return %c0_i32, %c0_i32_0, %c0_i32_1 : i32, i32, i32
  }
  func.func @transform_15(%arg0: i32) -> (i32, i32, i32) {
    %c0_i32 = arith.constant 0 : i32
    %c0_i32_0 = arith.constant 0 : i32
    %c0_i32_1 = arith.constant 0 : i32
    %c0_i32_2 = arith.constant 0 : i32
    return %c0_i32, %c0_i32_0, %c0_i32_1 : i32, i32, i32
  }
  func.func @transform_16(%arg0: i32) -> (i32, i32, i32) {
    %c0_i32 = arith.constant 0 : i32
    %c0_i32_0 = arith.constant 0 : i32
    %c0_i32_1 = arith.constant 0 : i32
    %c0_i32_2 = arith.constant 0 : i32
    return %c0_i32, %c0_i32_0, %c0_i32_1 : i32, i32, i32
  }
  func.func @transform_17(%arg0: i32) -> (i32, i32, i32) {
    %c0_i32 = arith.constant 0 : i32
    %c0_i32_0 = arith.constant 0 : i32
    %c0_i32_1 = arith.constant 0 : i32
    %c0_i32_2 = arith.constant 0 : i32
    return %c0_i32, %c0_i32_0, %c0_i32_1 : i32, i32, i32
  }
  func.func @transform_18(%arg0: i32) -> (i32, i32, i32) {
    %c0_i32 = arith.constant 0 : i32
    %c0_i32_0 = arith.constant 0 : i32
    %c0_i32_1 = arith.constant 0 : i32
    %c0_i32_2 = arith.constant 0 : i32
    return %c0_i32, %c0_i32_0, %c0_i32_1 : i32, i32, i32
  }
  func.func @transform_19(%arg0: i32) -> (i32, i32, i32) {
    %c0_i32 = arith.constant 0 : i32
    %c0_i32_0 = arith.constant 0 : i32
    %c0_i32_1 = arith.constant 0 : i32
    %c0_i32_2 = arith.constant 0 : i32
    return %c0_i32, %c0_i32_0, %c0_i32_1 : i32, i32, i32
  }
  func.func @transform_20(%arg0: i32) -> (i32, i32, i32) {
    %c0_i32 = arith.constant 0 : i32
    %c0_i32_0 = arith.constant 0 : i32
    %c0_i32_1 = arith.constant 0 : i32
    %c0_i32_2 = arith.constant 0 : i32
    return %c0_i32, %c0_i32_0, %c0_i32_1 : i32, i32, i32
  }
  func.func @transform_21(%arg0: i32) -> (i32, i32) {
    %c0_i32 = arith.constant 0 : i32
    %c0_i32_0 = arith.constant 0 : i32
    %c0_i32_1 = arith.constant 0 : i32
    return %c0_i32, %c0_i32_0 : i32, i32
  }
  func.func @transform_22(%arg0: i32) -> (i32, i32) {
    %c0_i32 = arith.constant 0 : i32
    %c0_i32_0 = arith.constant 0 : i32
    return %arg0, %c0_i32 : i32, i32
  }
}

</mosaic_0001>

<bundles_post_ra>
// kernel: swin_patchtst_forward.1
= control target key start
LH: loop header
LB: loop body
LE: loop exit
PB: predicated region body
PF: predicated region fallthrough
CT: control target
= control target key end

     0   :  { %s15824_s0 = inlined_call_operand.vmem [shape: bf16[128,16], index: 0, kind: input, shape index: {}]   ;;  %s15825_s1 = inlined_call_operand.vmem [shape: bf16[16,32], index: 1, kind: input, shape index: {}]   ;;  %s15826_s2 = inlined_call_operand.vmem [shape: f32[1,32], index: 2, kind: input, shape index: {}]   ;;  %s15827_s3 = inlined_call_operand.vmem [shape: f32[8,32], index: 3, kind: input, shape index: {}]   ;;  %s15828_s4 = inlined_call_operand.vmem [shape: bf16[2,32,32], index: 4, kind: input, shape index: {}]   ;;  %s15829_s5 = inlined_call_operand.vmem [shape: f32[2,1,32], index: 5, kind: input, shape index: {}]   ;;  %s15830_s6 = inlined_call_operand.vmem [shape: bf16[2,32,32], index: 6, kind: input, shape index: {}]   ;;  %s15831_s7 = inlined_call_operand.vmem [shape: f32[2,1,32], index: 7, kind: input, shape index: {}]   ;;  %s15832_s8 = inlined_call_operand.vmem [shape: bf16[2,32,32], index: 8, kind: input, shape index: {}]   ;;  %s15833_s9 = inlined_call_operand.vmem [shape: f32[2,1,32], index: 9, kind: input, shape index: {}]   ;;  %s15834_s10 = inlined_call_operand.vmem [shape: bf16[2,32,32], index: 10, kind: input, shape index: {}]   ;;  %s15835_s11 = inlined_call_operand.vmem [shape: f32[2,1,32], index: 11, kind: input, shape index: {}]   ;;  %s15836_s12 = inlined_call_operand.vmem [shape: f32[2,1,32], index: 12, kind: input, shape index: {}]   ;;  %s15837_s13 = inlined_call_operand.vmem [shape: f32[2,1,32], index: 13, kind: input, shape index: {}]   ;;  %s15838_s14 = inlined_call_operand.vmem [shape: bf16[2,32,64], index: 14, kind: input, shape index: {}]   ;;  %s15839_s15 = inlined_call_operand.vmem [shape: f32[2,1,64], index: 15, kind: input, shape index: {}]   ;;  %s15840_s16 = inlined_call_operand.vmem [shape: bf16[2,64,32], index: 16, kind: input, shape index: {}]   ;;  %s15841_s17 = inlined_call_operand.vmem [shape: f32[2,1,32], index: 17, kind: input, shape index: {}]   ;;  %s15842_s18 = inlined_call_operand.vmem [shape: f32[2,1,32], index: 18, kind: input, shape index: {}]   ;;  %s15843_s19 = inlined_call_operand.vmem [shape: f32[2,1,32], index: 19, kind: input, shape index: {}]   ;;  %s15844_s20 = inlined_call_operand.vmem [shape: bf16[7,32,128], index: 20, kind: input, shape index: {}]   ;;  %s15845_s21 = inlined_call_operand.vmem [shape: f32[1,128], index: 21, kind: input, shape index: {}]   ;;  %s15846_s22 = inlined_call_operand.vmem [shape: f32[16,128], index: 22, kind: output, shape index: {}]  }
   0x1   :  { %15875 = sst [smem:[#allocation11_spill]] %s15824_s0 }
   0x2   :  { %15876 = sst [smem:[#allocation12_spill]] %s15825_s1 }
   0x3   :  { %15877 = sst [smem:[#allocation13_spill]] %s15826_s2 }
   0x4   :  { %15878 = sst [smem:[#allocation14_spill]] %s15827_s3  ;;  %s13157_s3 = smov 0  }
   0x5   :  { %15879 = sst [smem:[#allocation15_spill]] %s15828_s4 }
   0x6   :  { %15880 = sst [smem:[#allocation16_spill]] %s15829_s5 }
   0x7   :  { %15881 = sst [smem:[#allocation17_spill]] %s15830_s6 }
   0x8 LB: > { %s13163_s28 = sadd.s32 4294967295, %s13031_s3   ;;  %p10696_p0 = scmp.ge.s32.totalorder %s13031_s3, 1  ;;  %s13031_s3 = sphi %s13157_s3, %s32_s3  }
   0x9   : > { %p613_p1 = scmp.lt.s32.totalorder %s13031_s3, 3 }
   0xb   : > { %p614_p2 = pnand %p10696_p0, %p613_p1 }
   0xd   : > { %617 = sbr.rel (%p614_p2) target bundleno = 9350 (0x2486), region = 108 }
  0x14   : > { %s15882_s4 = sld [smem:[#allocation12_spill]]  ;;  %s10697_s0 = sshll.u32 %s13163_s28, 3  ;;  %vm722_vm0 = vcmask 130048   ;;  %v12633_v7 = vld [vmem:[%s15832_s8] sm:$0xff]   ;;  %v12634_v8 = vld [vmem:[%s15832_s8 + $0x8] sm:$0xff]   ;;  %vm846_vm1 = vcmask 261120  }
  0x15   : > { %p675_p3 = scmp.lt.s32.totalorder %s10697_s0, 15  ;;  %s15883_s24 = sld [smem:[#allocation11_spill]]  ;;  %12460 = vmatprep.subr.bf16.mxu1 %v12633_v7  ;;  %v15850_v41 = vmov 0.0   ;;  %vm13034_vm2 = vmmov 0   ;;  %v13247_v46 = vld [vmem:[%s15833_s9] ss:$0 sm:$0xff] }
  0x16   : > { %s15884_s2 = sld [smem:[#allocation15_spill]]  ;;  %12462 = vmatpush3.bf16.msra.mxu1 %v12633_v7  ;;  %s15886_s26 = sld [smem:[#allocation14_spill]]  ;;  %v10717_v59 = vld [vmem:[%s15831_s7] ss:$0 sm:$0xff]  ;;  %vm1172_vm3 = vcmask 64512   ;;  %vm1656_vm4 = vcmask 1043456  }
  0x17   : > { %s15933_s0 = smov (!%p675_p3, %s10697_s0), 15  ;;  %12461 = vmatprep.subr.bf16.mxu1 %v12634_v8  ;;  %s15887_s30 = sld [smem:[#allocation13_spill]]  ;;  %vm4822_vm6 = vcmask 195584   ;;  %vm5266_vm7 = vcmask 523264  }
  0x18   : > { %s10698_s23 = sshll.u32 %s15933_s0, 2  ;;  %s15895_s27 = sld [smem:[#allocation16_spill]] }
  0x19   : > { %s13036_s29 = smov 120   ;;  %s15863_s0 = smov 8  }
  0x1a   : > { %v12626_v0 = vld [vmem:[%s15882_s4] sm:$0xff]   ;;  %12463 = vmatpush3.bf16.msra.mxu1 %v12634_v8  ;;  %s15865_s4 = smov 104   ;;  %p680_p4 = scmp.lt.s32.totalorder %s13163_s28, 1 }
  0x1b   : > { %11474 = vmatprep.subr.bf16.mxu0 %v12626_v0  ;;  %s678_s6 = scalar_lea.vmem %s15883_s24, %s10698_s23  ;;  %s15885_s24 = sld [smem:[#allocation17_spill]]  ;;  %11526 = vmatprep.subr.bf16.mxu1 %v15850_v41 }
  0x1c   : > { %11475 = vmatpush3.bf16.msra.mxu0 %v12626_v0  ;;  %v12627_v1 = vld [vmem:[%s678_s6] sm:$0xff]   ;;  %v12628_v2 = vld [vmem:[%s678_s6 + $0x8] sm:$0xff]   ;;  %v12629_v3 = vld [vmem:[%s678_s6 + $0x10] sm:$0xff]   ;;  %s15861_s23 = smov 16   ;;  %s15935_s28 = smov (!%p680_p4, %s13163_s28), 1 }
  0x1d   : > { %11476 = vmatprep.mubr.msk.bf16.mxu0 %vm722_vm0, %v12627_v1  ;;  %v12630_v4 = vld [vmem:[%s678_s6 + $0x18] sm:$0xff]   ;;  %v12631_v5 = vld [vmem:[%s15884_s2] sm:$0xff]   ;;  %v12632_v6 = vld [vmem:[%s15884_s2 + $0x8] sm:$0xff]   ;;  %s15859_s6 = smov 24  }
  0x1e   : > { %11484 = vmatprep.subr.bf16.mxu0 %v12631_v5  ;;  %v695_v10 = vld [vmem:[%s15886_s26] sm:$0xff] }
  0x1f   : > { %11477 = vmatmul.mubr.msk.bf16.vlgmr.msra.gmra.mrb[0].mxu0 %vm722_vm0, %v12628_v2  ;;  %v10709_v16 = vld [vmem:[%s15887_s30] ss:$0 sm:$0xff]  ;;  %s13037_s30 = smov 112  }
  0x20   : > { %11480 = vmatprep.mubr.msk.bf16.mxu0 %vm722_vm0, %v12629_v3  ;;  %11485 = vmatpush3.bf16.msra.mxu0 %v12631_v5  ;;  %v13277_v3 = vld [vmem:[%s15895_s27] ss:$0 sm:$0xff] }
  0x21   : > { %11486 = vmatprep.subr.bf16.mxu0 %v12632_v6  ;;  %v12635_v9 = vld [vmem:[%s15885_s24] sm:$0xff]   ;;  %v12636_v28 = vld [vmem:[%s15885_s24 + $0x8] sm:$0xff]  }
  0x24   : > { %11487 = vmatpush3.bf16.msra.mxu0 %v12632_v6 }
  0x25   : > { %11496 = vmatprep.subr.bf16.mxu0 %v12635_v9 }
  0x27   : > { %11481 = vmatmul.mubr.msk.bf16.gmra.mrb[4].mxu0 %vm722_vm0, %v12630_v4 }
  0xf2   : > { %v11478_v11 = vpop.f32.mrb[0].mxu0 }
  0xf3   : > { %v769_v12 = vpop.f32.mrb[1].mxu0  ;;  %v778_v15 = vadd.f32 %v11478_v11, %v695_v10 }
  0xf4   : > { %v770_v13 = vadd.f32 %v769_v12, %v695_v10  ;;  %v11479_v14 = vpop.f32.mrb[2].mxu0 }
  0xf5   : > { %v781_v17 = vadd.f32 %v11479_v14, %v695_v10  ;;  %v772_v18 = vpop.f32.mrb[3].mxu0  ;;  %v13205_v23 = vadd.f32 %v10709_v16, %v778_v15 }
  0xf6   : > { %v773_v19 = vadd.f32 %v772_v18, %v695_v10  ;;  %v13201_v21 = vadd.f32 %v10709_v16, %v770_v13 }
  0xf7   : > { %v13199_v20 = vadd.f32 %v10709_v16, %v781_v17  ;;  %15890 = vst [vmem:[#allocation5_spill] sm:$0xff] %v13205_v23 }
  0xf8   : > { %v13203_v22 = vadd.f32 %v10709_v16, %v773_v19 }
  0xf9   : > { %15888 = vst [vmem:[#allocation3_spill] sm:$0xff] %v13199_v20  ;;  %v820_v26 = vpack.c.bf16 %v13199_v20, %v13205_v23 }
  0xfa   : > { %15889 = vst [vmem:[#allocation4_spill] sm:$0xff] %v13203_v22  ;;  %v11482_v24 = vpop.f32.mrb[4].mxu0  ;;  %v819_v25 = vpack.c.bf16 %v13203_v22, %v13201_v21 }
  0xfb   : > { %v785_v27 = vpop.f32.mrb[5].mxu0  ;;  %v794_v31 = vadd.f32 %v11482_v24, %v695_v10 }
  0xfc   : > { %v786_v29 = vadd.f32 %v785_v27, %v695_v10  ;;  %v11483_v30 = vpop.f32.mrb[6].mxu0  ;;  %11488 = vmatprep.mubr.msk.bf16.mxu0 %vm846_vm1, %v819_v25 }
  0xfd   : > { %v797_v32 = vadd.f32 %v11483_v30, %v695_v10  ;;  %v788_v33 = vpop.f32.mrb[7].mxu0  ;;  %11489 = vmatmul.mubr.msk.bf16.vlgmr.msra.gmra.mrb[8].mxu0 %vm846_vm1, %v820_v26  ;;  %v13222_v38 = vadd.f32 %v10709_v16, %v794_v31 }
  0xfe   : > { %v789_v34 = vadd.f32 %v788_v33, %v695_v10  ;;  %11497 = vmatpush3.bf16.msra.mxu0 %v12635_v9  ;;  %v13218_v36 = vadd.f32 %v10709_v16, %v786_v29 }
  0xff   : > { %v13216_v35 = vadd.f32 %v10709_v16, %v797_v32  ;;  %11498 = vmatprep.subr.bf16.mxu0 %v12636_v28  ;;  %15894 = vst [vmem:[#allocation9_spill] sm:$0xff] %v13222_v38 }
 0x100   : > { %15892 = vst [vmem:[#allocation7_spill] sm:$0xff] %v13218_v36  ;;  %v13220_v37 = vadd.f32 %v10709_v16, %v789_v34 }
 0x101   : > { %15891 = vst [vmem:[#allocation6_spill] sm:$0xff] %v13216_v35  ;;  %v822_v40 = vpack.c.bf16 %v13216_v35, %v13222_v38 }
 0x102   : > { %15893 = vst [vmem:[#allocation8_spill] sm:$0xff] %v13220_v37  ;;  %v821_v39 = vpack.c.bf16 %v13220_v37, %v13218_v36  ;;  %11499 = vmatpush3.bf16.msra.mxu0 %v12636_v28 }
 0x103   : > { %11508 = vmatprep.subr.bf16.mxu0 %v12633_v7 }
 0x104   : > { %11492 = vmatprep.mubr.msk.bf16.mxu0 %vm846_vm1, %v821_v39  ;;  %11516 = vmatprep.mubr.msk.bf16.mxu1 %vm846_vm1, %v821_v39 }
 0x105   : > { %11493 = vmatmul.mubr.msk.bf16.gmra.mrb[12].mxu0 %vm846_vm1, %v822_v40  ;;  %11517 = vmatmul.mubr.msk.bf16.vlgmr.msra.gmra.mrb[0].mxu1 %vm846_vm1, %v822_v40 }
 0x106   : > { %11500 = vmatprep.mubr.msk.bf16.mxu0 %vm846_vm1, %v819_v25  ;;  %11528 = vmatprep.mubr.msk.bf16.mxu1 %vm13034_vm2, %v15850_v41 }
 0x10d   : > { %11501 = vmatmul.mubr.msk.bf16.vlgmr.msra.gmra.mrb[16].mxu0 %vm846_vm1, %v820_v26 }
 0x10e   : > { %11504 = vmatprep.mubr.msk.bf16.mxu0 %vm846_vm1, %v821_v39  ;;  %11509 = vmatpush3.bf16.msra.mxu0 %v12633_v7 }
 0x10f   : > { %11510 = vmatprep.subr.bf16.mxu0 %v12634_v8 }
 0x112   : > { %11511 = vmatpush3.bf16.msra.mxu0 %v12634_v8 }
 0x113   : > { %11520 = vmatprep.subr.bf16.mxu0 %v15850_v41 }
 0x115   : > { %11505 = vmatmul.mubr.msk.bf16.gmra.mrb[20].mxu0 %vm846_vm1, %v822_v40 }
 0x116   : > { %11512 = vmatprep.mubr.msk.bf16.mxu0 %vm846_vm1, %v819_v25 }
 0x11d   : > { %11513 = vmatmul.mubr.msk.bf16.vlgmr.msra.gmra.mrb[24].mxu0 %vm846_vm1, %v820_v26 }
 0x11e   : > { %11522 = vmatprep.mubr.msk.bf16.mxu0 %vm13034_vm2, %v15850_v41 }
 0x1d0   : > { %v11490_v42 = vpop.f32.mrb[8].mxu0 }
 0x1d1   : > { %v893_v43 = vpop.f32.mrb[9].mxu0  ;;  %v902_v25 = vadd.f32 %v11490_v42, %v13277_v3 }
 0x1d2   : > { %v11491_v44 = vpop.f32.mrb[10].mxu0  ;;  %v894_v7 = vadd.f32 %v13277_v3, %v893_v43 }
 0x1d3   : > { %v896_v45 = vpop.f32.mrb[11].mxu0  ;;  %v905_v31 = vadd.f32 %v11491_v44, %v13277_v3  ;;  %v13321_v40 = vpack.c.bf16 %v902_v25, %v902_v25 }
 0x1d4   : > { %v897_v12 = vadd.f32 %v13277_v3, %v896_v45  ;;  %v13291_v16 = vpack.c.bf16 %v894_v7, %v894_v7 }
 0x1d5   : > { %v13325_v43 = vpack.c.bf16 %v905_v31, %v905_v31 }
 0x1d6   : > { %v13295_v18 = vpack.c.bf16 %v897_v12, %v897_v12 }
 0x1d8   : > { %v13249_v47 = vpop.f32.mrb[12].mxu0  ;;  %v11518_v48 = vpop.f32.mrb[0].mxu1 }
 0x1d9   : > { %v13252_v49 = vadd.f32 %v11518_v48, %v13247_v46  ;;  %v13254_v50 = vpop.f32.mrb[13].mxu0  ;;  %v1085_v51 = vpop.f32.mrb[1].mxu1 }
 0x1da   : > { %v13257_v52 = vadd.f32 %v13247_v46, %v1085_v51  ;;  %v13259_v53 = vpop.f32.mrb[14].mxu0  ;;  %v11519_v54 = vpop.f32.mrb[2].mxu1  ;;  %v910_v48 = vadd.f32 %v13277_v3, %v13254_v50 }
 0x1db   : > { %v13262_v55 = vadd.f32 %v11519_v54, %v13247_v46  ;;  %v13264_v56 = vpop.f32.mrb[15].mxu0  ;;  %v1088_v57 = vpop.f32.mrb[3].mxu1 }
 0x1dc   : > { %v13267_v58 = vadd.f32 %v13247_v46, %v1088_v57  ;;  %v913_v57 = vadd.f32 %v13277_v3, %v13264_v56  ;;  %v13347_v50 = vpack.c.bf16 %v910_v48, %v910_v48  ;;  %v918_v56 = vadd.f32 %v13249_v47, %v13277_v3 }
 0x1e0   : > { %v11502_v60 = vpop.f32.mrb[16].mxu0 }
 0x1e1   : > { %v981_v61 = vpop.f32.mrb[17].mxu0  ;;  %v990_v4 = vadd.f32 %v11502_v60, %v10717_v59 }
 0x1e2   : > { %v982_v62 = vadd.f32 %v10717_v59, %v981_v61  ;;  %v11503_v63 = vpop.f32.mrb[18].mxu0  ;;  %v13351_v61 = vpack.c.bf16 %v913_v57, %v913_v57 }
 0x1e3   : > { %v984_v0 = vpop.f32.mrb[19].mxu0  ;;  %v993_v8 = vadd.f32 %v11503_v63, %v10717_v59  ;;  %v13288_v13 = vpack.c.bf16 %v990_v4, %v990_v4  ;;  %v921_v4 = vadd.f32 %v13259_v53, %v13277_v3  ;;  %v815_v3 = vlaneseq }
 0x1e4   : > { %v13272_v1 = vpack.c.bf16 %v982_v62, %v982_v62  ;;  %v985_v2 = vadd.f32 %v10717_v59, %v984_v0 }
 0x1e5   : > { %v13293_v17 = vpack.c.bf16 %v993_v8, %v993_v8  ;;  %v1269_v24 = vsel %vm1172_vm3, %v13288_v13, 0  ;;  %v13379_v7 = vpack.c.bf16 %v921_v4, %v921_v4 }
 0x1e6   : > { %v13279_v5 = vpack.c.bf16 %v985_v2, %v985_v2  ;;  %v1177_v6 = vsel %vm1172_vm3, %v13272_v1, 0 }
 0x1e7   : > { %11521 = vmatpush3.bf16.xpose.msra.mxu0 %v1177_v6  ;;  %v1315_v28 = vsel %vm1172_vm3, %v13293_v17, 0 }
 0x1e8   : > { %v11506_v9 = vpop.f32.mrb[20].mxu0  ;;  %v1223_v10 = vsel %vm1172_vm3, %v13279_v5, 0  ;;  %11532 = vmatprep.subr.bf16.mxu0 %v15850_v41 }
 0x1e9   : > { %v997_v11 = vpop.f32.mrb[21].mxu0  ;;  %11527 = vmatpush3.bf16.xpose.msra.mxu1 %v1223_v10  ;;  %v1006_v45 = vadd.f32 %v11506_v9, %v10717_v59  ;;  %v816_v9 = vand.u32 127, %v815_v3 }
 0x1ea   : > { %v11507_v14 = vpop.f32.mrb[22].mxu0  ;;  %11538 = vmatprep.subr.bf16.mxu1 %v15850_v41  ;;  %v998_v19 = vadd.f32 %v10717_v59, %v997_v11  ;;  %v13035_v11 = vmov -1e+30  }
 0x1eb   : > { %v1000_v15 = vpop.f32.mrb[23].mxu0  ;;  %v1009_v51 = vadd.f32 %v11507_v14, %v10717_v59  ;;  %v13344_v60 = vpack.c.bf16 %v1006_v45, %v1006_v45  ;;  %vm817_vm5 = vcmp.lt.s32.totalorder %v816_v9, 7 }
 0x1ec   : > { %v1001_v26 = vadd.f32 %v10717_v59, %v1000_v15  ;;  %v13315_v32 = vpack.c.bf16 %v998_v19, %v998_v19  ;;  %v13395_v12 = vsel %vm817_vm5, 0.0, %v13035_v11 }
 0x1ed   : > { %v13349_v59 = vpack.c.bf16 %v1009_v51, %v1009_v51  ;;  %v1453_v63 = vsel %vm1172_vm3, %v13344_v60, 0 }
 0x1ee   : > { %11523 = vmatmul.mubr.msk.bf16.vlgmr.msra.gmra.mrb[28].mxu0 %vm1172_vm3, %v13291_v16  ;;  %v13323_v42 = vpack.c.bf16 %v1001_v26, %v1001_v26  ;;  %v1361_v44 = vsel %vm1172_vm3, %v13315_v32, 0 }
 0x1ef   : > { %11533 = vmatpush3.bf16.xpose.msra.mxu0 %v1269_v24  ;;  %11534 = vmatprep.mubr.msk.bf16.mxu0 %vm13034_vm2, %v15850_v41  ;;  %v1499_v2 = vsel %vm1172_vm3, %v13349_v59, 0 }
 0x1f0   : > { %v11514_v27 = vpop.f32.mrb[24].mxu0  ;;  %11529 = vmatmul.mubr.msk.bf16.vlgmr.msra.gmra.mrb[4].mxu1 %vm1172_vm3, %v13295_v18  ;;  %11544 = vmatprep.subr.bf16.mxu0 %v15850_v41  ;;  %v1407_v54 = vsel %vm1172_vm3, %v13323_v42, 0 }
 0x1f1   : > { %v13310_v29 = vadd.f32 %v11514_v27, %v13247_v46  ;;  %v1069_v30 = vpop.f32.mrb[25].mxu0  ;;  %11539 = vmatpush3.bf16.xpose.msra.mxu1 %v1315_v28  ;;  %11540 = vmatprep.mubr.msk.bf16.mxu1 %vm13034_vm2, %v15850_v41 }
 0x1f2   : > { %v11515_v33 = vpop.f32.mrb[26].mxu0  ;;  %11550 = vmatprep.subr.bf16.mxu1 %v15850_v41  ;;  %v1070_v62 = vadd.f32 %v13247_v46, %v1069_v30 }
 0x1f3   : > { %v13319_v34 = vadd.f32 %v11515_v33, %v13247_v46  ;;  %v1072_v39 = vpop.f32.mrb[27].mxu0 }
 0x1f4   : > { %v1073_v0 = vadd.f32 %v13247_v46, %v1072_v39  ;;  %v13372_v6 = vpack.c.bf16 %v1070_v62, %v1070_v62  ;;  %v13375_v46 = vpack.c.bf16 %v918_v56, %v918_v56 }
 0x1f6   : > { %11535 = vmatmul.mubr.msk.bf16.vlgmr.msra.gmra.mrb[32].mxu0 %vm1172_vm3, %v13321_v40  ;;  %v13377_v47 = vpack.c.bf16 %v1073_v0, %v1073_v0  ;;  %v1658_v8 = vsel %vm1656_vm4, %v13372_v6, 0 }
 0x1f7   : > { %11545 = vmatpush3.bf16.xpose.msra.mxu0 %v1361_v44  ;;  %11546 = vmatprep.mubr.msk.bf16.mxu0 %vm13034_vm2, %v15850_v41 }
 0x1f8   : > { %11541 = vmatmul.mubr.msk.bf16.vlgmr.msra.gmra.mrb[8].mxu1 %vm1172_vm3, %v13325_v43  ;;  %11556 = vmatprep.subr.bf16.mxu0 %v15850_v41  ;;  %v1704_v53 = vsel %vm1656_vm4, %v13377_v47, 0 }
 0x1f9   : > { %11551 = vmatpush3.bf16.xpose.msra.mxu1 %v1407_v54  ;;  %11552 = vmatprep.mubr.msk.bf16.mxu1 %vm13034_vm2, %v15850_v41 }
 0x1fa   : > { %11562 = vmatprep.subr.bf16.mxu1 %v15850_v41 }
 0x1fe   : > { %11547 = vmatmul.mubr.msk.bf16.vlgmr.msra.gmra.mrb[36].mxu0 %vm1172_vm3, %v13347_v50 }
 0x1ff   : > { %11557 = vmatpush3.bf16.xpose.msra.mxu0 %v1453_v63  ;;  %11558 = vmatprep.mubr.msk.bf16.mxu0 %vm13034_vm2, %v15850_v41 }
 0x200   : > { %11553 = vmatmul.mubr.msk.bf16.vlgmr.msra.gmra.mrb[12].mxu1 %vm1172_vm3, %v13351_v61  ;;  %11568 = vmatprep.subr.bf16.mxu0 %v15850_v41 }
 0x201   : > { %11563 = vmatpush3.bf16.xpose.msra.mxu1 %v1499_v2  ;;  %11564 = vmatprep.mubr.msk.bf16.mxu1 %vm13034_vm2, %v15850_v41 }
 0x202   : > { %11574 = vmatprep.subr.bf16.mxu1 %v15850_v41 }
 0x206   : > { %11559 = vmatmul.mubr.msk.bf16.vlgmr.msra.gmra.mrb[40].mxu0 %vm1172_vm3, %v13375_v46 }
 0x207   : > { %11569 = vmatpush3.bf16.msra.mxu0 %v1658_v8  ;;  %11570 = vmatprep.mubr.msk.bf16.mxu0 %vm13034_vm2, %v15850_v41 }
 0x208   : > { %11565 = vmatmul.mubr.msk.bf16.vlgmr.msra.gmra.mrb[16].mxu1 %vm1172_vm3, %v13379_v7  ;;  %11580 = vmatprep.subr.bf16.mxu0 %v15850_v41 }
 0x209   : > { %11575 = vmatpush3.bf16.msra.mxu1 %v1704_v53  ;;  %11576 = vmatprep.mubr.msk.bf16.mxu1 %vm13034_vm2, %v15850_v41 }
 0x20a   : > { %11586 = vmatprep.subr.bf16.mxu1 %v15850_v41 }
 0x2c1   : > { %v1213_v10 = vpop.f32.mrb[28].mxu0 }
 0x2c2   : > { %v1541_v14 = vmul.f32 0.35355338, %v1213_v10  ;;  %v11524_v15 = vpop.f32.mrb[29].mxu0 }
 0x2c3   : > { %v1216_v19 = vpop.f32.mrb[30].mxu0  ;;  %v1259_v24 = vpop.f32.mrb[4].mxu1 }
 0x2c4   : > { %v1542_v25 = vmul.f32 0.35355338, %v1259_v24  ;;  %v11525_v26 = vpop.f32.mrb[31].mxu0  ;;  %v11530_v27 = vpop.f32.mrb[5].mxu1  ;;  %v1549_v28 = vadd.f32 %v1541_v14, %v13395_v12 }
 0x2c5   : > { %v1262_v30 = vpop.f32.mrb[6].mxu1 }
 0x2c6   : > { %v11531_v31 = vpop.f32.mrb[7].mxu1  ;;  %v1557_v33 = vsel %vm1172_vm3, %v1549_v28, -inf  ;;  %v1550_v39 = vadd.f32 %v1542_v25, %v13395_v12 }
 0x2c7   : > { %1558 = vmax.xlane.f32.xlu0 %v1557_v33 }
 0x2c8   : > { %v1560_v51 = vsel %vm1172_vm3, %v1550_v39, -inf }
 0x2c9   : > { %v1305_v45 = vpop.f32.mrb[32].mxu0 }
 0x2ca   : > { %v1543_v44 = vmul.f32 0.35355338, %v1305_v45  ;;  %v11536_v48 = vpop.f32.mrb[33].mxu0 }
 0x2cb   : > { %v1351_v54 = vpop.f32.mrb[8].mxu1  ;;  %1561 = vmax.xlane.f32.xlu0 %v1560_v51  ;;  %v1308_v57 = vpop.f32.mrb[34].mxu0 }
 0x2cc   : > { %v1544_v62 = vmul.f32 0.35355338, %v1351_v54  ;;  %v11537_v63 = vpop.f32.mrb[35].mxu0  ;;  %v11542_v56 = vpop.f32.mrb[9].mxu1  ;;  %v1551_v0 = vadd.f32 %v1543_v44, %v13395_v12 }
 0x2cd   : > { %v1354_v2 = vpop.f32.mrb[10].mxu1 }
 0x2ce   : > { %v11543_v4 = vpop.f32.mrb[11].mxu1  ;;  %v1563_v8 = vsel %vm1172_vm3, %v1551_v0, -inf  ;;  %v1552_v53 = vadd.f32 %v1544_v62, %v13395_v12 }
 0x2cf   : > { %1564 = vmax.xlane.f32.xlu1 %v1563_v8 }
 0x2d0   : > { %v1566_v11 = vsel %vm1172_vm3, %v1552_v53, -inf }
 0x2d1   : > { %v1397_v3 = vpop.f32.mrb[36].mxu0 }
 0x2d2   : > { %v1545_v9 = vmul.f32 0.35355338, %v1397_v3  ;;  %v11548_v10 = vpop.f32.mrb[37].mxu0 }
 0x2d3   : > { %v1443_v14 = vpop.f32.mrb[12].mxu1  ;;  %1567 = vmax.xlane.f32.xlu1 %v1566_v11  ;;  %v1400_v15 = vpop.f32.mrb[38].mxu0 }
 0x2d4   : > { %v1546_v19 = vmul.f32 0.35355338, %v1443_v14  ;;  %v11549_v24 = vpop.f32.mrb[39].mxu0  ;;  %v11554_v25 = vpop.f32.mrb[13].mxu1  ;;  %v1553_v26 = vadd.f32 %v1545_v9, %v13395_v12 }
 0x2d5   : > { %v1446_v27 = vpop.f32.mrb[14].mxu1 }
 0x2d6   : > { %v11555_v30 = vpop.f32.mrb[15].mxu1  ;;  %v1569_v31 = vsel %vm1172_vm3, %v1553_v26, -inf  ;;  %v1554_v33 = vadd.f32 %v1546_v19, %v13395_v12 }
 0x2d7   : > { %1570 = vmax.xlane.f32.xlu0 %v1569_v31 }
 0x2d8   : > { %v1572_v45 = vsel %vm1172_vm3, %v1554_v33, -inf }
 0x2d9   : > { %1573 = vmax.xlane.f32.xlu1 %v1572_v45  ;;  %v1489_v44 = vpop.f32.mrb[40].mxu0 }
 0x2da   : > { %v1547_v48 = vmul.f32 0.35355338, %v1489_v44  ;;  %v11560_v51 = vpop.f32.mrb[41].mxu0 }
 0x2db   : > { %v1492_v54 = vpop.f32.mrb[42].mxu0  ;;  %v1535_v57 = vpop.f32.mrb[16].mxu1 }
 0x2dc   : > { %v1548_v62 = vmul.f32 0.35355338, %v1535_v57  ;;  %v11561_v63 = vpop.f32.mrb[43].mxu0  ;;  %v11566_v56 = vpop.f32.mrb[17].mxu1  ;;  %v1555_v2 = vadd.f32 %v1547_v48, %v13395_v12 }
 0x2dd   : > { %v1538_v4 = vpop.f32.mrb[18].mxu1 }
 0x2de   : > { %v11567_v8 = vpop.f32.mrb[19].mxu1  ;;  %v1575_v3 = vsel %vm1172_vm3, %v1555_v2, -inf  ;;  %v1556_v9 = vadd.f32 %v1548_v62, %v13395_v12 }
 0x2df   : > { %1576 = vmax.xlane.f32.xlu0 %v1575_v3 }
 0x2e0   : > { %v1578_v10 = vsel %vm1172_vm3, %v1556_v9, -inf }
 0x2e1   : > { %1579 = vmax.xlane.f32.xlu1 %v1578_v10 }
 0x354   : > { %v1559_v11 = vpop.xlane.xlu0 %1558 }
 0x355   : > { %v1581_v14 = vsub.f32 %v1549_v28, %v1559_v11 }
 0x357   : > { %v1589_v15 = vmul.f32 1.442695, %v1581_v14 }
 0x358   : > { %v1562_v19 = vpop.xlane.xlu0 %1561 }
 0x359   : > { %12673 = vpow2.f32 %v1589_v15  ;;  %v1582_v24 = vsub.f32 %v1550_v39, %v1562_v19 }
 0x35b   : > { %v1591_v25 = vmul.f32 1.442695, %v1582_v24 }
 0x35c   : > { %v1565_v27 = vpop.xlane.xlu1 %1564 }
 0x35d   : > { %12675 = vpow2.f32 %v1591_v25  ;;  %v1583_v30 = vsub.f32 %v1551_v0, %v1565_v27 }
 0x35f   : > { %v1593_v31 = vmul.f32 1.442695, %v1583_v30 }
 0x360   : > { %v1568_v45 = vpop.xlane.xlu1 %1567 }
 0x361   : > { %12677 = vpow2.f32 %v1593_v31  ;;  %v1584_v44 = vsub.f32 %v1552_v53, %v1568_v45 }
 0x363   : > { %v13413_v48 = vpop.eup %12673  ;;  %v1595_v51 = vmul.f32 1.442695, %v1584_v44  ;;  %v13483_v44 = vpack.c.bf16 %v13310_v29, %v13310_v29 }
 0x364   : > { %v1571_v54 = vpop.xlane.xlu0 %1570  ;;  %v1605_v57 = vsel %vm1172_vm3, %v13413_v48, 0.0 }
 0x365   : > { %12679 = vpow2.f32 %v1595_v51  ;;  %v1585_v28 = vsub.f32 %v1553_v26, %v1571_v54  ;;  %1606 = vadd.xlane.f32.xlu0 %v1605_v57  ;;  %v13489_v51 = vpack.c.bf16 %v13319_v34, %v13319_v34  ;;  %v1750_v34 = vsel %vm1656_vm4, %v13483_v44, 0 }
 0x366   : > { %v1574_v62 = vpop.xlane.xlu1 %1573 }
 0x367   : > { %v13417_v39 = vpop.eup %12675  ;;  %v1597_v63 = vmul.f32 1.442695, %v1585_v28  ;;  %v1586_v56 = vsub.f32 %v1554_v33, %v1574_v62 }
 0x368   : > { %v1608_v0 = vsel %vm1172_vm3, %v13417_v39, 0.0 }
 0x369   : > { %12681 = vpow2.f32 %v1597_v63  ;;  %v1599_v53 = vmul.f32 1.442695, %v1586_v56  ;;  %1609 = vadd.xlane.f32.xlu1 %v1608_v0 }
 0x36b   : > { %v13421_v4 = vpop.eup %12677  ;;  %12683 = vpow2.f32 %v1599_v53 }
 0x36c   : > { %v1577_v8 = vpop.xlane.xlu0 %1576  ;;  %v1611_v3 = vsel %vm1172_vm3, %v13421_v4, 0.0 }
 0x36d   : > { %v1587_v26 = vsub.f32 %v1555_v2, %v1577_v8  ;;  %1612 = vadd.xlane.f32.xlu0 %v1611_v3 }
 0x36e   : > { %v1580_v27 = vpop.xlane.xlu1 %1579 }
 0x36f   : > { %v13425_v10 = vpop.eup %12679  ;;  %v1601_v11 = vmul.f32 1.442695, %v1587_v26  ;;  %v1588_v30 = vsub.f32 %v1556_v9, %v1580_v27 }
 0x370   : > { %v1614_v33 = vsel %vm1172_vm3, %v13425_v10, 0.0 }
 0x371   : > { %12685 = vpow2.f32 %v1601_v11  ;;  %1615 = vadd.xlane.f32.xlu1 %v1614_v33  ;;  %v1603_v31 = vmul.f32 1.442695, %v1588_v30  ;;  %v13503_v11 = vpack.c.bf16 %v13257_v52, %v13257_v52 }
 0x373   : > { %v13429_v14 = vpop.eup %12681  ;;  %12687 = vpow2.f32 %v1603_v31  ;;  %v1842_v52 = vsel %vm1656_vm4, %v13503_v11, 0 }
 0x374   : > { %v1617_v15 = vsel %vm1172_vm3, %v13429_v14, 0.0 }
 0x375   : > { %v13433_v19 = vpop.eup %12683  ;;  %1618 = vadd.xlane.f32.xlu0 %v1617_v15 }
 0x376   : > { %v1620_v2 = vsel %vm1172_vm3, %v13433_v19, 0.0 }
 0x377   : > { %1621 = vadd.xlane.f32.xlu1 %v1620_v2 }
 0x37b   : > { %v13437_v24 = vpop.eup %12685 }
 0x37c   : > { %v1623_v25 = vsel %vm1172_vm3, %v13437_v24, 0.0 }
 0x37d   : > { %1624 = vadd.xlane.f32.xlu0 %v1623_v25  ;;  %v13459_v45 = vpop.eup %12687  ;;  %v13514_v25 = vpack.c.bf16 %v13267_v58, %v13267_v58  ;;  %v13525_v58 = vpack.c.bf16 %v13252_v49, %v13252_v49  ;;  %v13537_v49 = vpack.c.bf16 %v13262_v55, %v13262_v55 }
 0x37e   : > { %v1626_v9 = vsel %vm1172_vm3, %v13459_v45, 0.0 }
 0x37f   : > { %v1980_v55 = vsel %vm1656_vm4, %v13537_v49, 0 }
 0x388   : > { %2074 = vrot.lane.b32.xlu1 %v13279_v5, %s13036_s29 }
 0x38c   : > { %2022 = vrot.lane.b32.xlu1 %v13291_v16, %s13036_s29 }
 0x393   : > { %2024 = vrot.lane.b32.xlu0 %v13272_v1, %s13036_s29 }
 0x397   : > { %2124 = vrot.lane.b32.xlu0 %v13288_v13, %s13036_s29 }
 0x39b   : > { %2122 = vrot.lane.b32.xlu0 %v13321_v40, %s13036_s29 }
 0x39f   : > { %2224 = vrot.lane.b32.xlu0 %v13315_v32, %s13036_s29 }
 0x3a3   : > { %2222 = vrot.lane.b32.xlu0 %v13347_v50, %s13036_s29 }
 0x3a7   : > { %2324 = vrot.lane.b32.xlu0 %v13344_v60, %s13036_s29 }
 0x3ab   : > { %2322 = vrot.lane.b32.xlu0 %v13375_v46, %s13036_s29 }
 0x3af   : > { %2534 = vrot.lane.b32.xlu0 %v13372_v6, %s13036_s29 }
 0x3b0   : > { %1627 = vadd.xlane.f32.xlu1 %v1626_v9  ;;  %v1888_v9 = vsel %vm1656_vm4, %v13514_v25, 0 }
 0x3c1   : > { %2072 = vrot.lane.b32.xlu1 %v13295_v18, %s13036_s29 }
 0x3c5   : > { %2174 = vrot.lane.b32.xlu1 %v13293_v17, %s13036_s29 }
 0x3c9   : > { %2172 = vrot.lane.b32.xlu1 %v13325_v43, %s13036_s29 }
 0x3cd   : > { %2274 = vrot.lane.b32.xlu1 %v13323_v42, %s13036_s29 }
 0x3d1   : > { %2272 = vrot.lane.b32.xlu1 %v13351_v61, %s13036_s29 }
 0x3d5   : > { %2374 = vrot.lane.b32.xlu1 %v13349_v59, %s13036_s29 }
 0x3d9   : > { %2372 = vrot.lane.b32.xlu1 %v13379_v7, %s13036_s29 }
 0x3dd   : > { %2582 = vrot.lane.b32.xlu1 %v13377_v47, %s13036_s29 }
 0x3e1   : > { %2630 = vrot.lane.b32.xlu1 %v13483_v44, %s13036_s29 }
 0x3e5   : > { %2678 = vrot.lane.b32.xlu1 %v13489_v51, %s13036_s29 }
 0x3f2   : > { %v1607_v54 = vpop.xlane.xlu0 %1606 }
 0x3f3   : > { %12689 = vrcp.f32 %v1607_v54 }
 0x3f6   : > { %v1610_v57 = vpop.xlane.xlu1 %1609 }
 0x3f7   : > { %12691 = vrcp.f32 %v1610_v57 }
 0x3fa   : > { %v1613_v28 = vpop.xlane.xlu0 %1612 }
 0x3fb   : > { %12693 = vrcp.f32 %v1613_v28 }
 0x3fd   : > { %v12690_v62 = vpop.eup %12689 }
 0x3fe   : > { %v1616_v63 = vpop.xlane.xlu1 %1615  ;;  %v1637_v29 = vmul.f32 %v12690_v62, %v13413_v48 }
 0x3ff   : > { %12695 = vrcp.f32 %v1616_v63  ;;  %v1934_v63 = vsel %vm1656_vm4, %v13525_v58, 0 }
 0x400   : > { %v1645_v56 = vpack.c.bf16 %v1637_v29, %v1637_v29 }
 0x401   : > { %v12692_v0 = vpop.eup %12691 }
 0x402   : > { %11571 = vmatmul.mubr.msk.bf16.vlgmr.msra.gmra.mrb[44].mxu0 %vm1172_vm3, %v1645_v56  ;;  %v1619_v53 = vpop.xlane.xlu0 %1618  ;;  %v1638_v8 = vmul.f32 %v12692_v0, %v13417_v39  ;;  %v1796_v39 = vsel %vm1656_vm4, %v13489_v51, 0 }
 0x403   : > { %11581 = vmatpush3.bf16.msra.mxu0 %v1750_v34  ;;  %12697 = vrcp.f32 %v1619_v53  ;;  %11582 = vmatprep.mubr.msk.bf16.mxu0 %vm13034_vm2, %v15850_v41 }
 0x404   : > { %v1622_v3 = vpop.xlane.xlu1 %1621  ;;  %v1646_v26 = vpack.c.bf16 %v1638_v8, %v1638_v8  ;;  %11592 = vmatprep.subr.bf16.mxu0 %v15850_v41 }
 0x405   : > { %v12694_v48 = vpop.eup %12693  ;;  %12699 = vrcp.f32 %v1622_v3 }
 0x406   : > { %11577 = vmatmul.mubr.msk.bf16.vlgmr.msra.gmra.mrb[20].mxu1 %vm1172_vm3, %v1646_v26  ;;  %v1639_v33 = vmul.f32 %v12694_v48, %v13421_v4 }
 0x407   : > { %11587 = vmatpush3.bf16.msra.mxu1 %v1796_v39  ;;  %11588 = vmatprep.mubr.msk.bf16.mxu1 %vm13034_vm2, %v15850_v41 }
 0x408   : > { %v1647_v15 = vpack.c.bf16 %v1639_v33, %v1639_v33  ;;  %11598 = vmatprep.subr.bf16.mxu1 %v15850_v41  ;;  %v2075_v8 = vpop.permute.xlu1 %2074 }
 0x409   : > { %v12696_v2 = vpop.eup %12695 }
 0x40a   : > { %11583 = vmatmul.mubr.msk.bf16.vlgmr.msra.gmra.mrb[48].mxu0 %vm1172_vm3, %v1647_v15  ;;  %v1625_v27 = vpop.xlane.xlu0 %1624  ;;  %v1640_v4 = vmul.f32 %v12696_v2, %v13425_v10 }
 0x40b   : > { %11593 = vmatpush3.bf16.msra.mxu0 %v1842_v52  ;;  %12701 = vrcp.f32 %v1625_v27  ;;  %11594 = vmatprep.mubr.msk.bf16.mxu0 %vm13034_vm2, %v15850_v41 }
 0x40c   : > { %v1648_v30 = vpack.c.bf16 %v1640_v4, %v1640_v4  ;;  %11604 = vmatprep.subr.bf16.mxu0 %v15850_v41  ;;  %v2023_v3 = vpop.permute.xlu1 %2022 }
 0x40d   : > { %v12698_v31 = vpop.eup %12697 }
 0x40e   : > { %11589 = vmatmul.mubr.msk.bf16.vlgmr.msra.gmra.mrb[24].mxu1 %vm1172_vm3, %v1648_v30  ;;  %v2025_v54 = vpop.permute.xlu0 %2024  ;;  %v1641_v10 = vmul.f32 %v12698_v31, %v13429_v14 }
 0x40f   : > { %v12700_v57 = vpop.eup %12699  ;;  %11599 = vmatpush3.bf16.msra.mxu1 %v1888_v9  ;;  %11600 = vmatprep.mubr.msk.bf16.mxu1 %vm13034_vm2, %v15850_v41  ;;  %v2030_v53 = vsel %vm1172_vm3, %v2025_v54, 0 }
 0x410   : > { %v1649_v28 = vpack.c.bf16 %v1641_v10, %v1641_v10  ;;  %11610 = vmatprep.subr.bf16.mxu1 %v15850_v41  ;;  %v1642_v62 = vmul.f32 %v12700_v57, %v13433_v19 }
 0x412   : > { %11595 = vmatmul.mubr.msk.bf16.vlgmr.msra.gmra.mrb[52].mxu0 %vm1172_vm3, %v1649_v28  ;;  %v2125_v14 = vpop.permute.xlu0 %2124  ;;  %v1650_v29 = vpack.c.bf16 %v1642_v62, %v1642_v62  ;;  %v2080_v28 = vsel %vm1172_vm3, %v2075_v8, 0 }
 0x413   : > { %11605 = vmatpush3.bf16.msra.mxu0 %v1934_v63  ;;  %11606 = vmatprep.mubr.msk.bf16.mxu0 %vm13034_vm2, %v15850_v41  ;;  %v2130_v26 = vsel %vm1172_vm3, %v2125_v14, 0 }
 0x414   : > { %11616 = vmatprep.subr.bf16.mxu0 %v15850_v41 }
 0x415   : > { %v12702_v56 = vpop.eup %12701 }
 0x416   : > { %11601 = vmatmul.mubr.msk.bf16.vlgmr.msra.gmra.mrb[28].mxu1 %vm1172_vm3, %v1650_v29  ;;  %v1643_v19 = vmul.f32 %v12702_v56, %v13437_v24  ;;  %v2123_v34 = vpop.permute.xlu0 %2122 }
 0x417   : > { %11611 = vmatpush3.bf16.msra.mxu1 %v1980_v55  ;;  %11612 = vmatprep.mubr.msk.bf16.mxu1 %vm13034_vm2, %v15850_v41 }
 0x418   : > { %v1651_v0 = vpack.c.bf16 %v1643_v19, %v1643_v19  ;;  %11622 = vmatprep.subr.bf16.mxu1 %v15850_v41 }
 0x41a   : > { %11607 = vmatmul.mubr.msk.bf16.vlgmr.msra.gmra.mrb[56].mxu0 %vm1172_vm3, %v1651_v0  ;;  %v2225_v24 = vpop.permute.xlu0 %2224 }
 0x41b   : > { %11618 = vmatprep.mubr.msk.bf16.mxu0 %vm13034_vm2, %v15850_v41  ;;  %v2230_v39 = vsel %vm1172_vm3, %v2225_v24, 0 }
 0x41c   : > { %11617 = vmatpush3.bf16.xpose.msra.mxu0 %v2030_v53 }
 0x41d   : > { %11628 = vmatprep.subr.bf16.mxu0 %v15850_v41 }
 0x41e   : > { %v2223_v48 = vpop.permute.xlu0 %2222 }
 0x422   : > { %v2325_v33 = vpop.permute.xlu0 %2324 }
 0x423   : > { %11619 = vmatmul.mubr.msk.bf16.vlgmr.msra.gmra.mrb[60].mxu0 %vm1172_vm3, %v2023_v3  ;;  %v2330_v2 = vsel %vm1172_vm3, %v2325_v33, 0 }
 0x424   : > { %11629 = vmatpush3.bf16.xpose.msra.mxu0 %v2130_v26  ;;  %11630 = vmatprep.mubr.msk.bf16.mxu0 %vm13034_vm2, %v15850_v41 }
 0x425   : > { %11640 = vmatprep.subr.bf16.mxu0 %v15850_v41 }
 0x426   : > { %v2323_v15 = vpop.permute.xlu0 %2322 }
 0x42a   : > { %v2535_v52 = vpop.permute.xlu0 %2534 }
 0x42b   : > { %11631 = vmatmul.mubr.msk.bf16.vlgmr.msra.gmra.mrb[64].mxu0 %vm1172_vm3, %v2123_v34  ;;  %v2540_v27 = vsel %vm1656_vm4, %v2535_v52, 0 }
 0x42c   : > { %11641 = vmatpush3.bf16.xpose.msra.mxu0 %v2230_v39  ;;  %11642 = vmatprep.mubr.msk.bf16.mxu0 %vm13034_vm2, %v15850_v41 }
 0x42d   : > { %11652 = vmatprep.subr.bf16.mxu0 %v15850_v41 }
 0x433   : > { %11643 = vmatmul.mubr.msk.bf16.vlgmr.msra.gmra.mrb[68].mxu0 %vm1172_vm3, %v2223_v48 }
 0x434   : > { %11653 = vmatpush3.bf16.xpose.msra.mxu0 %v2330_v2  ;;  %11654 = vmatprep.mubr.msk.bf16.mxu0 %vm13034_vm2, %v15850_v41 }
 0x435   : > { %11664 = vmatprep.subr.bf16.mxu0 %v15850_v41 }
 0x43b   : > { %11655 = vmatmul.mubr.msk.bf16.vlgmr.msra.gmra.mrb[72].mxu0 %vm1172_vm3, %v2323_v15 }
 0x43c   : > { %11665 = vmatpush3.bf16.msra.mxu0 %v2540_v27  ;;  %11666 = vmatprep.mubr.msk.bf16.mxu0 %vm13034_vm2, %v15850_v41 }
 0x43d   : > { %v1628_v4 = vpop.xlane.xlu1 %1627  ;;  %11676 = vmatprep.subr.bf16.mxu0 %v15850_v41 }
 0x43e   : > { %12703 = vrcp.f32 %v1628_v4 }
 0x441   : > { %v2073_v30 = vpop.permute.xlu1 %2072 }
 0x445   : > { %v2175_v31 = vpop.permute.xlu1 %2174 }
 0x446   : > { %v2180_v63 = vsel %vm1172_vm3, %v2175_v31, 0 }
 0x448   : > { %v12704_v9 = vpop.eup %12703 }
 0x449   : > { %v1644_v54 = vmul.f32 %v12704_v9, %v13459_v45  ;;  %v2173_v57 = vpop.permute.xlu1 %2172 }
 0x44b   : > { %v1652_v10 = vpack.c.bf16 %v1644_v54, %v1644_v54 }
 0x44d   : > { %11613 = vmatmul.mubr.msk.bf16.vlgmr.msra.gmra.mrb[32].mxu1 %vm1172_vm3, %v1652_v10  ;;  %v2275_v62 = vpop.permute.xlu1 %2274 }
 0x44e   : > { %11623 = vmatpush3.bf16.xpose.msra.mxu1 %v2080_v28  ;;  %11624 = vmatprep.mubr.msk.bf16.mxu1 %vm13034_vm2, %v15850_v41  ;;  %v2280_v14 = vsel %vm1172_vm3, %v2275_v62, 0 }
 0x44f   : > { %11634 = vmatprep.subr.bf16.mxu1 %v15850_v41 }
 0x451   : > { %v2273_v45 = vpop.permute.xlu1 %2272 }
 0x455   : > { %11625 = vmatmul.mubr.msk.bf16.vlgmr.msra.gmra.mrb[36].mxu1 %vm1172_vm3, %v2073_v30  ;;  %v2375_v29 = vpop.permute.xlu1 %2374 }
 0x456   : > { %11635 = vmatpush3.bf16.xpose.msra.mxu1 %v2180_v63  ;;  %11636 = vmatprep.mubr.msk.bf16.mxu1 %vm13034_vm2, %v15850_v41  ;;  %v2380_v55 = vsel %vm1172_vm3, %v2375_v29, 0 }
 0x457   : > { %11646 = vmatprep.subr.bf16.mxu1 %v15850_v41 }
 0x459   : > { %v2373_v56 = vpop.permute.xlu1 %2372 }
 0x45d   : > { %11637 = vmatmul.mubr.msk.bf16.vlgmr.msra.gmra.mrb[40].mxu1 %vm1172_vm3, %v2173_v57  ;;  %v2583_v19 = vpop.permute.xlu1 %2582 }
 0x45e   : > { %11647 = vmatpush3.bf16.xpose.msra.mxu1 %v2280_v14  ;;  %11648 = vmatprep.mubr.msk.bf16.mxu1 %vm13034_vm2, %v15850_v41  ;;  %v2588_v0 = vsel %vm1656_vm4, %v2583_v19, 0 }
 0x45f   : > { %11658 = vmatprep.subr.bf16.mxu1 %v15850_v41 }
 0x465   : > { %11649 = vmatmul.mubr.msk.bf16.vlgmr.msra.gmra.mrb[44].mxu1 %vm1172_vm3, %v2273_v45 }
 0x466   : > { %11659 = vmatpush3.bf16.xpose.msra.mxu1 %v2380_v55  ;;  %11660 = vmatprep.mubr.msk.bf16.mxu1 %vm13034_vm2, %v15850_v41 }
 0x467   : > { %11670 = vmatprep.subr.bf16.mxu1 %v15850_v41 }
 0x46d   : > { %11661 = vmatmul.mubr.msk.bf16.vlgmr.msra.gmra.mrb[48].mxu1 %vm1172_vm3, %v2373_v56 }
 0x46e   : > { %11671 = vmatpush3.bf16.msra.mxu1 %v2588_v0  ;;  %11672 = vmatprep.mubr.msk.bf16.mxu1 %vm13034_vm2, %v15850_v41 }
 0x46f   : > { %11682 = vmatprep.subr.bf16.mxu1 %v15850_v41 }
 0x4d5   : > { %v13603_v34 = vpop.f32.mrb[44].mxu0 }
 0x4d6   : > { %v11572_v53 = vpop.f32.mrb[45].mxu0 }
 0x4d7   : > { %v1697_v8 = vpop.f32.mrb[46].mxu0 }
 0x4d8   : > { %v11573_v24 = vpop.f32.mrb[47].mxu0 }
 0x4d9   : > { %v13605_v3 = vpop.f32.mrb[20].mxu1 }
 0x4da   : > { %v11578_v26 = vpop.f32.mrb[21].mxu1 }
 0x4db   : > { %v1743_v48 = vpop.f32.mrb[22].mxu1 }
 0x4dc   : > { %v11579_v39 = vpop.f32.mrb[23].mxu1 }
 0x4dd   : > { %v13607_v33 = vpop.f32.mrb[48].mxu0 }
 0x4de   : > { %v11584_v15 = vpop.f32.mrb[49].mxu0 }
 0x4df   : > { %v1789_v2 = vpop.f32.mrb[50].mxu0 }
 0x4e0   : > { %v11585_v52 = vpop.f32.mrb[51].mxu0 }
 0x4e1   : > { %v13609_v27 = vpop.f32.mrb[24].mxu1 }
 0x4e2   : > { %v11590_v4 = vpop.f32.mrb[25].mxu1 }
 0x4e3   : > { %v1835_v30 = vpop.f32.mrb[26].mxu1 }
 0x4e4   : > { %v11591_v31 = vpop.f32.mrb[27].mxu1 }
 0x4e5   : > { %v13611_v9 = vpop.f32.mrb[52].mxu0 }
 0x4e6   : > { %v11596_v54 = vpop.f32.mrb[53].mxu0 }
 0x4e7   : > { %v1881_v10 = vpop.f32.mrb[54].mxu0 }
 0x4e8   : > { %v11597_v57 = vpop.f32.mrb[55].mxu0 }
 0x4e9   : > { %v13613_v28 = vpop.f32.mrb[28].mxu1 }
 0x4ea   : > { %v11602_v62 = vpop.f32.mrb[29].mxu1 }
 0x4eb   : > { %v1927_v63 = vpop.f32.mrb[30].mxu1 }
 0x4ec   : > { %v11603_v45 = vpop.f32.mrb[31].mxu1 }
 0x4ed   : > { %v13615_v14 = vpop.f32.mrb[56].mxu0 }
 0x4ee   : > { %v11608_v29 = vpop.f32.mrb[57].mxu0 }
 0x4ef   : > { %v1973_v56 = vpop.f32.mrb[58].mxu0 }
 0x4f0   : > { %v11609_v55 = vpop.f32.mrb[59].mxu0 }
 0x4f6   : > { %v2066_v19 = vpop.f32.mrb[60].mxu0 }
 0x4f7   : > { %v2422_v0 = vmul.f32 0.35355338, %v2066_v19  ;;  %v11620_v53 = vpop.f32.mrb[61].mxu0 }
 0x4f8   : > { %v2069_v8 = vpop.f32.mrb[62].mxu0 }
 0x4f9   : > { %v11621_v24 = vpop.f32.mrb[63].mxu0  ;;  %v13618_v26 = vadd.f32 %v2422_v0, %v13395_v12 }
 0x4fb   : > { %v2438_v48 = vsel %vm1172_vm3, %v13618_v26, -inf }
 0x4fc   : > { %2439 = vmax.xlane.f32.xlu0 %v2438_v48 }
 0x4fe   : > { %v2166_v39 = vpop.f32.mrb[64].mxu0 }
 0x4ff   : > { %v2424_v15 = vmul.f32 0.35355338, %v2166_v39  ;;  %v11632_v2 = vpop.f32.mrb[65].mxu0 }
 0x500   : > { %v2169_v52 = vpop.f32.mrb[66].mxu0 }
 0x501   : > { %v11633_v4 = vpop.f32.mrb[67].mxu0  ;;  %v13623_v30 = vadd.f32 %v2424_v15, %v13395_v12 }
 0x503   : > { %v2444_v31 = vsel %vm1172_vm3, %v13623_v30, -inf }
 0x504   : > { %2445 = vmax.xlane.f32.xlu0 %v2444_v31 }
 0x506   : > { %v2266_v54 = vpop.f32.mrb[68].mxu0 }
 0x507   : > { %v11644_v10 = vpop.f32.mrb[69].mxu0  ;;  %v2426_v31 = vmul.f32 0.35355338, %v2266_v54 }
 0x508   : > { %v2269_v57 = vpop.f32.mrb[70].mxu0 }
 0x509   : > { %v11645_v62 = vpop.f32.mrb[71].mxu0 }
 0x50e   : > { %v2366_v63 = vpop.f32.mrb[72].mxu0 }
 0x50f   : > { %v11656_v45 = vpop.f32.mrb[73].mxu0 }
 0x510   : > { %v2369_v29 = vpop.f32.mrb[74].mxu0 }
 0x511   : > { %v11657_v56 = vpop.f32.mrb[75].mxu0 }
 0x512   : > { %v2428_v56 = vmul.f32 0.35355338, %v2366_v63 }
 0x520   : > { %v13627_v55 = vpop.f32.mrb[32].mxu1 }
 0x521   : > { %v11614_v19 = vpop.f32.mrb[33].mxu1 }
 0x522   : > { %v2019_v0 = vpop.f32.mrb[34].mxu1 }
 0x523   : > { %v11615_v53 = vpop.f32.mrb[35].mxu1  ;;  %v2434_v0 = vadd.f32 %v2426_v31, %v13395_v12 }
 0x528   : > { %v2116_v8 = vpop.f32.mrb[36].mxu1 }
 0x529   : > { %v11626_v24 = vpop.f32.mrb[37].mxu1  ;;  %v2423_v48 = vmul.f32 0.35355338, %v2116_v8 }
 0x52a   : > { %v2119_v39 = vpop.f32.mrb[38].mxu1 }
 0x52b   : > { %v11627_v15 = vpop.f32.mrb[39].mxu1  ;;  %v2431_v2 = vadd.f32 %v2423_v48, %v13395_v12  ;;  %v2450_v48 = vsel %vm1172_vm3, %v2434_v0, -inf  ;;  %v13636_v39 = vadd.f32 %v2428_v56, %v13395_v12 }
 0x52d   : > { %v2441_v52 = vsel %vm1172_vm3, %v2431_v2, -inf }
 0x52e   : > { %2442 = vmax.xlane.f32.xlu1 %v2441_v52 }
 0x530   : > { %v2216_v4 = vpop.f32.mrb[40].mxu1 }
 0x531   : > { %v2425_v10 = vmul.f32 0.35355338, %v2216_v4  ;;  %v11638_v57 = vpop.f32.mrb[41].mxu1  ;;  %v2456_v4 = vsel %vm1172_vm3, %v13636_v39, -inf }
 0x532   : > { %v2219_v62 = vpop.f32.mrb[42].mxu1 }
 0x533   : > { %v11639_v45 = vpop.f32.mrb[43].mxu1  ;;  %v2433_v29 = vadd.f32 %v2425_v10, %v13395_v12 }
 0x535   : > { %v2447_v19 = vsel %vm1172_vm3, %v2433_v29, -inf }
 0x536   : > { %2448 = vmax.xlane.f32.xlu0 %v2447_v19 }
 0x538   : > { %v2316_v53 = vpop.f32.mrb[44].mxu1 }
 0x539   : > { %v2427_v8 = vmul.f32 0.35355338, %v2316_v53  ;;  %v11650_v24 = vpop.f32.mrb[45].mxu1 }
 0x53a   : > { %v2319_v54 = vpop.f32.mrb[46].mxu1  ;;  %2451 = vmax.xlane.f32.xlu0 %v2450_v48 }
 0x53b   : > { %v11651_v15 = vpop.f32.mrb[47].mxu1  ;;  %v2435_v52 = vadd.f32 %v2427_v8, %v13395_v12 }
 0x53d   : > { %v2453_v63 = vsel %vm1172_vm3, %v2435_v52, -inf }
 0x53e   : > { %2454 = vmax.xlane.f32.xlu1 %v2453_v63  ;;  %2457 = vmax.xlane.f32.xlu0 %v2456_v4 }
 0x540   : > { %v2416_v31 = vpop.f32.mrb[48].mxu1 }
 0x541   : > { %v11662_v10 = vpop.f32.mrb[49].mxu1  ;;  %v2429_v45 = vmul.f32 0.35355338, %v2416_v31 }
 0x542   : > { %v2419_v57 = vpop.f32.mrb[50].mxu1 }
 0x543   : > { %v11663_v62 = vpop.f32.mrb[51].mxu1  ;;  %v13647_v56 = vadd.f32 %v2429_v45, %v13395_v12 }
 0x545   : > { %v2459_v19 = vsel %vm1172_vm3, %v13647_v56, -inf }
 0x54f   : > { %2774 = vrot.lane.b32.xlu1 %v13514_v25, %s13036_s29 }
 0x554   : > { %2726 = vrot.lane.b32.xlu0 %v13503_v11, %s13036_s29 }
 0x573   : > { %2460 = vmax.xlane.f32.xlu1 %v2459_v19 }
 0x589   : > { %v2440_v53 = vpop.xlane.xlu0 %2439 }
 0x58a   : > { %v2462_v8 = vsub.f32 %v13618_v26, %v2440_v53  ;;  %v2631_v26 = vpop.permute.xlu1 %2630 }
 0x58c   : > { %v2470_v24 = vmul.f32 1.442695, %v2462_v8 }
 0x58e   : > { %12705 = vpow2.f32 %v2470_v24  ;;  %v13661_v57 = vpop.permute.xlu1 %2678 }
 0x591   : > { %v2446_v48 = vpop.xlane.xlu0 %2445 }
 0x592   : > { %v2464_v54 = vsub.f32 %v13623_v30, %v2446_v48 }
 0x594   : > { %v2474_v15 = vmul.f32 1.442695, %v2464_v54 }
 0x596   : > { %12707 = vpow2.f32 %v2474_v15 }
 0x598   : > { %v13653_v63 = vpop.eup %12705 }
 0x599   : > { %v2486_v4 = vsel %vm1172_vm3, %v13653_v63, 0.0 }
 0x59a   : > { %2487 = vadd.xlane.f32.xlu0 %v2486_v4 }
 0x5a0   : > { %v13657_v31 = vpop.eup %12707 }
 0x5a1   : > { %v2492_v10 = vsel %vm1172_vm3, %v13657_v31, 0.0 }
 0x5a2   : > { %2493 = vadd.xlane.f32.xlu0 %v2492_v10 }
 0x5bb   : > { %v2443_v62 = vpop.xlane.xlu1 %2442 }
 0x5bc   : > { %v2463_v45 = vsub.f32 %v2431_v2, %v2443_v62 }
 0x5be   : > { %v2472_v30 = vmul.f32 1.442695, %v2463_v45 }
 0x5c0   : > { %12709 = vpow2.f32 %v2472_v30 }
 0x5c3   : > { %v2449_v19 = vpop.xlane.xlu0 %2448 }
 0x5c4   : > { %v2465_v53 = vsub.f32 %v2433_v29, %v2449_v19 }
 0x5c6   : > { %v2476_v8 = vmul.f32 1.442695, %v2465_v53 }
 0x5c7   : > { %v2452_v24 = vpop.xlane.xlu0 %2451 }
 0x5c8   : > { %12711 = vpow2.f32 %v2476_v8  ;;  %v2466_v48 = vsub.f32 %v2434_v0, %v2452_v24 }
 0x5ca   : > { %v13663_v54 = vpop.eup %12709  ;;  %v2478_v15 = vmul.f32 1.442695, %v2466_v48 }
 0x5cb   : > { %v2489_v4 = vsel %vm1172_vm3, %v13663_v54, 0.0  ;;  %v2455_v0 = vpop.xlane.xlu1 %2454  ;;  %v2458_v30 = vpop.xlane.xlu0 %2457 }
 0x5cc   : > { %12713 = vpow2.f32 %v2478_v15  ;;  %2490 = vadd.xlane.f32.xlu1 %v2489_v4  ;;  %v2467_v45 = vsub.f32 %v2435_v52, %v2455_v0  ;;  %v2468_v53 = vsub.f32 %v13636_v39, %v2458_v30 }
 0x5ce   : > { %v2480_v19 = vmul.f32 1.442695, %v2467_v45  ;;  %v2482_v8 = vmul.f32 1.442695, %v2468_v53 }
 0x5cf   : > { %v13690_v39 = vpop.permute.xlu1 %2774  ;;  %v2727_v52 = vpop.permute.xlu0 %2726 }
 0x5d0   : > { %12715 = vpow2.f32 %v2480_v19 }
 0x5d1   : > { %12717 = vpow2.f32 %v2482_v8  ;;  %v2636_v8 = vsel %vm1656_vm4, %v2631_v26, 0 }
 0x5d2   : > { %v13667_v10 = vpop.eup %12711 }
 0x5d3   : > { %v2495_v2 = vsel %vm1172_vm3, %v13667_v10, 0.0 }
 0x5d4   : > { %2496 = vadd.xlane.f32.xlu1 %v2495_v2 }
 0x5d6   : > { %v13671_v62 = vpop.eup %12713 }
 0x5d7   : > { %v2498_v29 = vsel %vm1172_vm3, %v13671_v62, 0.0 }
 0x5d8   : > { %2499 = vadd.xlane.f32.xlu0 %v2498_v29 }
 0x5da   : > { %v13680_v24 = vpop.eup %12715 }
 0x5db   : > { %v2501_v48 = vsel %vm1172_vm3, %v13680_v24, 0.0  ;;  %v13684_v15 = vpop.eup %12717 }
 0x5dc   : > { %v2504_v4 = vsel %vm1172_vm3, %v13684_v15, 0.0 }
 0x5e5   : > { %2870 = vrot.lane.b32.xlu1 %v13537_v49, %s13036_s29 }
 0x5ee   : > { %2822 = vrot.lane.b32.xlu0 %v13525_v58, %s13036_s29 }
 0x600   : > { %v2461_v2 = vpop.xlane.xlu1 %2460 }
 0x601   : > { %v2469_v29 = vsub.f32 %v13647_v56, %v2461_v2 }
 0x603   : > { %v2484_v45 = vmul.f32 1.442695, %v2469_v29  ;;  %v2732_v29 = vsel %vm1656_vm4, %v2727_v52, 0 }
 0x609   : > { %2502 = vadd.xlane.f32.xlu1 %v2501_v48 }
 0x60d   : > { %2505 = vadd.xlane.f32.xlu0 %v2504_v4 }
 0x61a   : > { %2970 = vrot.lane.b32.xlu1 %v13279_v5, %s13037_s30 }
 0x623   : > { %2920 = vrot.lane.b32.xlu0 %v13272_v1, %s13037_s30 }
 0x627   : > { %v2488_v0 = vpop.xlane.xlu0 %2487  ;;  %2918 = vrot.lane.b32.xlu0 %v13291_v16, %s13037_s30 }
 0x628   : > { %12719 = vrcp.f32 %v2488_v0 }
 0x629   : > { %12721 = vpow2.f32 %v2484_v45 }
 0x62b   : > { %3020 = vrot.lane.b32.xlu0 %v13288_v13, %s13037_s30 }
 0x62f   : > { %v2494_v30 = vpop.xlane.xlu0 %2493  ;;  %3018 = vrot.lane.b32.xlu0 %v13321_v40, %s13037_s30 }
 0x630   : > { %12723 = vrcp.f32 %v2494_v30 }
 0x632   : > { %v12720_v19 = vpop.eup %12719 }
 0x633   : > { %3120 = vrot.lane.b32.xlu0 %v13315_v32, %s13037_s30  ;;  %v2518_v56 = vmul.f32 %v12720_v19, %v13653_v63  ;;  %v13710_v48 = vpop.eup %12721 }
 0x634   : > { %v2507_v26 = vsel %vm1172_vm3, %v13710_v48, 0.0 }
 0x635   : > { %v2526_v53 = vpack.c.bf16 %v2518_v56, %v2518_v56  ;;  %v2684_v56 = vsel %vm1656_vm4, %v13661_v57, 0  ;;  %v2780_v57 = vsel %vm1656_vm4, %v13690_v39, 0 }
 0x637   : > { %11667 = vmatmul.mubr.msk.bf16.vlgmr.msra.gmra.mrb[76].mxu0 %vm1172_vm3, %v2526_v53  ;;  %3118 = vrot.lane.b32.xlu0 %v13347_v50, %s13037_s30 }
 0x638   : > { %11677 = vmatpush3.bf16.msra.mxu0 %v2636_v8  ;;  %11678 = vmatprep.mubr.msk.bf16.mxu0 %vm13034_vm2, %v15850_v41 }
 0x639   : > { %11688 = vmatprep.subr.bf16.mxu0 %v15850_v41 }
 0x63a   : > { %v12724_v4 = vpop.eup %12723 }
 0x63b   : > { %3220 = vrot.lane.b32.xlu0 %v13344_v60, %s13037_s30  ;;  %v2520_v63 = vmul.f32 %v12724_v4, %v13657_v31 }
 0x63d   : > { %v2528_v2 = vpack.c.bf16 %v2520_v63, %v2520_v63 }
 0x63e   : > { %2508 = vadd.xlane.f32.xlu1 %v2507_v26 }
 0x63f   : > { %11679 = vmatmul.mubr.msk.bf16.vlgmr.msra.gmra.mrb[80].mxu0 %vm1172_vm3, %v2528_v2  ;;  %3218 = vrot.lane.b32.xlu0 %v13375_v46, %s13037_s30 }
 0x640   : > { %11689 = vmatpush3.bf16.msra.mxu0 %v2732_v29  ;;  %11690 = vmatprep.mubr.msk.bf16.mxu0 %vm13034_vm2, %v15850_v41 }
 0x641   : > { %11700 = vmatprep.subr.bf16.mxu0 %v15850_v41 }
 0x643   : > { %3430 = vrot.lane.b32.xlu0 %v13372_v6, %s13037_s30 }
 0x64f   : > { %2968 = vrot.lane.b32.xlu1 %v13295_v18, %s13037_s30 }
 0x653   : > { %3070 = vrot.lane.b32.xlu1 %v13293_v17, %s13037_s30 }
 0x657   : > { %3068 = vrot.lane.b32.xlu1 %v13325_v43, %s13037_s30 }
 0x659   : > { %v2491_v31 = vpop.xlane.xlu1 %2490 }
 0x65a   : > { %12725 = vrcp.f32 %v2491_v31 }
 0x65b   : > { %3170 = vrot.lane.b32.xlu1 %v13323_v42, %s13037_s30 }
 0x65f   : > { %3168 = vrot.lane.b32.xlu1 %v13351_v61, %s13037_s30 }
 0x661   : > { %v2497_v52 = vpop.xlane.xlu1 %2496 }
 0x662   : > { %12727 = vrcp.f32 %v2497_v52 }
 0x663   : > { %3270 = vrot.lane.b32.xlu1 %v13349_v59, %s13037_s30 }
 0x664   : > { %v12726_v0 = vpop.eup %12725 }
 0x665   : > { %v2500_v45 = vpop.xlane.xlu0 %2499  ;;  %v2519_v30 = vmul.f32 %v12726_v0, %v13663_v54 }
 0x666   : > { %12729 = vrcp.f32 %v2500_v45 }
 0x667   : > { %3268 = vrot.lane.b32.xlu1 %v13379_v7, %s13037_s30  ;;  %v2527_v19 = vpack.c.bf16 %v2519_v30, %v2519_v30 }
 0x669   : > { %11673 = vmatmul.mubr.msk.bf16.vlgmr.msra.gmra.mrb[52].mxu1 %vm1172_vm3, %v2527_v19  ;;  %v2823_v26 = vpop.permute.xlu0 %2822 }
 0x66a   : > { %11683 = vmatpush3.bf16.msra.mxu1 %v2684_v56  ;;  %11684 = vmatprep.mubr.msk.bf16.mxu1 %vm13034_vm2, %v15850_v41  ;;  %v2828_v2 = vsel %vm1656_vm4, %v2823_v26, 0 }
 0x66b   : > { %3478 = vrot.lane.b32.xlu1 %v13377_v47, %s13037_s30  ;;  %11694 = vmatprep.subr.bf16.mxu1 %v15850_v41 }
 0x66c   : > { %v12728_v54 = vpop.eup %12727 }
 0x66d   : > { %v2521_v53 = vmul.f32 %v12728_v54, %v13667_v10 }
 0x66f   : > { %3526 = vrot.lane.b32.xlu1 %v13483_v44, %s13037_s30  ;;  %v2529_v8 = vpack.c.bf16 %v2521_v53, %v2521_v53 }
 0x670   : > { %v12730_v4 = vpop.eup %12729 }
 0x671   : > { %11685 = vmatmul.mubr.msk.bf16.vlgmr.msra.gmra.mrb[56].mxu1 %vm1172_vm3, %v2529_v8  ;;  %v2522_v63 = vmul.f32 %v12730_v4, %v13671_v62  ;;  %v2871_v62 = vpop.permute.xlu1 %2870 }
 0x672   : > { %11695 = vmatpush3.bf16.msra.mxu1 %v2780_v57  ;;  %11696 = vmatprep.mubr.msk.bf16.mxu1 %vm13034_vm2, %v15850_v41  ;;  %v2876_v56 = vsel %vm1656_vm4, %v2871_v62, 0 }
 0x673   : > { %3574 = vrot.lane.b32.xlu1 %v13489_v51, %s13037_s30  ;;  %v2530_v10 = vpack.c.bf16 %v2522_v63, %v2522_v63  ;;  %11706 = vmatprep.subr.bf16.mxu1 %v15850_v41 }
 0x675   : > { %11691 = vmatmul.mubr.msk.bf16.vlgmr.msra.gmra.mrb[84].mxu0 %vm1172_vm3, %v2530_v10 }
 0x676   : > { %11701 = vmatpush3.bf16.msra.mxu0 %v2828_v2  ;;  %11702 = vmatprep.mubr.msk.bf16.mxu0 %vm13034_vm2, %v15850_v41 }
 0x677   : > { %11712 = vmatprep.subr.bf16.mxu0 %v15850_v41 }
 0x696   : > { %v2503_v39 = vpop.xlane.xlu1 %2502 }
 0x697   : > { %12731 = vrcp.f32 %v2503_v39 }
 0x69a   : > { %v2506_v29 = vpop.xlane.xlu0 %2505  ;;  %v2971_v39 = vpop.permute.xlu1 %2970 }
 0x69b   : > { %12733 = vrcp.f32 %v2506_v29 }
 0x69e   : > { %v2921_v31 = vpop.permute.xlu0 %2920 }
 0x69f   : > { %v2926_v4 = vsel %vm1172_vm3, %v2921_v31, 0 }
 0x6a1   : > { %v12732_v52 = vpop.eup %12731 }
 0x6a2   : > { %v2919_v0 = vpop.permute.xlu0 %2918  ;;  %v2523_v45 = vmul.f32 %v12732_v52, %v13680_v24 }
 0x6a4   : > { %v2531_v30 = vpack.c.bf16 %v2523_v45, %v2523_v45 }
 0x6a5   : > { %v12734_v19 = vpop.eup %12733 }
 0x6a6   : > { %11697 = vmatmul.mubr.msk.bf16.vlgmr.msra.gmra.mrb[60].mxu1 %vm1172_vm3, %v2531_v30  ;;  %v3021_v54 = vpop.permute.xlu0 %3020  ;;  %v2524_v53 = vmul.f32 %v12734_v19, %v13684_v15 }
 0x6a7   : > { %11707 = vmatpush3.bf16.msra.mxu1 %v2876_v56  ;;  %11708 = vmatprep.mubr.msk.bf16.mxu1 %vm13034_vm2, %v15850_v41  ;;  %v3026_v15 = vsel %vm1172_vm3, %v3021_v54, 0 }
 0x6a8   : > { %v2532_v8 = vpack.c.bf16 %v2524_v53, %v2524_v53  ;;  %11718 = vmatprep.subr.bf16.mxu1 %v15850_v41  ;;  %v2976_v53 = vsel %vm1172_vm3, %v2971_v39, 0 }
 0x6aa   : > { %11703 = vmatmul.mubr.msk.bf16.vlgmr.msra.gmra.mrb[88].mxu0 %vm1172_vm3, %v2532_v8  ;;  %v3019_v24 = vpop.permute.xlu0 %3018 }
 0x6ab   : > { %11713 = vmatpush3.bf16.xpose.msra.mxu0 %v2926_v4  ;;  %11714 = vmatprep.mubr.msk.bf16.mxu0 %vm13034_vm2, %v15850_v41 }
 0x6ac   : > { %11724 = vmatprep.subr.bf16.mxu0 %v15850_v41 }
 0x6ae   : > { %v3121_v57 = vpop.permute.xlu0 %3120 }
 0x6af   : > { %v3126_v26 = vsel %vm1172_vm3, %v3121_v57, 0 }
 0x6b2   : > { %11715 = vmatmul.mubr.msk.bf16.vlgmr.msra.gmra.mrb[92].mxu0 %vm1172_vm3, %v2919_v0  ;;  %v3119_v63 = vpop.permute.xlu0 %3118 }
 0x6b3   : > { %11725 = vmatpush3.bf16.xpose.msra.mxu0 %v3026_v15  ;;  %11726 = vmatprep.mubr.msk.bf16.mxu0 %vm13034_vm2, %v15850_v41 }
 0x6b4   : > { %11736 = vmatprep.subr.bf16.mxu0 %v15850_v41 }
 0x6b6   : > { %v3221_v10 = vpop.permute.xlu0 %3220 }
 0x6b7   : > { %v3226_v62 = vsel %vm1172_vm3, %v3221_v10, 0 }
 0x6ba   : > { %11727 = vmatmul.mubr.msk.bf16.vlgmr.msra.gmra.mrb[96].mxu0 %vm1172_vm3, %v3019_v24  ;;  %v3219_v2 = vpop.permute.xlu0 %3218 }
 0x6bb   : > { %11737 = vmatpush3.bf16.xpose.msra.mxu0 %v3126_v26  ;;  %11738 = vmatprep.mubr.msk.bf16.mxu0 %vm13034_vm2, %v15850_v41 }
 0x6bc   : > { %11748 = vmatprep.subr.bf16.mxu0 %v15850_v41 }
 0x6be   : > { %v3431_v29 = vpop.permute.xlu0 %3430 }
 0x6bf   : > { %v3436_v31 = vsel %vm1656_vm4, %v3431_v29, 0 }
 0x6c2   : > { %11739 = vmatmul.mubr.msk.bf16.vlgmr.msra.gmra.mrb[100].mxu0 %vm1172_vm3, %v3119_v63 }
 0x6c3   : > { %11749 = vmatpush3.bf16.xpose.msra.mxu0 %v3226_v62  ;;  %11750 = vmatprep.mubr.msk.bf16.mxu0 %vm13034_vm2, %v15850_v41 }
 0x6c4   : > { %11760 = vmatprep.subr.bf16.mxu0 %v15850_v41 }
 0x6ca   : > { %11751 = vmatmul.mubr.msk.bf16.vlgmr.msra.gmra.mrb[104].mxu0 %vm1172_vm3, %v3219_v2 }
 0x6cb   : > { %11761 = vmatpush3.bf16.msra.mxu0 %v3436_v31  ;;  %v2509_v52 = vpop.xlane.xlu1 %2508  ;;  %11762 = vmatprep.mubr.msk.bf16.mxu0 %vm13034_vm2, %v15850_v41 }
 0x6cc   : > { %12735 = vrcp.f32 %v2509_v52  ;;  %11772 = vmatprep.subr.bf16.mxu0 %v15850_v41 }
 0x6cf   : > { %v2969_v0 = vpop.permute.xlu1 %2968 }
 0x6d3   : > { %v3071_v45 = vpop.permute.xlu1 %3070 }
 0x6d4   : > { %v3076_v4 = vsel %vm1172_vm3, %v3071_v45, 0 }
 0x6d6   : > { %v12736_v30 = vpop.eup %12735 }
 0x6d7   : > { %v2525_v19 = vmul.f32 %v12736_v30, %v13710_v48  ;;  %v3069_v54 = vpop.permute.xlu1 %3068 }
 0x6d9   : > { %v2533_v56 = vpack.c.bf16 %v2525_v19, %v2525_v19 }
 0x6db   : > { %11709 = vmatmul.mubr.msk.bf16.vlgmr.msra.gmra.mrb[64].mxu1 %vm1172_vm3, %v2533_v56  ;;  %v3171_v8 = vpop.permute.xlu1 %3170 }
 0x6dc   : > { %11719 = vmatpush3.bf16.xpose.msra.mxu1 %v2976_v53  ;;  %11720 = vmatprep.mubr.msk.bf16.mxu1 %vm13034_vm2, %v15850_v41  ;;  %v3176_v24 = vsel %vm1172_vm3, %v3171_v8, 0 }
 0x6dd   : > { %11730 = vmatprep.subr.bf16.mxu1 %v15850_v41 }
 0x6df   : > { %v3169_v48 = vpop.permute.xlu1 %3168 }
 0x6e3   : > { %11721 = vmatmul.mubr.msk.bf16.vlgmr.msra.gmra.mrb[68].mxu1 %vm1172_vm3, %v2969_v0  ;;  %v3271_v57 = vpop.permute.xlu1 %3270 }
 0x6e4   : > { %11731 = vmatpush3.bf16.xpose.msra.mxu1 %v3076_v4  ;;  %11732 = vmatprep.mubr.msk.bf16.mxu1 %vm13034_vm2, %v15850_v41  ;;  %v3276_v63 = vsel %vm1172_vm3, %v3271_v57, 0 }
 0x6e5   : > { %11742 = vmatprep.subr.bf16.mxu1 %v15850_v41 }
 0x6e7   : > { %v3269_v15 = vpop.permute.xlu1 %3268 }
 0x6eb   : > { %11733 = vmatmul.mubr.msk.bf16.vlgmr.msra.gmra.mrb[72].mxu1 %vm1172_vm3, %v3069_v54  ;;  %v3479_v26 = vpop.permute.xlu1 %3478 }
 0x6ec   : > { %11743 = vmatpush3.bf16.xpose.msra.mxu1 %v3176_v24  ;;  %11744 = vmatprep.mubr.msk.bf16.mxu1 %vm13034_vm2, %v15850_v41  ;;  %v3484_v10 = vsel %vm1656_vm4, %v3479_v26, 0 }
 0x6ed   : > { %11754 = vmatprep.subr.bf16.mxu1 %v15850_v41 }
 0x6f3   : > { %11745 = vmatmul.mubr.msk.bf16.vlgmr.msra.gmra.mrb[76].mxu1 %vm1172_vm3, %v3169_v48 }
 0x6f4   : > { %11755 = vmatpush3.bf16.xpose.msra.mxu1 %v3276_v63  ;;  %11756 = vmatprep.mubr.msk.bf16.mxu1 %vm13034_vm2, %v15850_v41 }
 0x6f5   : > { %11766 = vmatprep.subr.bf16.mxu1 %v15850_v41 }
 0x6fb   : > { %11757 = vmatmul.mubr.msk.bf16.vlgmr.msra.gmra.mrb[80].mxu1 %vm1172_vm3, %v3269_v15 }
 0x6fc   : > { %11767 = vmatpush3.bf16.msra.mxu1 %v3484_v10  ;;  %11768 = vmatprep.mubr.msk.bf16.mxu1 %vm13034_vm2, %v15850_v41 }
 0x6fd   : > { %11778 = vmatprep.subr.bf16.mxu1 %v15850_v41 }
 0x70a   : > { %v13825_v2 = vpop.f32.mrb[76].mxu0 }
 0x70b   : > { %v11668_v62 = vpop.f32.mrb[77].mxu0 }
 0x70c   : > { %v2579_v39 = vpop.f32.mrb[78].mxu0 }
 0x70d   : > { %v11669_v29 = vpop.f32.mrb[79].mxu0 }
 0x712   : > { %v13827_v31 = vpop.f32.mrb[80].mxu0 }
 0x713   : > { %v11680_v52 = vpop.f32.mrb[81].mxu0 }
 0x714   : > { %v2675_v0 = vpop.f32.mrb[82].mxu0 }
 0x715   : > { %v11681_v45 = vpop.f32.mrb[83].mxu0 }
 0x73c   : > { %v13829_v30 = vpop.f32.mrb[52].mxu1 }
 0x73d   : > { %v11674_v56 = vpop.f32.mrb[53].mxu1 }
 0x73e   : > { %v2627_v54 = vpop.f32.mrb[54].mxu1 }
 0x73f   : > { %v11675_v53 = vpop.f32.mrb[55].mxu1 }
 0x744   : > { %v13833_v8 = vpop.f32.mrb[56].mxu1 }
 0x745   : > { %v11686_v48 = vpop.f32.mrb[57].mxu1 }
 0x746   : > { %v2723_v24 = vpop.f32.mrb[58].mxu1 }
 0x747   : > { %v11687_v57 = vpop.f32.mrb[59].mxu1 }
 0x748   : > { %v13837_v15 = vpop.f32.mrb[84].mxu0 }
 0x749   : > { %v11692_v63 = vpop.f32.mrb[85].mxu0 }
 0x74a   : > { %v2771_v26 = vpop.f32.mrb[86].mxu0 }
 0x74b   : > { %v11693_v10 = vpop.f32.mrb[87].mxu0 }
 0x779   : > { %v13839_v62 = vpop.f32.mrb[60].mxu1 }
 0x77a   : > { %v11698_v29 = vpop.f32.mrb[61].mxu1 }
 0x77b   : > { %v2819_v52 = vpop.f32.mrb[62].mxu1 }
 0x77c   : > { %v11699_v0 = vpop.f32.mrb[63].mxu1 }
 0x77d   : > { %v13843_v45 = vpop.f32.mrb[88].mxu0 }
 0x77e   : > { %v11704_v56 = vpop.f32.mrb[89].mxu0 }
 0x77f   : > { %v2867_v54 = vpop.f32.mrb[90].mxu0 }
 0x780   : > { %v11705_v53 = vpop.f32.mrb[91].mxu0 }
 0x785   : > { %v2962_v48 = vpop.f32.mrb[92].mxu0 }
 0x786   : > { %v3318_v24 = vmul.f32 0.35355338, %v2962_v48  ;;  %v11716_v57 = vpop.f32.mrb[93].mxu0 }
 0x787   : > { %v2965_v4 = vpop.f32.mrb[94].mxu0 }
 0x788   : > { %v11717_v63 = vpop.f32.mrb[95].mxu0  ;;  %v13846_v26 = vadd.f32 %v3318_v24, %v13395_v12 }
 0x78a   : > { %v3334_v10 = vsel %vm1172_vm3, %v13846_v26, -inf }
 0x78b   : > { %3335 = vmax.xlane.f32.xlu0 %v3334_v10 }
 0x78d   : > { %v3062_v29 = vpop.f32.mrb[96].mxu0 }
 0x78e   : > { %v3320_v52 = vmul.f32 0.35355338, %v3062_v29  ;;  %v11728_v0 = vpop.f32.mrb[97].mxu0 }
 0x78f   : > { %v3065_v39 = vpop.f32.mrb[98].mxu0 }
 0x790   : > { %v11729_v19 = vpop.f32.mrb[99].mxu0  ;;  %v13851_v56 = vadd.f32 %v3320_v52, %v13395_v12 }
 0x792   : > { %v3340_v54 = vsel %vm1172_vm3, %v13851_v56, -inf }
 0x793   : > { %3341 = vmax.xlane.f32.xlu0 %v3340_v54 }
 0x795   : > { %v3162_v4 = vpop.f32.mrb[100].mxu0 }
 0x796   : > { %v11740_v53 = vpop.f32.mrb[101].mxu0 }
 0x797   : > { %v3165_v48 = vpop.f32.mrb[102].mxu0 }
 0x798   : > { %v11741_v24 = vpop.f32.mrb[103].mxu0 }
 0x799   : > { %v3322_v24 = vmul.f32 0.35355338, %v3162_v4 }
 0x79d   : > { %v3262_v57 = vpop.f32.mrb[104].mxu0 }
 0x79e   : > { %v11752_v63 = vpop.f32.mrb[105].mxu0 }
 0x79f   : > { %v3265_v41 = vpop.f32.mrb[106].mxu0 }
 0x7a0   : > { %v11753_v10 = vpop.f32.mrb[107].mxu0 }
 0x7ae   : > { %v13855_v35 = vpop.f32.mrb[64].mxu1 }
 0x7af   : > { %v11710_v39 = vpop.f32.mrb[65].mxu1 }
 0x7b0   : > { %v2915_v29 = vpop.f32.mrb[66].mxu1 }
 0x7b1   : > { %v11711_v52 = vpop.f32.mrb[67].mxu1  ;;  %v3324_v29 = vmul.f32 0.35355338, %v3262_v57 }
 0x7b6   : > { %v3012_v0 = vpop.f32.mrb[68].mxu1 }
 0x7b7   : > { %v3319_v37 = vmul.f32 0.35355338, %v3012_v0  ;;  %v11722_v38 = vpop.f32.mrb[69].mxu1 }
 0x7b8   : > { %v3015_v54 = vpop.f32.mrb[70].mxu1  ;;  %v3330_v38 = vadd.f32 %v3322_v24, %v13395_v12 }
 0x7b9   : > { %v11723_v36 = vpop.f32.mrb[71].mxu1  ;;  %v3327_v53 = vadd.f32 %v3319_v37, %v13395_v12 }
 0x7ba   : > { %v3346_v54 = vsel %vm1172_vm3, %v3330_v38, -inf }
 0x7bb   : > { %v3337_v48 = vsel %vm1172_vm3, %v3327_v53, -inf }
 0x7bc   : > { %3338 = vmax.xlane.f32.xlu1 %v3337_v48  ;;  %v13866_v48 = vadd.f32 %v3324_v29, %v13395_v12 }
 0x7be   : > { %v3112_v41 = vpop.f32.mrb[72].mxu1 }
 0x7bf   : > { %v3321_v63 = vmul.f32 0.35355338, %v3112_v41  ;;  %v11734_v10 = vpop.f32.mrb[73].mxu1  ;;  %v3352_v41 = vsel %vm1172_vm3, %v13866_v48, -inf }
 0x7c0   : > { %v3115_v20 = vpop.f32.mrb[74].mxu1 }
 0x7c1   : > { %v11735_v22 = vpop.f32.mrb[75].mxu1  ;;  %v3329_v39 = vadd.f32 %v3321_v63, %v13395_v12 }
 0x7c3   : > { %v3343_v52 = vsel %vm1172_vm3, %v3329_v39, -inf }
 0x7c4   : > { %3344 = vmax.xlane.f32.xlu0 %v3343_v52 }
 0x7c6   : > { %v3212_v36 = vpop.f32.mrb[76].mxu1 }
 0x7c7   : > { %v3323_v0 = vmul.f32 0.35355338, %v3212_v36  ;;  %v11746_v37 = vpop.f32.mrb[77].mxu1 }
 0x7c8   : > { %v3215_v4 = vpop.f32.mrb[78].mxu1  ;;  %3347 = vmax.xlane.f32.xlu0 %v3346_v54 }
 0x7c9   : > { %v11747_v20 = vpop.f32.mrb[79].mxu1  ;;  %v3331_v22 = vadd.f32 %v3323_v0, %v13395_v12 }
 0x7cb   : > { %v3349_v57 = vsel %vm1172_vm3, %v3331_v22, -inf }
 0x7cc   : > { %3350 = vmax.xlane.f32.xlu1 %v3349_v57  ;;  %3353 = vmax.xlane.f32.xlu0 %v3352_v41 }
 0x7ce   : > { %v3312_v24 = vpop.f32.mrb[80].mxu1 }
 0x7cf   : > { %v11758_v63 = vpop.f32.mrb[81].mxu1  ;;  %v3325_v29 = vmul.f32 0.35355338, %v3312_v24 }
 0x7d0   : > { %v3315_v10 = vpop.f32.mrb[82].mxu1 }
 0x7d1   : > { %v11759_v52 = vpop.f32.mrb[83].mxu1  ;;  %v13877_v36 = vadd.f32 %v3325_v29, %v13395_v12 }
 0x7d3   : > { %v3355_v0 = vsel %vm1172_vm3, %v13877_v36, -inf }
 0x7dd   : > { %3670 = vrot.lane.b32.xlu1 %v13514_v25, %s13037_s30 }
 0x7e2   : > { %3622 = vrot.lane.b32.xlu0 %v13503_v11, %s13037_s30 }
 0x801   : > { %3356 = vmax.xlane.f32.xlu1 %v3355_v0 }
 0x818   : > { %v3336_v37 = vpop.xlane.xlu0 %3335 }
 0x819   : > { %v3358_v54 = vsub.f32 %v13846_v26, %v3336_v37  ;;  %v3527_v26 = vpop.permute.xlu1 %3526 }
 0x81b   : > { %v3366_v4 = vmul.f32 1.442695, %v3358_v54 }
 0x81d   : > { %12737 = vpow2.f32 %v3366_v4  ;;  %v13891_v29 = vpop.permute.xlu1 %3574 }
 0x820   : > { %v3342_v20 = vpop.xlane.xlu0 %3341 }
 0x821   : > { %v3360_v57 = vsub.f32 %v13851_v56, %v3342_v20 }
 0x823   : > { %v3370_v41 = vmul.f32 1.442695, %v3360_v57 }
 0x825   : > { %12739 = vpow2.f32 %v3370_v41 }
 0x827   : > { %v13883_v63 = vpop.eup %12737 }
 0x828   : > { %v3382_v24 = vsel %vm1172_vm3, %v13883_v63, 0.0 }
 0x829   : > { %3383 = vadd.xlane.f32.xlu0 %v3382_v24 }
 0x82f   : > { %v13887_v10 = vpop.eup %12739 }
 0x830   : > { %v3388_v52 = vsel %vm1172_vm3, %v13887_v10, 0.0 }
 0x831   : > { %3389 = vadd.xlane.f32.xlu0 %v3388_v52 }
 0x849   : > { %v3339_v0 = vpop.xlane.xlu1 %3338 }
 0x84a   : > { %v3359_v37 = vsub.f32 %v3327_v53, %v3339_v0 }
 0x84c   : > { %v3368_v56 = vmul.f32 1.442695, %v3359_v37 }
 0x84e   : > { %12741 = vpow2.f32 %v3368_v56 }
 0x851   : > { %v3345_v54 = vpop.xlane.xlu0 %3344 }
 0x852   : > { %v3361_v4 = vsub.f32 %v3329_v39, %v3345_v54 }
 0x854   : > { %v3372_v20 = vmul.f32 1.442695, %v3361_v4 }
 0x855   : > { %v3348_v57 = vpop.xlane.xlu0 %3347 }
 0x856   : > { %12743 = vpow2.f32 %v3372_v20  ;;  %v3362_v41 = vsub.f32 %v3330_v38, %v3348_v57 }
 0x858   : > { %v13893_v24 = vpop.eup %12741  ;;  %v3374_v19 = vmul.f32 1.442695, %v3362_v41 }
 0x859   : > { %v3385_v23 = vsel %vm1172_vm3, %v13893_v24, 0.0  ;;  %v3354_v38 = vpop.xlane.xlu0 %3353 }
 0x85a   : > { %12745 = vpow2.f32 %v3374_v19  ;;  %3386 = vadd.xlane.f32.xlu1 %v3385_v23  ;;  %v3351_v19 = vpop.xlane.xlu1 %3350  ;;  %v3364_v56 = vsub.f32 %v13866_v48, %v3354_v38 }
 0x85b   : > { %v3363_v23 = vsub.f32 %v3331_v22, %v3351_v19 }
 0x85c   : > { %v3378_v54 = vmul.f32 1.442695, %v3364_v56 }
 0x85d   : > { %v3376_v37 = vmul.f32 1.442695, %v3363_v23  ;;  %v3623_v22 = vpop.permute.xlu0 %3622 }
 0x85e   : > { %v3671_v48 = vpop.permute.xlu1 %3670 }
 0x85f   : > { %12747 = vpow2.f32 %v3376_v37 }
 0x860   : > { %v13897_v52 = vpop.eup %12743  ;;  %12749 = vpow2.f32 %v3378_v54  ;;  %v3676_v54 = vsel %vm1656_vm4, %v3671_v48, 0 }
 0x861   : > { %v3391_v53 = vsel %vm1172_vm3, %v13897_v52, 0.0 }
 0x862   : > { %3392 = vadd.xlane.f32.xlu1 %v3391_v53 }
 0x864   : > { %v13901_v0 = vpop.eup %12745 }
 0x865   : > { %v3394_v39 = vsel %vm1172_vm3, %v13901_v0, 0.0 }
 0x866   : > { %3395 = vadd.xlane.f32.xlu0 %v3394_v39 }
 0x869   : > { %v13910_v4 = vpop.eup %12747 }
 0x86a   : > { %v3397_v20 = vsel %vm1172_vm3, %v13910_v4, 0.0  ;;  %v13914_v57 = vpop.eup %12749 }
 0x86b   : > { %v3400_v41 = vsel %vm1172_vm3, %v13914_v57, 0.0 }
 0x873   : > { %3766 = vrot.lane.b32.xlu1 %v13537_v49, %s13037_s30 }
 0x87c   : > { %3718 = vrot.lane.b32.xlu0 %v13525_v58, %s13037_s30 }
 0x88e   : > { %v3357_v53 = vpop.xlane.xlu1 %3356 }
 0x88f   : > { %v3365_v39 = vsub.f32 %v13877_v36, %v3357_v53  ;;  %v3532_v36 = vsel %vm1656_vm4, %v3527_v26, 0  ;;  %v3628_v26 = vsel %vm1656_vm4, %v3623_v22, 0 }
 0x891   : > { %v3380_v23 = vmul.f32 1.442695, %v3365_v39 }
 0x897   : > { %3398 = vadd.xlane.f32.xlu1 %v3397_v20 }
 0x89b   : > { %3401 = vadd.xlane.f32.xlu0 %v3400_v41 }
 0x8a8   : > { %3866 = vrot.lane.b32.xlu1 %v13279_v5, %s15865_s4 }
 0x8b1   : > { %3816 = vrot.lane.b32.xlu0 %v13272_v1, %s15865_s4 }
 0x8b5   : > { %3814 = vrot.lane.b32.xlu0 %v13291_v16, %s15865_s4 }
 0x8b6   : > { %v3384_v19 = vpop.xlane.xlu0 %3383 }
 0x8b7   : > { %12751 = vrcp.f32 %v3384_v19 }
 0x8b8   : > { %12753 = vpow2.f32 %v3380_v23 }
 0x8b9   : > { %3916 = vrot.lane.b32.xlu0 %v13288_v13, %s15865_s4  ;;  %v15896_v13 = vmov 0.0  }
 0x8bd   : > { %3914 = vrot.lane.b32.xlu0 %v13321_v40, %s15865_s4 }
 0x8be   : > { %v3390_v5 = vpop.xlane.xlu0 %3389 }
 0x8bf   : > { %12755 = vrcp.f32 %v3390_v5 }
 0x8c1   : > { %v12752_v1 = vpop.eup %12751  ;;  %4016 = vrot.lane.b32.xlu0 %v13315_v32, %s15865_s4 }
 0x8c2   : > { %v3414_v16 = vmul.f32 %v12752_v1, %v13883_v63  ;;  %v13938_v40 = vpop.eup %12753 }
 0x8c4   : > { %v3422_v38 = vpack.c.bf16 %v3414_v16, %v3414_v16 }
 0x8c5   : > { %4014 = vrot.lane.b32.xlu0 %v13347_v50, %s15865_s4  ;;  %v3403_v50 = vsel %vm1172_vm3, %v13938_v40, 0.0 }
 0x8c6   : > { %11763 = vmatmul.mubr.msk.bf16.vlgmr.msra.gmra.mrb[108].mxu0 %vm1172_vm3, %v3422_v38 }
 0x8c7   : > { %11773 = vmatpush3.bf16.msra.mxu0 %v3532_v36  ;;  %11774 = vmatprep.mubr.msk.bf16.mxu0 %vm13034_vm2, %v15896_v13 }
 0x8c8   : > { %11784 = vmatprep.subr.bf16.mxu0 %v15896_v13 }
 0x8c9   : > { %v12756_v37 = vpop.eup %12755  ;;  %4116 = vrot.lane.b32.xlu0 %v13344_v60, %s15865_s4 }
 0x8ca   : > { %v3416_v32 = vmul.f32 %v12756_v37, %v13887_v10 }
 0x8cc   : > { %3404 = vadd.xlane.f32.xlu1 %v3403_v50  ;;  %v3424_v63 = vpack.c.bf16 %v3416_v32, %v3416_v32 }
 0x8cd   : > { %4114 = vrot.lane.b32.xlu0 %v13375_v46, %s15865_s4 }
 0x8ce   : > { %11775 = vmatmul.mubr.msk.bf16.vlgmr.msra.gmra.mrb[112].mxu0 %vm1172_vm3, %v3424_v63 }
 0x8cf   : > { %11785 = vmatpush3.bf16.msra.mxu0 %v3628_v26  ;;  %11786 = vmatprep.mubr.msk.bf16.mxu0 %vm13034_vm2, %v15896_v13 }
 0x8d0   : > { %11796 = vmatprep.subr.bf16.mxu0 %v15896_v13 }
 0x8dd   : > { %3864 = vrot.lane.b32.xlu1 %v13295_v18, %s15865_s4 }
 0x8e1   : > { %3966 = vrot.lane.b32.xlu1 %v13293_v17, %s15865_s4 }
 0x8e5   : > { %3964 = vrot.lane.b32.xlu1 %v13325_v43, %s15865_s4 }
 0x8e7   : > { %v3387_v60 = vpop.xlane.xlu1 %3386 }
 0x8e8   : > { %12757 = vrcp.f32 %v3387_v60 }
 0x8e9   : > { %4066 = vrot.lane.b32.xlu1 %v13323_v42, %s15865_s4  ;;  %v3580_v42 = vsel %vm1656_vm4, %v13891_v29, 0 }
 0x8ed   : > { %4064 = vrot.lane.b32.xlu1 %v13351_v61, %s15865_s4 }
 0x8ef   : > { %v3393_v46 = vpop.xlane.xlu1 %3392 }
 0x8f0   : > { %12759 = vrcp.f32 %v3393_v46 }
 0x8f1   : > { %4166 = vrot.lane.b32.xlu1 %v13349_v59, %s15865_s4 }
 0x8f2   : > { %v12758_v18 = vpop.eup %12757 }
 0x8f3   : > { %v3396_v10 = vpop.xlane.xlu0 %3395  ;;  %v3415_v17 = vmul.f32 %v12758_v18, %v13893_v24 }
 0x8f4   : > { %12761 = vrcp.f32 %v3396_v10 }
 0x8f5   : > { %4164 = vrot.lane.b32.xlu1 %v13379_v7, %s15865_s4  ;;  %v3423_v43 = vpack.c.bf16 %v3415_v17, %v3415_v17 }
 0x8f7   : > { %11769 = vmatmul.mubr.msk.bf16.vlgmr.msra.gmra.mrb[84].mxu1 %vm1172_vm3, %v3423_v43  ;;  %v3719_v29 = vpop.permute.xlu0 %3718 }
 0x8f8   : > { %11779 = vmatpush3.bf16.msra.mxu1 %v3580_v42  ;;  %11780 = vmatprep.mubr.msk.bf16.mxu1 %vm13034_vm2, %v15896_v13  ;;  %v3724_v41 = vsel %vm1656_vm4, %v3719_v29, 0 }
 0x8f9   : > { %11790 = vmatprep.subr.bf16.mxu1 %v15896_v13 }
 0x8fa   : > { %v12760_v59 = vpop.eup %12759 }
 0x8fb   : > { %v3417_v61 = vmul.f32 %v12760_v59, %v13897_v52  ;;  %v3767_v52 = vpop.permute.xlu1 %3766 }
 0x8fc   : > { %v3772_v1 = vsel %vm1656_vm4, %v3767_v52, 0 }
 0x8fd   : > { %v3425_v24 = vpack.c.bf16 %v3417_v61, %v3417_v61 }
 0x8fe   : > { %v12762_v56 = vpop.eup %12761 }
 0x8ff   : > { %11781 = vmatmul.mubr.msk.bf16.vlgmr.msra.gmra.mrb[88].mxu1 %vm1172_vm3, %v3425_v24  ;;  %v3418_v7 = vmul.f32 %v12762_v56, %v13901_v0 }
 0x900   : > { %11791 = vmatpush3.bf16.msra.mxu1 %v3676_v54  ;;  %11792 = vmatprep.mubr.msk.bf16.mxu1 %vm13034_vm2, %v15896_v13 }
 0x901   : > { %v3426_v20 = vpack.c.bf16 %v3418_v7, %v3418_v7  ;;  %11802 = vmatprep.subr.bf16.mxu1 %v15896_v13 }
 0x903   : > { %11787 = vmatmul.mubr.msk.bf16.vlgmr.msra.gmra.mrb[116].mxu0 %vm1172_vm3, %v3426_v20 }
 0x904   : > { %11797 = vmatpush3.bf16.msra.mxu0 %v3724_v41  ;;  %11798 = vmatprep.mubr.msk.bf16.mxu0 %vm13034_vm2, %v15896_v13 }
 0x905   : > { %11808 = vmatprep.subr.bf16.mxu0 %v15896_v13 }
 0x924   : > { %v3399_v0 = vpop.xlane.xlu1 %3398 }
 0x925   : > { %12763 = vrcp.f32 %v3399_v0 }
 0x928   : > { %v3402_v48 = vpop.xlane.xlu0 %3401  ;;  %v3867_v46 = vpop.permute.xlu1 %3866 }
 0x929   : > { %12765 = vrcp.f32 %v3402_v48  ;;  %v3872_v24 = vsel %vm1172_vm3, %v3867_v46, 0 }
 0x92c   : > { %v3817_v22 = vpop.permute.xlu0 %3816 }
 0x92d   : > { %v3822_v37 = vsel %vm1172_vm3, %v3817_v22, 0 }
 0x92f   : > { %v12764_v53 = vpop.eup %12763 }
 0x930   : > { %v3815_v39 = vpop.permute.xlu0 %3814  ;;  %v3419_v19 = vmul.f32 %v12764_v53, %v13910_v4 }
 0x932   : > { %v3427_v23 = vpack.c.bf16 %v3419_v19, %v3419_v19 }
 0x933   : > { %v12766_v5 = vpop.eup %12765 }
 0x934   : > { %11793 = vmatmul.mubr.msk.bf16.vlgmr.msra.gmra.mrb[92].mxu1 %vm1172_vm3, %v3427_v23  ;;  %v3420_v16 = vmul.f32 %v12766_v5, %v13914_v57  ;;  %v3917_v38 = vpop.permute.xlu0 %3916 }
 0x935   : > { %11803 = vmatpush3.bf16.msra.mxu1 %v3772_v1  ;;  %11804 = vmatprep.mubr.msk.bf16.mxu1 %vm13034_vm2, %v15896_v13  ;;  %v3922_v57 = vsel %vm1172_vm3, %v3917_v38, 0 }
 0x936   : > { %v3428_v36 = vpack.c.bf16 %v3420_v16, %v3420_v16  ;;  %11814 = vmatprep.subr.bf16.mxu1 %v15896_v13 }
 0x938   : > { %11799 = vmatmul.mubr.msk.bf16.vlgmr.msra.gmra.mrb[120].mxu0 %vm1172_vm3, %v3428_v36  ;;  %v3915_v4 = vpop.permute.xlu0 %3914 }
 0x939   : > { %11809 = vmatpush3.bf16.xpose.msra.mxu0 %v3822_v37  ;;  %11810 = vmatprep.mubr.msk.bf16.mxu0 %vm13034_vm2, %v15896_v13 }
 0x93a   : > { %11820 = vmatprep.subr.bf16.mxu0 %v15896_v13 }
 0x93c   : > { %v4017_v32 = vpop.permute.xlu0 %4016 }
 0x93d   : > { %v4022_v63 = vsel %vm1172_vm3, %v4017_v32, 0 }
 0x940   : > { %11811 = vmatmul.mubr.msk.bf16.vlgmr.msra.gmra.mrb[124].mxu0 %vm1172_vm3, %v3815_v39  ;;  %v4015_v50 = vpop.permute.xlu0 %4014 }
 0x941   : > { %11821 = vmatpush3.bf16.xpose.msra.mxu0 %v3922_v57  ;;  %11822 = vmatprep.mubr.msk.bf16.mxu0 %vm13034_vm2, %v15896_v13 }
 0x942   : > { %11832 = vmatprep.subr.bf16.mxu0 %v15896_v13 }
 0x944   : > { %v4117_v26 = vpop.permute.xlu0 %4116 }
 0x945   : > { %v4122_v60 = vsel %vm1172_vm3, %v4117_v26, 0 }
 0x948   : > { %11823 = vmatmul.mubr.msk.bf16.vlgmr.msra.gmra.mrb[128].mxu0 %vm1172_vm3, %v3915_v4  ;;  %v4115_v18 = vpop.permute.xlu0 %4114 }
 0x949   : > { %11833 = vmatpush3.bf16.xpose.msra.mxu0 %v4022_v63  ;;  %11834 = vmatprep.mubr.msk.bf16.mxu0 %vm13034_vm2, %v15896_v13 }
 0x94a   : > { %11844 = vmatprep.subr.bf16.mxu0 %v15896_v13 }
 0x950   : > { %11835 = vmatmul.mubr.msk.bf16.vlgmr.msra.gmra.mrb[132].mxu0 %vm1172_vm3, %v4015_v50 }
 0x951   : > { %11845 = vmatpush3.bf16.xpose.msra.mxu0 %v4122_v60  ;;  %11846 = vmatprep.mubr.msk.bf16.mxu0 %vm13034_vm2, %v15896_v13 }
 0x952   : > { %11856 = vmatprep.subr.bf16.mxu0 %v15896_v13 }
 0x958   : > { %11847 = vmatmul.mubr.msk.bf16.vlgmr.msra.gmra.mrb[136].mxu0 %vm1172_vm3, %v4115_v18 }
 0x959   : > { %v3405_v10 = vpop.xlane.xlu1 %3404  ;;  %11858 = vmatprep.mubr.msk.bf16.mxu0 %vm13034_vm2, %v15896_v13 }
 0x95a   : > { %12767 = vrcp.f32 %v3405_v10 }
 0x95d   : > { %v3865_v17 = vpop.permute.xlu1 %3864 }
 0x961   : > { %v3967_v59 = vpop.permute.xlu1 %3966 }
 0x962   : > { %v3972_v54 = vsel %vm1172_vm3, %v3967_v59, 0 }
 0x964   : > { %v12768_v43 = vpop.eup %12767 }
 0x965   : > { %v3421_v42 = vmul.f32 %v12768_v43, %v13938_v40  ;;  %v3965_v56 = vpop.permute.xlu1 %3964 }
 0x967   : > { %v3429_v61 = vpack.c.bf16 %v3421_v42, %v3421_v42 }
 0x969   : > { %11805 = vmatmul.mubr.msk.bf16.vlgmr.msra.gmra.mrb[96].mxu1 %vm1172_vm3, %v3429_v61  ;;  %v4067_v7 = vpop.permute.xlu1 %4066 }
 0x96a   : > { %11815 = vmatpush3.bf16.xpose.msra.mxu1 %v3872_v24  ;;  %11816 = vmatprep.mubr.msk.bf16.mxu1 %vm13034_vm2, %v15896_v13  ;;  %v4072_v29 = vsel %vm1172_vm3, %v4067_v7, 0 }
 0x96b   : > { %11826 = vmatprep.subr.bf16.mxu1 %v15896_v13 }
 0x96d   : > { %v4065_v40 = vpop.permute.xlu1 %4064 }
 0x971   : > { %11817 = vmatmul.mubr.msk.bf16.vlgmr.msra.gmra.mrb[100].mxu1 %vm1172_vm3, %v3865_v17  ;;  %v4167_v20 = vpop.permute.xlu1 %4166 }
 0x972   : > { %11827 = vmatpush3.bf16.xpose.msra.mxu1 %v3972_v54  ;;  %11828 = vmatprep.mubr.msk.bf16.mxu1 %vm13034_vm2, %v15896_v13  ;;  %v4172_v41 = vsel %vm1172_vm3, %v4167_v20, 0 }
 0x973   : > { %11838 = vmatprep.subr.bf16.mxu1 %v15896_v13 }
 0x975   : > { %v4165_v52 = vpop.permute.xlu1 %4164 }
 0x979   : > { %11829 = vmatmul.mubr.msk.bf16.vlgmr.msra.gmra.mrb[104].mxu1 %vm1172_vm3, %v3965_v56 }
 0x97a   : > { %11839 = vmatpush3.bf16.xpose.msra.mxu1 %v4072_v29  ;;  %11840 = vmatprep.mubr.msk.bf16.mxu1 %vm13034_vm2, %v15896_v13 }
 0x97b   : > { %11850 = vmatprep.subr.bf16.mxu1 %v15896_v13 }
 0x981   : > { %11841 = vmatmul.mubr.msk.bf16.vlgmr.msra.gmra.mrb[108].mxu1 %vm1172_vm3, %v4065_v40 }
 0x982   : > { %11851 = vmatpush3.bf16.xpose.msra.mxu1 %v4172_v41  ;;  %11852 = vmatprep.mubr.msk.bf16.mxu1 %vm13034_vm2, %v15896_v13 }
 0x983   : > { %11862 = vmatprep.subr.bf16.mxu1 %v15896_v13 }
 0x989   : > { %11853 = vmatmul.mubr.msk.bf16.vlgmr.msra.gmra.mrb[112].mxu1 %vm1172_vm3, %v4165_v52 }
 0x98a   : > { %11864 = vmatprep.mubr.msk.bf16.mxu1 %vm13034_vm2, %v15896_v13 }
 0x999   : > { %v14040_v0 = vpop.f32.mrb[108].mxu0 }
 0x99a   : > { %v11764_v48 = vpop.f32.mrb[109].mxu0 }
 0x99b   : > { %v3475_v22 = vpop.f32.mrb[110].mxu0 }
 0x99c   : > { %v11765_v53 = vpop.f32.mrb[111].mxu0 }
 0x9a1   : > { %v14042_v39 = vpop.f32.mrb[112].mxu0 }
 0x9a2   : > { %v11776_v19 = vpop.f32.mrb[113].mxu0 }
 0x9a3   : > { %v3571_v23 = vpop.f32.mrb[114].mxu0 }
 0x9a4   : > { %v11777_v5 = vpop.f32.mrb[115].mxu0 }
 0x9ca   : > { %v14044_v1 = vpop.f32.mrb[84].mxu1 }
 0x9cb   : > { %v12516_v16 = vpack.i.bf16 %v14044_v1, %v14040_v0  ;;  %v11770_v38 = vpop.f32.mrb[85].mxu1 }
 0x9cc   : > { %v3523_v36 = vpop.f32.mrb[86].mxu1 }
 0x9cd   : > { %v11771_v37 = vpop.f32.mrb[87].mxu1 }
 0x9d2   : > { %v14048_v4 = vpop.f32.mrb[88].mxu1 }
 0x9d3   : > { %v12521_v57 = vpack.i.bf16 %v14048_v4, %v14042_v39  ;;  %v11782_v32 = vpop.f32.mrb[89].mxu1 }
 0x9d4   : > { %v3619_v50 = vpop.f32.mrb[90].mxu1 }
 0x9d5   : > { %v11783_v63 = vpop.f32.mrb[91].mxu1 }
 0x9d6   : > { %v14052_v26 = vpop.f32.mrb[116].mxu0 }
 0x9d7   : > { %v11788_v60 = vpop.f32.mrb[117].mxu0 }
 0x9d8   : > { %v3667_v46 = vpop.f32.mrb[118].mxu0 }
 0x9d9   : > { %v11789_v18 = vpop.f32.mrb[119].mxu0 }
 0xa07   : > { %v14054_v10 = vpop.f32.mrb[92].mxu1 }
 0xa08   : > { %v12546_v17 = vpack.i.bf16 %v14054_v10, %v14052_v26  ;;  %v11794_v43 = vpop.f32.mrb[93].mxu1  ;;  %v15900_v10 = vpack.i.bf16 %v13855_v35, %v13843_v45 }
 0xa09   : > { %v3715_v42 = vpop.f32.mrb[94].mxu1 }
 0xa0a   : > { %v11795_v59 = vpop.f32.mrb[95].mxu1 }
 0xa0b   : > { %v14058_v61 = vpop.f32.mrb[120].mxu0 }
 0xa0c   : > { %v11800_v24 = vpop.f32.mrb[121].mxu0 }
 0xa0d   : > { %v3763_v56 = vpop.f32.mrb[122].mxu0 }
 0xa0e   : > { %v11801_v54 = vpop.f32.mrb[123].mxu0 }
 0xa13   : > { %v3858_v7 = vpop.f32.mrb[124].mxu0 }
 0xa14   : > { %v4214_v40 = vmul.f32 0.35355338, %v3858_v7  ;;  %v11812_v29 = vpop.f32.mrb[125].mxu0 }
 0xa15   : > { %v3861_v20 = vpop.f32.mrb[126].mxu0 }
 0xa16   : > { %v14061_v41 = vadd.f32 %v4214_v40, %v13395_v12  ;;  %v11813_v52 = vpop.f32.mrb[127].mxu0 }
 0xa18   : > { %v4230_v48 = vsel %vm1172_vm3, %v14061_v41, -inf }
 0xa19   : > { %4231 = vmax.xlane.f32.xlu0 %v4230_v48 }
 0xa1b   : > { %v3958_v22 = vpop.f32.mrb[128].mxu0 }
 0xa1c   : > { %v4216_v53 = vmul.f32 0.35355338, %v3958_v22  ;;  %v11824_v19 = vpop.f32.mrb[129].mxu0 }
 0xa1d   : > { %v3961_v23 = vpop.f32.mrb[130].mxu0 }
 0xa1e   : > { %v14066_v5 = vadd.f32 %v4216_v53, %v13395_v12  ;;  %v11825_v38 = vpop.f32.mrb[131].mxu0 }
 0xa20   : > { %v4236_v36 = vsel %vm1172_vm3, %v14066_v5, -inf }
 0xa21   : > { %4237 = vmax.xlane.f32.xlu0 %v4236_v36 }
 0xa23   : > { %v4058_v37 = vpop.f32.mrb[132].mxu0 }
 0xa24   : > { %v11836_v32 = vpop.f32.mrb[133].mxu0  ;;  %v4218_v19 = vmul.f32 0.35355338, %v4058_v37 }
 0xa25   : > { %v4061_v50 = vpop.f32.mrb[134].mxu0 }
 0xa26   : > { %v11837_v63 = vpop.f32.mrb[135].mxu0 }
 0xa27   : > { %v4226_v63 = vadd.f32 %v4218_v19, %v13395_v12 }
 0xa29   : > { %v4242_v37 = vsel %vm1172_vm3, %v4226_v63, -inf }
 0xa2b   : > { %v4158_v60 = vpop.f32.mrb[136].mxu0 }
 0xa2c   : > { %v11848_v46 = vpop.f32.mrb[137].mxu0 }
 0xa2d   : > { %v4161_v18 = vpop.f32.mrb[138].mxu0  ;;  %v4220_v46 = vmul.f32 0.35355338, %v4158_v60 }
 0xa2e   : > { %v11849_v43 = vpop.f32.mrb[139].mxu0 }
 0xa3c   : > { %v14070_v42 = vpop.f32.mrb[96].mxu1 }
 0xa3d   : > { %v12551_v59 = vpack.i.bf16 %v14070_v42, %v14058_v61  ;;  %v11806_v24 = vpop.f32.mrb[97].mxu1 }
 0xa3e   : > { %v3811_v56 = vpop.f32.mrb[98].mxu1  ;;  %v4228_v24 = vadd.f32 %v4220_v46, %v13395_v12 }
 0xa3f   : > { %v11807_v54 = vpop.f32.mrb[99].mxu1 }
 0xa44   : > { %v3908_v7 = vpop.f32.mrb[100].mxu1 }
 0xa45   : > { %v4215_v40 = vmul.f32 0.35355338, %v3908_v7  ;;  %v11818_v29 = vpop.f32.mrb[101].mxu1 }
 0xa46   : > { %v3911_v20 = vpop.f32.mrb[102].mxu1 }
 0xa47   : > { %v4223_v52 = vadd.f32 %v4215_v40, %v13395_v12  ;;  %v11819_v48 = vpop.f32.mrb[103].mxu1  ;;  %v4248_v20 = vsel %vm1172_vm3, %v4228_v24, -inf }
 0xa49   : > { %v4233_v22 = vsel %vm1172_vm3, %v4223_v52, -inf }
 0xa4a   : > { %4234 = vmax.xlane.f32.xlu1 %v4233_v22 }
 0xa4c   : > { %v4008_v53 = vpop.f32.mrb[104].mxu1 }
 0xa4d   : > { %v4217_v23 = vmul.f32 0.35355338, %v4008_v53  ;;  %v11830_v38 = vpop.f32.mrb[105].mxu1 }
 0xa4e   : > { %v4011_v36 = vpop.f32.mrb[106].mxu1 }
 0xa4f   : > { %v14077_v32 = vadd.f32 %v4217_v23, %v13395_v12  ;;  %v11831_v50 = vpop.f32.mrb[107].mxu1 }
 0xa51   : > { %v4239_v18 = vsel %vm1172_vm3, %v14077_v32, -inf }
 0xa52   : > { %4240 = vmax.xlane.f32.xlu0 %v4239_v18 }
 0xa54   : > { %v4108_v43 = vpop.f32.mrb[108].mxu1 }
 0xa55   : > { %v4219_v56 = vmul.f32 0.35355338, %v4108_v43  ;;  %v11842_v54 = vpop.f32.mrb[109].mxu1 }
 0xa56   : > { %v4111_v7 = vpop.f32.mrb[110].mxu1  ;;  %4243 = vmax.xlane.f32.xlu0 %v4242_v37 }
 0xa57   : > { %v14085_v40 = vadd.f32 %v4219_v56, %v13395_v12  ;;  %v11843_v29 = vpop.f32.mrb[111].mxu1 }
 0xa59   : > { %v4245_v60 = vsel %vm1172_vm3, %v14085_v40, -inf }
 0xa5a   : > { %4246 = vmax.xlane.f32.xlu1 %v4245_v60  ;;  %4249 = vmax.xlane.f32.xlu0 %v4248_v20 }
 0xa5c   : > { %v4208_v48 = vpop.f32.mrb[112].mxu1 }
 0xa5d   : > { %v11854_v22 = vpop.f32.mrb[113].mxu1  ;;  %v4221_v23 = vmul.f32 0.35355338, %v4208_v48 }
 0xa5e   : > { %v4211_v53 = vpop.f32.mrb[114].mxu1 }
 0xa5f   : > { %v11855_v19 = vpop.f32.mrb[115].mxu1  ;;  %v14097_v38 = vadd.f32 %v4221_v23, %v13395_v12 }
 0xa61   : > { %v4251_v36 = vsel %vm1172_vm3, %v14097_v38, -inf }
 0xa6b   : > { %4374 = vrot.lane.b32.xlu1 %v13377_v47, %s15865_s4 }
 0xa6f   : > { %4422 = vrot.lane.b32.xlu1 %v13483_v44, %s15865_s4 }
 0xa70   : > { %4326 = vrot.lane.b32.xlu0 %v13372_v6, %s15865_s4 }
 0xa93   : > { %4252 = vmax.xlane.f32.xlu1 %v4251_v36 }
 0xaa4   : > { %4470 = vrot.lane.b32.xlu1 %v13489_v51, %s15865_s4 }
 0xaa6   : > { %v4232_v50 = vpop.xlane.xlu0 %4231 }
 0xaa7   : > { %v4254_v47 = vsub.f32 %v14061_v41, %v4232_v50 }
 0xaa9   : > { %v4262_v46 = vmul.f32 1.442695, %v4254_v47 }
 0xaab   : > { %12769 = vpow2.f32 %v4262_v46 }
 0xaae   : > { %v4238_v44 = vpop.xlane.xlu0 %4237 }
 0xaaf   : > { %v4256_v18 = vsub.f32 %v14066_v5, %v4238_v44 }
 0xab1   : > { %v4266_v6 = vmul.f32 1.442695, %v4256_v18 }
 0xab3   : > { %12771 = vpow2.f32 %v4266_v6 }
 0xab5   : > { %v14105_v43 = vpop.eup %12769 }
 0xab6   : > { %v4278_v56 = vsel %vm1172_vm3, %v14105_v43, 0.0 }
 0xab7   : > { %4279 = vadd.xlane.f32.xlu0 %v4278_v56 }
 0xabd   : > { %v14109_v54 = vpop.eup %12771 }
 0xabe   : > { %v4284_v51 = vsel %vm1172_vm3, %v14109_v54, 0.0 }
 0xabf   : > { %4285 = vadd.xlane.f32.xlu0 %v4284_v51 }
 0xad5   : > { %4518 = vrot.lane.b32.xlu0 %v13503_v11, %s15865_s4 }
 0xad7   : > { %v4235_v41 = vpop.xlane.xlu1 %4234 }
 0xad8   : > { %v4255_v37 = vsub.f32 %v4223_v52, %v4235_v41  ;;  %v15897_v41 = vpack.i.bf16 %v13829_v30, %v13825_v2 }
 0xada   : > { %v4264_v5 = vmul.f32 1.442695, %v4255_v37 }
 0xadc   : > { %12773 = vpow2.f32 %v4264_v5 }
 0xadf   : > { %v4241_v7 = vpop.xlane.xlu0 %4240 }
 0xae0   : > { %v4257_v18 = vsub.f32 %v14077_v32, %v4241_v7  ;;  %v15898_v7 = vpack.i.bf16 %v13833_v8, %v13827_v31 }
 0xae2   : > { %v4268_v6 = vmul.f32 1.442695, %v4257_v18 }
 0xae3   : > { %v4244_v29 = vpop.xlane.xlu0 %4243 }
 0xae4   : > { %v4258_v60 = vsub.f32 %v4226_v63, %v4244_v29 }
 0xae6   : > { %v14115_v20 = vpop.eup %12773  ;;  %v4270_v48 = vmul.f32 1.442695, %v4258_v60 }
 0xae7   : > { %v4247_v22 = vpop.xlane.xlu1 %4246  ;;  %v4250_v53 = vpop.xlane.xlu0 %4249  ;;  %v4281_v19 = vsel %vm1172_vm3, %v14115_v20, 0.0 }
 0xae8   : > { %12775 = vpow2.f32 %v4270_v48  ;;  %v4260_v23 = vsub.f32 %v4228_v24, %v4250_v53  ;;  %4282 = vadd.xlane.f32.xlu1 %v4281_v19  ;;  %v4259_v56 = vsub.f32 %v14085_v40, %v4247_v22 }
 0xaea   : > { %v4274_v36 = vmul.f32 1.442695, %v4260_v23  ;;  %v4272_v51 = vmul.f32 1.442695, %v4259_v56 }
 0xaeb   : > { %v4375_v11 = vpop.permute.xlu1 %4374  ;;  %v4327_v50 = vpop.permute.xlu0 %4326 }
 0xaec   : > { %v4380_v52 = vsel %vm1656_vm4, %v4375_v11, 0  ;;  %v4332_v47 = vsel %vm1656_vm4, %v4327_v50, 0  ;;  %12777 = vpow2.f32 %v4274_v36 }
 0xaed   : > { %11857 = vmatpush3.bf16.msra.mxu0 %v4332_v47  ;;  %11863 = vmatpush3.bf16.msra.mxu1 %v4380_v52  ;;  %12779 = vpow2.f32 %v4268_v6 }
 0xaee   : > { %11868 = vmatprep.subr.bf16.mxu0 %v15896_v13  ;;  %11874 = vmatprep.subr.bf16.mxu1 %v15896_v13  ;;  %12781 = vpow2.f32 %v4272_v51 }
 0xaef   : > { %v4423_v32 = vpop.permute.xlu1 %4422 }
 0xaf2   : > { %v14123_v63 = vpop.eup %12775 }
 0xaf3   : > { %v4290_v24 = vsel %vm1172_vm3, %v14123_v63, 0.0 }
 0xaf4   : > { %4291 = vadd.xlane.f32.xlu0 %v4290_v24 }
 0xaf6   : > { %v14127_v46 = vpop.eup %12777 }
 0xaf7   : > { %v4296_v44 = vsel %vm1172_vm3, %v14127_v46, 0.0 }
 0xaf8   : > { %4297 = vadd.xlane.f32.xlu0 %v4296_v44 }
 0xaf9   : > { %4566 = vrot.lane.b32.xlu1 %v13514_v25, %s15865_s4  ;;  %v14145_v25 = vpop.eup %12779 }
 0xafa   : > { %v4287_v40 = vsel %vm1172_vm3, %v14145_v25, 0.0 }
 0xb0e   : > { %4614 = vrot.lane.b32.xlu0 %v13525_v58, %s15865_s4  ;;  %v14149_v58 = vpop.eup %12781 }
 0xb0f   : > { %v4293_v2 = vsel %vm1172_vm3, %v14149_v58, 0.0 }
 0xb12   : > { %12507 = vrot.lane.b32.xlu0 %v15897_v41, %s15863_s0 }
 0xb16   : > { %12517 = vrot.lane.b32.xlu0 %v12516_v16, %s15861_s23 }
 0xb1d   : > { %4288 = vadd.xlane.f32.xlu1 %v4287_v40 }
 0xb20   : > { %v4253_v37 = vpop.xlane.xlu1 %4252 }
 0xb21   : > { %v4261_v30 = vsub.f32 %v14097_v38, %v4253_v37  ;;  %4294 = vadd.xlane.f32.xlu1 %v4293_v2 }
 0xb23   : > { %v4276_v5 = vmul.f32 1.442695, %v4261_v30 }
 0xb25   : > { %12783 = vpow2.f32 %v4276_v5 }
 0xb2f   : > { %v14154_v0 = vpop.eup %12783 }
 0xb30   : > { %v4299_v1 = vsel %vm1172_vm3, %v14154_v0, 0.0 }
 0xb31   : > { %4300 = vadd.xlane.f32.xlu1 %v4299_v1 }
 0xb42   : > { %4662 = vrot.lane.b32.xlu1 %v13537_v49, %s15865_s4  ;;  %v4428_v49 = vsel %vm1656_vm4, %v4423_v32, 0  ;;  %s15919_s4 = smov 16  }
 0xb44   : > { %v4280_v16 = vpop.xlane.xlu0 %4279 }
 0xb45   : > { %12785 = vrcp.f32 %v4280_v16 }
 0xb46   : > { %12512 = vrot.lane.b32.xlu1 %v15898_v7, %s15863_s0 }
 0xb4a   : > { %12522 = vrot.lane.b32.xlu1 %v12521_v57, %s15861_s23 }
 0xb4c   : > { %v4286_v38 = vpop.xlane.xlu0 %4285 }
 0xb4d   : > { %12787 = vrcp.f32 %v4286_v38 }
 0xb4f   : > { %v12786_v29 = vpop.eup %12785 }
 0xb50   : > { %v4310_v60 = vmul.f32 %v12786_v29, %v14105_v43  ;;  %v4519_v39 = vpop.permute.xlu0 %4518  ;;  %v4471_v43 = vpop.permute.xlu1 %4470 }
 0xb51   : > { %v4524_v57 = vsel %vm1656_vm4, %v4519_v39, 0  ;;  %v4476_v36 = vsel %vm1656_vm4, %v4471_v43, 0 }
 0xb52   : > { %v4318_v48 = vpack.c.bf16 %v4310_v60, %v4310_v60 }
 0xb54   : > { %11859 = vmatmul.mubr.msk.bf16.vlgmr.msra.gmra.mrb[140].mxu0 %vm1172_vm3, %v4318_v48 }
 0xb55   : > { %11869 = vmatpush3.bf16.msra.mxu0 %v4428_v49  ;;  %11870 = vmatprep.mubr.msk.bf16.mxu0 %vm13034_vm2, %v15896_v13 }
 0xb56   : > { %11880 = vmatprep.subr.bf16.mxu0 %v15896_v13 }
 0xb57   : > { %v12788_v31 = vpop.eup %12787 }
 0xb58   : > { %v4312_v8 = vmul.f32 %v12788_v31, %v14109_v54 }
 0xb5a   : > { %v4320_v4 = vpack.c.bf16 %v4312_v8, %v4312_v8 }
 0xb5c   : > { %11871 = vmatmul.mubr.msk.bf16.vlgmr.msra.gmra.mrb[144].mxu0 %vm1172_vm3, %v4320_v4 }
 0xb5d   : > { %11881 = vmatpush3.bf16.msra.mxu0 %v4524_v57  ;;  %11882 = vmatprep.mubr.msk.bf16.mxu0 %vm13034_vm2, %v15896_v13  ;;  %v12637_v57 = vld [vmem:[%s15834_s10] sm:$0xff]  }
 0xb5e   : > { %11892 = vmatprep.subr.bf16.mxu0 %v15896_v13 }
 0xb75   : > { %v4283_v22 = vpop.xlane.xlu1 %4282 }
 0xb76   : > { %12789 = vrcp.f32 %v4283_v22 }
 0xb79   : > { %v4567_v56 = vpop.permute.xlu1 %4566 }
 0xb7a   : > { %v4572_v2 = vsel %vm1656_vm4, %v4567_v56, 0 }
 0xb80   : > { %v12790_v53 = vpop.eup %12789 }
 0xb81   : > { %v4292_v19 = vpop.xlane.xlu0 %4291  ;;  %v4311_v23 = vmul.f32 %v12790_v53, %v14115_v20 }
 0xb82   : > { %12791 = vrcp.f32 %v4292_v19  ;;  %v15899_v19 = vpack.i.bf16 %v13839_v62, %v13837_v15 }
 0xb83   : > { %v4319_v54 = vpack.c.bf16 %v4311_v23, %v4311_v23 }
 0xb85   : > { %11865 = vmatmul.mubr.msk.bf16.vlgmr.msra.gmra.mrb[116].mxu1 %vm1172_vm3, %v4319_v54  ;;  %v4298_v11 = vpop.xlane.xlu0 %4297 }
 0xb86   : > { %11875 = vmatpush3.bf16.msra.mxu1 %v4476_v36  ;;  %11876 = vmatprep.mubr.msk.bf16.mxu1 %vm13034_vm2, %v15896_v13  ;;  %12793 = vrcp.f32 %v4298_v11 }
 0xb87   : > { %11886 = vmatprep.subr.bf16.mxu1 %v15896_v13 }
 0xb89   : > { %v4615_v47 = vpop.permute.xlu0 %4614 }
 0xb8a   : > { %v4620_v44 = vsel %vm1656_vm4, %v4615_v47, 0 }
 0xb8c   : > { %v12792_v50 = vpop.eup %12791 }
 0xb8d   : > { %v4314_v52 = vmul.f32 %v12792_v50, %v14123_v63  ;;  %v12508_v35 = vpop.permute.xlu0 %12507 }
 0xb8f   : > { %v4322_v24 = vpack.c.bf16 %v4314_v52, %v4314_v52 }
 0xb90   : > { %v12794_v20 = vpop.eup %12793 }
 0xb91   : > { %11883 = vmatmul.mubr.msk.bf16.vlgmr.msra.gmra.mrb[148].mxu0 %vm1172_vm3, %v4322_v24  ;;  %v4316_v18 = vmul.f32 %v12794_v20, %v14127_v46  ;;  %v12638_v20 = vld [vmem:[%s15834_s10 + $0x8] sm:$0xff]   ;;  %v12518_v45 = vpop.permute.xlu0 %12517 }
 0xb92   : > { %11893 = vmatpush3.bf16.msra.mxu0 %v4620_v44  ;;  %11894 = vmatprep.mubr.msk.bf16.mxu0 %vm13034_vm2, %v15896_v13 }
 0xb93   : > { %v4324_v6 = vpack.c.bf16 %v4316_v18, %v4316_v18  ;;  %11904 = vmatprep.subr.bf16.mxu0 %v12637_v57 }
 0xb99   : > { %11895 = vmatmul.mubr.msk.bf16.vlgmr.msra.gmra.mrb[152].mxu0 %vm1172_vm3, %v4324_v6 }
 0xb9a   : > { %11905 = vmatpush3.bf16.msra.mxu0 %v12637_v57 }
 0xb9b   : > { %11906 = vmatprep.subr.bf16.mxu0 %v12638_v20 }
 0xb9e   : > { %11907 = vmatpush3.bf16.msra.mxu0 %v12638_v20 }
 0xbaa   : > { %v4289_v51 = vpop.xlane.xlu1 %4288 }
 0xbab   : > { %12795 = vrcp.f32 %v4289_v51 }
 0xbae   : > { %v4295_v63 = vpop.xlane.xlu1 %4294 }
 0xbaf   : > { %12797 = vrcp.f32 %v4295_v63 }
 0xbb5   : > { %v12796_v41 = vpop.eup %12795 }
 0xbb6   : > { %v4313_v32 = vmul.f32 %v12796_v41, %v14145_v25 }
 0xbb8   : > { %v4321_v40 = vpack.c.bf16 %v4313_v32, %v4313_v32 }
 0xbb9   : > { %v12798_v37 = vpop.eup %12797 }
 0xbba   : > { %11877 = vmatmul.mubr.msk.bf16.vlgmr.msra.gmra.mrb[120].mxu1 %vm1172_vm3, %v4321_v40  ;;  %v4315_v46 = vmul.f32 %v12798_v37, %v14149_v58 }
 0xbbb   : > { %11887 = vmatpush3.bf16.msra.mxu1 %v4572_v2  ;;  %11888 = vmatprep.mubr.msk.bf16.mxu1 %vm13034_vm2, %v15896_v13 }
 0xbbc   : > { %11898 = vmatprep.subr.bf16.mxu1 %v15896_v13  ;;  %v4323_v5 = vpack.c.bf16 %v4315_v46, %v4315_v46  ;;  %v12510_v46 = vunpack.i.h.bf16 %v12508_v35 }
 0xbbe   : > { %v4301_v30 = vpop.xlane.xlu1 %4300  ;;  %v4807_v61 = vsel %vm1172_vm3, %v13605_v3, %v12510_v46 }
 0xbbf   : > { %12799 = vrcp.f32 %v4301_v30  ;;  %v12509_v30 = vunpack.i.l.bf16 %v12508_v35 }
 0xbc1   : > { %v4806_v42 = vsel %vm1172_vm3, %v13603_v34, %v12509_v30 }
 0xbc2   : > { %11889 = vmatmul.mubr.msk.bf16.vlgmr.msra.gmra.mrb[124].mxu1 %vm1172_vm3, %v4323_v5  ;;  %v4663_v25 = vpop.permute.xlu1 %4662  ;;  %v12520_v5 = vunpack.i.h.bf16 %v12518_v45 }
 0xbc3   : > { %v4668_v1 = vsel %vm1656_vm4, %v4663_v25, 0  ;;  %11900 = vmatprep.mubr.msk.bf16.mxu1 %vm13034_vm2, %v15896_v13  ;;  %v12519_v25 = vunpack.i.l.bf16 %v12518_v45 }
 0xbc4   : > { %11899 = vmatpush3.bf16.msra.mxu1 %v4668_v1 }
 0xbc9   : > { %v12800_v16 = vpop.eup %12799 }
 0xbca   : > { %v4317_v7 = vmul.f32 %v12800_v16, %v14154_v0 }
 0xbcc   : > { %v4325_v38 = vpack.c.bf16 %v4317_v7, %v4317_v7  ;;  %v4814_v7 = vsel %vm722_vm0, %v4806_v42, %v12519_v25 }
 0xbce   : > { %11901 = vmatmul.mubr.msk.bf16.vlgmr.msra.gmra.mrb[128].mxu1 %vm1172_vm3, %v4325_v38  ;;  %v4815_v38 = vsel %vm722_vm0, %v4807_v61, %v12520_v5 }
 0xc27   : > { %v4368_v58 = vpop.f32.mrb[140].mxu0 }
 0xc28   : > { %v11860_v29 = vpop.f32.mrb[141].mxu0 }
 0xc29   : > { %v4371_v60 = vpop.f32.mrb[142].mxu0 }
 0xc2a   : > { %v11861_v48 = vpop.f32.mrb[143].mxu0 }
 0xc2b   : > { %v12513_v48 = vpop.permute.xlu1 %12512 }
 0xc2c   : > { %v12514_v3 = vunpack.i.l.bf16 %v12513_v48 }
 0xc2f   : > { %v4464_v49 = vpop.f32.mrb[144].mxu0 }
 0xc30   : > { %v11872_v31 = vpop.f32.mrb[145].mxu0 }
 0xc31   : > { %v4467_v8 = vpop.f32.mrb[146].mxu0  ;;  %v12515_v31 = vunpack.i.h.bf16 %v12513_v48 }
 0xc32   : > { %v11873_v39 = vpop.f32.mrb[147].mxu0 }
 0xc33   : > { %v4809_v57 = vsel %vm1172_vm3, %v13609_v27, %v12515_v31 }
 0xc58   : > { %v4416_v4 = vpop.f32.mrb[116].mxu1 }
 0xc59   : > { %v12526_v43 = vpack.i.bf16 %v4416_v4, %v4368_v58  ;;  %v11866_v22 = vpop.f32.mrb[117].mxu1 }
 0xc5a   : > { %v4419_v53 = vpop.f32.mrb[118].mxu1 }
 0xc5b   : > { %v11867_v0 = vpop.f32.mrb[119].mxu1  ;;  %12527 = vrot.lane.b32.xlu0 %v12526_v43, %s15859_s6  ;;  %v4808_v43 = vsel %vm1172_vm3, %v13607_v33, %v12514_v3  ;;  %v15903_v3 = vld [vmem:[#allocation3_spill] sm:$0xff] }
 0xc5f   : > { %12537 = vrot.lane.b32.xlu0 %v15899_v19, %s15863_s0 }
 0xc63   : > { %12547 = vrot.lane.b32.xlu0 %v12546_v17, %s15861_s23 }
 0xc64   : > { %v4560_v23 = vpop.f32.mrb[148].mxu0 }
 0xc65   : > { %v11884_v54 = vpop.f32.mrb[149].mxu0 }
 0xc66   : > { %v4563_v36 = vpop.f32.mrb[150].mxu0 }
 0xc67   : > { %v11885_v11 = vpop.f32.mrb[151].mxu0 }
 0xc6c   : > { %v4656_v50 = vpop.f32.mrb[152].mxu0 }
 0xc6d   : > { %v11896_v52 = vpop.f32.mrb[153].mxu0 }
 0xc6e   : > { %v4659_v47 = vpop.f32.mrb[154].mxu0 }
 0xc6f   : > { %v11897_v24 = vpop.f32.mrb[155].mxu0 }
 0xc8d   : > { %v4512_v15 = vpop.f32.mrb[120].mxu1 }
 0xc8e   : > { %v12531_v62 = vpack.i.bf16 %v4512_v15, %v4464_v49  ;;  %v11878_v44 = vpop.f32.mrb[121].mxu1  ;;  %v12523_v49 = vpop.permute.xlu1 %12522 }
 0xc8f   : > { %v4515_v18 = vpop.f32.mrb[122].mxu1  ;;  %v12525_v39 = vunpack.i.h.bf16 %v12523_v49  ;;  %v12524_v34 = vunpack.i.l.bf16 %v12523_v49 }
 0xc90   : > { %v11879_v26 = vpop.f32.mrb[123].mxu1  ;;  %12532 = vrot.lane.b32.xlu1 %v12531_v62, %s15859_s6 }
 0xc91   : > { %v4816_v0 = vsel %vm722_vm0, %v4808_v43, %v12524_v34  ;;  %v4817_v19 = vsel %vm722_vm0, %v4809_v57, %v12525_v39 }
 0xc94   : > { %12542 = vrot.lane.b32.xlu1 %v15900_v10, %s15863_s0 }
 0xc95   : > { %v4608_v17 = vpop.f32.mrb[124].mxu1 }
 0xc96   : > { %v12556_v6 = vpack.i.bf16 %v4608_v17, %v4560_v23  ;;  %v11890_v56 = vpop.f32.mrb[125].mxu1 }
 0xc97   : > { %v4611_v51 = vpop.f32.mrb[126].mxu1 }
 0xc98   : > { %v11891_v63 = vpop.f32.mrb[127].mxu1  ;;  %12552 = vrot.lane.b32.xlu1 %v12551_v59, %s15861_s23  ;;  %12557 = vrot.lane.b32.xlu0 %v12556_v6, %s15859_s6 }
 0xca1   : > { %v4704_v41 = vpop.f32.mrb[128].mxu1 }
 0xca2   : > { %v12561_v32 = vpack.i.bf16 %v4704_v41, %v4656_v50  ;;  %v11902_v40 = vpop.f32.mrb[129].mxu1 }
 0xca3   : > { %v4707_v37 = vpop.f32.mrb[130].mxu1 }
 0xca4   : > { %v11903_v2 = vpop.f32.mrb[131].mxu1  ;;  %12562 = vrot.lane.b32.xlu1 %v12561_v32, %s15859_s6  ;;  %s15923_s6 = smov 24  }
 0xccd   : > { %v12528_v1 = vpop.permute.xlu0 %12527 }
 0xcce   : > { %v12530_v59 = vunpack.i.h.bf16 %v12528_v1  ;;  %v12529_v16 = vunpack.i.l.bf16 %v12528_v1 }
 0xcd0   : > { %v4824_v58 = vsel %vm4822_vm6, %v4815_v38, %v12530_v59  ;;  %v4823_v29 = vsel %vm4822_vm6, %v4814_v7, %v12529_v16  ;;  %v15901_v38 = vld [vmem:[#allocation5_spill] sm:$0xff] }
 0xcd1   : > { %v4831_v60 = vpack.c.bf16 %v4824_v58, %v4823_v29  ;;  %v12538_v8 = vpop.permute.xlu0 %12537 }
 0xcd2   : > { %v12540_v50 = vunpack.i.h.bf16 %v12538_v8  ;;  %v12539_v52 = vunpack.i.l.bf16 %v12538_v8 }
 0xcd3   : > { %11908 = vmatprep.mubr.msk.bf16.mxu0 %vm846_vm1, %v4831_v60  ;;  %v15902_v60 = vld [vmem:[#allocation4_spill] sm:$0xff] }
 0xcd4   : > { %v4811_v33 = vsel %vm1172_vm3, %v13613_v28, %v12540_v50  ;;  %v4810_v20 = vsel %vm1172_vm3, %v13611_v9, %v12539_v52  ;;  %v15906_v50 = vld [vmem:[#allocation8_spill] sm:$0xff] }
 0xcd5   : > { %v12548_v23 = vpop.permute.xlu0 %12547 }
 0xcd6   : > { %v12550_v47 = vunpack.i.h.bf16 %v12548_v23  ;;  %v12549_v24 = vunpack.i.l.bf16 %v12548_v23 }
 0xcd8   : > { %v4818_v18 = vsel %vm722_vm0, %v4810_v20, %v12549_v24  ;;  %v4819_v26 = vsel %vm722_vm0, %v4811_v33, %v12550_v47  ;;  %v15907_v24 = vld [vmem:[#allocation6_spill] sm:$0xff] }
 0xd02   : > { %v12533_v4 = vpop.permute.xlu1 %12532 }
 0xd03   : > { %v12535_v22 = vunpack.i.h.bf16 %v12533_v4  ;;  %v12534_v53 = vunpack.i.l.bf16 %v12533_v4 }
 0xd05   : > { %v4826_v54 = vsel %vm4822_vm6, %v4817_v19, %v12535_v22  ;;  %v4825_v36 = vsel %vm4822_vm6, %v4816_v0, %v12534_v53  ;;  %v15904_v0 = vld [vmem:[#allocation7_spill] sm:$0xff] }
 0xd06   : > { %v4832_v11 = vpack.c.bf16 %v4826_v54, %v4825_v36  ;;  %v12543_v15 = vpop.permute.xlu1 %12542  ;;  %v15905_v36 = vld [vmem:[#allocation9_spill] sm:$0xff] }
 0xd07   : > { %v12545_v51 = vunpack.i.h.bf16 %v12543_v15  ;;  %v12544_v28 = vunpack.i.l.bf16 %v12543_v15 }
 0xd08   : > { %11909 = vmatmul.mubr.msk.bf16.vlgmr.msra.gmra.mrb[156].mxu0 %vm846_vm1, %v4832_v11 }
 0xd09   : > { %v4813_v32 = vsel %vm1172_vm3, %v13627_v55, %v12545_v51  ;;  %v4812_v40 = vsel %vm1172_vm3, %v13615_v14, %v12544_v28  ;;  %v10819_v55 = vld [vmem:[%s15835_s11] ss:$0 sm:$0xff] }
 0xd0a   : > { %v12558_v27 = vpop.permute.xlu0 %12557  ;;  %v12553_v56 = vpop.permute.xlu1 %12552 }
 0xd0b   : > { %v12560_v62 = vunpack.i.h.bf16 %v12558_v27  ;;  %v12559_v44 = vunpack.i.l.bf16 %v12558_v27  ;;  %v12555_v63 = vunpack.i.h.bf16 %v12553_v56  ;;  %v12554_v41 = vunpack.i.l.bf16 %v12553_v56 }
 0xd0d   : > { %v4828_v10 = vsel %vm4822_vm6, %v4819_v26, %v12560_v62  ;;  %v4827_v17 = vsel %vm4822_vm6, %v4818_v18, %v12559_v44  ;;  %v4820_v35 = vsel %vm722_vm0, %v4812_v40, %v12554_v41  ;;  %v4821_v45 = vsel %vm722_vm0, %v4813_v32, %v12555_v63 }
 0xd0e   : > { %v4833_v6 = vpack.c.bf16 %v4828_v10, %v4827_v17 }
 0xd10   : > { %11912 = vmatprep.mubr.msk.bf16.mxu0 %vm846_vm1, %v4833_v6 }
 0xd16   : > { %v12563_v9 = vpop.permute.xlu1 %12562 }
 0xd17   : > { %v12565_v37 = vunpack.i.h.bf16 %v12563_v9  ;;  %v12564_v2 = vunpack.i.l.bf16 %v12563_v9 }
 0xd19   : > { %v4830_v46 = vsel %vm4822_vm6, %v4821_v45, %v12565_v37  ;;  %v4829_v30 = vsel %vm4822_vm6, %v4820_v35, %v12564_v2 }
 0xd1a   : > { %v4834_v5 = vpack.c.bf16 %v4830_v46, %v4829_v30 }
 0xd1c   : > { %11913 = vmatmul.mubr.msk.bf16.gmra.mrb[160].mxu0 %vm846_vm1, %v4834_v5 }
 0xddb   : > { %v11910_v25 = vpop.f32.mrb[156].mxu0 }
 0xddc   : > { %v4904_v1 = vpop.f32.mrb[157].mxu0  ;;  %v4913_v14 = vadd.f32 %v11910_v25, %v10819_v55 }
 0xddd   : > { %v4905_v61 = vadd.f32 %v10819_v55, %v4904_v1  ;;  %v11911_v42 = vpop.f32.mrb[158].mxu0 }
 0xdde   : > { %v4907_v59 = vpop.f32.mrb[159].mxu0  ;;  %v4937_v58 = vadd.f32 %v4913_v14, %v15901_v38  ;;  %v4916_v29 = vadd.f32 %v11911_v42, %v10819_v55 }
 0xddf   : > { %v4935_v16 = vadd.f32 %v4905_v61, %v13201_v21  ;;  %v4908_v7 = vadd.f32 %v10819_v55, %v4907_v59 }
 0xde0   : > { %v4938_v8 = vadd.f32 %v4916_v29, %v15903_v3  ;;  %v4951_v39 = vsel %vm846_vm1, %v4937_v58, 0.0 }
 0xde1   : > { %v4936_v48 = vadd.f32 %v4908_v7, %v15902_v60  ;;  %v4945_v49 = vsel %vm846_vm1, %v4935_v16, 0.0 }
 0xde2   : > { %4946 = vadd.xlane.f32.xlu0 %v4945_v49  ;;  %v4954_v34 = vsel %vm846_vm1, %v4938_v8, 0.0 }
 0xde3   : > { %v4948_v31 = vsel %vm846_vm1, %v4936_v48, 0.0 }
 0xde4   : > { %4949 = vadd.xlane.f32.xlu1 %v4948_v31 }
 0xde6   : > { %4952 = vadd.xlane.f32.xlu0 %v4951_v39  ;;  %v12639_v39 = vld [vmem:[%s15838_s14] sm:$0xff]  }
 0xde7   : > { %11916 = vmatprep.subr.bf16.mxu1 %v12639_v39 }
 0xde8   : > { %11917 = vmatpush3.bf16.msra.mxu1 %v12639_v39 }
 0xdea   : > { %4955 = vadd.xlane.f32.xlu0 %v4954_v34  ;;  %v12640_v34 = vld [vmem:[%s15838_s14 + $0x8] sm:$0xff]  }
 0xdeb   : > { %11918 = vmatprep.subr.bf16.mxu1 %v12640_v34 }
 0xdec   : > { %11919 = vmatpush3.bf16.msra.mxu1 %v12640_v34 }
 0xdef   : > { %v11914_v21 = vpop.f32.mrb[160].mxu0 }
 0xdf0   : > { %v4920_v4 = vpop.f32.mrb[161].mxu0  ;;  %v4929_v57 = vadd.f32 %v11914_v21, %v10819_v55 }
 0xdf1   : > { %v4921_v43 = vadd.f32 %v10819_v55, %v4920_v4  ;;  %v11915_v22 = vpop.f32.mrb[162].mxu0 }
 0xdf2   : > { %v4923_v53 = vpop.f32.mrb[163].mxu0  ;;  %v4932_v23 = vadd.f32 %v11915_v22, %v10819_v55  ;;  %v4941_v11 = vadd.f32 %v4929_v57, %v15905_v36 }
 0xdf3   : > { %v4939_v19 = vadd.f32 %v4921_v43, %v15904_v0  ;;  %v4924_v54 = vadd.f32 %v10819_v55, %v4923_v53 }
 0xdf4   : > { %v4942_v27 = vadd.f32 %v4932_v23, %v15907_v24  ;;  %v4963_v20 = vsel %vm846_vm1, %v4941_v11, 0.0 }
 0xdf5   : > { %v4940_v52 = vadd.f32 %v4924_v54, %v15906_v50  ;;  %v4957_v47 = vsel %vm846_vm1, %v4939_v19, 0.0 }
 0xdf6   : > { %4958 = vadd.xlane.f32.xlu0 %v4957_v47  ;;  %v4966_v15 = vsel %vm846_vm1, %v4942_v27, 0.0 }
 0xdf7   : > { %v4960_v33 = vsel %vm846_vm1, %v4940_v52, 0.0 }
 0xdf8   : > { %4961 = vadd.xlane.f32.xlu1 %v4960_v33 }
 0xdfa   : > { %4964 = vadd.xlane.f32.xlu0 %v4963_v20 }
 0xdfc   : > { %4967 = vadd.xlane.f32.xlu1 %v4966_v15  ;;  %v10827_v15 = vld [vmem:[%s15837_s13] ss:$0 sm:$0xff] }
 0xe6f   : > { %v4947_v62 = vpop.xlane.xlu0 %4946 }
 0xe70   : > { %v4970_v44 = vmul.f32 0.03125, %v4947_v62 }
 0xe71   : > { %v4950_v18 = vpop.xlane.xlu1 %4949 }
 0xe72   : > { %v14287_v26 = vsub.f32 %v4935_v16, %v4970_v44  ;;  %v4971_v10 = vmul.f32 0.03125, %v4950_v18 }
 0xe73   : > { %v4953_v17 = vpop.xlane.xlu0 %4952 }
 0xe74   : > { %v14289_v6 = vsub.f32 %v4936_v48, %v4971_v10  ;;  %v4972_v56 = vmul.f32 0.03125, %v4953_v17  ;;  %v4986_v51 = vmul.f32 %v14287_v26, %v14287_v26 }
 0xe76   : > { %v14293_v28 = vsub.f32 %v4937_v58, %v4972_v56  ;;  %v4994_v63 = vsel %vm846_vm1, %v4986_v51, 0.0  ;;  %v4987_v41 = vmul.f32 %v14289_v6, %v14289_v6 }
 0xe77   : > { %4995 = vadd.xlane.f32.xlu0 %v4994_v63  ;;  %v4956_v9 = vpop.xlane.xlu0 %4955 }
 0xe78   : > { %v4973_v32 = vmul.f32 0.03125, %v4956_v9  ;;  %v4997_v40 = vsel %vm846_vm1, %v4987_v41, 0.0  ;;  %v4988_v37 = vmul.f32 %v14293_v28, %v14293_v28 }
 0xe79   : > { %4998 = vadd.xlane.f32.xlu1 %v4997_v40 }
 0xe7a   : > { %v14301_v2 = vsub.f32 %v4938_v8, %v4973_v32  ;;  %v5000_v35 = vsel %vm846_vm1, %v4988_v37, 0.0 }
 0xe7b   : > { %5001 = vadd.xlane.f32.xlu0 %v5000_v35 }
 0xe7c   : > { %v4989_v45 = vmul.f32 %v14301_v2, %v14301_v2 }
 0xe7e   : > { %v5003_v46 = vsel %vm846_vm1, %v4989_v45, 0.0 }
 0xe7f   : > { %5004 = vadd.xlane.f32.xlu1 %v5003_v46 }
 0xe83   : > { %v4959_v30 = vpop.xlane.xlu0 %4958 }
 0xe84   : > { %v4974_v5 = vmul.f32 0.03125, %v4959_v30 }
 0xe85   : > { %v4962_v55 = vpop.xlane.xlu1 %4961 }
 0xe86   : > { %v14307_v25 = vsub.f32 %v4939_v19, %v4974_v5  ;;  %v4975_v1 = vmul.f32 0.03125, %v4962_v55 }
 0xe87   : > { %v4965_v14 = vpop.xlane.xlu0 %4964 }
 0xe88   : > { %v14309_v61 = vsub.f32 %v4940_v52, %v4975_v1  ;;  %v4976_v42 = vmul.f32 0.03125, %v4965_v14  ;;  %v4990_v59 = vmul.f32 %v14307_v25, %v14307_v25  ;;  %v10826_v52 = vld [vmem:[%s15836_s12] ss:$0 sm:$0xff] }
 0xe89   : > { %v4968_v16 = vpop.xlane.xlu1 %4967 }
 0xe8a   : > { %v14313_v7 = vsub.f32 %v4941_v11, %v4976_v42  ;;  %v4977_v38 = vmul.f32 0.03125, %v4968_v16  ;;  %v5006_v58 = vsel %vm846_vm1, %v4990_v59, 0.0  ;;  %v4991_v29 = vmul.f32 %v14309_v61, %v14309_v61 }
 0xe8b   : > { %5007 = vadd.xlane.f32.xlu0 %v5006_v58 }
 0xe8c   : > { %v14318_v60 = vsub.f32 %v4942_v27, %v4977_v38  ;;  %v5009_v48 = vsel %vm846_vm1, %v4991_v29, 0.0  ;;  %v4992_v49 = vmul.f32 %v14313_v7, %v14313_v7 }
 0xe8d   : > { %5010 = vadd.xlane.f32.xlu1 %v5009_v48 }
 0xe8e   : > { %v5012_v31 = vsel %vm846_vm1, %v4992_v49, 0.0  ;;  %v4993_v3 = vmul.f32 %v14318_v60, %v14318_v60 }
 0xe8f   : > { %5013 = vadd.xlane.f32.xlu0 %v5012_v31 }
 0xe90   : > { %v5015_v8 = vsel %vm846_vm1, %v4993_v3, 0.0 }
 0xe91   : > { %5016 = vadd.xlane.f32.xlu1 %v5015_v8 }
 0xf04   : > { %v4996_v21 = vpop.xlane.xlu0 %4995 }
 0xf05   : > { %v5018_v4 = vmul.f32 0.03125, %v4996_v21 }
 0xf06   : > { %v4999_v57 = vpop.xlane.xlu1 %4998 }
 0xf07   : > { %v5026_v43 = vadd.f32 1e-05, %v5018_v4  ;;  %v5019_v22 = vmul.f32 0.03125, %v4999_v57  ;;  %v12642_v4 = vld [vmem:[%s15840_s16 + $0x8] sm:$0xff]   ;;  %v12643_v57 = vld [vmem:[%s15840_s16 + $0x10] sm:$0xff]  }
 0xf08   : > { %v5002_v53 = vpop.xlane.xlu0 %5001 }
 0xf09   : > { %12801 = vrsqrt.f32 %v5026_v43  ;;  %v5027_v0 = vadd.f32 1e-05, %v5019_v22  ;;  %v5020_v19 = vmul.f32 0.03125, %v5002_v53  ;;  %v12644_v43 = vld [vmem:[%s15840_s16 + $0x18] sm:$0xff]   ;;  %v10828_v22 = vld [vmem:[%s15839_s15] ss:$0 sm:$0xff] }
 0xf0b   : > { %12803 = vrsqrt.f32 %v5027_v0  ;;  %v5028_v23 = vadd.f32 1e-05, %v5020_v19 }
 0xf0c   : > { %v5005_v54 = vpop.xlane.xlu1 %5004 }
 0xf0d   : > { %12805 = vrsqrt.f32 %v5028_v23  ;;  %v5021_v36 = vmul.f32 0.03125, %v5005_v54 }
 0xf0f   : > { %v5029_v11 = vadd.f32 1e-05, %v5021_v36 }
 0xf11   : > { %12807 = vrsqrt.f32 %v5029_v11 }
 0xf13   : > { %v12802_v50 = vpop.eup %12801 }
 0xf14   : > { %v5042_v47 = vmul.f32 %v12802_v50, %v14287_v26 }
 0xf15   : > { %v12804_v24 = vpop.eup %12803 }
 0xf16   : > { %v5043_v27 = vmul.f32 %v12804_v24, %v14289_v6  ;;  %v5056_v33 = vmul.f32 %v10826_v52, %v5042_v47 }
 0xf17   : > { %v12806_v20 = vpop.eup %12805 }
 0xf18   : > { %v5044_v62 = vmul.f32 %v12806_v20, %v14293_v28  ;;  %v5008_v44 = vpop.xlane.xlu0 %5007  ;;  %v5057_v18 = vmul.f32 %v10826_v52, %v5043_v27  ;;  %v14342_v56 = vadd.f32 %v10827_v15, %v5056_v33 }
 0xf19   : > { %v5022_v10 = vmul.f32 0.03125, %v5008_v44 }
 0xf1a   : > { %v5011_v17 = vpop.xlane.xlu1 %5010  ;;  %v14344_v51 = vadd.f32 %v10827_v15, %v5057_v18  ;;  %v5058_v6 = vmul.f32 %v10826_v52, %v5044_v62 }
 0xf1b   : > { %v12808_v26 = vpop.eup %12807  ;;  %v5030_v63 = vadd.f32 1e-05, %v5022_v10  ;;  %v5023_v41 = vmul.f32 0.03125, %v5011_v17 }
 0xf1c   : > { %v5045_v9 = vmul.f32 %v12808_v26, %v14301_v2  ;;  %v5014_v32 = vpop.xlane.xlu0 %5013  ;;  %v5078_v40 = vpack.c.bf16 %v14344_v51, %v14342_v56  ;;  %v14350_v5 = vadd.f32 %v10827_v15, %v5058_v6 }
 0xf1d   : > { %12809 = vrsqrt.f32 %v5030_v63  ;;  %v5031_v28 = vadd.f32 1e-05, %v5023_v41  ;;  %v5024_v37 = vmul.f32 0.03125, %v5014_v32 }
 0xf1e   : > { %v5059_v35 = vmul.f32 %v10826_v52, %v5045_v9  ;;  %v5017_v45 = vpop.xlane.xlu1 %5016  ;;  %11920 = vmatprep.mubr.msk.bf16.mxu1 %vm846_vm1, %v5078_v40 }
 0xf1f   : > { %12811 = vrsqrt.f32 %v5031_v28  ;;  %v5032_v46 = vadd.f32 1e-05, %v5024_v37  ;;  %v5025_v30 = vmul.f32 0.03125, %v5017_v45 }
 0xf20   : > { %v14352_v55 = vadd.f32 %v10827_v15, %v5059_v35 }
 0xf21   : > { %12813 = vrsqrt.f32 %v5032_v46  ;;  %v5033_v2 = vadd.f32 1e-05, %v5025_v30 }
 0xf22   : > { %v5079_v1 = vpack.c.bf16 %v14352_v55, %v14350_v5 }
 0xf23   : > { %12815 = vrsqrt.f32 %v5033_v2 }
 0xf24   : > { %11921 = vmatmul.mubr.msk.bf16.vlgmr.msra.gmra.mrb[132].mxu1 %vm846_vm1, %v5079_v1 }
 0xf27   : > { %v12810_v14 = vpop.eup %12809 }
 0xf28   : > { %v5046_v42 = vmul.f32 %v12810_v14, %v14307_v25 }
 0xf29   : > { %v12812_v59 = vpop.eup %12811 }
 0xf2a   : > { %v5047_v16 = vmul.f32 %v12812_v59, %v14309_v61  ;;  %v5060_v38 = vmul.f32 %v10826_v52, %v5046_v42 }
 0xf2b   : > { %v12814_v58 = vpop.eup %12813 }
 0xf2c   : > { %v5061_v29 = vmul.f32 %v10826_v52, %v5047_v16  ;;  %v5048_v48 = vmul.f32 %v12814_v58, %v14313_v7  ;;  %v14360_v31 = vadd.f32 %v10827_v15, %v5060_v38 }
 0xf2d   : > { %v12816_v49 = vpop.eup %12815 }
 0xf2e   : > { %v14362_v3 = vadd.f32 %v10827_v15, %v5061_v29  ;;  %v5049_v8 = vmul.f32 %v12816_v49, %v14318_v60  ;;  %v5062_v39 = vmul.f32 %v10826_v52, %v5048_v48  ;;  %v12641_v60 = vld [vmem:[%s15840_s16] sm:$0xff]  }
 0xf2f   : > { %11928 = vmatprep.subr.bf16.mxu0 %v12641_v60 }
 0xf30   : > { %v5080_v34 = vpack.c.bf16 %v14362_v3, %v14360_v31  ;;  %v5063_v25 = vmul.f32 %v10826_v52, %v5049_v8  ;;  %v14368_v61 = vadd.f32 %v10827_v15, %v5062_v39  ;;  %11929 = vmatpush3.bf16.msra.mxu0 %v12641_v60 }
 0xf31   : > { %11930 = vmatprep.subr.bf16.mxu0 %v12642_v4 }
 0xf32   : > { %11924 = vmatprep.mubr.msk.bf16.mxu1 %vm846_vm1, %v5080_v34  ;;  %v14370_v21 = vadd.f32 %v10827_v15, %v5063_v25 }
 0xf34   : > { %v5081_v7 = vpack.c.bf16 %v14370_v21, %v14368_v61  ;;  %11931 = vmatpush3.bf16.msra.mxu0 %v12642_v4 }
 0xf35   : > { %11932 = vmatprep.subr.bf16.mxu0 %v12643_v57 }
 0xf36   : > { %11925 = vmatmul.mubr.msk.bf16.gmra.mrb[136].mxu1 %vm846_vm1, %v5081_v7 }
 0xf38   : > { %11933 = vmatpush3.bf16.msra.mxu0 %v12643_v57 }
 0xf39   : > { %11934 = vmatprep.subr.bf16.mxu0 %v12644_v43 }
 0xf3c   : > { %11935 = vmatpush3.bf16.msra.mxu0 %v12644_v43 }
 0xff7   : > { %v11922_v53 = vpop.f32.mrb[132].mxu1 }
 0xff8   : > { %v5160_v0 = vadd.f32 %v11922_v53, %v10828_v22  ;;  %v5151_v19 = vpop.f32.mrb[133].mxu1 }
 0xff9   : > { %v5152_v23 = vadd.f32 %v10828_v22, %v5151_v19  ;;  %v11923_v54 = vpop.f32.mrb[134].mxu1 }
 0xffa   : > { %v5193_v36 = vmul.f32 0.70710677, %v5160_v0  ;;  %v5163_v11 = vadd.f32 %v11923_v54, %v10828_v22  ;;  %v5154_v50 = vpop.f32.mrb[135].mxu1  ;;  %v5184_v10 = vmul.f32 0.5, %v5160_v0 }
 0xffb   : > { %v5191_v52 = vmul.f32 0.70710677, %v5152_v23  ;;  %v5155_v47 = vadd.f32 %v10828_v22, %v5154_v50  ;;  %v5182_v41 = vmul.f32 0.5, %v5152_v23 }
 0xffc   : > { %12817 = verf.f32 %v5193_v36  ;;  %v5194_v24 = vmul.f32 0.70710677, %v5163_v11  ;;  %v5185_v17 = vmul.f32 0.5, %v5163_v11  ;;  %v10835_v11 = vld [vmem:[%s15841_s17] ss:$0 sm:$0xff] }
 0xffd   : > { %12819 = verf.f32 %v5191_v52  ;;  %v5192_v27 = vmul.f32 0.70710677, %v5155_v47  ;;  %v5183_v6 = vmul.f32 0.5, %v5155_v47 }
 0xffe   : > { %12821 = verf.f32 %v5194_v24 }
 0xfff   : > { %12823 = verf.f32 %v5192_v27 }
0x1006   : > { %v12818_v33 = vpop.eup %12817 }
0x1007   : > { %v12820_v20 = vpop.eup %12819  ;;  %v5209_v15 = vadd.f32 1.0, %v12818_v33 }
0x1008   : > { %v12822_v62 = vpop.eup %12821  ;;  %v5207_v44 = vadd.f32 1.0, %v12820_v20 }
0x1009   : > { %v12824_v18 = vpop.eup %12823  ;;  %v5210_v26 = vadd.f32 1.0, %v12822_v62  ;;  %v11926_v63 = vpop.f32.mrb[136].mxu1  ;;  %v5217_v28 = vmul.f32 %v5209_v15, %v5184_v10 }
0x100a   : > { %v5208_v9 = vadd.f32 1.0, %v12824_v18  ;;  %v5176_v32 = vadd.f32 %v11926_v63, %v10828_v22  ;;  %v5167_v40 = vpop.f32.mrb[137].mxu1  ;;  %v5215_v46 = vmul.f32 %v5207_v44, %v5182_v41 }
0x100b   : > { %v5218_v37 = vmul.f32 %v5210_v26, %v5185_v17  ;;  %v5168_v35 = vadd.f32 %v10828_v22, %v5167_v40  ;;  %v11927_v45 = vpop.f32.mrb[138].mxu1 }
0x100c   : > { %v5216_v30 = vmul.f32 %v5208_v9, %v5183_v6  ;;  %v5197_v2 = vmul.f32 0.70710677, %v5176_v32  ;;  %v5179_v1 = vadd.f32 %v11927_v45, %v10828_v22  ;;  %v5170_v14 = vpop.f32.mrb[139].mxu1  ;;  %v5188_v7 = vmul.f32 0.5, %v5176_v32 }
0x100d   : > { %v5224_v42 = vpack.c.bf16 %v5218_v37, %v5217_v28  ;;  %v5195_v59 = vmul.f32 0.70710677, %v5168_v35  ;;  %v5171_v16 = vadd.f32 %v10828_v22, %v5170_v14  ;;  %v5186_v57 = vmul.f32 0.5, %v5168_v35 }
0x100e   : > { %v5223_v38 = vpack.c.bf16 %v5216_v30, %v5215_v46  ;;  %12825 = verf.f32 %v5197_v2  ;;  %v5198_v58 = vmul.f32 0.70710677, %v5179_v1  ;;  %v5189_v60 = vmul.f32 0.5, %v5179_v1 }
0x100f   : > { %12827 = verf.f32 %v5195_v59  ;;  %v5196_v29 = vmul.f32 0.70710677, %v5171_v16  ;;  %v5187_v43 = vmul.f32 0.5, %v5171_v16 }
0x1010   : > { %12829 = verf.f32 %v5198_v58  ;;  %11936 = vmatprep.mubr.msk.bf16.mxu0 %vm5266_vm7, %v5223_v38 }
0x1011   : > { %12831 = verf.f32 %v5196_v29  ;;  %11937 = vmatmul.mubr.msk.bf16.vlgmr.msra.gmra.mrb[164].mxu0 %vm5266_vm7, %v5224_v42 }
0x1018   : > { %v12826_v48 = vpop.eup %12825 }
0x1019   : > { %v12828_v49 = vpop.eup %12827  ;;  %v5213_v8 = vadd.f32 1.0, %v12826_v48 }
0x101a   : > { %v12830_v39 = vpop.eup %12829  ;;  %v5211_v34 = vadd.f32 1.0, %v12828_v49 }
0x101b   : > { %v12832_v25 = vpop.eup %12831  ;;  %v5214_v4 = vadd.f32 1.0, %v12830_v39  ;;  %v5221_v53 = vmul.f32 %v5213_v8, %v5188_v7 }
0x101c   : > { %v5212_v22 = vadd.f32 1.0, %v12832_v25  ;;  %v5219_v19 = vmul.f32 %v5211_v34, %v5186_v57 }
0x101d   : > { %v5222_v0 = vmul.f32 %v5214_v4, %v5189_v60 }
0x101e   : > { %v5220_v23 = vmul.f32 %v5212_v22, %v5187_v43 }
0x101f   : > { %v5226_v54 = vpack.c.bf16 %v5222_v0, %v5221_v53 }
0x1020   : > { %v5225_v36 = vpack.c.bf16 %v5220_v23, %v5219_v19 }
0x1022   : > { %11940 = vmatprep.mubr.msk.bf16.mxu0 %vm5266_vm7, %v5225_v36 }
0x1023   : > { %11941 = vmatmul.mubr.msk.bf16.gmra.mrb[168].mxu0 %vm5266_vm7, %v5226_v54 }
0x10e4   : > { %v11938_v50 = vpop.f32.mrb[164].mxu0 }
0x10e5   : > { %v5313_v52 = vpop.f32.mrb[165].mxu0  ;;  %v5322_v47 = vadd.f32 %v11938_v50, %v10835_v11 }
0x10e6   : > { %v5314_v24 = vadd.f32 %v10835_v11, %v5313_v52  ;;  %v11939_v27 = vpop.f32.mrb[166].mxu0 }
0x10e7   : > { %v5316_v33 = vpop.f32.mrb[167].mxu0  ;;  %v5325_v15 = vadd.f32 %v11939_v27, %v10835_v11  ;;  %v5346_v44 = vadd.f32 %v5322_v47, %v14350_v5 }
0x10e8   : > { %v5344_v20 = vadd.f32 %v5314_v24, %v14342_v56  ;;  %v5317_v62 = vadd.f32 %v10835_v11, %v5316_v33 }
0x10e9   : > { %v5347_v17 = vadd.f32 %v5325_v15, %v14352_v55  ;;  %v5360_v63 = vsel %vm846_vm1, %v5346_v44, 0.0 }
0x10ea   : > { %v5345_v18 = vadd.f32 %v5317_v62, %v14344_v51  ;;  %v5354_v10 = vsel %vm846_vm1, %v5344_v20, 0.0 }
0x10eb   : > { %5355 = vadd.xlane.f32.xlu0 %v5354_v10  ;;  %v5363_v41 = vsel %vm846_vm1, %v5347_v17, 0.0  ;;  %v12646_v10 = vld [vmem:[%s15885_s24 + $0x10] sm:$0xff]  }
0x10ec   : > { %v5357_v26 = vsel %vm846_vm1, %v5345_v18, 0.0  ;;  %11956 = vmatprep.subr.bf16.mxu0 %v12646_v10 }
0x10ed   : > { %5358 = vadd.xlane.f32.xlu1 %v5357_v26  ;;  %11957 = vmatpush3.bf16.msra.mxu0 %v12646_v10  ;;  %v12648_v26 = vld [vmem:[%s15885_s24 + $0x18] sm:$0xff]  }
0x10ee   : > { %11958 = vmatprep.subr.bf16.mxu0 %v12648_v26 }
0x10ef   : > { %5361 = vadd.xlane.f32.xlu0 %v5360_v63  ;;  %v12649_v63 = vld [vmem:[%s15832_s8 + $0x10] sm:$0xff]  }
0x10f1   : > { %5364 = vadd.xlane.f32.xlu1 %v5363_v41  ;;  %11959 = vmatpush3.bf16.msra.mxu0 %v12648_v26 }
0x10f2   : > { %11980 = vmatprep.subr.bf16.mxu0 %v15896_v13 }
0x10f6   : > { %v11942_v56 = vpop.f32.mrb[168].mxu0 }
0x10f7   : > { %v5329_v6 = vpop.f32.mrb[169].mxu0  ;;  %v5338_v9 = vadd.f32 %v11942_v56, %v10835_v11 }
0x10f8   : > { %v5330_v5 = vadd.f32 %v10835_v11, %v5329_v6  ;;  %v11943_v32 = vpop.f32.mrb[170].mxu0 }
0x10f9   : > { %v5332_v51 = vpop.f32.mrb[171].mxu0  ;;  %v5341_v28 = vadd.f32 %v11943_v32, %v10835_v11  ;;  %v5350_v55 = vadd.f32 %v5338_v9, %v14368_v61 }
0x10fa   : > { %v5348_v40 = vadd.f32 %v5330_v5, %v14360_v31  ;;  %v5333_v37 = vadd.f32 %v10835_v11, %v5332_v51 }
0x10fb   : > { %v5351_v46 = vadd.f32 %v5341_v28, %v14370_v21  ;;  %v5372_v2 = vsel %vm846_vm1, %v5350_v55, 0.0 }
0x10fc   : > { %v5349_v35 = vadd.f32 %v5333_v37, %v14362_v3  ;;  %v5366_v45 = vsel %vm846_vm1, %v5348_v40, 0.0 }
0x10fd   : > { %5367 = vadd.xlane.f32.xlu0 %v5366_v45  ;;  %v5375_v1 = vsel %vm846_vm1, %v5351_v46, 0.0 }
0x10fe   : > { %v5369_v30 = vsel %vm846_vm1, %v5349_v35, 0.0 }
0x10ff   : > { %5370 = vadd.xlane.f32.xlu1 %v5369_v30 }
0x1101   : > { %5373 = vadd.xlane.f32.xlu0 %v5372_v2 }
0x1103   : > { %5376 = vadd.xlane.f32.xlu1 %v5375_v1 }
0x1178   : > { %v5356_v31 = vpop.xlane.xlu0 %5355 }
0x1179   : > { %v5378_v14 = vmul.f32 0.03125, %v5356_v31 }
0x117a   : > { %v5359_v42 = vpop.xlane.xlu1 %5358 }
0x117b   : > { %v14413_v61 = vsub.f32 %v5344_v20, %v5378_v14  ;;  %v5379_v3 = vmul.f32 0.03125, %v5359_v42 }
0x117c   : > { %v5362_v59 = vpop.xlane.xlu0 %5361 }
0x117d   : > { %v14415_v16 = vsub.f32 %v5345_v18, %v5379_v3  ;;  %v5380_v38 = vmul.f32 0.03125, %v5362_v59  ;;  %v5394_v21 = vmul.f32 %v14413_v61, %v14413_v61  ;;  %v12645_v18 = vld [vmem:[%s15884_s2 + $0x10] sm:$0xff]   ;;  %v10845_v3 = vld [vmem:[%s15843_s19] ss:$0 sm:$0xff] }
0x117e   : > { %v5365_v58 = vpop.xlane.xlu1 %5364  ;;  %11944 = vmatprep.subr.bf16.mxu1 %v12645_v18 }
0x117f   : > { %v14419_v29 = vsub.f32 %v5346_v44, %v5380_v38  ;;  %v5381_v48 = vmul.f32 0.03125, %v5365_v58  ;;  %v5402_v49 = vsel %vm846_vm1, %v5394_v21, 0.0  ;;  %v5395_v8 = vmul.f32 %v14415_v16, %v14415_v16  ;;  %11945 = vmatpush3.bf16.msra.mxu1 %v12645_v18 }
0x1180   : > { %5403 = vadd.xlane.f32.xlu0 %v5402_v49 }
0x1181   : > { %v14424_v39 = vsub.f32 %v5347_v17, %v5381_v48  ;;  %v5405_v34 = vsel %vm846_vm1, %v5395_v8, 0.0  ;;  %v5396_v25 = vmul.f32 %v14419_v29, %v14419_v29  ;;  %v12647_v17 = vld [vmem:[%s15884_s2 + $0x18] sm:$0xff]  }
0x1182   : > { %5406 = vadd.xlane.f32.xlu1 %v5405_v34  ;;  %11946 = vmatprep.subr.bf16.mxu1 %v12647_v17 }
0x1183   : > { %v5408_v7 = vsel %vm846_vm1, %v5396_v25, 0.0  ;;  %v5397_v60 = vmul.f32 %v14424_v39, %v14424_v39  ;;  %11947 = vmatpush3.bf16.msra.mxu1 %v12647_v17 }
0x1184   : > { %5409 = vadd.xlane.f32.xlu0 %v5408_v7  ;;  %11968 = vmatprep.subr.bf16.mxu1 %v12649_v63 }
0x1185   : > { %v5411_v4 = vsel %vm846_vm1, %v5397_v60, 0.0 }
0x1186   : > { %5412 = vadd.xlane.f32.xlu1 %v5411_v4 }
0x118a   : > { %v5368_v57 = vpop.xlane.xlu0 %5367 }
0x118b   : > { %v5382_v43 = vmul.f32 0.03125, %v5368_v57 }
0x118c   : > { %v5371_v22 = vpop.xlane.xlu1 %5370 }
0x118d   : > { %v14433_v53 = vsub.f32 %v5348_v40, %v5382_v43  ;;  %v5383_v0 = vmul.f32 0.03125, %v5371_v22 }
0x118e   : > { %v5374_v19 = vpop.xlane.xlu0 %5373 }
0x118f   : > { %v14435_v23 = vsub.f32 %v5349_v35, %v5383_v0  ;;  %v5384_v54 = vmul.f32 0.03125, %v5374_v19  ;;  %v5398_v36 = vmul.f32 %v14433_v53, %v14433_v53 }
0x1190   : > { %v5377_v11 = vpop.xlane.xlu1 %5376 }
0x1191   : > { %v14439_v50 = vsub.f32 %v5350_v55, %v5384_v54  ;;  %v5385_v52 = vmul.f32 0.03125, %v5377_v11  ;;  %v5414_v47 = vsel %vm846_vm1, %v5398_v36, 0.0  ;;  %v5399_v24 = vmul.f32 %v14435_v23, %v14435_v23  ;;  %v12650_v11 = vld [vmem:[%s15832_s8 + $0x18] sm:$0xff]  }
0x1192   : > { %5415 = vadd.xlane.f32.xlu0 %v5414_v47 }
0x1193   : > { %v14444_v27 = vsub.f32 %v5351_v46, %v5385_v52  ;;  %v5417_v33 = vsel %vm846_vm1, %v5399_v24, 0.0  ;;  %v5400_v20 = vmul.f32 %v14439_v50, %v14439_v50  ;;  %v10844_v46 = vld [vmem:[%s15842_s18] ss:$0 sm:$0xff] }
0x1194   : > { %5418 = vadd.xlane.f32.xlu1 %v5417_v33 }
0x1195   : > { %v5420_v15 = vsel %vm846_vm1, %v5400_v20, 0.0  ;;  %v5401_v62 = vmul.f32 %v14444_v27, %v14444_v27 }
0x1196   : > { %5421 = vadd.xlane.f32.xlu0 %v5420_v15 }
0x1197   : > { %v5423_v44 = vsel %vm846_vm1, %v5401_v62, 0.0 }
0x1198   : > { %5424 = vadd.xlane.f32.xlu1 %v5423_v44 }
0x120d   : > { %v5404_v41 = vpop.xlane.xlu0 %5403 }
0x120e   : > { %v5426_v56 = vmul.f32 0.03125, %v5404_v41 }
0x120f   : > { %v5407_v6 = vpop.xlane.xlu1 %5406 }
0x1210   : > { %v5434_v9 = vadd.f32 1e-05, %v5426_v56  ;;  %v5427_v5 = vmul.f32 0.03125, %v5407_v6 }
0x1211   : > { %v5410_v32 = vpop.xlane.xlu0 %5409 }
0x1212   : > { %12833 = vrsqrt.f32 %v5434_v9  ;;  %v5435_v51 = vadd.f32 1e-05, %v5427_v5  ;;  %v5428_v40 = vmul.f32 0.03125, %v5410_v32 }
0x1213   : > { %v5413_v28 = vpop.xlane.xlu1 %5412 }
0x1214   : > { %12835 = vrsqrt.f32 %v5435_v51  ;;  %v5436_v37 = vadd.f32 1e-05, %v5428_v40  ;;  %v5429_v55 = vmul.f32 0.03125, %v5413_v28 }
0x1216   : > { %12837 = vrsqrt.f32 %v5436_v37  ;;  %v5437_v35 = vadd.f32 1e-05, %v5429_v55 }
0x1218   : > { %12839 = vrsqrt.f32 %v5437_v35 }
0x121c   : > { %v12834_v45 = vpop.eup %12833 }
0x121d   : > { %v5450_v30 = vmul.f32 %v12834_v45, %v14413_v61 }
0x121e   : > { %v12836_v2 = vpop.eup %12835 }
0x121f   : > { %v5416_v1 = vpop.xlane.xlu0 %5415  ;;  %v5451_v31 = vmul.f32 %v12836_v2, %v14415_v16  ;;  %v5464_v14 = vmul.f32 %v10844_v46, %v5450_v30 }
0x1220   : > { %v12838_v42 = vpop.eup %12837  ;;  %v5430_v59 = vmul.f32 0.03125, %v5416_v1 }
0x1221   : > { %v5452_v38 = vmul.f32 %v12838_v42, %v14419_v29  ;;  %v5419_v21 = vpop.xlane.xlu1 %5418  ;;  %v5465_v58 = vmul.f32 %v10844_v46, %v5451_v31  ;;  %v14479_v7 = vadd.f32 %v10845_v3, %v5464_v14 }
0x1222   : > { %v12840_v48 = vpop.eup %12839  ;;  %v5438_v49 = vadd.f32 1e-05, %v5430_v59  ;;  %v5431_v8 = vmul.f32 0.03125, %v5419_v21 }
0x1223   : > { %v5466_v34 = vmul.f32 %v10844_v46, %v5452_v38  ;;  %v5453_v61 = vmul.f32 %v12840_v48, %v14424_v39  ;;  %v5422_v25 = vpop.xlane.xlu0 %5421  ;;  %15908 = vst [vmem:[#allocation5_spill] sm:$0xff] %v14479_v7  ;;  %v14481_v16 = vadd.f32 %v10845_v3, %v5465_v58 }
0x1224   : > { %12841 = vrsqrt.f32 %v5438_v49  ;;  %v5439_v60 = vadd.f32 1e-05, %v5431_v8  ;;  %v5432_v4 = vmul.f32 0.03125, %v5422_v25 }
0x1225   : > { %15909 = vst [vmem:[#allocation4_spill] sm:$0xff] %v14481_v16  ;;  %v5467_v57 = vmul.f32 %v10844_v46, %v5453_v61  ;;  %v5425_v43 = vpop.xlane.xlu1 %5424  ;;  %v5486_v29 = vpack.c.bf16 %v14481_v16, %v14479_v7  ;;  %v14485_v19 = vadd.f32 %v10845_v3, %v5466_v34 }
0x1226   : > { %12843 = vrsqrt.f32 %v5439_v60  ;;  %v5440_v22 = vadd.f32 1e-05, %v5432_v4  ;;  %v5433_v0 = vmul.f32 0.03125, %v5425_v43 }
0x1227   : > { %15910 = vst [vmem:[#allocation3_spill] sm:$0xff] %v14485_v19  ;;  %v14487_v54 = vadd.f32 %v10845_v3, %v5467_v57  ;;  %11948 = vmatprep.mubr.msk.bf16.mxu1 %vm846_vm1, %v5486_v29  ;;  %11960 = vmatprep.mubr.msk.bf16.mxu0 %vm846_vm1, %v5486_v29 }
0x1228   : > { %12845 = vrsqrt.f32 %v5440_v22  ;;  %v5441_v39 = vadd.f32 1e-05, %v5433_v0 }
0x1229   : > { %15911 = vst [vmem:[#allocation7_spill] sm:$0xff] %v14487_v54  ;;  %v5487_v36 = vpack.c.bf16 %v14487_v54, %v14485_v19 }
0x122a   : > { %12847 = vrsqrt.f32 %v5441_v39 }
0x122b   : > { %11949 = vmatmul.mubr.msk.bf16.vlgmr.msra.gmra.mrb[140].mxu1 %vm846_vm1, %v5487_v36  ;;  %11961 = vmatmul.mubr.msk.bf16.vlgmr.msra.gmra.mrb[172].mxu0 %vm846_vm1, %v5487_v36 }
0x122c   : > { %11969 = vmatpush3.bf16.msra.mxu1 %v12649_v63 }
0x122d   : > { %11970 = vmatprep.subr.bf16.mxu1 %v12650_v11 }
0x122e   : > { %v12842_v52 = vpop.eup %12841 }
0x122f   : > { %v5454_v47 = vmul.f32 %v12842_v52, %v14433_v53 }
0x1230   : > { %v12844_v24 = vpop.eup %12843  ;;  %11971 = vmatpush3.bf16.msra.mxu1 %v12650_v11 }
0x1231   : > { %v5455_v33 = vmul.f32 %v12844_v24, %v14435_v23  ;;  %v5468_v20 = vmul.f32 %v10844_v46, %v5454_v47  ;;  %11986 = vmatprep.subr.bf16.mxu1 %v15896_v13 }
0x1232   : > { %v12846_v15 = vpop.eup %12845 }
0x1233   : > { %v5469_v62 = vmul.f32 %v10844_v46, %v5455_v33  ;;  %v5456_v44 = vmul.f32 %v12846_v15, %v14439_v50  ;;  %v14502_v10 = vadd.f32 %v10845_v3, %v5468_v20  ;;  %v10875_v20 = vld [vmem:[%s15833_s9 + $0x1] ss:$0 sm:$0xff] }
0x1234   : > { %v12848_v18 = vpop.eup %12847 }
0x1235   : > { %15912 = vst [vmem:[#allocation9_spill] sm:$0xff] %v14502_v10  ;;  %v14504_v17 = vadd.f32 %v10845_v3, %v5469_v62  ;;  %v5457_v26 = vmul.f32 %v12848_v18, %v14444_v27  ;;  %v5470_v63 = vmul.f32 %v10844_v46, %v5456_v44  ;;  %v14530_v27 = vld [vmem:[%s15831_s7 + $0x1] ss:$0 sm:$0xff] }
0x1237   : > { %15913 = vst [vmem:[#allocation8_spill] sm:$0xff] %v14504_v17  ;;  %v5488_v53 = vpack.c.bf16 %v14504_v17, %v14502_v10  ;;  %v5471_v41 = vmul.f32 %v10844_v46, %v5457_v26  ;;  %v14511_v23 = vadd.f32 %v10845_v3, %v5470_v63  ;;  %v14539_v46 = vld [vmem:[%s15895_s27 + $0x1] ss:$0 sm:$0xff] }
0x1239   : > { %11952 = vmatprep.mubr.msk.bf16.mxu1 %vm846_vm1, %v5488_v53  ;;  %11964 = vmatprep.mubr.msk.bf16.mxu0 %vm846_vm1, %v5488_v53  ;;  %15914 = vst [vmem:[#allocation6_spill] sm:$0xff] %v14511_v23  ;;  %v14513_v56 = vadd.f32 %v10845_v3, %v5471_v41 }
0x123b   : > { %15915 = vst [vmem:[#allocation10_spill] sm:$0xff] %v14513_v56  ;;  %v5489_v50 = vpack.c.bf16 %v14513_v56, %v14511_v23 }
0x123d   : > { %11953 = vmatmul.mubr.msk.bf16.gmra.mrb[144].mxu1 %vm846_vm1, %v5489_v50  ;;  %11965 = vmatmul.mubr.msk.bf16.gmra.mrb[176].mxu0 %vm846_vm1, %v5489_v50 }
0x123e   : > { %11972 = vmatprep.mubr.msk.bf16.mxu1 %vm846_vm1, %v5486_v29  ;;  %11982 = vmatprep.mubr.msk.bf16.mxu0 %vm13034_vm2, %v15896_v13 }
0x1245   : > { %11973 = vmatmul.mubr.msk.bf16.vlgmr.msra.gmra.mrb[148].mxu1 %vm846_vm1, %v5487_v36 }
0x1246   : > { %11976 = vmatprep.mubr.msk.bf16.mxu1 %vm846_vm1, %v5488_v53 }
0x124d   : > { %11977 = vmatmul.mubr.msk.bf16.gmra.mrb[152].mxu1 %vm846_vm1, %v5489_v50 }
0x124e   : > { %11988 = vmatprep.mubr.msk.bf16.mxu1 %vm13034_vm2, %v15896_v13 }
0x12fe   : > { %v11950_v6 = vpop.f32.mrb[140].mxu1  ;;  %v11962_v9 = vpop.f32.mrb[172].mxu0 }
0x12ff   : > { %v5561_v5 = vpop.f32.mrb[141].mxu1  ;;  %v5651_v32 = vpop.f32.mrb[173].mxu0  ;;  %v5660_v30 = vadd.f32 %v11962_v9, %v14530_v27  ;;  %v5570_v49 = vadd.f32 %v11950_v6, %v14539_v46 }
0x1300   : > { %v5652_v51 = vadd.f32 %v14530_v27, %v5651_v32  ;;  %v11951_v40 = vpop.f32.mrb[142].mxu1  ;;  %v11963_v28 = vpop.f32.mrb[174].mxu0  ;;  %v5562_v31 = vadd.f32 %v14539_v46, %v5561_v5 }
0x1301   : > { %v5564_v37 = vpop.f32.mrb[143].mxu1  ;;  %v5654_v55 = vpop.f32.mrb[175].mxu0  ;;  %v5663_v14 = vadd.f32 %v11963_v28, %v14530_v27  ;;  %v14551_v3 = vpack.c.bf16 %v5660_v30, %v5660_v30  ;;  %v5573_v34 = vadd.f32 %v11951_v40, %v14539_v46  ;;  %v14577_v57 = vpack.c.bf16 %v5570_v49, %v5570_v49 }
0x1302   : > { %v14533_v35 = vpack.c.bf16 %v5652_v51, %v5652_v51  ;;  %v5655_v45 = vadd.f32 %v14530_v27, %v5654_v55  ;;  %v5565_v59 = vadd.f32 %v14539_v46, %v5564_v37  ;;  %v14555_v38 = vpack.c.bf16 %v5562_v31, %v5562_v31 }
0x1303   : > { %v14557_v21 = vpack.c.bf16 %v5663_v14, %v5663_v14  ;;  %v5940_v48 = vsel %vm1172_vm3, %v14551_v3, 0  ;;  %v14580_v36 = vpack.c.bf16 %v5573_v34, %v5573_v34 }
0x1304   : > { %v14542_v2 = vpack.c.bf16 %v5655_v45, %v5655_v45  ;;  %v5848_v1 = vsel %vm1172_vm3, %v14533_v35, 0  ;;  %v14559_v58 = vpack.c.bf16 %v5565_v59, %v5565_v59 }
0x1305   : > { %11981 = vmatpush3.bf16.xpose.msra.mxu0 %v5848_v1  ;;  %v5986_v8 = vsel %vm1172_vm3, %v14557_v21, 0 }
0x1306   : > { %v5894_v42 = vsel %vm1172_vm3, %v14542_v2, 0  ;;  %11992 = vmatprep.subr.bf16.mxu0 %v15896_v13 }
0x1307   : > { %11987 = vmatpush3.bf16.xpose.msra.mxu1 %v5894_v42 }
0x1308   : > { %11998 = vmatprep.subr.bf16.mxu1 %v15896_v13 }
0x130c   : > { %11983 = vmatmul.mubr.msk.bf16.vlgmr.msra.gmra.mrb[180].mxu0 %vm1172_vm3, %v14555_v38 }
0x130d   : > { %11993 = vmatpush3.bf16.xpose.msra.mxu0 %v5940_v48  ;;  %11994 = vmatprep.mubr.msk.bf16.mxu0 %vm13034_vm2, %v15896_v13 }
0x130e   : > { %11989 = vmatmul.mubr.msk.bf16.vlgmr.msra.gmra.mrb[156].mxu1 %vm1172_vm3, %v14559_v58  ;;  %12004 = vmatprep.subr.bf16.mxu0 %v15896_v13 }
0x130f   : > { %11999 = vmatpush3.bf16.xpose.msra.mxu1 %v5986_v8  ;;  %12000 = vmatprep.mubr.msk.bf16.mxu1 %vm13034_vm2, %v15896_v13 }
0x1310   : > { %v11954_v61 = vpop.f32.mrb[144].mxu1  ;;  %v11966_v25 = vpop.f32.mrb[176].mxu0  ;;  %12010 = vmatprep.subr.bf16.mxu1 %v15896_v13 }
0x1311   : > { %v5577_v60 = vpop.f32.mrb[145].mxu1  ;;  %v5667_v4 = vpop.f32.mrb[177].mxu0  ;;  %v5676_v47 = vadd.f32 %v11966_v25, %v14530_v27  ;;  %v5586_v28 = vadd.f32 %v11954_v61, %v14539_v46 }
0x1312   : > { %v5668_v43 = vadd.f32 %v14530_v27, %v5667_v4  ;;  %v11955_v29 = vpop.f32.mrb[146].mxu1  ;;  %v11967_v22 = vpop.f32.mrb[178].mxu0  ;;  %v5578_v15 = vadd.f32 %v14539_v46, %v5577_v60 }
0x1313   : > { %v5580_v0 = vpop.f32.mrb[147].mxu1  ;;  %v5670_v39 = vpop.f32.mrb[179].mxu0  ;;  %v5679_v62 = vadd.f32 %v11967_v22, %v14530_v27  ;;  %v14608_v53 = vpack.c.bf16 %v5676_v47, %v5676_v47  ;;  %v5589_v31 = vadd.f32 %v11955_v29, %v14539_v46  ;;  %v14644_v8 = vpack.c.bf16 %v5586_v28, %v5586_v28 }
0x1314   : > { %v14582_v11 = vpack.c.bf16 %v5668_v43, %v5668_v43  ;;  %v5671_v52 = vadd.f32 %v14530_v27, %v5670_v39  ;;  %11995 = vmatmul.mubr.msk.bf16.vlgmr.msra.gmra.mrb[184].mxu0 %vm1172_vm3, %v14577_v57  ;;  %v5581_v41 = vadd.f32 %v14539_v46, %v5580_v0  ;;  %v14614_v9 = vpack.c.bf16 %v5578_v15, %v5578_v15 }
0x1315   : > { %12006 = vmatprep.mubr.msk.bf16.mxu0 %vm13034_vm2, %v15896_v13  ;;  %v14616_v5 = vpack.c.bf16 %v5679_v62, %v5679_v62  ;;  %v6124_v40 = vsel %vm1172_vm3, %v14608_v53, 0  ;;  %v14650_v25 = vpack.c.bf16 %v5589_v31, %v5589_v31 }
0x1316   : > { %v14590_v24 = vpack.c.bf16 %v5671_v52, %v5671_v52  ;;  %12001 = vmatmul.mubr.msk.bf16.vlgmr.msra.gmra.mrb[160].mxu1 %vm1172_vm3, %v14580_v36  ;;  %v6032_v33 = vsel %vm1172_vm3, %v14582_v11, 0  ;;  %v14618_v32 = vpack.c.bf16 %v5581_v41, %v5581_v41 }
0x1317   : > { %12005 = vmatpush3.bf16.xpose.msra.mxu0 %v6032_v33  ;;  %12012 = vmatprep.mubr.msk.bf16.mxu1 %vm13034_vm2, %v15896_v13  ;;  %v6170_v45 = vsel %vm1172_vm3, %v14616_v5, 0 }
0x1318   : > { %v11974_v44 = vpop.f32.mrb[148].mxu1  ;;  %v6078_v18 = vsel %vm1172_vm3, %v14590_v24, 0  ;;  %12016 = vmatprep.subr.bf16.mxu0 %v15896_v13 }
0x1319   : > { %v14606_v26 = vadd.f32 %v11974_v44, %v10875_v20  ;;  %v5741_v63 = vpop.f32.mrb[149].mxu1  ;;  %12011 = vmatpush3.bf16.xpose.msra.mxu1 %v6078_v18 }
0x131a   : > { %v11975_v50 = vpop.f32.mrb[150].mxu1  ;;  %12022 = vmatprep.subr.bf16.mxu1 %v15896_v13  ;;  %v5742_v51 = vadd.f32 %v10875_v20, %v5741_v63 }
0x131b   : > { %v14612_v6 = vadd.f32 %v11975_v50, %v10875_v20  ;;  %v5744_v27 = vpop.f32.mrb[151].mxu1 }
0x131c   : > { %v5745_v37 = vadd.f32 %v10875_v20, %v5744_v27  ;;  %v14637_v14 = vpack.c.bf16 %v5742_v51, %v5742_v51 }
0x131e   : > { %12007 = vmatmul.mubr.msk.bf16.vlgmr.msra.gmra.mrb[188].mxu0 %vm1172_vm3, %v14614_v9  ;;  %v14646_v34 = vpack.c.bf16 %v5745_v37, %v5745_v37  ;;  %v6328_v46 = vsel %vm1656_vm4, %v14637_v14, 0 }
0x131f   : > { %12017 = vmatpush3.bf16.xpose.msra.mxu0 %v6124_v40  ;;  %12018 = vmatprep.mubr.msk.bf16.mxu0 %vm13034_vm2, %v15896_v13 }
0x1320   : > { %v11978_v55 = vpop.f32.mrb[152].mxu1  ;;  %12013 = vmatmul.mubr.msk.bf16.vlgmr.msra.gmra.mrb[164].mxu1 %vm1172_vm3, %v14618_v32  ;;  %12028 = vmatprep.subr.bf16.mxu0 %v15896_v13  ;;  %v6374_v60 = vsel %vm1656_vm4, %v14646_v34, 0 }
0x1321   : > { %v14632_v30 = vadd.f32 %v11978_v55, %v10875_v20  ;;  %v5757_v1 = vpop.f32.mrb[153].mxu1  ;;  %12023 = vmatpush3.bf16.xpose.msra.mxu1 %v6170_v45  ;;  %12024 = vmatprep.mubr.msk.bf16.mxu1 %vm13034_vm2, %v15896_v13 }
0x1322   : > { %v14639_v42 = vadd.f32 %v10875_v20, %v5757_v1  ;;  %v11979_v59 = vpop.f32.mrb[154].mxu1  ;;  %12034 = vmatprep.subr.bf16.mxu1 %v15896_v13 }
0x1323   : > { %v14642_v48 = vadd.f32 %v11979_v59, %v10875_v20  ;;  %v5760_v49 = vpop.f32.mrb[155].mxu1 }
0x1324   : > { %v14648_v61 = vadd.f32 %v10875_v20, %v5760_v49 }
0x1326   : > { %12019 = vmatmul.mubr.msk.bf16.vlgmr.msra.gmra.mrb[192].mxu0 %vm1172_vm3, %v14644_v8 }
0x1327   : > { %12029 = vmatpush3.bf16.msra.mxu0 %v6328_v46  ;;  %12030 = vmatprep.mubr.msk.bf16.mxu0 %vm13034_vm2, %v15896_v13 }
0x1328   : > { %12025 = vmatmul.mubr.msk.bf16.vlgmr.msra.gmra.mrb[168].mxu1 %vm1172_vm3, %v14650_v25  ;;  %12040 = vmatprep.subr.bf16.mxu0 %v15896_v13 }
0x1329   : > { %12035 = vmatpush3.bf16.msra.mxu1 %v6374_v60  ;;  %12036 = vmatprep.mubr.msk.bf16.mxu1 %vm13034_vm2, %v15896_v13 }
0x132a   : > { %12046 = vmatprep.subr.bf16.mxu1 %v15896_v13 }
0x13df   : > { %v5884_v4 = vpop.f32.mrb[180].mxu0 }
0x13e0   : > { %v6212_v43 = vmul.f32 0.35355338, %v5884_v4  ;;  %v11984_v29 = vpop.f32.mrb[181].mxu0 }
0x13e1   : > { %v5887_v22 = vpop.f32.mrb[182].mxu0  ;;  %v5930_v0 = vpop.f32.mrb[156].mxu1 }
0x13e2   : > { %v6220_v39 = vadd.f32 %v6212_v43, %v13395_v12  ;;  %v6213_v52 = vmul.f32 0.35355338, %v5930_v0  ;;  %v11985_v47 = vpop.f32.mrb[183].mxu0  ;;  %v11990_v33 = vpop.f32.mrb[157].mxu1 }
0x13e3   : > { %v5933_v20 = vpop.f32.mrb[158].mxu1 }
0x13e4   : > { %v6221_v15 = vadd.f32 %v6213_v52, %v13395_v12  ;;  %v11991_v62 = vpop.f32.mrb[159].mxu1  ;;  %v6228_v44 = vsel %vm1172_vm3, %v6220_v39, -inf }
0x13e5   : > { %6229 = vmax.xlane.f32.xlu0 %v6228_v44 }
0x13e6   : > { %v6231_v18 = vsel %vm1172_vm3, %v6221_v15, -inf }
0x13e7   : > { %v5976_v63 = vpop.f32.mrb[184].mxu0  ;;  %6232 = vmax.xlane.f32.xlu1 %v6231_v18 }
0x13e8   : > { %v6214_v41 = vmul.f32 0.35355338, %v5976_v63  ;;  %v11996_v50 = vpop.f32.mrb[185].mxu0 }
0x13e9   : > { %v5979_v27 = vpop.f32.mrb[186].mxu0  ;;  %v6022_v51 = vpop.f32.mrb[160].mxu1 }
0x13ea   : > { %v6222_v40 = vadd.f32 %v6214_v41, %v13395_v12  ;;  %v6215_v28 = vmul.f32 0.35355338, %v6022_v51  ;;  %v11997_v37 = vpop.f32.mrb[187].mxu0  ;;  %v12002_v55 = vpop.f32.mrb[161].mxu1 }
0x13eb   : > { %v6025_v45 = vpop.f32.mrb[162].mxu1 }
0x13ec   : > { %v6223_v1 = vadd.f32 %v6215_v28, %v13395_v12  ;;  %v12003_v31 = vpop.f32.mrb[163].mxu1  ;;  %v6234_v59 = vsel %vm1172_vm3, %v6222_v40, -inf }
0x13ed   : > { %6235 = vmax.xlane.f32.xlu0 %v6234_v59 }
0x13ee   : > { %v6237_v49 = vsel %vm1172_vm3, %v6223_v1, -inf }
0x13ef   : > { %6238 = vmax.xlane.f32.xlu1 %v6237_v49 }
0x13f1   : > { %v6068_v46 = vpop.f32.mrb[188].mxu0 }
0x13f2   : > { %v6216_v60 = vmul.f32 0.35355338, %v6068_v46  ;;  %v12008_v4 = vpop.f32.mrb[189].mxu0 }
0x13f3   : > { %v6071_v43 = vpop.f32.mrb[190].mxu0  ;;  %v6114_v29 = vpop.f32.mrb[164].mxu1 }
0x13f4   : > { %v6224_v22 = vadd.f32 %v6216_v60, %v13395_v12  ;;  %v6217_v0 = vmul.f32 0.35355338, %v6114_v29  ;;  %v12009_v52 = vpop.f32.mrb[191].mxu0  ;;  %v12014_v47 = vpop.f32.mrb[165].mxu1 }
0x13f5   : > { %v6117_v33 = vpop.f32.mrb[166].mxu1 }
0x13f6   : > { %v6225_v20 = vadd.f32 %v6217_v0, %v13395_v12  ;;  %v12015_v62 = vpop.f32.mrb[167].mxu1  ;;  %v6240_v44 = vsel %vm1172_vm3, %v6224_v22, -inf }
0x13f7   : > { %6241 = vmax.xlane.f32.xlu0 %v6240_v44 }
0x13f8   : > { %v6243_v18 = vsel %vm1172_vm3, %v6225_v20, -inf }
0x13f9   : > { %6244 = vmax.xlane.f32.xlu1 %v6243_v18  ;;  %v6160_v63 = vpop.f32.mrb[192].mxu0 }
0x13fa   : > { %v6218_v41 = vmul.f32 0.35355338, %v6160_v63  ;;  %v12020_v50 = vpop.f32.mrb[193].mxu0 }
0x13fb   : > { %v6163_v27 = vpop.f32.mrb[194].mxu0  ;;  %v6206_v51 = vpop.f32.mrb[168].mxu1 }
0x13fc   : > { %v6226_v28 = vadd.f32 %v6218_v41, %v13395_v12  ;;  %v6219_v37 = vmul.f32 0.35355338, %v6206_v51  ;;  %v12021_v55 = vpop.f32.mrb[195].mxu0  ;;  %v12026_v45 = vpop.f32.mrb[169].mxu1 }
0x13fd   : > { %v6209_v31 = vpop.f32.mrb[170].mxu1 }
0x13fe   : > { %v6227_v59 = vadd.f32 %v6219_v37, %v13395_v12  ;;  %v12027_v49 = vpop.f32.mrb[171].mxu1  ;;  %v6246_v46 = vsel %vm1172_vm3, %v6226_v28, -inf }
0x13ff   : > { %6247 = vmax.xlane.f32.xlu0 %v6246_v46 }
0x1400   : > { %v6249_v60 = vsel %vm1172_vm3, %v6227_v59, -inf }
0x1401   : > { %6250 = vmax.xlane.f32.xlu1 %v6249_v60 }
0x1472   : > { %v6230_v4 = vpop.xlane.xlu0 %6229 }
0x1473   : > { %v6252_v43 = vsub.f32 %v6220_v39, %v6230_v4 }
0x1474   : > { %v6233_v29 = vpop.xlane.xlu1 %6232 }
0x1475   : > { %v6260_v0 = vmul.f32 1.442695, %v6252_v43  ;;  %v6253_v52 = vsub.f32 %v6221_v15, %v6233_v29 }
0x1477   : > { %12849 = vpow2.f32 %v6260_v0  ;;  %v6262_v47 = vmul.f32 1.442695, %v6253_v52 }
0x1479   : > { %12851 = vpow2.f32 %v6262_v47 }
0x147a   : > { %v6236_v33 = vpop.xlane.xlu0 %6235 }
0x147b   : > { %v6254_v62 = vsub.f32 %v6222_v40, %v6236_v33 }
0x147c   : > { %v6239_v44 = vpop.xlane.xlu1 %6238 }
0x147d   : > { %v6264_v18 = vmul.f32 1.442695, %v6254_v62  ;;  %v6255_v63 = vsub.f32 %v6223_v1, %v6239_v44 }
0x147f   : > { %12853 = vpow2.f32 %v6264_v18  ;;  %v6266_v41 = vmul.f32 1.442695, %v6255_v63  ;;  %v14752_v63 = vpack.c.bf16 %v14606_v26, %v14606_v26 }
0x1481   : > { %v14682_v50 = vpop.eup %12849  ;;  %12855 = vpow2.f32 %v6266_v41  ;;  %v14758_v41 = vpack.c.bf16 %v14612_v6, %v14612_v6  ;;  %v6420_v6 = vsel %vm1656_vm4, %v14752_v63, 0 }
0x1482   : > { %v6276_v27 = vsel %vm1172_vm3, %v14682_v50, 0.0 }
0x1483   : > { %v14686_v39 = vpop.eup %12851  ;;  %6277 = vadd.xlane.f32.xlu0 %v6276_v27 }
0x1484   : > { %v6242_v15 = vpop.xlane.xlu0 %6241  ;;  %v6279_v51 = vsel %vm1172_vm3, %v14686_v39, 0.0 }
0x1485   : > { %v6256_v37 = vsub.f32 %v6224_v22, %v6242_v15  ;;  %6280 = vadd.xlane.f32.xlu1 %v6279_v51 }
0x1486   : > { %v6245_v40 = vpop.xlane.xlu1 %6244 }
0x1487   : > { %v6268_v55 = vmul.f32 1.442695, %v6256_v37  ;;  %v6257_v1 = vsub.f32 %v6225_v20, %v6245_v40 }
0x1489   : > { %v14690_v45 = vpop.eup %12853  ;;  %12857 = vpow2.f32 %v6268_v55  ;;  %v6270_v31 = vmul.f32 1.442695, %v6257_v1 }
0x148a   : > { %v6282_v49 = vsel %vm1172_vm3, %v14690_v45, 0.0 }
0x148b   : > { %v14694_v46 = vpop.eup %12855  ;;  %12859 = vpow2.f32 %v6270_v31  ;;  %6283 = vadd.xlane.f32.xlu0 %v6282_v49 }
0x148c   : > { %v6248_v60 = vpop.xlane.xlu0 %6247  ;;  %v6285_v4 = vsel %vm1172_vm3, %v14694_v46, 0.0 }
0x148d   : > { %v6258_v22 = vsub.f32 %v6226_v28, %v6248_v60  ;;  %6286 = vadd.xlane.f32.xlu1 %v6285_v4  ;;  %v6466_v60 = vsel %vm1656_vm4, %v14758_v41, 0 }
0x148e   : > { %v6251_v33 = vpop.xlane.xlu1 %6250 }
0x148f   : > { %v6272_v43 = vmul.f32 1.442695, %v6258_v22  ;;  %v6259_v62 = vsub.f32 %v6227_v59, %v6251_v33 }
0x1491   : > { %12861 = vpow2.f32 %v6272_v43  ;;  %v6274_v44 = vmul.f32 1.442695, %v6259_v62 }
0x1493   : > { %v14698_v20 = vpop.eup %12857  ;;  %12863 = vpow2.f32 %v6274_v44  ;;  %v14800_v44 = vpack.c.bf16 %v14632_v30, %v14632_v30 }
0x1494   : > { %v6288_v29 = vsel %vm1172_vm3, %v14698_v20, 0.0 }
0x1495   : > { %v14702_v0 = vpop.eup %12859  ;;  %6289 = vadd.xlane.f32.xlu0 %v6288_v29 }
0x1496   : > { %v6291_v52 = vsel %vm1172_vm3, %v14702_v0, 0.0 }
0x1497   : > { %6292 = vadd.xlane.f32.xlu1 %v6291_v52  ;;  %v14783_v52 = vpack.c.bf16 %v14648_v61, %v14648_v61 }
0x149b   : > { %v14706_v47 = vpop.eup %12861 }
0x149c   : > { %v6294_v28 = vsel %vm1172_vm3, %v14706_v47, 0.0 }
0x149d   : > { %6295 = vadd.xlane.f32.xlu0 %v6294_v28  ;;  %v14728_v18 = vpop.eup %12863 }
0x149e   : > { %v6297_v59 = vsel %vm1172_vm3, %v14728_v18, 0.0 }
0x14a8   : > { %6744 = vrot.lane.b32.xlu1 %v14542_v2, %s13036_s29 }
0x14ac   : > { %6692 = vrot.lane.b32.xlu1 %v14555_v38, %s13036_s29 }
0x14b3   : > { %6694 = vrot.lane.b32.xlu0 %v14533_v35, %s13036_s29 }
0x14b7   : > { %6794 = vrot.lane.b32.xlu0 %v14551_v3, %s13036_s29 }
0x14bb   : > { %6792 = vrot.lane.b32.xlu0 %v14577_v57, %s13036_s29 }
0x14bf   : > { %6894 = vrot.lane.b32.xlu0 %v14582_v11, %s13036_s29 }
0x14c3   : > { %6892 = vrot.lane.b32.xlu0 %v14614_v9, %s13036_s29 }
0x14c7   : > { %6994 = vrot.lane.b32.xlu0 %v14608_v53, %s13036_s29 }
0x14cb   : > { %6992 = vrot.lane.b32.xlu0 %v14644_v8, %s13036_s29 }
0x14cf   : > { %7204 = vrot.lane.b32.xlu0 %v14637_v14, %s13036_s29 }
0x14d0   : > { %6298 = vadd.xlane.f32.xlu1 %v6297_v59 }
0x14e1   : > { %6742 = vrot.lane.b32.xlu1 %v14559_v58, %s13036_s29 }
0x14e5   : > { %6844 = vrot.lane.b32.xlu1 %v14557_v21, %s13036_s29 }
0x14e9   : > { %6842 = vrot.lane.b32.xlu1 %v14580_v36, %s13036_s29 }
0x14ed   : > { %6944 = vrot.lane.b32.xlu1 %v14590_v24, %s13036_s29 }
0x14f1   : > { %6942 = vrot.lane.b32.xlu1 %v14618_v32, %s13036_s29 }
0x14f5   : > { %7044 = vrot.lane.b32.xlu1 %v14616_v5, %s13036_s29 }
0x14f9   : > { %7042 = vrot.lane.b32.xlu1 %v14650_v25, %s13036_s29 }
0x14fd   : > { %7252 = vrot.lane.b32.xlu1 %v14646_v34, %s13036_s29 }
0x1501   : > { %7300 = vrot.lane.b32.xlu1 %v14752_v63, %s13036_s29 }
0x1505   : > { %7348 = vrot.lane.b32.xlu1 %v14758_v41, %s13036_s29 }
0x1510   : > { %v6278_v27 = vpop.xlane.xlu0 %6277 }
0x1511   : > { %12865 = vrcp.f32 %v6278_v27 }
0x1512   : > { %v6281_v15 = vpop.xlane.xlu1 %6280 }
0x1513   : > { %12867 = vrcp.f32 %v6281_v15 }
0x1518   : > { %v6284_v51 = vpop.xlane.xlu0 %6283 }
0x1519   : > { %12869 = vrcp.f32 %v6284_v51  ;;  %v14805_v51 = vpack.c.bf16 %v14642_v48, %v14642_v48 }
0x151a   : > { %v6287_v37 = vpop.xlane.xlu1 %6286 }
0x151b   : > { %v12866_v40 = vpop.eup %12865  ;;  %12871 = vrcp.f32 %v6287_v37  ;;  %v6650_v48 = vsel %vm1656_vm4, %v14805_v51, 0 }
0x151c   : > { %v6308_v26 = vmul.f32 %v12866_v40, %v14682_v50 }
0x151d   : > { %v12868_v55 = vpop.eup %12867 }
0x151e   : > { %v6316_v1 = vpack.c.bf16 %v6308_v26, %v6308_v26  ;;  %v6309_v31 = vmul.f32 %v12868_v55, %v14686_v39  ;;  %v14777_v39 = vpack.c.bf16 %v14639_v42, %v14639_v42  ;;  %v6604_v26 = vsel %vm1656_vm4, %v14800_v44, 0 }
0x1520   : > { %12031 = vmatmul.mubr.msk.bf16.vlgmr.msra.gmra.mrb[196].mxu0 %vm1172_vm3, %v6316_v1  ;;  %v6317_v49 = vpack.c.bf16 %v6309_v31, %v6309_v31  ;;  %v6512_v42 = vsel %vm1656_vm4, %v14777_v39, 0 }
0x1521   : > { %12041 = vmatpush3.bf16.msra.mxu0 %v6420_v6  ;;  %12042 = vmatprep.mubr.msk.bf16.mxu0 %vm13034_vm2, %v15896_v13 }
0x1522   : > { %12037 = vmatmul.mubr.msk.bf16.vlgmr.msra.gmra.mrb[172].mxu1 %vm1172_vm3, %v6317_v49  ;;  %v6290_v50 = vpop.xlane.xlu0 %6289  ;;  %12052 = vmatprep.subr.bf16.mxu0 %v15896_v13 }
0x1523   : > { %v12870_v4 = vpop.eup %12869  ;;  %12047 = vmatpush3.bf16.msra.mxu1 %v6466_v60  ;;  %12873 = vrcp.f32 %v6290_v50  ;;  %12048 = vmatprep.mubr.msk.bf16.mxu1 %vm13034_vm2, %v15896_v13 }
0x1524   : > { %v6293_v22 = vpop.xlane.xlu1 %6292  ;;  %v6310_v43 = vmul.f32 %v12870_v4, %v14690_v45  ;;  %12058 = vmatprep.subr.bf16.mxu1 %v15896_v13  ;;  %v6558_v45 = vsel %vm1656_vm4, %v14783_v52, 0 }
0x1525   : > { %v12872_v29 = vpop.eup %12871  ;;  %12875 = vrcp.f32 %v6293_v22 }
0x1526   : > { %v6318_v28 = vpack.c.bf16 %v6310_v43, %v6310_v43  ;;  %v6311_v33 = vmul.f32 %v12872_v29, %v14694_v46 }
0x1528   : > { %12043 = vmatmul.mubr.msk.bf16.vlgmr.msra.gmra.mrb[200].mxu0 %vm1172_vm3, %v6318_v28  ;;  %v6319_v62 = vpack.c.bf16 %v6311_v33, %v6311_v33  ;;  %v6745_v49 = vpop.permute.xlu1 %6744 }
0x1529   : > { %12053 = vmatpush3.bf16.msra.mxu0 %v6512_v42  ;;  %12054 = vmatprep.mubr.msk.bf16.mxu0 %vm13034_vm2, %v15896_v13 }
0x152a   : > { %12049 = vmatmul.mubr.msk.bf16.vlgmr.msra.gmra.mrb[176].mxu1 %vm1172_vm3, %v6319_v62  ;;  %v6296_v61 = vpop.xlane.xlu0 %6295  ;;  %12064 = vmatprep.subr.bf16.mxu0 %v15896_v13 }
0x152b   : > { %12059 = vmatpush3.bf16.msra.mxu1 %v6558_v45  ;;  %12877 = vrcp.f32 %v6296_v61  ;;  %12060 = vmatprep.mubr.msk.bf16.mxu1 %vm13034_vm2, %v15896_v13 }
0x152c   : > { %12070 = vmatprep.subr.bf16.mxu1 %v15896_v13  ;;  %v6693_v50 = vpop.permute.xlu1 %6692 }
0x152d   : > { %v12874_v46 = vpop.eup %12873 }
0x152e   : > { %v6695_v59 = vpop.permute.xlu0 %6694  ;;  %v6312_v27 = vmul.f32 %v12874_v46, %v14698_v20 }
0x152f   : > { %v12876_v15 = vpop.eup %12875  ;;  %v6700_v6 = vsel %vm1172_vm3, %v6695_v59, 0 }
0x1530   : > { %v6320_v37 = vpack.c.bf16 %v6312_v27, %v6312_v27  ;;  %v6313_v40 = vmul.f32 %v12876_v15, %v14702_v0 }
0x1532   : > { %12055 = vmatmul.mubr.msk.bf16.vlgmr.msra.gmra.mrb[204].mxu0 %vm1172_vm3, %v6320_v37  ;;  %v6321_v55 = vpack.c.bf16 %v6313_v40, %v6313_v40  ;;  %v6795_v30 = vpop.permute.xlu0 %6794  ;;  %v6750_v37 = vsel %vm1172_vm3, %v6745_v49, 0 }
0x1533   : > { %12065 = vmatpush3.bf16.msra.mxu0 %v6604_v26  ;;  %12066 = vmatprep.mubr.msk.bf16.mxu0 %vm13034_vm2, %v15896_v13  ;;  %v6800_v4 = vsel %vm1172_vm3, %v6795_v30, 0 }
0x1534   : > { %12061 = vmatmul.mubr.msk.bf16.vlgmr.msra.gmra.mrb[180].mxu1 %vm1172_vm3, %v6321_v55  ;;  %12076 = vmatprep.subr.bf16.mxu0 %v15896_v13 }
0x1535   : > { %v12878_v20 = vpop.eup %12877  ;;  %12071 = vmatpush3.bf16.msra.mxu1 %v6650_v48  ;;  %12072 = vmatprep.mubr.msk.bf16.mxu1 %vm13034_vm2, %v15896_v13 }
0x1536   : > { %v6314_v0 = vmul.f32 %v12878_v20, %v14706_v47  ;;  %12082 = vmatprep.subr.bf16.mxu1 %v15896_v13  ;;  %v6793_v31 = vpop.permute.xlu0 %6792 }
0x1538   : > { %v6322_v1 = vpack.c.bf16 %v6314_v0, %v6314_v0 }
0x153a   : > { %12067 = vmatmul.mubr.msk.bf16.vlgmr.msra.gmra.mrb[208].mxu0 %vm1172_vm3, %v6322_v1  ;;  %v6895_v60 = vpop.permute.xlu0 %6894 }
0x153b   : > { %12078 = vmatprep.mubr.msk.bf16.mxu0 %vm13034_vm2, %v15896_v13  ;;  %v6900_v22 = vsel %vm1172_vm3, %v6895_v60, 0 }
0x153c   : > { %12077 = vmatpush3.bf16.xpose.msra.mxu0 %v6700_v6 }
0x153d   : > { %12088 = vmatprep.subr.bf16.mxu0 %v15896_v13 }
0x153e   : > { %v6893_v47 = vpop.permute.xlu0 %6892 }
0x1542   : > { %v6995_v43 = vpop.permute.xlu0 %6994 }
0x1543   : > { %12079 = vmatmul.mubr.msk.bf16.vlgmr.msra.gmra.mrb[212].mxu0 %vm1172_vm3, %v6693_v50  ;;  %v7000_v28 = vsel %vm1172_vm3, %v6995_v43, 0 }
0x1544   : > { %12089 = vmatpush3.bf16.xpose.msra.mxu0 %v6800_v4  ;;  %12090 = vmatprep.mubr.msk.bf16.mxu0 %vm13034_vm2, %v15896_v13 }
0x1545   : > { %12100 = vmatprep.subr.bf16.mxu0 %v15896_v13 }
0x1546   : > { %v6993_v29 = vpop.permute.xlu0 %6992 }
0x154a   : > { %v7205_v33 = vpop.permute.xlu0 %7204 }
0x154b   : > { %12091 = vmatmul.mubr.msk.bf16.vlgmr.msra.gmra.mrb[216].mxu0 %vm1172_vm3, %v6793_v31  ;;  %v7210_v42 = vsel %vm1656_vm4, %v7205_v33, 0 }
0x154c   : > { %12101 = vmatpush3.bf16.xpose.msra.mxu0 %v6900_v22  ;;  %12102 = vmatprep.mubr.msk.bf16.mxu0 %vm13034_vm2, %v15896_v13 }
0x154d   : > { %12112 = vmatprep.subr.bf16.mxu0 %v15896_v13 }
0x1553   : > { %12103 = vmatmul.mubr.msk.bf16.vlgmr.msra.gmra.mrb[220].mxu0 %vm1172_vm3, %v6893_v47 }
0x1554   : > { %12113 = vmatpush3.bf16.xpose.msra.mxu0 %v7000_v28  ;;  %12114 = vmatprep.mubr.msk.bf16.mxu0 %vm13034_vm2, %v15896_v13 }
0x1555   : > { %12124 = vmatprep.subr.bf16.mxu0 %v15896_v13 }
0x155b   : > { %12115 = vmatmul.mubr.msk.bf16.vlgmr.msra.gmra.mrb[224].mxu0 %vm1172_vm3, %v6993_v29 }
0x155c   : > { %12125 = vmatpush3.bf16.msra.mxu0 %v7210_v42  ;;  %12126 = vmatprep.mubr.msk.bf16.mxu0 %vm13034_vm2, %v15896_v13 }
0x155d   : > { %v6299_v62 = vpop.xlane.xlu1 %6298  ;;  %12136 = vmatprep.subr.bf16.mxu0 %v15896_v13 }
0x155e   : > { %12879 = vrcp.f32 %v6299_v62 }
0x1561   : > { %v6743_v45 = vpop.permute.xlu1 %6742 }
0x1565   : > { %v6845_v61 = vpop.permute.xlu1 %6844 }
0x1566   : > { %v6850_v26 = vsel %vm1172_vm3, %v6845_v61, 0 }
0x1568   : > { %v12880_v46 = vpop.eup %12879 }
0x1569   : > { %v6315_v59 = vmul.f32 %v12880_v46, %v14728_v18  ;;  %v6843_v15 = vpop.permute.xlu1 %6842 }
0x156b   : > { %v6323_v27 = vpack.c.bf16 %v6315_v59, %v6315_v59 }
0x156d   : > { %12073 = vmatmul.mubr.msk.bf16.vlgmr.msra.gmra.mrb[184].mxu1 %vm1172_vm3, %v6323_v27  ;;  %v6945_v40 = vpop.permute.xlu1 %6944 }
0x156e   : > { %12083 = vmatpush3.bf16.xpose.msra.mxu1 %v6750_v37  ;;  %12084 = vmatprep.mubr.msk.bf16.mxu1 %vm13034_vm2, %v15896_v13  ;;  %v6950_v55 = vsel %vm1172_vm3, %v6945_v40, 0 }
0x156f   : > { %12094 = vmatprep.subr.bf16.mxu1 %v15896_v13 }
0x1571   : > { %v6943_v18 = vpop.permute.xlu1 %6942 }
0x1575   : > { %12085 = vmatmul.mubr.msk.bf16.vlgmr.msra.gmra.mrb[188].mxu1 %vm1172_vm3, %v6743_v45  ;;  %v7045_v30 = vpop.permute.xlu1 %7044 }
0x1576   : > { %12095 = vmatpush3.bf16.xpose.msra.mxu1 %v6850_v26  ;;  %12096 = vmatprep.mubr.msk.bf16.mxu1 %vm13034_vm2, %v15896_v13  ;;  %v7050_v20 = vsel %vm1172_vm3, %v7045_v30, 0 }
0x1577   : > { %12106 = vmatprep.subr.bf16.mxu1 %v15896_v13 }
0x1579   : > { %v7043_v48 = vpop.permute.xlu1 %7042 }
0x157d   : > { %12097 = vmatmul.mubr.msk.bf16.vlgmr.msra.gmra.mrb[192].mxu1 %vm1172_vm3, %v6843_v15  ;;  %v7253_v0 = vpop.permute.xlu1 %7252 }
0x157e   : > { %12107 = vmatpush3.bf16.xpose.msra.mxu1 %v6950_v55  ;;  %12108 = vmatprep.mubr.msk.bf16.mxu1 %vm13034_vm2, %v15896_v13  ;;  %v7258_v1 = vsel %vm1656_vm4, %v7253_v0, 0 }
0x157f   : > { %12118 = vmatprep.subr.bf16.mxu1 %v15896_v13 }
0x1585   : > { %12109 = vmatmul.mubr.msk.bf16.vlgmr.msra.gmra.mrb[196].mxu1 %vm1172_vm3, %v6943_v18 }
0x1586   : > { %12119 = vmatpush3.bf16.xpose.msra.mxu1 %v7050_v20  ;;  %12120 = vmatprep.mubr.msk.bf16.mxu1 %vm13034_vm2, %v15896_v13 }
0x1587   : > { %12130 = vmatprep.subr.bf16.mxu1 %v15896_v13 }
0x158d   : > { %12121 = vmatmul.mubr.msk.bf16.vlgmr.msra.gmra.mrb[200].mxu1 %vm1172_vm3, %v7043_v48 }
0x158e   : > { %12131 = vmatpush3.bf16.msra.mxu1 %v7258_v1  ;;  %12132 = vmatprep.mubr.msk.bf16.mxu1 %vm13034_vm2, %v15896_v13 }
0x158f   : > { %12142 = vmatprep.subr.bf16.mxu1 %v15896_v13 }
0x15f3   : > { %v14872_v31 = vpop.f32.mrb[196].mxu0 }
0x15f4   : > { %v12032_v6 = vpop.f32.mrb[197].mxu0 }
0x15f5   : > { %v6367_v49 = vpop.f32.mrb[198].mxu0  ;;  %v14874_v60 = vpop.f32.mrb[172].mxu1 }
0x15f6   : > { %v12033_v50 = vpop.f32.mrb[199].mxu0  ;;  %v12038_v4 = vpop.f32.mrb[173].mxu1 }
0x15f7   : > { %v6413_v47 = vpop.f32.mrb[174].mxu1 }
0x15f8   : > { %v12039_v22 = vpop.f32.mrb[175].mxu1 }
0x15fb   : > { %v14876_v43 = vpop.f32.mrb[200].mxu0 }
0x15fc   : > { %v12044_v29 = vpop.f32.mrb[201].mxu0 }
0x15fd   : > { %v6459_v28 = vpop.f32.mrb[202].mxu0  ;;  %v14878_v33 = vpop.f32.mrb[176].mxu1 }
0x15fe   : > { %v12045_v42 = vpop.f32.mrb[203].mxu0  ;;  %v12050_v62 = vpop.f32.mrb[177].mxu1 }
0x15ff   : > { %v6505_v45 = vpop.f32.mrb[178].mxu1 }
0x1600   : > { %v12051_v61 = vpop.f32.mrb[179].mxu1 }
0x1605   : > { %v14880_v46 = vpop.f32.mrb[204].mxu0 }
0x1606   : > { %v12056_v59 = vpop.f32.mrb[205].mxu0 }
0x1607   : > { %v6551_v27 = vpop.f32.mrb[206].mxu0  ;;  %v14882_v15 = vpop.f32.mrb[180].mxu1 }
0x1608   : > { %v12057_v37 = vpop.f32.mrb[207].mxu0  ;;  %v12062_v40 = vpop.f32.mrb[181].mxu1 }
0x1609   : > { %v6597_v26 = vpop.f32.mrb[182].mxu1 }
0x160a   : > { %v12063_v18 = vpop.f32.mrb[183].mxu1 }
0x160d   : > { %v14884_v55 = vpop.f32.mrb[208].mxu0 }
0x160e   : > { %v12068_v30 = vpop.f32.mrb[209].mxu0 }
0x160f   : > { %v6643_v48 = vpop.f32.mrb[210].mxu0 }
0x1610   : > { %v12069_v20 = vpop.f32.mrb[211].mxu0 }
0x1616   : > { %v6736_v0 = vpop.f32.mrb[212].mxu0 }
0x1617   : > { %v7092_v1 = vmul.f32 0.35355338, %v6736_v0  ;;  %v12080_v6 = vpop.f32.mrb[213].mxu0 }
0x1618   : > { %v6739_v49 = vpop.f32.mrb[214].mxu0 }
0x1619   : > { %v14887_v50 = vadd.f32 %v7092_v1, %v13395_v12  ;;  %v12081_v4 = vpop.f32.mrb[215].mxu0 }
0x161b   : > { %v7108_v47 = vsel %vm1172_vm3, %v14887_v50, -inf }
0x161c   : > { %7109 = vmax.xlane.f32.xlu0 %v7108_v47 }
0x161e   : > { %v6836_v22 = vpop.f32.mrb[216].mxu0 }
0x161f   : > { %v7094_v29 = vmul.f32 0.35355338, %v6836_v22  ;;  %v12092_v28 = vpop.f32.mrb[217].mxu0 }
0x1620   : > { %v6839_v42 = vpop.f32.mrb[218].mxu0 }
0x1621   : > { %v14892_v62 = vadd.f32 %v7094_v29, %v13395_v12  ;;  %v12093_v45 = vpop.f32.mrb[219].mxu0 }
0x1623   : > { %v7114_v61 = vsel %vm1172_vm3, %v14892_v62, -inf }
0x1624   : > { %7115 = vmax.xlane.f32.xlu0 %v7114_v61 }
0x1626   : > { %v6936_v59 = vpop.f32.mrb[220].mxu0 }
0x1627   : > { %v12104_v27 = vpop.f32.mrb[221].mxu0  ;;  %v7096_v61 = vmul.f32 0.35355338, %v6936_v59 }
0x1628   : > { %v6939_v37 = vpop.f32.mrb[222].mxu0 }
0x1629   : > { %v12105_v40 = vpop.f32.mrb[223].mxu0 }
0x162e   : > { %v7036_v26 = vpop.f32.mrb[224].mxu0 }
0x162f   : > { %v12116_v18 = vpop.f32.mrb[225].mxu0 }
0x1630   : > { %v7039_v30 = vpop.f32.mrb[226].mxu0 }
0x1631   : > { %v12117_v48 = vpop.f32.mrb[227].mxu0 }
0x1632   : > { %v7104_v48 = vadd.f32 %v7096_v61, %v13395_v12 }
0x1634   : > { %v7120_v59 = vsel %vm1172_vm3, %v7104_v48, -inf }
0x1640   : > { %v14896_v20 = vpop.f32.mrb[184].mxu1 }
0x1641   : > { %v12074_v0 = vpop.f32.mrb[185].mxu1 }
0x1642   : > { %v6689_v1 = vpop.f32.mrb[186].mxu1  ;;  %v7098_v0 = vmul.f32 0.35355338, %v7036_v26 }
0x1643   : > { %v12075_v6 = vpop.f32.mrb[187].mxu1 }
0x1648   : > { %v6786_v49 = vpop.f32.mrb[188].mxu1 }
0x1649   : > { %v7093_v4 = vmul.f32 0.35355338, %v6786_v49  ;;  %v12086_v47 = vpop.f32.mrb[189].mxu1  ;;  %v14904_v49 = vadd.f32 %v7098_v0, %v13395_v12 }
0x164a   : > { %v6789_v22 = vpop.f32.mrb[190].mxu1 }
0x164b   : > { %v7101_v29 = vadd.f32 %v7093_v4, %v13395_v12  ;;  %v12087_v28 = vpop.f32.mrb[191].mxu1  ;;  %v7126_v26 = vsel %vm1172_vm3, %v14904_v49, -inf }
0x164d   : > { %v7111_v42 = vsel %vm1172_vm3, %v7101_v29, -inf }
0x164e   : > { %7112 = vmax.xlane.f32.xlu1 %v7111_v42 }
0x1650   : > { %v6886_v45 = vpop.f32.mrb[192].mxu1 }
0x1651   : > { %v7095_v27 = vmul.f32 0.35355338, %v6886_v45  ;;  %v12098_v37 = vpop.f32.mrb[193].mxu1 }
0x1652   : > { %v6889_v40 = vpop.f32.mrb[194].mxu1 }
0x1653   : > { %v7103_v18 = vadd.f32 %v7095_v27, %v13395_v12  ;;  %v12099_v30 = vpop.f32.mrb[195].mxu1 }
0x1655   : > { %v7117_v1 = vsel %vm1172_vm3, %v7103_v18, -inf }
0x1656   : > { %7118 = vmax.xlane.f32.xlu0 %v7117_v1 }
0x1658   : > { %v6986_v6 = vpop.f32.mrb[196].mxu1 }
0x1659   : > { %v7097_v4 = vmul.f32 0.35355338, %v6986_v6  ;;  %v12110_v47 = vpop.f32.mrb[197].mxu1 }
0x165a   : > { %v6989_v22 = vpop.f32.mrb[198].mxu1  ;;  %7121 = vmax.xlane.f32.xlu0 %v7120_v59 }
0x165b   : > { %v7105_v28 = vadd.f32 %v7097_v4, %v13395_v12  ;;  %v12111_v42 = vpop.f32.mrb[199].mxu1 }
0x165d   : > { %v7123_v45 = vsel %vm1172_vm3, %v7105_v28, -inf }
0x165e   : > { %7124 = vmax.xlane.f32.xlu1 %v7123_v45  ;;  %7127 = vmax.xlane.f32.xlu0 %v7126_v26 }
0x1660   : > { %v7086_v61 = vpop.f32.mrb[200].mxu1 }
0x1661   : > { %v12122_v27 = vpop.f32.mrb[201].mxu1  ;;  %v7099_v30 = vmul.f32 0.35355338, %v7086_v61 }
0x1662   : > { %v7089_v37 = vpop.f32.mrb[202].mxu1 }
0x1663   : > { %v12123_v40 = vpop.f32.mrb[203].mxu1  ;;  %v14916_v0 = vadd.f32 %v7099_v30, %v13395_v12  ;;  %v7301_v37 = vpop.permute.xlu1 %7300 }
0x1665   : > { %v7129_v1 = vsel %vm1172_vm3, %v14916_v0, -inf }
0x1667   : > { %v14927_v40 = vpop.permute.xlu1 %7348 }
0x166f   : > { %7444 = vrot.lane.b32.xlu1 %v14783_v52, %s13036_s29 }
0x1674   : > { %7396 = vrot.lane.b32.xlu0 %v14777_v39, %s13036_s29 }
0x1693   : > { %7130 = vmax.xlane.f32.xlu1 %v7129_v1 }
0x16a9   : > { %v7110_v6 = vpop.xlane.xlu0 %7109 }
0x16aa   : > { %v7132_v4 = vsub.f32 %v14887_v50, %v7110_v6 }
0x16ac   : > { %v7140_v47 = vmul.f32 1.442695, %v7132_v4 }
0x16ae   : > { %12881 = vpow2.f32 %v7140_v47 }
0x16b1   : > { %v7116_v59 = vpop.xlane.xlu0 %7115 }
0x16b2   : > { %v7134_v22 = vsub.f32 %v14892_v62, %v7116_v59 }
0x16b4   : > { %v7144_v42 = vmul.f32 1.442695, %v7134_v22 }
0x16b6   : > { %12883 = vpow2.f32 %v7144_v42 }
0x16b8   : > { %v12882_v45 = vpop.eup %12881 }
0x16b9   : > { %v7156_v26 = vsel %vm1172_vm3, %v12882_v45, 0.0 }
0x16ba   : > { %7157 = vadd.xlane.f32.xlu0 %v7156_v26 }
0x16c0   : > { %v14923_v61 = vpop.eup %12883 }
0x16c1   : > { %v7162_v27 = vsel %vm1172_vm3, %v14923_v61, 0.0 }
0x16c2   : > { %7163 = vadd.xlane.f32.xlu0 %v7162_v27 }
0x16db   : > { %v7113_v50 = vpop.xlane.xlu1 %7112 }
0x16dc   : > { %v7133_v30 = vsub.f32 %v7101_v29, %v7113_v50 }
0x16de   : > { %v7142_v1 = vmul.f32 1.442695, %v7133_v30 }
0x16e0   : > { %12885 = vpow2.f32 %v7142_v1 }
0x16e3   : > { %v7119_v62 = vpop.xlane.xlu0 %7118 }
0x16e4   : > { %v7135_v6 = vsub.f32 %v7103_v18, %v7119_v62 }
0x16e6   : > { %v7146_v4 = vmul.f32 1.442695, %v7135_v6 }
0x16e7   : > { %v7122_v47 = vpop.xlane.xlu0 %7121 }
0x16e8   : > { %12887 = vpow2.f32 %v7146_v4  ;;  %v7136_v59 = vsub.f32 %v7104_v48, %v7122_v47 }
0x16ea   : > { %v14929_v22 = vpop.eup %12885  ;;  %v7148_v42 = vmul.f32 1.442695, %v7136_v59 }
0x16eb   : > { %v7159_v26 = vsel %vm1172_vm3, %v14929_v22, 0.0  ;;  %v7125_v48 = vpop.xlane.xlu1 %7124  ;;  %v7128_v1 = vpop.xlane.xlu0 %7127 }
0x16ec   : > { %12889 = vpow2.f32 %v7148_v42  ;;  %7160 = vadd.xlane.f32.xlu1 %v7159_v26  ;;  %v7137_v30 = vsub.f32 %v7105_v28, %v7125_v48  ;;  %v7138_v6 = vsub.f32 %v14904_v49, %v7128_v1 }
0x16ee   : > { %v7150_v62 = vmul.f32 1.442695, %v7137_v30  ;;  %v7152_v4 = vmul.f32 1.442695, %v7138_v6 }
0x16ef   : > { %v14956_v28 = vpop.permute.xlu1 %7444  ;;  %v7397_v49 = vpop.permute.xlu0 %7396 }
0x16f0   : > { %12891 = vpow2.f32 %v7150_v62 }
0x16f1   : > { %12893 = vpow2.f32 %v7152_v4  ;;  %v7306_v4 = vsel %vm1656_vm4, %v7301_v37, 0 }
0x16f2   : > { %v14933_v27 = vpop.eup %12887 }
0x16f3   : > { %v7165_v29 = vsel %vm1172_vm3, %v14933_v27, 0.0 }
0x16f4   : > { %7166 = vadd.xlane.f32.xlu1 %v7165_v29 }
0x16f6   : > { %v14937_v50 = vpop.eup %12889 }
0x16f7   : > { %v7168_v18 = vsel %vm1172_vm3, %v14937_v50, 0.0 }
0x16f8   : > { %7169 = vadd.xlane.f32.xlu0 %v7168_v18 }
0x16fa   : > { %v14946_v47 = vpop.eup %12891 }
0x16fb   : > { %v7171_v59 = vsel %vm1172_vm3, %v14946_v47, 0.0  ;;  %v14950_v42 = vpop.eup %12893 }
0x16fc   : > { %v7174_v26 = vsel %vm1172_vm3, %v14950_v42, 0.0 }
0x1705   : > { %7540 = vrot.lane.b32.xlu1 %v14805_v51, %s13036_s29 }
0x170e   : > { %7492 = vrot.lane.b32.xlu0 %v14800_v44, %s13036_s29  ;;  %s15916_s29 = smov 104  }
0x1720   : > { %v7131_v29 = vpop.xlane.xlu1 %7130 }
0x1721   : > { %v7139_v18 = vsub.f32 %v14916_v0, %v7131_v29 }
0x1723   : > { %v7154_v30 = vmul.f32 1.442695, %v7139_v18  ;;  %v7402_v18 = vsel %vm1656_vm4, %v7397_v49, 0 }
0x1729   : > { %7172 = vadd.xlane.f32.xlu1 %v7171_v59 }
0x172d   : > { %7175 = vadd.xlane.f32.xlu0 %v7174_v26 }
0x173a   : > { %7640 = vrot.lane.b32.xlu1 %v14542_v2, %s13037_s30 }
0x1743   : > { %7590 = vrot.lane.b32.xlu0 %v14533_v35, %s13037_s30 }
0x1747   : > { %v7158_v48 = vpop.xlane.xlu0 %7157  ;;  %7588 = vrot.lane.b32.xlu0 %v14555_v38, %s13037_s30 }
0x1748   : > { %12895 = vrcp.f32 %v7158_v48 }
0x1749   : > { %12897 = vpow2.f32 %v7154_v30 }
0x174b   : > { %7690 = vrot.lane.b32.xlu0 %v14551_v3, %s13037_s30 }
0x174f   : > { %v7164_v1 = vpop.xlane.xlu0 %7163  ;;  %7688 = vrot.lane.b32.xlu0 %v14577_v57, %s13037_s30 }
0x1750   : > { %12899 = vrcp.f32 %v7164_v1 }
0x1752   : > { %v12896_v62 = vpop.eup %12895 }
0x1753   : > { %7790 = vrot.lane.b32.xlu0 %v14582_v11, %s13037_s30  ;;  %v7188_v0 = vmul.f32 %v12896_v62, %v12882_v45  ;;  %v14975_v59 = vpop.eup %12897 }
0x1754   : > { %v7177_v37 = vsel %vm1172_vm3, %v14975_v59, 0.0 }
0x1755   : > { %v7196_v6 = vpack.c.bf16 %v7188_v0, %v7188_v0  ;;  %v7354_v0 = vsel %vm1656_vm4, %v14927_v40, 0  ;;  %v7450_v40 = vsel %vm1656_vm4, %v14956_v28, 0 }
0x1757   : > { %12127 = vmatmul.mubr.msk.bf16.vlgmr.msra.gmra.mrb[228].mxu0 %vm1172_vm3, %v7196_v6  ;;  %7788 = vrot.lane.b32.xlu0 %v14614_v9, %s13037_s30 }
0x1758   : > { %12137 = vmatpush3.bf16.msra.mxu0 %v7306_v4  ;;  %12138 = vmatprep.mubr.msk.bf16.mxu0 %vm13034_vm2, %v15896_v13 }
0x1759   : > { %12148 = vmatprep.subr.bf16.mxu0 %v15896_v13 }
0x175a   : > { %v12900_v26 = vpop.eup %12899 }
0x175b   : > { %7890 = vrot.lane.b32.xlu0 %v14608_v53, %s13037_s30  ;;  %v7190_v45 = vmul.f32 %v12900_v26, %v14923_v61 }
0x175d   : > { %v7198_v29 = vpack.c.bf16 %v7190_v45, %v7190_v45 }
0x175e   : > { %7178 = vadd.xlane.f32.xlu1 %v7177_v37 }
0x175f   : > { %12139 = vmatmul.mubr.msk.bf16.vlgmr.msra.gmra.mrb[232].mxu0 %vm1172_vm3, %v7198_v29  ;;  %7888 = vrot.lane.b32.xlu0 %v14644_v8, %s13037_s30 }
0x1760   : > { %12149 = vmatpush3.bf16.msra.mxu0 %v7402_v18  ;;  %12150 = vmatprep.mubr.msk.bf16.mxu0 %vm13034_vm2, %v15896_v13 }
0x1761   : > { %12160 = vmatprep.subr.bf16.mxu0 %v15896_v13 }
0x1763   : > { %8100 = vrot.lane.b32.xlu0 %v14637_v14, %s13037_s30 }
0x176f   : > { %7638 = vrot.lane.b32.xlu1 %v14559_v58, %s13037_s30 }
0x1773   : > { %7740 = vrot.lane.b32.xlu1 %v14557_v21, %s13037_s30 }
0x1777   : > { %7738 = vrot.lane.b32.xlu1 %v14580_v36, %s13037_s30 }
0x1779   : > { %v7161_v61 = vpop.xlane.xlu1 %7160 }
0x177a   : > { %12901 = vrcp.f32 %v7161_v61 }
0x177b   : > { %7840 = vrot.lane.b32.xlu1 %v14590_v24, %s13037_s30 }
0x177f   : > { %7838 = vrot.lane.b32.xlu1 %v14618_v32, %s13037_s30 }
0x1781   : > { %v7167_v49 = vpop.xlane.xlu1 %7166 }
0x1782   : > { %12903 = vrcp.f32 %v7167_v49 }
0x1783   : > { %7940 = vrot.lane.b32.xlu1 %v14616_v5, %s13037_s30 }
0x1784   : > { %v12902_v48 = vpop.eup %12901 }
0x1785   : > { %v7170_v30 = vpop.xlane.xlu0 %7169  ;;  %v7189_v1 = vmul.f32 %v12902_v48, %v14929_v22 }
0x1786   : > { %12905 = vrcp.f32 %v7170_v30 }
0x1787   : > { %7938 = vrot.lane.b32.xlu1 %v14650_v25, %s13037_s30  ;;  %v7197_v62 = vpack.c.bf16 %v7189_v1, %v7189_v1 }
0x1789   : > { %12133 = vmatmul.mubr.msk.bf16.vlgmr.msra.gmra.mrb[204].mxu1 %vm1172_vm3, %v7197_v62  ;;  %v7493_v37 = vpop.permute.xlu0 %7492 }
0x178a   : > { %12143 = vmatpush3.bf16.msra.mxu1 %v7354_v0  ;;  %12144 = vmatprep.mubr.msk.bf16.mxu1 %vm13034_vm2, %v15896_v13  ;;  %v7498_v29 = vsel %vm1656_vm4, %v7493_v37, 0 }
0x178b   : > { %8148 = vrot.lane.b32.xlu1 %v14646_v34, %s13037_s30  ;;  %12154 = vmatprep.subr.bf16.mxu1 %v15896_v13 }
0x178c   : > { %v12904_v22 = vpop.eup %12903 }
0x178d   : > { %v7191_v6 = vmul.f32 %v12904_v22, %v14933_v27 }
0x178f   : > { %8196 = vrot.lane.b32.xlu1 %v14752_v63, %s13037_s30  ;;  %v7199_v4 = vpack.c.bf16 %v7191_v6, %v7191_v6 }
0x1790   : > { %v12906_v26 = vpop.eup %12905 }
0x1791   : > { %12145 = vmatmul.mubr.msk.bf16.vlgmr.msra.gmra.mrb[208].mxu1 %vm1172_vm3, %v7199_v4  ;;  %v7192_v45 = vmul.f32 %v12906_v26, %v14937_v50  ;;  %v7541_v50 = vpop.permute.xlu1 %7540 }
0x1792   : > { %12155 = vmatpush3.bf16.msra.mxu1 %v7450_v40  ;;  %12156 = vmatprep.mubr.msk.bf16.mxu1 %vm13034_vm2, %v15896_v13  ;;  %v7546_v0 = vsel %vm1656_vm4, %v7541_v50, 0 }
0x1793   : > { %8244 = vrot.lane.b32.xlu1 %v14758_v41, %s13037_s30  ;;  %v7200_v27 = vpack.c.bf16 %v7192_v45, %v7192_v45  ;;  %12166 = vmatprep.subr.bf16.mxu1 %v15896_v13 }
0x1795   : > { %12151 = vmatmul.mubr.msk.bf16.vlgmr.msra.gmra.mrb[236].mxu0 %vm1172_vm3, %v7200_v27 }
0x1796   : > { %12161 = vmatpush3.bf16.msra.mxu0 %v7498_v29  ;;  %12162 = vmatprep.mubr.msk.bf16.mxu0 %vm13034_vm2, %v15896_v13 }
0x1797   : > { %12172 = vmatprep.subr.bf16.mxu0 %v15896_v13 }
0x17b6   : > { %v7173_v28 = vpop.xlane.xlu1 %7172 }
0x17b7   : > { %12907 = vrcp.f32 %v7173_v28 }
0x17ba   : > { %v7176_v18 = vpop.xlane.xlu0 %7175  ;;  %v7641_v28 = vpop.permute.xlu1 %7640 }
0x17bb   : > { %12909 = vrcp.f32 %v7176_v18 }
0x17be   : > { %v7591_v61 = vpop.permute.xlu0 %7590 }
0x17bf   : > { %v7596_v26 = vsel %vm1172_vm3, %v7591_v61, 0 }
0x17c1   : > { %v12908_v49 = vpop.eup %12907 }
0x17c2   : > { %v7589_v48 = vpop.permute.xlu0 %7588  ;;  %v7193_v30 = vmul.f32 %v12908_v49, %v14946_v47 }
0x17c4   : > { %v7201_v1 = vpack.c.bf16 %v7193_v30, %v7193_v30 }
0x17c5   : > { %v12910_v62 = vpop.eup %12909 }
0x17c6   : > { %12157 = vmatmul.mubr.msk.bf16.vlgmr.msra.gmra.mrb[212].mxu1 %vm1172_vm3, %v7201_v1  ;;  %v7691_v22 = vpop.permute.xlu0 %7690  ;;  %v7194_v6 = vmul.f32 %v12910_v62, %v14950_v42 }
0x17c7   : > { %12167 = vmatpush3.bf16.msra.mxu1 %v7546_v0  ;;  %12168 = vmatprep.mubr.msk.bf16.mxu1 %vm13034_vm2, %v15896_v13  ;;  %v7696_v42 = vsel %vm1172_vm3, %v7691_v22, 0 }
0x17c8   : > { %v7202_v4 = vpack.c.bf16 %v7194_v6, %v7194_v6  ;;  %12178 = vmatprep.subr.bf16.mxu1 %v15896_v13  ;;  %v7646_v6 = vsel %vm1172_vm3, %v7641_v28, 0 }
0x17ca   : > { %12163 = vmatmul.mubr.msk.bf16.vlgmr.msra.gmra.mrb[240].mxu0 %vm1172_vm3, %v7202_v4  ;;  %v7689_v47 = vpop.permute.xlu0 %7688 }
0x17cb   : > { %12173 = vmatpush3.bf16.xpose.msra.mxu0 %v7596_v26  ;;  %12174 = vmatprep.mubr.msk.bf16.mxu0 %vm13034_vm2, %v15896_v13 }
0x17cc   : > { %12184 = vmatprep.subr.bf16.mxu0 %v15896_v13 }
0x17ce   : > { %v7791_v40 = vpop.permute.xlu0 %7790 }
0x17cf   : > { %v7796_v37 = vsel %vm1172_vm3, %v7791_v40, 0 }
0x17d2   : > { %12175 = vmatmul.mubr.msk.bf16.vlgmr.msra.gmra.mrb[244].mxu0 %vm1172_vm3, %v7589_v48  ;;  %v7789_v45 = vpop.permute.xlu0 %7788 }
0x17d3   : > { %12185 = vmatpush3.bf16.xpose.msra.mxu0 %v7696_v42  ;;  %12186 = vmatprep.mubr.msk.bf16.mxu0 %vm13034_vm2, %v15896_v13 }
0x17d4   : > { %12196 = vmatprep.subr.bf16.mxu0 %v15896_v13 }
0x17d6   : > { %v7891_v27 = vpop.permute.xlu0 %7890 }
0x17d7   : > { %v7896_v50 = vsel %vm1172_vm3, %v7891_v27, 0 }
0x17da   : > { %12187 = vmatmul.mubr.msk.bf16.vlgmr.msra.gmra.mrb[248].mxu0 %vm1172_vm3, %v7689_v47  ;;  %v7889_v29 = vpop.permute.xlu0 %7888 }
0x17db   : > { %12197 = vmatpush3.bf16.xpose.msra.mxu0 %v7796_v37  ;;  %12198 = vmatprep.mubr.msk.bf16.mxu0 %vm13034_vm2, %v15896_v13 }
0x17dc   : > { %12208 = vmatprep.subr.bf16.mxu0 %v15896_v13 }
0x17de   : > { %v8101_v18 = vpop.permute.xlu0 %8100 }
0x17df   : > { %v8106_v61 = vsel %vm1656_vm4, %v8101_v18, 0 }
0x17e2   : > { %12199 = vmatmul.mubr.msk.bf16.vlgmr.msra.gmra.mrb[252].mxu0 %vm1172_vm3, %v7789_v45 }
0x17e3   : > { %12209 = vmatpush3.bf16.xpose.msra.mxu0 %v7896_v50  ;;  %12210 = vmatprep.mubr.msk.bf16.mxu0 %vm13034_vm2, %v15896_v13 }
0x17e4   : > { %12220 = vmatprep.subr.bf16.mxu0 %v15896_v13 }
0x17ea   : > { %12211 = vmatmul.mubr.msk.bf16.vlgmr.msra.gmra.mrb[0].mxu0 %vm1172_vm3, %v7889_v29 }
0x17eb   : > { %12221 = vmatpush3.bf16.msra.mxu0 %v8106_v61  ;;  %v7179_v49 = vpop.xlane.xlu1 %7178  ;;  %12222 = vmatprep.mubr.msk.bf16.mxu0 %vm13034_vm2, %v15896_v13 }
0x17ec   : > { %12911 = vrcp.f32 %v7179_v49  ;;  %12232 = vmatprep.subr.bf16.mxu0 %v15896_v13 }
0x17ef   : > { %v7639_v48 = vpop.permute.xlu1 %7638 }
0x17f3   : > { %v7741_v30 = vpop.permute.xlu1 %7740 }
0x17f4   : > { %v7746_v26 = vsel %vm1172_vm3, %v7741_v30, 0 }
0x17f6   : > { %v12912_v1 = vpop.eup %12911 }
0x17f7   : > { %v7195_v62 = vmul.f32 %v12912_v1, %v14975_v59  ;;  %v7739_v22 = vpop.permute.xlu1 %7738 }
0x17f9   : > { %v7203_v0 = vpack.c.bf16 %v7195_v62, %v7195_v62 }
0x17fb   : > { %12169 = vmatmul.mubr.msk.bf16.vlgmr.msra.gmra.mrb[216].mxu1 %vm1172_vm3, %v7203_v0  ;;  %v7841_v4 = vpop.permute.xlu1 %7840 }
0x17fc   : > { %12179 = vmatpush3.bf16.xpose.msra.mxu1 %v7646_v6  ;;  %12180 = vmatprep.mubr.msk.bf16.mxu1 %vm13034_vm2, %v15896_v13  ;;  %v7846_v47 = vsel %vm1172_vm3, %v7841_v4, 0 }
0x17fd   : > { %12190 = vmatprep.subr.bf16.mxu1 %v15896_v13 }
0x17ff   : > { %v7839_v59 = vpop.permute.xlu1 %7838 }
0x1803   : > { %12181 = vmatmul.mubr.msk.bf16.vlgmr.msra.gmra.mrb[220].mxu1 %vm1172_vm3, %v7639_v48  ;;  %v7941_v40 = vpop.permute.xlu1 %7940 }
0x1804   : > { %12191 = vmatpush3.bf16.xpose.msra.mxu1 %v7746_v26  ;;  %12192 = vmatprep.mubr.msk.bf16.mxu1 %vm13034_vm2, %v15896_v13  ;;  %v7946_v45 = vsel %vm1172_vm3, %v7941_v40, 0 }
0x1805   : > { %12202 = vmatprep.subr.bf16.mxu1 %v15896_v13 }
0x1807   : > { %v7939_v42 = vpop.permute.xlu1 %7938 }
0x180b   : > { %12193 = vmatmul.mubr.msk.bf16.vlgmr.msra.gmra.mrb[224].mxu1 %vm1172_vm3, %v7739_v22  ;;  %v8149_v37 = vpop.permute.xlu1 %8148 }
0x180c   : > { %12203 = vmatpush3.bf16.xpose.msra.mxu1 %v7846_v47  ;;  %12204 = vmatprep.mubr.msk.bf16.mxu1 %vm13034_vm2, %v15896_v13  ;;  %v8154_v27 = vsel %vm1656_vm4, %v8149_v37, 0 }
0x180d   : > { %12214 = vmatprep.subr.bf16.mxu1 %v15896_v13 }
0x1813   : > { %12205 = vmatmul.mubr.msk.bf16.vlgmr.msra.gmra.mrb[228].mxu1 %vm1172_vm3, %v7839_v59 }
0x1814   : > { %12215 = vmatpush3.bf16.xpose.msra.mxu1 %v7946_v45  ;;  %12216 = vmatprep.mubr.msk.bf16.mxu1 %vm13034_vm2, %v15896_v13 }
0x1815   : > { %12226 = vmatprep.subr.bf16.mxu1 %v15896_v13 }
0x181b   : > { %12217 = vmatmul.mubr.msk.bf16.vlgmr.msra.gmra.mrb[232].mxu1 %vm1172_vm3, %v7939_v42 }
0x181c   : > { %12227 = vmatpush3.bf16.msra.mxu1 %v8154_v27  ;;  %12228 = vmatprep.mubr.msk.bf16.mxu1 %vm13034_vm2, %v15896_v13 }
0x181d   : > { %12238 = vmatprep.subr.bf16.mxu1 %v15896_v13 }
0x182a   : > { %v15090_v29 = vpop.f32.mrb[228].mxu0 }
0x182b   : > { %v12128_v50 = vpop.f32.mrb[229].mxu0 }
0x182c   : > { %v7249_v28 = vpop.f32.mrb[230].mxu0 }
0x182d   : > { %v12129_v18 = vpop.f32.mrb[231].mxu0 }
0x1832   : > { %v15092_v61 = vpop.f32.mrb[232].mxu0 }
0x1833   : > { %v12140_v49 = vpop.f32.mrb[233].mxu0 }
0x1834   : > { %v7345_v48 = vpop.f32.mrb[234].mxu0 }
0x1835   : > { %v12141_v30 = vpop.f32.mrb[235].mxu0 }
0x185c   : > { %v15094_v1 = vpop.f32.mrb[204].mxu1 }
0x185d   : > { %v12134_v0 = vpop.f32.mrb[205].mxu1 }
0x185e   : > { %v7297_v22 = vpop.f32.mrb[206].mxu1 }
0x185f   : > { %v12135_v6 = vpop.f32.mrb[207].mxu1 }
0x1864   : > { %v15098_v4 = vpop.f32.mrb[208].mxu1 }
0x1865   : > { %v12146_v59 = vpop.f32.mrb[209].mxu1 }
0x1866   : > { %v7393_v47 = vpop.f32.mrb[210].mxu1 }
0x1867   : > { %v12147_v40 = vpop.f32.mrb[211].mxu1 }
0x1868   : > { %v15102_v42 = vpop.f32.mrb[236].mxu0 }
0x1869   : > { %v12152_v45 = vpop.f32.mrb[237].mxu0 }
0x186a   : > { %v7441_v37 = vpop.f32.mrb[238].mxu0 }
0x186b   : > { %v12153_v27 = vpop.f32.mrb[239].mxu0 }
0x1899   : > { %v15104_v50 = vpop.f32.mrb[212].mxu1 }
0x189a   : > { %v12158_v18 = vpop.f32.mrb[213].mxu1 }
0x189b   : > { %v7489_v49 = vpop.f32.mrb[214].mxu1 }
0x189c   : > { %v12159_v48 = vpop.f32.mrb[215].mxu1 }
0x189d   : > { %v15108_v30 = vpop.f32.mrb[240].mxu0 }
0x189e   : > { %v12164_v0 = vpop.f32.mrb[241].mxu0 }
0x189f   : > { %v7537_v22 = vpop.f32.mrb[242].mxu0 }
0x18a0   : > { %v12165_v6 = vpop.f32.mrb[243].mxu0 }
0x18a5   : > { %v7632_v59 = vpop.f32.mrb[244].mxu0 }
0x18a6   : > { %v7988_v47 = vmul.f32 0.35355338, %v7632_v59  ;;  %v12176_v40 = vpop.f32.mrb[245].mxu0 }
0x18a7   : > { %v7635_v26 = vpop.f32.mrb[246].mxu0 }
0x18a8   : > { %v15111_v45 = vadd.f32 %v7988_v47, %v13395_v12  ;;  %v12177_v37 = vpop.f32.mrb[247].mxu0 }
0x18aa   : > { %v8004_v27 = vsel %vm1172_vm3, %v15111_v45, -inf }
0x18ab   : > { %8005 = vmax.xlane.f32.xlu0 %v8004_v27 }
0x18ad   : > { %v7732_v18 = vpop.f32.mrb[248].mxu0 }
0x18ae   : > { %v7990_v49 = vmul.f32 0.35355338, %v7732_v18  ;;  %v12188_v48 = vpop.f32.mrb[249].mxu0 }
0x18af   : > { %v7735_v28 = vpop.f32.mrb[250].mxu0 }
0x18b0   : > { %v15116_v0 = vadd.f32 %v7990_v49, %v13395_v12  ;;  %v12189_v22 = vpop.f32.mrb[251].mxu0 }
0x18b2   : > { %v8010_v6 = vsel %vm1172_vm3, %v15116_v0, -inf }
0x18b3   : > { %8011 = vmax.xlane.f32.xlu0 %v8010_v6 }
0x18b5   : > { %v7832_v26 = vpop.f32.mrb[252].mxu0 }
0x18b6   : > { %v12200_v59 = vpop.f32.mrb[253].mxu0 }
0x18b7   : > { %v7835_v47 = vpop.f32.mrb[254].mxu0 }
0x18b8   : > { %v12201_v40 = vpop.f32.mrb[255].mxu0 }
0x18bd   : > { %v7932_v37 = vpop.f32.mrb[0].mxu0 }
0x18be   : > { %v12212_v62 = vpop.f32.mrb[1].mxu0 }
0x18bf   : > { %v7935_v56 = vpop.f32.mrb[2].mxu0  ;;  %v7992_v62 = vmul.f32 0.35355338, %v7832_v26 }
0x18c0   : > { %v12213_v27 = vpop.f32.mrb[3].mxu0 }
0x18ce   : > { %v15120_v17 = vpop.f32.mrb[216].mxu1 }
0x18cf   : > { %v12170_v18 = vpop.f32.mrb[217].mxu1 }
0x18d0   : > { %v7585_v49 = vpop.f32.mrb[218].mxu1 }
0x18d1   : > { %v12171_v48 = vpop.f32.mrb[219].mxu1  ;;  %v8000_v49 = vadd.f32 %v7992_v62, %v13395_v12 }
0x18d2   : > { %v7994_v48 = vmul.f32 0.35355338, %v7932_v37 }
0x18d3   : > { %v8016_v26 = vsel %vm1172_vm3, %v8000_v49, -inf }
0x18d6   : > { %v7682_v22 = vpop.f32.mrb[220].mxu1 }
0x18d7   : > { %v7989_v23 = vmul.f32 0.35355338, %v7682_v22  ;;  %v12182_v10 = vpop.f32.mrb[221].mxu1 }
0x18d8   : > { %v7685_v6 = vpop.f32.mrb[222].mxu1 }
0x18d9   : > { %v7997_v59 = vadd.f32 %v7989_v23, %v13395_v12  ;;  %v12183_v47 = vpop.f32.mrb[223].mxu1  ;;  %v15130_v23 = vadd.f32 %v7994_v48, %v13395_v12 }
0x18db   : > { %v8007_v40 = vsel %vm1172_vm3, %v7997_v59, -inf  ;;  %v8022_v37 = vsel %vm1172_vm3, %v15130_v23, -inf }
0x18dc   : > { %8008 = vmax.xlane.f32.xlu1 %v8007_v40 }
0x18de   : > { %v7782_v56 = vpop.f32.mrb[224].mxu1 }
0x18df   : > { %v7991_v27 = vmul.f32 0.35355338, %v7782_v56  ;;  %v12194_v54 = vpop.f32.mrb[225].mxu1 }
0x18e0   : > { %v7785_v16 = vpop.f32.mrb[226].mxu1 }
0x18e1   : > { %v7999_v28 = vadd.f32 %v7991_v27, %v13395_v12  ;;  %v12195_v18 = vpop.f32.mrb[227].mxu1 }
0x18e3   : > { %v8013_v10 = vsel %vm1172_vm3, %v7999_v28, -inf }
0x18e4   : > { %8014 = vmax.xlane.f32.xlu0 %v8013_v10 }
0x18e6   : > { %v7882_v22 = vpop.f32.mrb[228].mxu1 }
0x18e7   : > { %v7993_v6 = vmul.f32 0.35355338, %v7882_v22  ;;  %v12206_v47 = vpop.f32.mrb[229].mxu1 }
0x18e8   : > { %v7885_v40 = vpop.f32.mrb[230].mxu1  ;;  %8017 = vmax.xlane.f32.xlu0 %v8016_v26 }
0x18e9   : > { %v8001_v16 = vadd.f32 %v7993_v6, %v13395_v12  ;;  %v12207_v54 = vpop.f32.mrb[231].mxu1 }
0x18eb   : > { %v8019_v56 = vsel %vm1172_vm3, %v8001_v16, -inf }
0x18ec   : > { %8020 = vmax.xlane.f32.xlu1 %v8019_v56  ;;  %8023 = vmax.xlane.f32.xlu0 %v8022_v37 }
0x18ee   : > { %v7982_v62 = vpop.f32.mrb[232].mxu1 }
0x18ef   : > { %v12218_v27 = vpop.f32.mrb[233].mxu1  ;;  %v7995_v10 = vmul.f32 0.35355338, %v7982_v62 }
0x18f0   : > { %v7985_v18 = vpop.f32.mrb[234].mxu1 }
0x18f1   : > { %v12219_v48 = vpop.f32.mrb[235].mxu1  ;;  %v15142_v22 = vadd.f32 %v7995_v10, %v13395_v12  ;;  %v8197_v10 = vpop.permute.xlu1 %8196 }
0x18f3   : > { %v8025_v6 = vsel %vm1172_vm3, %v15142_v22, -inf }
0x18fd   : > { %8340 = vrot.lane.b32.xlu1 %v14783_v52, %s13037_s30 }
0x1902   : > { %8292 = vrot.lane.b32.xlu0 %v14777_v39, %s13037_s30 }
0x1921   : > { %8026 = vmax.xlane.f32.xlu1 %v8025_v6  ;;  %v15153_v6 = vpop.permute.xlu1 %8244 }
0x1938   : > { %v8006_v47 = vpop.xlane.xlu0 %8005 }
0x1939   : > { %v8028_v26 = vsub.f32 %v15111_v45, %v8006_v47 }
0x193b   : > { %v8036_v40 = vmul.f32 1.442695, %v8028_v26 }
0x193d   : > { %12913 = vpow2.f32 %v8036_v40 }
0x1940   : > { %v8012_v54 = vpop.xlane.xlu0 %8011 }
0x1941   : > { %v8030_v56 = vsub.f32 %v15116_v0, %v8012_v54 }
0x1943   : > { %v8040_v37 = vmul.f32 1.442695, %v8030_v56 }
0x1945   : > { %12915 = vpow2.f32 %v8040_v37 }
0x1947   : > { %v12914_v27 = vpop.eup %12913 }
0x1948   : > { %v8052_v62 = vsel %vm1172_vm3, %v12914_v27, 0.0 }
0x1949   : > { %8053 = vadd.xlane.f32.xlu0 %v8052_v62 }
0x194f   : > { %v15149_v18 = vpop.eup %12915 }
0x1950   : > { %v8058_v48 = vsel %vm1172_vm3, %v15149_v18, 0.0 }
0x1951   : > { %8059 = vadd.xlane.f32.xlu0 %v8058_v48 }
0x1969   : > { %v8009_v45 = vpop.xlane.xlu1 %8008 }
0x196a   : > { %v8029_v47 = vsub.f32 %v7997_v59, %v8009_v45 }
0x196c   : > { %v8038_v26 = vmul.f32 1.442695, %v8029_v47 }
0x196e   : > { %12917 = vpow2.f32 %v8038_v26 }
0x1971   : > { %v8015_v0 = vpop.xlane.xlu0 %8014 }
0x1972   : > { %v8031_v40 = vsub.f32 %v7999_v28, %v8015_v0 }
0x1974   : > { %v8042_v54 = vmul.f32 1.442695, %v8031_v40 }
0x1975   : > { %v8018_v56 = vpop.xlane.xlu0 %8017 }
0x1976   : > { %12919 = vpow2.f32 %v8042_v54  ;;  %v8032_v37 = vsub.f32 %v8000_v49, %v8018_v56 }
0x1978   : > { %v15155_v62 = vpop.eup %12917  ;;  %v8044_v19 = vmul.f32 1.442695, %v8032_v37 }
0x1979   : > { %v8055_v7 = vsel %vm1172_vm3, %v15155_v62, 0.0  ;;  %v8024_v49 = vpop.xlane.xlu0 %8023 }
0x197a   : > { %12921 = vpow2.f32 %v8044_v19  ;;  %8056 = vadd.xlane.f32.xlu1 %v8055_v7  ;;  %v8021_v19 = vpop.xlane.xlu1 %8020  ;;  %v8034_v26 = vsub.f32 %v15130_v23, %v8024_v49 }
0x197b   : > { %v8033_v7 = vsub.f32 %v8001_v16, %v8021_v19 }
0x197c   : > { %v8048_v0 = vmul.f32 1.442695, %v8034_v26 }
0x197d   : > { %v8046_v47 = vmul.f32 1.442695, %v8033_v7  ;;  %v8293_v23 = vpop.permute.xlu0 %8292 }
0x197e   : > { %v8341_v16 = vpop.permute.xlu1 %8340 }
0x197f   : > { %12923 = vpow2.f32 %v8046_v47  ;;  %v8346_v26 = vsel %vm1656_vm4, %v8341_v16, 0 }
0x1980   : > { %v15159_v48 = vpop.eup %12919  ;;  %12925 = vpow2.f32 %v8048_v0 }
0x1981   : > { %v8061_v59 = vsel %vm1172_vm3, %v15159_v48, 0.0 }
0x1982   : > { %8062 = vadd.xlane.f32.xlu1 %v8061_v59 }
0x1984   : > { %v15163_v45 = vpop.eup %12921 }
0x1985   : > { %v8064_v28 = vsel %vm1172_vm3, %v15163_v45, 0.0 }
0x1986   : > { %8065 = vadd.xlane.f32.xlu0 %v8064_v28 }
0x1989   : > { %v15172_v40 = vpop.eup %12923 }
0x198a   : > { %v8067_v54 = vsel %vm1172_vm3, %v15172_v40, 0.0  ;;  %v15176_v56 = vpop.eup %12925 }
0x198b   : > { %v8070_v37 = vsel %vm1172_vm3, %v15176_v56, 0.0 }
0x1993   : > { %8436 = vrot.lane.b32.xlu1 %v14805_v51, %s13037_s30 }
0x199c   : > { %8388 = vrot.lane.b32.xlu0 %v14800_v44, %s13037_s30  ;;  %s15917_s30 = smov 8  }
0x19ae   : > { %v8027_v59 = vpop.xlane.xlu1 %8026 }
0x19af   : > { %v8035_v28 = vsub.f32 %v15142_v22, %v8027_v59  ;;  %v8202_v22 = vsel %vm1656_vm4, %v8197_v10, 0  ;;  %v8298_v10 = vsel %vm1656_vm4, %v8293_v23, 0 }
0x19b1   : > { %v8050_v7 = vmul.f32 1.442695, %v8035_v28 }
0x19b7   : > { %8068 = vadd.xlane.f32.xlu1 %v8067_v54 }
0x19bb   : > { %8071 = vadd.xlane.f32.xlu0 %v8070_v37 }
0x19c8   : > { %8536 = vrot.lane.b32.xlu1 %v14542_v2, %s15916_s29 }
0x19d1   : > { %8486 = vrot.lane.b32.xlu0 %v14533_v35, %s15916_s29 }
0x19d5   : > { %8484 = vrot.lane.b32.xlu0 %v14555_v38, %s15916_s29 }
0x19d6   : > { %v8054_v19 = vpop.xlane.xlu0 %8053 }
0x19d7   : > { %12927 = vrcp.f32 %v8054_v19 }
0x19d8   : > { %12929 = vpow2.f32 %v8050_v7 }
0x19d9   : > { %8586 = vrot.lane.b32.xlu0 %v14551_v3, %s15916_s29 }
0x19dd   : > { %8584 = vrot.lane.b32.xlu0 %v14577_v57, %s15916_s29 }
0x19de   : > { %v8060_v2 = vpop.xlane.xlu0 %8059 }
0x19df   : > { %12931 = vrcp.f32 %v8060_v2 }
0x19e1   : > { %v12928_v35 = vpop.eup %12927  ;;  %8686 = vrot.lane.b32.xlu0 %v14582_v11, %s15916_s29 }
0x19e2   : > { %v8084_v49 = vmul.f32 %v12928_v35, %v12914_v27  ;;  %v15199_v3 = vpop.eup %12929 }
0x19e4   : > { %v8092_v38 = vpack.c.bf16 %v8084_v49, %v8084_v49 }
0x19e5   : > { %8684 = vrot.lane.b32.xlu0 %v14614_v9, %s15916_s29  ;;  %v8073_v9 = vsel %vm1172_vm3, %v15199_v3, 0.0 }
0x19e6   : > { %12223 = vmatmul.mubr.msk.bf16.vlgmr.msra.gmra.mrb[4].mxu0 %vm1172_vm3, %v8092_v38 }
0x19e7   : > { %12233 = vmatpush3.bf16.msra.mxu0 %v8202_v22  ;;  %12234 = vmatprep.mubr.msk.bf16.mxu0 %vm13034_vm2, %v15896_v13 }
0x19e8   : > { %12244 = vmatprep.subr.bf16.mxu0 %v15896_v13 }
0x19e9   : > { %v12932_v57 = vpop.eup %12931  ;;  %8786 = vrot.lane.b32.xlu0 %v14608_v53, %s15916_s29 }
0x19ea   : > { %v8086_v11 = vmul.f32 %v12932_v57, %v15149_v18 }
0x19ec   : > { %v8094_v27 = vpack.c.bf16 %v8086_v11, %v8086_v11  ;;  %8074 = vadd.xlane.f32.xlu1 %v8073_v9 }
0x19ed   : > { %8784 = vrot.lane.b32.xlu0 %v14644_v8, %s15916_s29 }
0x19ee   : > { %12235 = vmatmul.mubr.msk.bf16.vlgmr.msra.gmra.mrb[8].mxu0 %vm1172_vm3, %v8094_v27 }
0x19ef   : > { %12245 = vmatpush3.bf16.msra.mxu0 %v8298_v10  ;;  %12246 = vmatprep.mubr.msk.bf16.mxu0 %vm13034_vm2, %v15896_v13 }
0x19f0   : > { %12256 = vmatprep.subr.bf16.mxu0 %v15896_v13 }
0x19fd   : > { %8534 = vrot.lane.b32.xlu1 %v14559_v58, %s15916_s29 }
0x1a01   : > { %8636 = vrot.lane.b32.xlu1 %v14557_v21, %s15916_s29 }
0x1a05   : > { %8634 = vrot.lane.b32.xlu1 %v14580_v36, %s15916_s29 }
0x1a07   : > { %v8057_v53 = vpop.xlane.xlu1 %8056 }
0x1a08   : > { %12933 = vrcp.f32 %v8057_v53 }
0x1a09   : > { %8736 = vrot.lane.b32.xlu1 %v14590_v24, %s15916_s29  ;;  %v8250_v24 = vsel %vm1656_vm4, %v15153_v6, 0 }
0x1a0d   : > { %8734 = vrot.lane.b32.xlu1 %v14618_v32, %s15916_s29 }
0x1a0f   : > { %v8063_v8 = vpop.xlane.xlu1 %8062 }
0x1a10   : > { %12935 = vrcp.f32 %v8063_v8 }
0x1a11   : > { %8836 = vrot.lane.b32.xlu1 %v14616_v5, %s15916_s29 }
0x1a12   : > { %v12934_v58 = vpop.eup %12933 }
0x1a13   : > { %v8085_v18 = vmul.f32 %v12934_v58, %v15155_v62  ;;  %v8066_v21 = vpop.xlane.xlu0 %8065 }
0x1a14   : > { %12937 = vrcp.f32 %v8066_v21 }
0x1a15   : > { %8834 = vrot.lane.b32.xlu1 %v14650_v25, %s15916_s29  ;;  %v8093_v36 = vpack.c.bf16 %v8085_v18, %v8085_v18 }
0x1a17   : > { %12229 = vmatmul.mubr.msk.bf16.vlgmr.msra.gmra.mrb[236].mxu1 %vm1172_vm3, %v8093_v36  ;;  %v8389_v6 = vpop.permute.xlu0 %8388 }
0x1a18   : > { %12239 = vmatpush3.bf16.msra.mxu1 %v8250_v24  ;;  %12240 = vmatprep.mubr.msk.bf16.mxu1 %vm13034_vm2, %v15896_v13  ;;  %v8394_v54 = vsel %vm1656_vm4, %v8389_v6, 0 }
0x1a19   : > { %12250 = vmatprep.subr.bf16.mxu1 %v15896_v13 }
0x1a1a   : > { %v12936_v5 = vpop.eup %12935 }
0x1a1b   : > { %v8087_v32 = vmul.f32 %v12936_v5, %v15159_v48  ;;  %v8437_v48 = vpop.permute.xlu1 %8436 }
0x1a1c   : > { %v8442_v2 = vsel %vm1656_vm4, %v8437_v48, 0 }
0x1a1d   : > { %v8095_v62 = vpack.c.bf16 %v8087_v32, %v8087_v32 }
0x1a1e   : > { %v12938_v47 = vpop.eup %12937 }
0x1a1f   : > { %v8088_v25 = vmul.f32 %v12938_v47, %v15163_v45  ;;  %12241 = vmatmul.mubr.msk.bf16.vlgmr.msra.gmra.mrb[240].mxu1 %vm1172_vm3, %v8095_v62 }
0x1a20   : > { %12251 = vmatpush3.bf16.msra.mxu1 %v8346_v26  ;;  %12252 = vmatprep.mubr.msk.bf16.mxu1 %vm13034_vm2, %v15896_v13 }
0x1a21   : > { %v8096_v0 = vpack.c.bf16 %v8088_v25, %v8088_v25  ;;  %12262 = vmatprep.subr.bf16.mxu1 %v15896_v13 }
0x1a23   : > { %12247 = vmatmul.mubr.msk.bf16.vlgmr.msra.gmra.mrb[12].mxu0 %vm1172_vm3, %v8096_v0 }
0x1a24   : > { %12257 = vmatpush3.bf16.msra.mxu0 %v8394_v54  ;;  %12258 = vmatprep.mubr.msk.bf16.mxu0 %vm13034_vm2, %v15896_v13 }
0x1a25   : > { %12268 = vmatprep.subr.bf16.mxu0 %v15896_v13 }
0x1a44   : > { %v8069_v45 = vpop.xlane.xlu1 %8068 }
0x1a45   : > { %12939 = vrcp.f32 %v8069_v45 }
0x1a48   : > { %v8072_v37 = vpop.xlane.xlu0 %8071  ;;  %v8537_v53 = vpop.permute.xlu1 %8536 }
0x1a49   : > { %12941 = vrcp.f32 %v8072_v37  ;;  %v8542_v32 = vsel %vm1172_vm3, %v8537_v53, 0 }
0x1a4c   : > { %v8487_v16 = vpop.permute.xlu0 %8486 }
0x1a4d   : > { %v8492_v22 = vsel %vm1172_vm3, %v8487_v16, 0 }
0x1a4f   : > { %v12940_v23 = vpop.eup %12939 }
0x1a50   : > { %v8089_v59 = vmul.f32 %v12940_v23, %v15172_v40  ;;  %v8485_v28 = vpop.permute.xlu0 %8484 }
0x1a52   : > { %v8097_v19 = vpack.c.bf16 %v8089_v59, %v8089_v59 }
0x1a53   : > { %v12942_v7 = vpop.eup %12941 }
0x1a54   : > { %v8090_v35 = vmul.f32 %v12942_v7, %v15176_v56  ;;  %12253 = vmatmul.mubr.msk.bf16.vlgmr.msra.gmra.mrb[244].mxu1 %vm1172_vm3, %v8097_v19  ;;  %v8587_v49 = vpop.permute.xlu0 %8586 }
0x1a55   : > { %12263 = vmatpush3.bf16.msra.mxu1 %v8442_v2  ;;  %12264 = vmatprep.mubr.msk.bf16.mxu1 %vm13034_vm2, %v15896_v13  ;;  %v8592_v56 = vsel %vm1172_vm3, %v8587_v49, 0 }
0x1a56   : > { %v8098_v38 = vpack.c.bf16 %v8090_v35, %v8090_v35  ;;  %12274 = vmatprep.subr.bf16.mxu1 %v15896_v13 }
0x1a58   : > { %12259 = vmatmul.mubr.msk.bf16.vlgmr.msra.gmra.mrb[16].mxu0 %vm1172_vm3, %v8098_v38  ;;  %v8585_v40 = vpop.permute.xlu0 %8584 }
0x1a59   : > { %12269 = vmatpush3.bf16.xpose.msra.mxu0 %v8492_v22  ;;  %12270 = vmatprep.mubr.msk.bf16.mxu0 %vm13034_vm2, %v15896_v13 }
0x1a5a   : > { %12280 = vmatprep.subr.bf16.mxu0 %v15896_v13 }
0x1a5c   : > { %v8687_v57 = vpop.permute.xlu0 %8686 }
0x1a5d   : > { %v8692_v9 = vsel %vm1172_vm3, %v8687_v57, 0 }
0x1a60   : > { %12271 = vmatmul.mubr.msk.bf16.vlgmr.msra.gmra.mrb[20].mxu0 %vm1172_vm3, %v8485_v28  ;;  %v8685_v11 = vpop.permute.xlu0 %8684 }
0x1a61   : > { %12281 = vmatpush3.bf16.xpose.msra.mxu0 %v8592_v56  ;;  %12282 = vmatprep.mubr.msk.bf16.mxu0 %vm13034_vm2, %v15896_v13 }
0x1a62   : > { %12292 = vmatprep.subr.bf16.mxu0 %v15896_v13 }
0x1a64   : > { %v8787_v27 = vpop.permute.xlu0 %8786 }
0x1a65   : > { %v8792_v10 = vsel %vm1172_vm3, %v8787_v27, 0 }
0x1a68   : > { %12283 = vmatmul.mubr.msk.bf16.vlgmr.msra.gmra.mrb[24].mxu0 %vm1172_vm3, %v8585_v40  ;;  %v8785_v8 = vpop.permute.xlu0 %8784 }
0x1a69   : > { %12293 = vmatpush3.bf16.xpose.msra.mxu0 %v8692_v9  ;;  %12294 = vmatprep.mubr.msk.bf16.mxu0 %vm13034_vm2, %v15896_v13 }
0x1a6a   : > { %12304 = vmatprep.subr.bf16.mxu0 %v15896_v13 }
0x1a70   : > { %12295 = vmatmul.mubr.msk.bf16.vlgmr.msra.gmra.mrb[28].mxu0 %vm1172_vm3, %v8685_v11 }
0x1a71   : > { %12305 = vmatpush3.bf16.xpose.msra.mxu0 %v8792_v10  ;;  %12306 = vmatprep.mubr.msk.bf16.mxu0 %vm13034_vm2, %v15896_v13 }
0x1a72   : > { %12316 = vmatprep.subr.bf16.mxu0 %v15896_v13 }
0x1a78   : > { %12307 = vmatmul.mubr.msk.bf16.vlgmr.msra.gmra.mrb[32].mxu0 %vm1172_vm3, %v8785_v8 }
0x1a79   : > { %v8075_v58 = vpop.xlane.xlu1 %8074  ;;  %12318 = vmatprep.mubr.msk.bf16.mxu0 %vm13034_vm2, %v15896_v13 }
0x1a7a   : > { %12943 = vrcp.f32 %v8075_v58 }
0x1a7d   : > { %v8535_v18 = vpop.permute.xlu1 %8534 }
0x1a81   : > { %v8637_v24 = vpop.permute.xlu1 %8636 }
0x1a82   : > { %v8642_v47 = vsel %vm1172_vm3, %v8637_v24, 0 }
0x1a84   : > { %v12944_v21 = vpop.eup %12943 }
0x1a85   : > { %v8091_v36 = vmul.f32 %v12944_v21, %v15199_v3  ;;  %v8635_v62 = vpop.permute.xlu1 %8634 }
0x1a87   : > { %v8099_v5 = vpack.c.bf16 %v8091_v36, %v8091_v36 }
0x1a89   : > { %12265 = vmatmul.mubr.msk.bf16.vlgmr.msra.gmra.mrb[248].mxu1 %vm1172_vm3, %v8099_v5  ;;  %v8737_v26 = vpop.permute.xlu1 %8736 }
0x1a8a   : > { %12275 = vmatpush3.bf16.xpose.msra.mxu1 %v8542_v32  ;;  %12276 = vmatprep.mubr.msk.bf16.mxu1 %vm13034_vm2, %v15896_v13  ;;  %v8742_v25 = vsel %vm1172_vm3, %v8737_v26, 0 }
0x1a8b   : > { %12286 = vmatprep.subr.bf16.mxu1 %v15896_v13 }
0x1a8d   : > { %v8735_v3 = vpop.permute.xlu1 %8734 }
0x1a91   : > { %12277 = vmatmul.mubr.msk.bf16.vlgmr.msra.gmra.mrb[252].mxu1 %vm1172_vm3, %v8535_v18  ;;  %v8837_v6 = vpop.permute.xlu1 %8836 }
0x1a92   : > { %12287 = vmatpush3.bf16.xpose.msra.mxu1 %v8642_v47  ;;  %12288 = vmatprep.mubr.msk.bf16.mxu1 %vm13034_vm2, %v15896_v13  ;;  %v8842_v0 = vsel %vm1172_vm3, %v8837_v6, 0 }
0x1a93   : > { %12298 = vmatprep.subr.bf16.mxu1 %v15896_v13 }
0x1a95   : > { %v8835_v54 = vpop.permute.xlu1 %8834 }
0x1a99   : > { %12289 = vmatmul.mubr.msk.bf16.vlgmr.msra.gmra.mrb[0].mxu1 %vm1172_vm3, %v8635_v62 }
0x1a9a   : > { %12299 = vmatpush3.bf16.xpose.msra.mxu1 %v8742_v25  ;;  %12300 = vmatprep.mubr.msk.bf16.mxu1 %vm13034_vm2, %v15896_v13 }
0x1a9b   : > { %12310 = vmatprep.subr.bf16.mxu1 %v15896_v13 }
0x1aa1   : > { %12301 = vmatmul.mubr.msk.bf16.vlgmr.msra.gmra.mrb[4].mxu1 %vm1172_vm3, %v8735_v3 }
0x1aa2   : > { %12311 = vmatpush3.bf16.xpose.msra.mxu1 %v8842_v0  ;;  %12312 = vmatprep.mubr.msk.bf16.mxu1 %vm13034_vm2, %v15896_v13 }
0x1aa3   : > { %12322 = vmatprep.subr.bf16.mxu1 %v15896_v13 }
0x1aa9   : > { %12313 = vmatmul.mubr.msk.bf16.vlgmr.msra.gmra.mrb[8].mxu1 %vm1172_vm3, %v8835_v54 }
0x1aaa   : > { %12324 = vmatprep.mubr.msk.bf16.mxu1 %vm13034_vm2, %v15896_v13 }
0x1ab9   : > { %v15301_v48 = vpop.f32.mrb[4].mxu0 }
0x1aba   : > { %v12224_v45 = vpop.f32.mrb[5].mxu0 }
0x1abb   : > { %v8145_v37 = vpop.f32.mrb[6].mxu0 }
0x1abc   : > { %v12225_v16 = vpop.f32.mrb[7].mxu0 }
0x1ac1   : > { %v15303_v23 = vpop.f32.mrb[8].mxu0 }
0x1ac2   : > { %v12236_v59 = vpop.f32.mrb[9].mxu0 }
0x1ac3   : > { %v8241_v28 = vpop.f32.mrb[10].mxu0 }
0x1ac4   : > { %v12237_v19 = vpop.f32.mrb[11].mxu0 }
0x1aea   : > { %v15305_v7 = vpop.f32.mrb[236].mxu1 }
0x1aeb   : > { %v12576_v2 = vpack.i.bf16 %v15305_v7, %v15301_v48  ;;  %v12230_v35 = vpop.f32.mrb[237].mxu1 }
0x1aec   : > { %v8193_v49 = vpop.f32.mrb[238].mxu1 }
0x1aed   : > { %v12231_v38 = vpop.f32.mrb[239].mxu1 }
0x1af2   : > { %v15309_v22 = vpop.f32.mrb[240].mxu1 }
0x1af3   : > { %v12581_v40 = vpack.i.bf16 %v15309_v22, %v15303_v23  ;;  %v12242_v56 = vpop.f32.mrb[241].mxu1 }
0x1af4   : > { %v8289_v57 = vpop.f32.mrb[242].mxu1 }
0x1af5   : > { %v12243_v11 = vpop.f32.mrb[243].mxu1 }
0x1af6   : > { %v15313_v9 = vpop.f32.mrb[12].mxu0 }
0x1af7   : > { %v12248_v27 = vpop.f32.mrb[13].mxu0 }
0x1af8   : > { %v8337_v10 = vpop.f32.mrb[14].mxu0 }
0x1af9   : > { %v12249_v53 = vpop.f32.mrb[15].mxu0 }
0x1b27   : > { %v15315_v8 = vpop.f32.mrb[244].mxu1 }
0x1b28   : > { %v12601_v58 = vpack.i.bf16 %v15315_v8, %v15313_v9  ;;  %v12254_v18 = vpop.f32.mrb[245].mxu1 }
0x1b29   : > { %v8385_v21 = vpop.f32.mrb[246].mxu1 }
0x1b2a   : > { %v12255_v36 = vpop.f32.mrb[247].mxu1 }
0x1b2b   : > { %v15319_v24 = vpop.f32.mrb[16].mxu0 }
0x1b2c   : > { %v12260_v5 = vpop.f32.mrb[17].mxu0 }
0x1b2d   : > { %v8433_v32 = vpop.f32.mrb[18].mxu0 }
0x1b2e   : > { %v12261_v62 = vpop.f32.mrb[19].mxu0 }
0x1b33   : > { %v8528_v47 = vpop.f32.mrb[20].mxu0 }
0x1b34   : > { %v8884_v26 = vmul.f32 0.35355338, %v8528_v47  ;;  %v12272_v3 = vpop.f32.mrb[21].mxu0 }
0x1b35   : > { %v8531_v25 = vpop.f32.mrb[22].mxu0 }
0x1b36   : > { %v15322_v6 = vadd.f32 %v8884_v26, %v13395_v12  ;;  %v12273_v0 = vpop.f32.mrb[23].mxu0 }
0x1b38   : > { %v8900_v54 = vsel %vm1172_vm3, %v15322_v6, -inf }
0x1b39   : > { %8901 = vmax.xlane.f32.xlu0 %v8900_v54 }
0x1b3b   : > { %v8628_v45 = vpop.f32.mrb[24].mxu0 }
0x1b3c   : > { %v8886_v37 = vmul.f32 0.35355338, %v8628_v45  ;;  %v12284_v16 = vpop.f32.mrb[25].mxu0 }
0x1b3d   : > { %v8631_v59 = vpop.f32.mrb[26].mxu0 }
0x1b3e   : > { %v15327_v28 = vadd.f32 %v8886_v37, %v13395_v12  ;;  %v12285_v19 = vpop.f32.mrb[27].mxu0 }
0x1b40   : > { %v8906_v35 = vsel %vm1172_vm3, %v15327_v28, -inf }
0x1b41   : > { %8907 = vmax.xlane.f32.xlu0 %v8906_v35 }
0x1b43   : > { %v8728_v49 = vpop.f32.mrb[28].mxu0 }
0x1b44   : > { %v12296_v38 = vpop.f32.mrb[29].mxu0  ;;  %v8888_v37 = vmul.f32 0.35355338, %v8728_v49 }
0x1b45   : > { %v8731_v56 = vpop.f32.mrb[30].mxu0 }
0x1b46   : > { %v12297_v57 = vpop.f32.mrb[31].mxu0  ;;  %v8896_v56 = vadd.f32 %v8888_v37, %v13395_v12 }
0x1b48   : > { %v8912_v49 = vsel %vm1172_vm3, %v8896_v56, -inf }
0x1b4b   : > { %v8828_v11 = vpop.f32.mrb[32].mxu0 }
0x1b4c   : > { %v12308_v27 = vpop.f32.mrb[33].mxu0  ;;  %v8890_v57 = vmul.f32 0.35355338, %v8828_v11 }
0x1b4d   : > { %v8831_v10 = vpop.f32.mrb[34].mxu0 }
0x1b4e   : > { %v12309_v53 = vpop.f32.mrb[35].mxu0 }
0x1b4f   : > { %v8898_v53 = vadd.f32 %v8890_v57, %v13395_v12 }
0x1b5c   : > { %v15331_v18 = vpop.f32.mrb[248].mxu1 }
0x1b5d   : > { %v12611_v21 = vpack.i.bf16 %v15331_v18, %v15319_v24  ;;  %v12266_v36 = vpop.f32.mrb[249].mxu1 }
0x1b5e   : > { %v8481_v5 = vpop.f32.mrb[250].mxu1 }
0x1b5f   : > { %v12267_v32 = vpop.f32.mrb[251].mxu1 }
0x1b64   : > { %v8578_v62 = vpop.f32.mrb[252].mxu1 }
0x1b65   : > { %v8885_v47 = vmul.f32 0.35355338, %v8578_v62  ;;  %v12278_v26 = vpop.f32.mrb[253].mxu1 }
0x1b66   : > { %v8581_v3 = vpop.f32.mrb[254].mxu1  ;;  %v8918_v26 = vsel %vm1172_vm3, %v8898_v53, -inf }
0x1b67   : > { %v8893_v25 = vadd.f32 %v8885_v47, %v13395_v12  ;;  %v12279_v0 = vpop.f32.mrb[255].mxu1 }
0x1b69   : > { %v8903_v54 = vsel %vm1172_vm3, %v8893_v25, -inf }
0x1b6a   : > { %8904 = vmax.xlane.f32.xlu1 %v8903_v54 }
0x1b6c   : > { %v8678_v45 = vpop.f32.mrb[0].mxu1 }
0x1b6d   : > { %v8887_v16 = vmul.f32 0.35355338, %v8678_v45  ;;  %v12290_v59 = vpop.f32.mrb[1].mxu1 }
0x1b6e   : > { %v8681_v19 = vpop.f32.mrb[2].mxu1 }
0x1b6f   : > { %v15338_v35 = vadd.f32 %v8887_v16, %v13395_v12  ;;  %v12291_v38 = vpop.f32.mrb[3].mxu1 }
0x1b71   : > { %v8909_v27 = vsel %vm1172_vm3, %v15338_v35, -inf }
0x1b72   : > { %8910 = vmax.xlane.f32.xlu0 %v8909_v27 }
0x1b74   : > { %v8778_v10 = vpop.f32.mrb[4].mxu1 }
0x1b75   : > { %v8889_v36 = vmul.f32 0.35355338, %v8778_v10  ;;  %v12302_v5 = vpop.f32.mrb[5].mxu1 }
0x1b76   : > { %v8781_v32 = vpop.f32.mrb[6].mxu1  ;;  %8913 = vmax.xlane.f32.xlu0 %v8912_v49 }
0x1b77   : > { %v15346_v62 = vadd.f32 %v8889_v36, %v13395_v12  ;;  %v12303_v47 = vpop.f32.mrb[7].mxu1 }
0x1b79   : > { %v8915_v11 = vsel %vm1172_vm3, %v15346_v62, -inf }
0x1b7a   : > { %8916 = vmax.xlane.f32.xlu1 %v8915_v11  ;;  %8919 = vmax.xlane.f32.xlu0 %v8918_v26 }
0x1b7c   : > { %v8878_v3 = vpop.f32.mrb[8].mxu1 }
0x1b7d   : > { %v12314_v0 = vpop.f32.mrb[9].mxu1  ;;  %v8891_v37 = vmul.f32 0.35355338, %v8878_v3 }
0x1b7e   : > { %v8881_v54 = vpop.f32.mrb[10].mxu1 }
0x1b7f   : > { %v12315_v45 = vpop.f32.mrb[11].mxu1  ;;  %v15358_v16 = vadd.f32 %v8891_v37, %v13395_v12 }
0x1b81   : > { %v8921_v59 = vsel %vm1172_vm3, %v15358_v16, -inf }
0x1b8b   : > { %9044 = vrot.lane.b32.xlu1 %v14646_v34, %s15916_s29 }
0x1b8f   : > { %9092 = vrot.lane.b32.xlu1 %v14752_v63, %s15916_s29 }
0x1b90   : > { %8996 = vrot.lane.b32.xlu0 %v14637_v14, %s15916_s29 }
0x1bb3   : > { %8922 = vmax.xlane.f32.xlu1 %v8921_v59 }
0x1bc4   : > { %9140 = vrot.lane.b32.xlu1 %v14758_v41, %s15916_s29 }
0x1bc6   : > { %v8902_v19 = vpop.xlane.xlu0 %8901 }
0x1bc7   : > { %v8924_v34 = vsub.f32 %v15322_v6, %v8902_v19 }
0x1bc9   : > { %v8932_v38 = vmul.f32 1.442695, %v8924_v34 }
0x1bcb   : > { %12945 = vpow2.f32 %v8932_v38 }
0x1bce   : > { %v8908_v63 = vpop.xlane.xlu0 %8907 }
0x1bcf   : > { %v8926_v57 = vsub.f32 %v15327_v28, %v8908_v63 }
0x1bd1   : > { %v8936_v14 = vmul.f32 1.442695, %v8926_v57 }
0x1bd3   : > { %12947 = vpow2.f32 %v8936_v14 }
0x1bd5   : > { %v15366_v27 = vpop.eup %12945 }
0x1bd6   : > { %v8948_v12 = vsel %vm1172_vm3, %v15366_v27, 0.0 }
0x1bd7   : > { %8949 = vadd.xlane.f32.xlu0 %v8948_v12  ;;  %v15918_v12 = vpack.i.bf16 %v15094_v1, %v15090_v29 }
0x1bdd   : > { %v15370_v10 = vpop.eup %12947 }
0x1bde   : > { %v8954_v41 = vsel %vm1172_vm3, %v15370_v10, 0.0 }
0x1bdf   : > { %8955 = vadd.xlane.f32.xlu0 %v8954_v41 }
0x1bf5   : > { %9188 = vrot.lane.b32.xlu0 %v14777_v39, %s15916_s29 }
0x1bf7   : > { %v8905_v6 = vpop.xlane.xlu1 %8904 }
0x1bf8   : > { %v8925_v36 = vsub.f32 %v8893_v25, %v8905_v6  ;;  %v15921_v6 = vpack.i.bf16 %v15098_v4, %v15092_v61 }
0x1bfa   : > { %v8934_v28 = vmul.f32 1.442695, %v8925_v36  ;;  %v15922_v36 = vpack.i.bf16 %v15120_v17, %v15108_v30 }
0x1bfc   : > { %12949 = vpow2.f32 %v8934_v28 }
0x1bff   : > { %v8911_v5 = vpop.xlane.xlu0 %8910 }
0x1c00   : > { %v8927_v38 = vsub.f32 %v15338_v35, %v8911_v5  ;;  %v15920_v35 = vpack.i.bf16 %v15104_v50, %v15102_v42 }
0x1c02   : > { %v8938_v63 = vmul.f32 1.442695, %v8927_v38 }
0x1c03   : > { %v8914_v49 = vpop.xlane.xlu0 %8913 }
0x1c04   : > { %v8928_v32 = vsub.f32 %v8896_v56, %v8914_v49 }
0x1c06   : > { %v15376_v47 = vpop.eup %12949  ;;  %v8940_v11 = vmul.f32 1.442695, %v8928_v32 }
0x1c07   : > { %v8917_v26 = vpop.xlane.xlu1 %8916  ;;  %v8920_v3 = vpop.xlane.xlu0 %8919  ;;  %v8951_v0 = vsel %vm1172_vm3, %v15376_v47, 0.0 }
0x1c08   : > { %12951 = vpow2.f32 %v8940_v11  ;;  %v8930_v54 = vsub.f32 %v8898_v53, %v8920_v3  ;;  %8952 = vadd.xlane.f32.xlu1 %v8951_v0  ;;  %v8929_v57 = vsub.f32 %v15346_v62, %v8917_v26 }
0x1c0a   : > { %v8944_v45 = vmul.f32 1.442695, %v8930_v54  ;;  %v8942_v14 = vmul.f32 1.442695, %v8929_v57 }
0x1c0b   : > { %v9045_v39 = vpop.permute.xlu1 %9044  ;;  %v8997_v37 = vpop.permute.xlu0 %8996 }
0x1c0c   : > { %v9050_v25 = vsel %vm1656_vm4, %v9045_v39, 0  ;;  %v9002_v59 = vsel %vm1656_vm4, %v8997_v37, 0  ;;  %12953 = vpow2.f32 %v8944_v45 }
0x1c0d   : > { %12317 = vmatpush3.bf16.msra.mxu0 %v9002_v59  ;;  %12323 = vmatpush3.bf16.msra.mxu1 %v9050_v25  ;;  %12955 = vpow2.f32 %v8938_v63 }
0x1c0e   : > { %12328 = vmatprep.subr.bf16.mxu0 %v15896_v13  ;;  %12334 = vmatprep.subr.bf16.mxu1 %v15896_v13  ;;  %12957 = vpow2.f32 %v8942_v14 }
0x1c0f   : > { %v9093_v62 = vpop.permute.xlu1 %9092 }
0x1c10   : > { %v9098_v49 = vsel %vm1656_vm4, %v9093_v62, 0 }
0x1c12   : > { %v15384_v56 = vpop.eup %12951 }
0x1c13   : > { %v8960_v53 = vsel %vm1172_vm3, %v15384_v56, 0.0 }
0x1c14   : > { %8961 = vadd.xlane.f32.xlu0 %v8960_v53 }
0x1c16   : > { %v15388_v19 = vpop.eup %12953 }
0x1c17   : > { %v8966_v34 = vsel %vm1172_vm3, %v15388_v19, 0.0 }
0x1c18   : > { %8967 = vadd.xlane.f32.xlu0 %v8966_v34 }
0x1c19   : > { %9236 = vrot.lane.b32.xlu1 %v14783_v52, %s15916_s29  ;;  %v15406_v52 = vpop.eup %12955 }
0x1c1a   : > { %v15414_v41 = vpop.eup %12957 }
0x1c1b   : > { %v8963_v1 = vsel %vm1172_vm3, %v15414_v41, 0.0 }
0x1c2e   : > { %9284 = vrot.lane.b32.xlu0 %v14800_v44, %s15916_s29  ;;  %v8957_v44 = vsel %vm1172_vm3, %v15406_v52, 0.0 }
0x1c32   : > { %12567 = vrot.lane.b32.xlu0 %v15918_v12, %s15917_s30 }
0x1c36   : > { %12577 = vrot.lane.b32.xlu0 %v12576_v2, %s15919_s4 }
0x1c3a   : > { %12587 = vrot.lane.b32.xlu0 %v15920_v35, %s15917_s30 }
0x1c3d   : > { %8958 = vadd.xlane.f32.xlu1 %v8957_v44 }
0x1c40   : > { %v8923_v29 = vpop.xlane.xlu1 %8922 }
0x1c41   : > { %v8931_v48 = vsub.f32 %v15358_v16, %v8923_v29  ;;  %8964 = vadd.xlane.f32.xlu1 %v8963_v1 }
0x1c43   : > { %v8946_v7 = vmul.f32 1.442695, %v8931_v48 }
0x1c44   : > { %v9141_v22 = vpop.permute.xlu1 %9140 }
0x1c45   : > { %12959 = vpow2.f32 %v8946_v7  ;;  %v9146_v26 = vsel %vm1656_vm4, %v9141_v22, 0 }
0x1c4f   : > { %v15419_v2 = vpop.eup %12959 }
0x1c50   : > { %v8969_v42 = vsel %vm1172_vm3, %v15419_v2, 0.0 }
0x1c51   : > { %8970 = vadd.xlane.f32.xlu1 %v8969_v42 }
0x1c62   : > { %9332 = vrot.lane.b32.xlu1 %v14805_v51, %s15916_s29 }
0x1c64   : > { %v8950_v50 = vpop.xlane.xlu0 %8949 }
0x1c65   : > { %12961 = vrcp.f32 %v8950_v50 }
0x1c66   : > { %12572 = vrot.lane.b32.xlu1 %v15921_v6, %s15917_s30 }
0x1c6a   : > { %12582 = vrot.lane.b32.xlu1 %v12581_v40, %s15919_s4 }
0x1c6c   : > { %v8956_v16 = vpop.xlane.xlu0 %8955 }
0x1c6d   : > { %12963 = vrcp.f32 %v8956_v16 }
0x1c6e   : > { %12592 = vrot.lane.b32.xlu1 %v15922_v36, %s15917_s30 }
0x1c6f   : > { %v12962_v51 = vpop.eup %12961 }
0x1c70   : > { %v8980_v28 = vmul.f32 %v12962_v51, %v15366_v27  ;;  %v9189_v23 = vpop.permute.xlu0 %9188 }
0x1c71   : > { %v9194_v30 = vsel %vm1656_vm4, %v9189_v23, 0 }
0x1c72   : > { %v8988_v5 = vpack.c.bf16 %v8980_v28, %v8980_v28  ;;  %v12651_v28 = vld [vmem:[%s15834_s10 + $0x10] sm:$0xff]  }
0x1c74   : > { %12319 = vmatmul.mubr.msk.bf16.vlgmr.msra.gmra.mrb[36].mxu0 %vm1172_vm3, %v8988_v5 }
0x1c75   : > { %12329 = vmatpush3.bf16.msra.mxu0 %v9098_v49  ;;  %12330 = vmatprep.mubr.msk.bf16.mxu0 %vm13034_vm2, %v15896_v13 }
0x1c76   : > { %12340 = vmatprep.subr.bf16.mxu0 %v15896_v13 }
0x1c77   : > { %v12964_v61 = vpop.eup %12963 }
0x1c78   : > { %v8982_v4 = vmul.f32 %v12964_v61, %v15370_v10 }
0x1c7a   : > { %v8990_v17 = vpack.c.bf16 %v8982_v4, %v8982_v4 }
0x1c7c   : > { %12331 = vmatmul.mubr.msk.bf16.vlgmr.msra.gmra.mrb[40].mxu0 %vm1172_vm3, %v8990_v17 }
0x1c7d   : > { %12341 = vmatpush3.bf16.msra.mxu0 %v9194_v30  ;;  %12342 = vmatprep.mubr.msk.bf16.mxu0 %vm13034_vm2, %v15896_v13 }
0x1c7e   : > { %12352 = vmatprep.subr.bf16.mxu0 %v15896_v13 }
0x1c95   : > { %v8953_v40 = vpop.xlane.xlu1 %8952 }
0x1c96   : > { %12965 = vrcp.f32 %v8953_v40 }
0x1c99   : > { %v9237_v53 = vpop.permute.xlu1 %9236 }
0x1c9a   : > { %v9242_v12 = vsel %vm1656_vm4, %v9237_v53, 0 }
0x1ca0   : > { %v12966_v27 = vpop.eup %12965 }
0x1ca1   : > { %v8981_v32 = vmul.f32 %v12966_v27, %v15376_v47  ;;  %v8962_v11 = vpop.xlane.xlu0 %8961 }
0x1ca2   : > { %12967 = vrcp.f32 %v8962_v11 }
0x1ca3   : > { %v8989_v10 = vpack.c.bf16 %v8981_v32, %v8981_v32 }
0x1ca5   : > { %12325 = vmatmul.mubr.msk.bf16.vlgmr.msra.gmra.mrb[12].mxu1 %vm1172_vm3, %v8989_v10  ;;  %v8968_v3 = vpop.xlane.xlu0 %8967  ;;  %v12652_v10 = vld [vmem:[%s15834_s10 + $0x18] sm:$0xff]  }
0x1ca6   : > { %12335 = vmatpush3.bf16.msra.mxu1 %v9146_v26  ;;  %12336 = vmatprep.mubr.msk.bf16.mxu1 %vm13034_vm2, %v15896_v13  ;;  %12969 = vrcp.f32 %v8968_v3 }
0x1ca7   : > { %12346 = vmatprep.subr.bf16.mxu1 %v15896_v13 }
0x1ca9   : > { %v9285_v45 = vpop.permute.xlu0 %9284 }
0x1caa   : > { %v9290_v37 = vsel %vm1656_vm4, %v9285_v45, 0 }
0x1cac   : > { %v12968_v0 = vpop.eup %12967 }
0x1cad   : > { %v8984_v54 = vmul.f32 %v12968_v0, %v15384_v56 }
0x1caf   : > { %v8992_v47 = vpack.c.bf16 %v8984_v54, %v8984_v54 }
0x1cb0   : > { %v12970_v39 = vpop.eup %12969 }
0x1cb1   : > { %12343 = vmatmul.mubr.msk.bf16.vlgmr.msra.gmra.mrb[44].mxu0 %vm1172_vm3, %v8992_v47  ;;  %v8986_v25 = vmul.f32 %v12970_v39, %v15388_v19 }
0x1cb2   : > { %12353 = vmatpush3.bf16.msra.mxu0 %v9290_v37  ;;  %12354 = vmatprep.mubr.msk.bf16.mxu0 %vm13034_vm2, %v15896_v13 }
0x1cb3   : > { %v8994_v59 = vpack.c.bf16 %v8986_v25, %v8986_v25  ;;  %12364 = vmatprep.subr.bf16.mxu0 %v12651_v28 }
0x1cb9   : > { %12355 = vmatmul.mubr.msk.bf16.vlgmr.msra.gmra.mrb[48].mxu0 %vm1172_vm3, %v8994_v59 }
0x1cba   : > { %12365 = vmatpush3.bf16.msra.mxu0 %v12651_v28 }
0x1cbb   : > { %12366 = vmatprep.subr.bf16.mxu0 %v12652_v10 }
0x1cbe   : > { %12367 = vmatpush3.bf16.msra.mxu0 %v12652_v10 }
0x1cca   : > { %v8959_v34 = vpop.xlane.xlu1 %8958 }
0x1ccb   : > { %12971 = vrcp.f32 %v8959_v34 }
0x1cce   : > { %v8965_v56 = vpop.xlane.xlu1 %8964 }
0x1ccf   : > { %12973 = vrcp.f32 %v8965_v56  ;;  %v12568_v56 = vpop.permute.xlu0 %12567 }
0x1cd0   : > { %v12569_v24 = vunpack.i.l.bf16 %v12568_v56 }
0x1cd5   : > { %v12972_v38 = vpop.eup %12971 }
0x1cd6   : > { %v8983_v63 = vmul.f32 %v12972_v38, %v15406_v52  ;;  %v12578_v38 = vpop.permute.xlu0 %12577 }
0x1cd7   : > { %v12580_v18 = vunpack.i.h.bf16 %v12578_v38 }
0x1cd8   : > { %v8991_v57 = vpack.c.bf16 %v8983_v63, %v8983_v63 }
0x1cd9   : > { %v12974_v14 = vpop.eup %12973 }
0x1cda   : > { %12337 = vmatmul.mubr.msk.bf16.vlgmr.msra.gmra.mrb[16].mxu1 %vm1172_vm3, %v8991_v57  ;;  %v8985_v19 = vmul.f32 %v12974_v14, %v15414_v41  ;;  %v12588_v63 = vpop.permute.xlu0 %12587  ;;  %v12570_v57 = vunpack.i.h.bf16 %v12568_v56 }
0x1cdb   : > { %12347 = vmatpush3.bf16.msra.mxu1 %v9242_v12  ;;  %12348 = vmatprep.mubr.msk.bf16.mxu1 %vm13034_vm2, %v15896_v13 }
0x1cdc   : > { %12358 = vmatprep.subr.bf16.mxu1 %v15896_v13  ;;  %v8993_v62 = vpack.c.bf16 %v8985_v19, %v8985_v19  ;;  %v9477_v12 = vsel %vm1172_vm3, %v14874_v60, %v12570_v57  ;;  %v9476_v19 = vsel %vm1172_vm3, %v14872_v31, %v12569_v24 }
0x1cde   : > { %v8971_v35 = vpop.xlane.xlu1 %8970 }
0x1cdf   : > { %12975 = vrcp.f32 %v8971_v35 }
0x1ce2   : > { %12349 = vmatmul.mubr.msk.bf16.vlgmr.msra.gmra.mrb[20].mxu1 %vm1172_vm3, %v8993_v62  ;;  %v9333_v52 = vpop.permute.xlu1 %9332 }
0x1ce3   : > { %v9338_v44 = vsel %vm1656_vm4, %v9333_v52, 0  ;;  %12360 = vmatprep.mubr.msk.bf16.mxu1 %vm13034_vm2, %v15896_v13 }
0x1ce4   : > { %12359 = vmatpush3.bf16.msra.mxu1 %v9338_v44  ;;  %v9485_v44 = vsel %vm722_vm0, %v9477_v12, %v12580_v18  ;;  %v15924_v12 = vld [vmem:[#allocation5_spill] sm:$0xff] }
0x1ce9   : > { %v12976_v29 = vpop.eup %12975 }
0x1cea   : > { %v8987_v1 = vmul.f32 %v12976_v29, %v15419_v2 }
0x1cec   : > { %v8995_v48 = vpack.c.bf16 %v8987_v1, %v8987_v1 }
0x1cee   : > { %12361 = vmatmul.mubr.msk.bf16.vlgmr.msra.gmra.mrb[24].mxu1 %vm1172_vm3, %v8995_v48 }
0x1d47   : > { %v9038_v41 = vpop.f32.mrb[36].mxu0 }
0x1d48   : > { %v12320_v7 = vpop.f32.mrb[37].mxu0 }
0x1d49   : > { %v9041_v42 = vpop.f32.mrb[38].mxu0 }
0x1d4a   : > { %v12321_v50 = vpop.f32.mrb[39].mxu0 }
0x1d4f   : > { %v9134_v6 = vpop.f32.mrb[40].mxu0 }
0x1d50   : > { %v12332_v16 = vpop.f32.mrb[41].mxu0 }
0x1d51   : > { %v9137_v36 = vpop.f32.mrb[42].mxu0 }
0x1d52   : > { %v12333_v51 = vpop.f32.mrb[43].mxu0 }
0x1d78   : > { %v9086_v5 = vpop.f32.mrb[12].mxu1 }
0x1d79   : > { %v12596_v49 = vpack.i.bf16 %v9086_v5, %v9038_v41  ;;  %v12326_v2 = vpop.f32.mrb[13].mxu1  ;;  %v12573_v41 = vpop.permute.xlu1 %12572 }
0x1d7a   : > { %v9089_v61 = vpop.f32.mrb[14].mxu1  ;;  %v12575_v60 = vunpack.i.h.bf16 %v12573_v41  ;;  %v12574_v50 = vunpack.i.l.bf16 %v12573_v41 }
0x1d7b   : > { %v12327_v4 = vpop.f32.mrb[15].mxu1  ;;  %12597 = vrot.lane.b32.xlu0 %v12596_v49, %s15923_s6 }
0x1d7c   : > { %v9479_v36 = vsel %vm1172_vm3, %v14878_v33, %v12575_v60  ;;  %v9478_v51 = vsel %vm1172_vm3, %v14876_v43, %v12574_v50 }
0x1d7d   : > { %v12583_v7 = vpop.permute.xlu1 %12582 }
0x1d7e   : > { %v12584_v31 = vunpack.i.l.bf16 %v12583_v7 }
0x1d7f   : > { %12602 = vrot.lane.b32.xlu0 %v12601_v58, %s15919_s4 }
0x1d80   : > { %v9486_v49 = vsel %vm722_vm0, %v9478_v51, %v12584_v31 }
0x1d81   : > { %v12593_v42 = vpop.permute.xlu1 %12592 }
0x1d84   : > { %v9230_v23 = vpop.f32.mrb[44].mxu0 }
0x1d85   : > { %v12344_v17 = vpop.f32.mrb[45].mxu0 }
0x1d86   : > { %v9233_v30 = vpop.f32.mrb[46].mxu0 }
0x1d87   : > { %v12345_v22 = vpop.f32.mrb[47].mxu0  ;;  %v12590_v30 = vunpack.i.h.bf16 %v12588_v63 }
0x1d88   : > { %v12589_v22 = vunpack.i.l.bf16 %v12588_v63 }
0x1d89   : > { %v9481_v43 = vsel %vm1172_vm3, %v14882_v15, %v12590_v30 }
0x1d8c   : > { %v9326_v40 = vpop.f32.mrb[48].mxu0 }
0x1d8d   : > { %v12356_v27 = vpop.f32.mrb[49].mxu0 }
0x1d8e   : > { %v9329_v32 = vpop.f32.mrb[50].mxu0 }
0x1d8f   : > { %v12357_v11 = vpop.f32.mrb[51].mxu0  ;;  %v9480_v32 = vsel %vm1172_vm3, %v14880_v46, %v12589_v22 }
0x1dad   : > { %v9182_v26 = vpop.f32.mrb[16].mxu1 }
0x1dae   : > { %v12606_v3 = vpack.i.bf16 %v9182_v26, %v9134_v6  ;;  %v12338_v0 = vpop.f32.mrb[17].mxu1  ;;  %v12585_v6 = vunpack.i.h.bf16 %v12583_v7  ;;  %v15927_v7 = vld [vmem:[#allocation7_spill] sm:$0xff] }
0x1daf   : > { %v9185_v54 = vpop.f32.mrb[18].mxu1 }
0x1db0   : > { %v12339_v9 = vpop.f32.mrb[19].mxu1  ;;  %12607 = vrot.lane.b32.xlu1 %v12606_v3, %s15923_s6  ;;  %v9487_v2 = vsel %vm722_vm0, %v9479_v36, %v12585_v6 }
0x1db4   : > { %12612 = vrot.lane.b32.xlu1 %v12611_v21, %s15919_s4  ;;  %v12579_v21 = vunpack.i.l.bf16 %v12578_v38  ;;  %s10699_s4 = sshll.u32 %s15935_s28, 3 }
0x1db5   : > { %v9278_v8 = vpop.f32.mrb[20].mxu1  ;;  %s683_s5 = scalar_lea.vmem %s15846_s22, %s10699_s4 }
0x1db6   : > { %v12616_v58 = vpack.i.bf16 %v9278_v8, %v9230_v23  ;;  %v12350_v45 = vpop.f32.mrb[21].mxu1  ;;  %v9484_v52 = vsel %vm722_vm0, %v9476_v19, %v12579_v21 }
0x1db7   : > { %v9281_v47 = vpop.f32.mrb[22].mxu1  ;;  %v12594_v45 = vunpack.i.l.bf16 %v12593_v42 }
0x1db8   : > { %v12351_v39 = vpop.f32.mrb[23].mxu1  ;;  %12617 = vrot.lane.b32.xlu0 %v12616_v58, %s15923_s6  ;;  %v12595_v58 = vunpack.i.h.bf16 %v12593_v42 }
0x1dba   : > { %v9483_v46 = vsel %vm1172_vm3, %v14896_v20, %v12595_v58  ;;  %v10975_v20 = vld [vmem:[%s15835_s11 + $0x1] ss:$0 sm:$0xff] }
0x1dc1   : > { %v9374_v37 = vpop.f32.mrb[24].mxu1 }
0x1dc2   : > { %v12621_v25 = vpack.i.bf16 %v9374_v37, %v9326_v40  ;;  %v12362_v59 = vpop.f32.mrb[25].mxu1  ;;  %v9482_v37 = vsel %vm1172_vm3, %v14884_v55, %v12594_v45 }
0x1dc3   : > { %v9377_v53 = vpop.f32.mrb[26].mxu1 }
0x1dc4   : > { %v12363_v34 = vpop.f32.mrb[27].mxu1  ;;  %12622 = vrot.lane.b32.xlu1 %v12621_v25, %s15923_s6 }
0x1ded   : > { %v12598_v14 = vpop.permute.xlu0 %12597 }
0x1dee   : > { %v12600_v35 = vunpack.i.h.bf16 %v12598_v14  ;;  %v12599_v62 = vunpack.i.l.bf16 %v12598_v14 }
0x1df0   : > { %v9493_v29 = vsel %vm4822_vm6, %v9485_v44, %v12600_v35  ;;  %v9492_v1 = vsel %vm4822_vm6, %v9484_v52, %v12599_v62  ;;  %v15925_v62 = vld [vmem:[#allocation3_spill] sm:$0xff] }
0x1df1   : > { %v9500_v48 = vpack.c.bf16 %v9493_v29, %v9492_v1  ;;  %v12603_v61 = vpop.permute.xlu0 %12602  ;;  %v15926_v29 = vld [vmem:[#allocation4_spill] sm:$0xff] }
0x1df2   : > { %v12605_v40 = vunpack.i.h.bf16 %v12603_v61  ;;  %v12604_v27 = vunpack.i.l.bf16 %v12603_v61 }
0x1df3   : > { %12368 = vmatprep.mubr.msk.bf16.mxu0 %vm846_vm1, %v9500_v48 }
0x1df4   : > { %v9489_v26 = vsel %vm722_vm0, %v9481_v43, %v12605_v40  ;;  %v9488_v3 = vsel %vm722_vm0, %v9480_v32, %v12604_v27  ;;  %v15931_v40 = vld [vmem:[#allocation10_spill] sm:$0xff] }
0x1e22   : > { %v12608_v16 = vpop.permute.xlu1 %12607 }
0x1e23   : > { %v12610_v28 = vunpack.i.h.bf16 %v12608_v16  ;;  %v12609_v5 = vunpack.i.l.bf16 %v12608_v16 }
0x1e25   : > { %v9495_v4 = vsel %vm4822_vm6, %v9487_v2, %v12610_v28  ;;  %v9494_v23 = vsel %vm4822_vm6, %v9486_v49, %v12609_v5  ;;  %v15928_v5 = vld [vmem:[#allocation9_spill] sm:$0xff] }
0x1e26   : > { %v9501_v17 = vpack.c.bf16 %v9495_v4, %v9494_v23  ;;  %v12613_v8 = vpop.permute.xlu1 %12612  ;;  %v15929_v4 = vld [vmem:[#allocation6_spill] sm:$0xff] }
0x1e27   : > { %v12615_v15 = vunpack.i.h.bf16 %v12613_v8  ;;  %v12614_v47 = vunpack.i.l.bf16 %v12613_v8 }
0x1e28   : > { %12369 = vmatmul.mubr.msk.bf16.vlgmr.msra.gmra.mrb[52].mxu0 %vm846_vm1, %v9501_v17  ;;  %v15930_v17 = vld [vmem:[#allocation8_spill] sm:$0xff] }
0x1e29   : > { %v9491_v53 = vsel %vm722_vm0, %v9483_v46, %v12615_v15  ;;  %v9490_v34 = vsel %vm722_vm0, %v9482_v37, %v12614_v47 }
0x1e2a   : > { %v12618_v33 = vpop.permute.xlu0 %12617 }
0x1e2b   : > { %v12620_v11 = vunpack.i.h.bf16 %v12618_v33  ;;  %v12619_v10 = vunpack.i.l.bf16 %v12618_v33 }
0x1e2d   : > { %v9497_v0 = vsel %vm4822_vm6, %v9489_v26, %v12620_v11  ;;  %v9496_v54 = vsel %vm4822_vm6, %v9488_v3, %v12619_v10 }
0x1e2e   : > { %v9502_v9 = vpack.c.bf16 %v9497_v0, %v9496_v54 }
0x1e30   : > { %12372 = vmatprep.mubr.msk.bf16.mxu0 %vm846_vm1, %v9502_v9 }
0x1e36   : > { %v12623_v39 = vpop.permute.xlu1 %12622 }
0x1e37   : > { %v12625_v25 = vunpack.i.h.bf16 %v12623_v39  ;;  %v12624_v59 = vunpack.i.l.bf16 %v12623_v39 }
0x1e39   : > { %v9499_v56 = vsel %vm4822_vm6, %v9491_v53, %v12625_v25  ;;  %v9498_v38 = vsel %vm4822_vm6, %v9490_v34, %v12624_v59 }
0x1e3a   : > { %v9503_v63 = vpack.c.bf16 %v9499_v56, %v9498_v38 }
0x1e3c   : > { %12373 = vmatmul.mubr.msk.bf16.gmra.mrb[56].mxu0 %vm846_vm1, %v9503_v63 }
0x1efb   : > { %v12370_v57 = vpop.f32.mrb[52].mxu0 }
0x1efc   : > { %v9575_v24 = vpop.f32.mrb[53].mxu0  ;;  %v9584_v55 = vadd.f32 %v12370_v57, %v10975_v20 }
0x1efd   : > { %v9576_v18 = vadd.f32 %v10975_v20, %v9575_v24  ;;  %v12371_v21 = vpop.f32.mrb[54].mxu0 }
0x1efe   : > { %v9578_v14 = vpop.f32.mrb[55].mxu0  ;;  %v9608_v52 = vadd.f32 %v9584_v55, %v15925_v62  ;;  %v9587_v44 = vadd.f32 %v12371_v21, %v10975_v20 }
0x1eff   : > { %v9606_v19 = vadd.f32 %v9576_v18, %v15924_v12  ;;  %v9579_v35 = vadd.f32 %v10975_v20, %v9578_v14 }
0x1f00   : > { %v9609_v42 = vadd.f32 %v9587_v44, %v15927_v7  ;;  %v9624_v60 = vsel %vm846_vm1, %v9608_v52, 0.0 }
0x1f01   : > { %v9607_v1 = vadd.f32 %v9579_v35, %v15926_v29  ;;  %v9618_v48 = vsel %vm846_vm1, %v9606_v19, 0.0 }
0x1f02   : > { %9619 = vadd.xlane.f32.xlu0 %v9618_v48  ;;  %v9627_v50 = vsel %vm846_vm1, %v9609_v42, 0.0 }
0x1f03   : > { %v9621_v41 = vsel %vm846_vm1, %v9607_v1, 0.0 }
0x1f04   : > { %9622 = vadd.xlane.f32.xlu1 %v9621_v41 }
0x1f06   : > { %9625 = vadd.xlane.f32.xlu0 %v9624_v60  ;;  %v12654_v60 = vld [vmem:[%s15838_s14 + $0x18] sm:$0xff]  }
0x1f0a   : > { %9628 = vadd.xlane.f32.xlu0 %v9627_v50 }
0x1f0f   : > { %v12374_v6 = vpop.f32.mrb[56].mxu0 }
0x1f10   : > { %v9591_v31 = vpop.f32.mrb[57].mxu0  ;;  %v9600_v16 = vadd.f32 %v12374_v6, %v10975_v20 }
0x1f11   : > { %v9592_v36 = vadd.f32 %v10975_v20, %v9591_v31  ;;  %v12375_v51 = vpop.f32.mrb[58].mxu0 }
0x1f12   : > { %v9594_v28 = vpop.f32.mrb[59].mxu0  ;;  %v9603_v2 = vadd.f32 %v12375_v51, %v10975_v20  ;;  %v9612_v23 = vadd.f32 %v9600_v16, %v15929_v4 }
0x1f13   : > { %v9610_v49 = vadd.f32 %v9592_v36, %v15928_v5  ;;  %v9595_v61 = vadd.f32 %v10975_v20, %v9594_v28 }
0x1f14   : > { %v9613_v27 = vadd.f32 %v9603_v2, %v15931_v40  ;;  %v9636_v43 = vsel %vm846_vm1, %v9612_v23, 0.0 }
0x1f15   : > { %v9611_v30 = vadd.f32 %v9595_v61, %v15930_v17  ;;  %v9630_v22 = vsel %vm846_vm1, %v9610_v49, 0.0  ;;  %v10984_v17 = vld [vmem:[%s15836_s12 + $0x1] ss:$0 sm:$0xff] }
0x1f16   : > { %9631 = vadd.xlane.f32.xlu0 %v9630_v22  ;;  %v9639_v32 = vsel %vm846_vm1, %v9613_v27, 0.0 }
0x1f17   : > { %v9633_v33 = vsel %vm846_vm1, %v9611_v30, 0.0 }
0x1f18   : > { %9634 = vadd.xlane.f32.xlu1 %v9633_v33 }
0x1f1a   : > { %9637 = vadd.xlane.f32.xlu0 %v9636_v43  ;;  %v10985_v43 = vld [vmem:[%s15837_s13 + $0x1] ss:$0 sm:$0xff] }
0x1f1c   : > { %9640 = vadd.xlane.f32.xlu1 %v9639_v32 }
0x1f8f   : > { %v9620_v11 = vpop.xlane.xlu0 %9619 }
0x1f90   : > { %v9642_v10 = vmul.f32 0.03125, %v9620_v11 }
0x1f91   : > { %v9623_v26 = vpop.xlane.xlu1 %9622 }
0x1f92   : > { %v15548_v3 = vsub.f32 %v9606_v19, %v9642_v10  ;;  %v9643_v0 = vmul.f32 0.03125, %v9623_v26 }
0x1f93   : > { %v9626_v54 = vpop.xlane.xlu0 %9625 }
0x1f94   : > { %v15550_v9 = vsub.f32 %v9607_v1, %v9643_v0  ;;  %v9644_v8 = vmul.f32 0.03125, %v9626_v54  ;;  %v9658_v58 = vmul.f32 %v15548_v3, %v15548_v3 }
0x1f96   : > { %v15554_v45 = vsub.f32 %v9608_v52, %v9644_v8  ;;  %v9666_v15 = vsel %vm846_vm1, %v9658_v58, 0.0  ;;  %v9659_v47 = vmul.f32 %v15550_v9, %v15550_v9 }
0x1f97   : > { %9667 = vadd.xlane.f32.xlu0 %v9666_v15  ;;  %v9629_v39 = vpop.xlane.xlu0 %9628 }
0x1f98   : > { %v9645_v46 = vmul.f32 0.03125, %v9629_v39  ;;  %v9669_v37 = vsel %vm846_vm1, %v9659_v47, 0.0  ;;  %v9660_v25 = vmul.f32 %v15554_v45, %v15554_v45 }
0x1f99   : > { %9670 = vadd.xlane.f32.xlu1 %v9669_v37 }
0x1f9a   : > { %v15562_v59 = vsub.f32 %v9609_v42, %v9645_v46  ;;  %v9672_v53 = vsel %vm846_vm1, %v9660_v25, 0.0  ;;  %v12653_v42 = vld [vmem:[%s15838_s14 + $0x10] sm:$0xff]  }
0x1f9b   : > { %9673 = vadd.xlane.f32.xlu0 %v9672_v53  ;;  %12376 = vmatprep.subr.bf16.mxu1 %v12653_v42 }
0x1f9c   : > { %v9661_v34 = vmul.f32 %v15562_v59, %v15562_v59  ;;  %12377 = vmatpush3.bf16.msra.mxu1 %v12653_v42 }
0x1f9d   : > { %12378 = vmatprep.subr.bf16.mxu1 %v12654_v60 }
0x1f9e   : > { %v9675_v56 = vsel %vm846_vm1, %v9661_v34, 0.0 }
0x1f9f   : > { %9676 = vadd.xlane.f32.xlu1 %v9675_v56 }
0x1fa0   : > { %12379 = vmatpush3.bf16.msra.mxu1 %v12654_v60 }
0x1fa1   : > { %12404 = vmatprep.subr.bf16.mxu1 %v15896_v13 }
0x1fa3   : > { %v9632_v38 = vpop.xlane.xlu0 %9631 }
0x1fa4   : > { %v9646_v63 = vmul.f32 0.03125, %v9632_v38 }
0x1fa5   : > { %v9635_v20 = vpop.xlane.xlu1 %9634 }
0x1fa6   : > { %v15568_v57 = vsub.f32 %v9610_v49, %v9646_v63  ;;  %v9647_v24 = vmul.f32 0.03125, %v9635_v20 }
0x1fa7   : > { %v9638_v55 = vpop.xlane.xlu0 %9637 }
0x1fa8   : > { %v15570_v18 = vsub.f32 %v9611_v30, %v9647_v24  ;;  %v9648_v21 = vmul.f32 0.03125, %v9638_v55  ;;  %v9662_v14 = vmul.f32 %v15568_v57, %v15568_v57 }
0x1fa9   : > { %v9641_v12 = vpop.xlane.xlu1 %9640 }
0x1faa   : > { %v15574_v19 = vsub.f32 %v9612_v23, %v9648_v21  ;;  %v9649_v35 = vmul.f32 0.03125, %v9641_v12  ;;  %v9678_v62 = vsel %vm846_vm1, %v9662_v14, 0.0  ;;  %v9663_v52 = vmul.f32 %v15570_v18, %v15570_v18 }
0x1fab   : > { %9679 = vadd.xlane.f32.xlu0 %v9678_v62 }
0x1fac   : > { %v15579_v44 = vsub.f32 %v9613_v27, %v9649_v35  ;;  %v9681_v29 = vsel %vm846_vm1, %v9663_v52, 0.0  ;;  %v9664_v1 = vmul.f32 %v15574_v19, %v15574_v19 }
0x1fad   : > { %9682 = vadd.xlane.f32.xlu1 %v9681_v29 }
0x1fae   : > { %v9684_v48 = vsel %vm846_vm1, %v9664_v1, 0.0  ;;  %v9665_v41 = vmul.f32 %v15579_v44, %v15579_v44 }
0x1faf   : > { %9685 = vadd.xlane.f32.xlu0 %v9684_v48 }
0x1fb0   : > { %v9687_v7 = vsel %vm846_vm1, %v9665_v41, 0.0 }
0x1fb1   : > { %9688 = vadd.xlane.f32.xlu1 %v9687_v7 }
0x2024   : > { %v9668_v50 = vpop.xlane.xlu0 %9667 }
0x2025   : > { %v9690_v6 = vmul.f32 0.03125, %v9668_v50  ;;  %v12656_v50 = vld [vmem:[%s15840_s16 + $0x28] sm:$0xff]  }
0x2026   : > { %v9671_v31 = vpop.xlane.xlu1 %9670 }
0x2027   : > { %v9698_v16 = vadd.f32 1e-05, %v9690_v6  ;;  %v9691_v36 = vmul.f32 0.03125, %v9671_v31  ;;  %v12657_v6 = vld [vmem:[%s15840_s16 + $0x30] sm:$0xff]   ;;  %v12658_v31 = vld [vmem:[%s15840_s16 + $0x38] sm:$0xff]  }
0x2028   : > { %v9674_v51 = vpop.xlane.xlu0 %9673 }
0x2029   : > { %12977 = vrsqrt.f32 %v9698_v16  ;;  %v9699_v28 = vadd.f32 1e-05, %v9691_v36  ;;  %v9692_v5 = vmul.f32 0.03125, %v9674_v51  ;;  %v10991_v16 = vld [vmem:[%s15839_s15 + $0x1] ss:$0 sm:$0xff] }
0x202b   : > { %12979 = vrsqrt.f32 %v9699_v28  ;;  %v9700_v49 = vadd.f32 1e-05, %v9692_v5 }
0x202c   : > { %v9677_v2 = vpop.xlane.xlu1 %9676 }
0x202d   : > { %12981 = vrsqrt.f32 %v9700_v49  ;;  %v9693_v61 = vmul.f32 0.03125, %v9677_v2 }
0x202f   : > { %v9701_v4 = vadd.f32 1e-05, %v9693_v61 }
0x2031   : > { %12983 = vrsqrt.f32 %v9701_v4 }
0x2033   : > { %v12978_v23 = vpop.eup %12977 }
0x2034   : > { %v9714_v30 = vmul.f32 %v12978_v23, %v15548_v3 }
0x2035   : > { %v12980_v22 = vpop.eup %12979 }
0x2036   : > { %v9715_v40 = vmul.f32 %v12980_v22, %v15550_v9  ;;  %v9728_v27 = vmul.f32 %v10984_v17, %v9714_v30 }
0x2037   : > { %v12982_v33 = vpop.eup %12981 }
0x2038   : > { %v9716_v32 = vmul.f32 %v12982_v33, %v15554_v45  ;;  %v9680_v11 = vpop.xlane.xlu0 %9679  ;;  %v9729_v10 = vmul.f32 %v10984_v17, %v9715_v40  ;;  %v15604_v54 = vadd.f32 %v10985_v43, %v9728_v27 }
0x2039   : > { %v9694_v26 = vmul.f32 0.03125, %v9680_v11 }
0x203a   : > { %v9683_v0 = vpop.xlane.xlu1 %9682  ;;  %v15606_v8 = vadd.f32 %v10985_v43, %v9729_v10  ;;  %v9730_v9 = vmul.f32 %v10984_v17, %v9716_v32 }
0x203b   : > { %v12984_v3 = vpop.eup %12983  ;;  %v9702_v58 = vadd.f32 1e-05, %v9694_v26  ;;  %v9695_v15 = vmul.f32 0.03125, %v9683_v0 }
0x203c   : > { %v9717_v47 = vmul.f32 %v12984_v3, %v15562_v59  ;;  %v9686_v39 = vpop.xlane.xlu0 %9685  ;;  %v9750_v46 = vpack.c.bf16 %v15606_v8, %v15604_v54  ;;  %v15612_v38 = vadd.f32 %v10985_v43, %v9730_v9 }
0x203d   : > { %12985 = vrsqrt.f32 %v9702_v58  ;;  %v9703_v45 = vadd.f32 1e-05, %v9695_v15  ;;  %v9696_v37 = vmul.f32 0.03125, %v9686_v39 }
0x203e   : > { %v9731_v25 = vmul.f32 %v10984_v17, %v9717_v47  ;;  %v9689_v53 = vpop.xlane.xlu1 %9688  ;;  %12380 = vmatprep.mubr.msk.bf16.mxu1 %vm846_vm1, %v9750_v46 }
0x203f   : > { %12987 = vrsqrt.f32 %v9703_v45  ;;  %v9704_v34 = vadd.f32 1e-05, %v9696_v37  ;;  %v9697_v56 = vmul.f32 0.03125, %v9689_v53 }
0x2040   : > { %v15614_v63 = vadd.f32 %v10985_v43, %v9731_v25 }
0x2041   : > { %12989 = vrsqrt.f32 %v9704_v34  ;;  %v9705_v59 = vadd.f32 1e-05, %v9697_v56 }
0x2042   : > { %v9751_v20 = vpack.c.bf16 %v15614_v63, %v15612_v38 }
0x2043   : > { %12991 = vrsqrt.f32 %v9705_v59 }
0x2044   : > { %12381 = vmatmul.mubr.msk.bf16.vlgmr.msra.gmra.mrb[28].mxu1 %vm846_vm1, %v9751_v20 }
0x2047   : > { %v12986_v24 = vpop.eup %12985 }
0x2048   : > { %v9718_v55 = vmul.f32 %v12986_v24, %v15568_v57 }
0x2049   : > { %v12988_v21 = vpop.eup %12987 }
0x204a   : > { %v9719_v14 = vmul.f32 %v12988_v21, %v15570_v18  ;;  %v9732_v12 = vmul.f32 %v10984_v17, %v9718_v55 }
0x204b   : > { %v12990_v35 = vpop.eup %12989 }
0x204c   : > { %v9720_v62 = vmul.f32 %v12990_v35, %v15574_v19  ;;  %v9733_v52 = vmul.f32 %v10984_v17, %v9719_v14  ;;  %v15623_v41 = vadd.f32 %v10985_v43, %v9732_v12 }
0x204d   : > { %v12992_v29 = vpop.eup %12991 }
0x204e   : > { %v9734_v1 = vmul.f32 %v10984_v17, %v9720_v62  ;;  %v9721_v48 = vmul.f32 %v12992_v29, %v15579_v44  ;;  %v15625_v7 = vadd.f32 %v10985_v43, %v9733_v52  ;;  %v12655_v44 = vld [vmem:[%s15840_s16 + $0x20] sm:$0xff]  }
0x204f   : > { %12388 = vmatprep.subr.bf16.mxu0 %v12655_v44 }
0x2050   : > { %v9735_v42 = vmul.f32 %v10984_v17, %v9721_v48  ;;  %v9752_v57 = vpack.c.bf16 %v15625_v7, %v15623_v41  ;;  %v15629_v60 = vadd.f32 %v10985_v43, %v9734_v1  ;;  %12389 = vmatpush3.bf16.msra.mxu0 %v12655_v44 }
0x2051   : > { %12390 = vmatprep.subr.bf16.mxu0 %v12656_v50 }
0x2052   : > { %v15631_v18 = vadd.f32 %v10985_v43, %v9735_v42  ;;  %12384 = vmatprep.mubr.msk.bf16.mxu1 %vm846_vm1, %v9752_v57 }
0x2054   : > { %v9753_v19 = vpack.c.bf16 %v15631_v18, %v15629_v60  ;;  %12391 = vmatpush3.bf16.msra.mxu0 %v12656_v50 }
0x2055   : > { %12392 = vmatprep.subr.bf16.mxu0 %v12657_v6 }
0x2056   : > { %12385 = vmatmul.mubr.msk.bf16.gmra.mrb[32].mxu1 %vm846_vm1, %v9753_v19 }
0x2057   : > { %12408 = vmatprep.mubr.msk.bf16.mxu1 %vm13034_vm2, %v15896_v13 }
0x2058   : > { %12393 = vmatpush3.bf16.msra.mxu0 %v12657_v6 }
0x2059   : > { %12394 = vmatprep.subr.bf16.mxu0 %v12658_v31 }
0x205c   : > { %12395 = vmatpush3.bf16.msra.mxu0 %v12658_v31 }
0x2117   : > { %v12382_v36 = vpop.f32.mrb[28].mxu1 }
0x2118   : > { %v9834_v51 = vadd.f32 %v12382_v36, %v10991_v16  ;;  %v9825_v28 = vpop.f32.mrb[29].mxu1 }
0x2119   : > { %v9826_v5 = vadd.f32 %v10991_v16, %v9825_v28  ;;  %v12383_v49 = vpop.f32.mrb[30].mxu1 }
0x211a   : > { %v9866_v2 = vmul.f32 0.70710677, %v9834_v51  ;;  %v9837_v61 = vadd.f32 %v12383_v49, %v10991_v16  ;;  %v9828_v4 = vpop.f32.mrb[31].mxu1  ;;  %v9858_v10 = vmul.f32 0.5, %v9834_v51 }
0x211b   : > { %v9864_v23 = vmul.f32 0.70710677, %v9826_v5  ;;  %v9829_v17 = vadd.f32 %v10991_v16, %v9828_v4  ;;  %v9856_v58 = vmul.f32 0.5, %v9826_v5 }
0x211c   : > { %12993 = verf.f32 %v9866_v2  ;;  %v9867_v30 = vmul.f32 0.70710677, %v9837_v61  ;;  %v9859_v26 = vmul.f32 0.5, %v9837_v61  ;;  %v11007_v2 = vld [vmem:[%s15841_s17 + $0x1] ss:$0 sm:$0xff] }
0x211d   : > { %12995 = verf.f32 %v9864_v23  ;;  %v9865_v22 = vmul.f32 0.70710677, %v9829_v17  ;;  %v9857_v15 = vmul.f32 0.5, %v9829_v17 }
0x211e   : > { %12997 = verf.f32 %v9867_v30 }
0x211f   : > { %12999 = verf.f32 %v9865_v22 }
0x2126   : > { %v12994_v40 = vpop.eup %12993 }
0x2127   : > { %v12996_v27 = vpop.eup %12995  ;;  %v9882_v33 = vadd.f32 1.0, %v12994_v40 }
0x2128   : > { %v12998_v43 = vpop.eup %12997  ;;  %v9880_v32 = vadd.f32 1.0, %v12996_v27 }
0x2129   : > { %v13000_v11 = vpop.eup %12999  ;;  %v9883_v0 = vadd.f32 1.0, %v12998_v43  ;;  %v12386_v3 = vpop.f32.mrb[32].mxu1  ;;  %v9890_v46 = vmul.f32 %v9882_v33, %v9858_v10 }
0x212a   : > { %v9881_v9 = vadd.f32 1.0, %v13000_v11  ;;  %v9850_v47 = vadd.f32 %v12386_v3, %v10991_v16  ;;  %v9841_v39 = vpop.f32.mrb[33].mxu1  ;;  %v9888_v53 = vmul.f32 %v9880_v32, %v9856_v58 }
0x212b   : > { %v9891_v45 = vmul.f32 %v9883_v0, %v9859_v26  ;;  %v9842_v37 = vadd.f32 %v10991_v16, %v9841_v39  ;;  %v12387_v25 = vpop.f32.mrb[34].mxu1 }
0x212c   : > { %v9889_v34 = vmul.f32 %v9881_v9, %v9857_v15  ;;  %v9870_v56 = vmul.f32 0.70710677, %v9850_v47  ;;  %v9853_v59 = vadd.f32 %v12387_v25, %v10991_v16  ;;  %v9844_v20 = vpop.f32.mrb[35].mxu1  ;;  %v9862_v57 = vmul.f32 0.5, %v9850_v47 }
0x212d   : > { %v9897_v24 = vpack.c.bf16 %v9891_v45, %v9890_v46  ;;  %v9868_v55 = vmul.f32 0.70710677, %v9842_v37  ;;  %v9845_v21 = vadd.f32 %v10991_v16, %v9844_v20  ;;  %v9860_v50 = vmul.f32 0.5, %v9842_v37 }
0x212e   : > { %v9896_v14 = vpack.c.bf16 %v9889_v34, %v9888_v53  ;;  %13001 = verf.f32 %v9870_v56  ;;  %v9871_v12 = vmul.f32 0.70710677, %v9853_v59  ;;  %v9863_v19 = vmul.f32 0.5, %v9853_v59 }
0x212f   : > { %13003 = verf.f32 %v9868_v55  ;;  %v9869_v35 = vmul.f32 0.70710677, %v9845_v21  ;;  %v9861_v6 = vmul.f32 0.5, %v9845_v21 }
0x2130   : > { %13005 = verf.f32 %v9871_v12  ;;  %12396 = vmatprep.mubr.msk.bf16.mxu0 %vm5266_vm7, %v9896_v14 }
0x2131   : > { %13007 = verf.f32 %v9869_v35  ;;  %12397 = vmatmul.mubr.msk.bf16.vlgmr.msra.gmra.mrb[60].mxu0 %vm5266_vm7, %v9897_v24 }
0x2138   : > { %v13002_v62 = vpop.eup %13001 }
0x2139   : > { %v13004_v52 = vpop.eup %13003  ;;  %v9886_v29 = vadd.f32 1.0, %v13002_v62 }
0x213a   : > { %v13006_v1 = vpop.eup %13005  ;;  %v9884_v48 = vadd.f32 1.0, %v13004_v52 }
0x213b   : > { %v13008_v42 = vpop.eup %13007  ;;  %v9887_v44 = vadd.f32 1.0, %v13006_v1  ;;  %v9894_v16 = vmul.f32 %v9886_v29, %v9862_v57 }
0x213c   : > { %v9885_v31 = vadd.f32 1.0, %v13008_v42  ;;  %v9892_v51 = vmul.f32 %v9884_v48, %v9860_v50 }
0x213d   : > { %v9895_v36 = vmul.f32 %v9887_v44, %v9863_v19 }
0x213e   : > { %v9893_v28 = vmul.f32 %v9885_v31, %v9861_v6 }
0x213f   : > { %v9899_v5 = vpack.c.bf16 %v9895_v36, %v9894_v16 }
0x2140   : > { %v9898_v49 = vpack.c.bf16 %v9893_v28, %v9892_v51 }
0x2142   : > { %12400 = vmatprep.mubr.msk.bf16.mxu0 %vm5266_vm7, %v9898_v49 }
0x2143   : > { %12401 = vmatmul.mubr.msk.bf16.gmra.mrb[64].mxu0 %vm5266_vm7, %v9899_v5 }
0x2204   : > { %v12398_v61 = vpop.f32.mrb[60].mxu0 }
0x2205   : > { %v9996_v4 = vadd.f32 %v12398_v61, %v11007_v2  ;;  %v9987_v23 = vpop.f32.mrb[61].mxu0 }
0x2206   : > { %v9988_v17 = vadd.f32 %v11007_v2, %v9987_v23  ;;  %v12399_v30 = vpop.f32.mrb[62].mxu0 }
0x2207   : > { %v10020_v22 = vadd.f32 %v9996_v4, %v15612_v38  ;;  %v9999_v40 = vadd.f32 %v12399_v30, %v11007_v2  ;;  %v9990_v27 = vpop.f32.mrb[63].mxu0 }
0x2208   : > { %v9991_v33 = vadd.f32 %v11007_v2, %v9990_v27  ;;  %v10018_v43 = vadd.f32 %v9988_v17, %v15604_v54 }
0x2209   : > { %v10021_v32 = vadd.f32 %v9999_v40, %v15614_v63  ;;  %v10036_v11 = vsel %vm846_vm1, %v10020_v22, 0.0 }
0x220a   : > { %10037 = vadd.xlane.f32.xlu0 %v10036_v11  ;;  %v10019_v10 = vadd.f32 %v9991_v33, %v15606_v8  ;;  %v10030_v0 = vsel %vm846_vm1, %v10018_v43, 0.0 }
0x220b   : > { %v10039_v26 = vsel %vm846_vm1, %v10021_v32, 0.0 }
0x220c   : > { %10040 = vadd.xlane.f32.xlu1 %v10039_v26  ;;  %v10033_v38 = vsel %vm846_vm1, %v10019_v10, 0.0 }
0x220e   : > { %10031 = vadd.xlane.f32.xlu0 %v10030_v0 }
0x2210   : > { %10034 = vadd.xlane.f32.xlu1 %v10033_v38 }
0x2216   : > { %v12402_v3 = vpop.f32.mrb[64].mxu0 }
0x2217   : > { %v10003_v58 = vpop.f32.mrb[65].mxu0  ;;  %v10012_v15 = vadd.f32 %v12402_v3, %v11007_v2 }
0x2218   : > { %v10004_v54 = vadd.f32 %v11007_v2, %v10003_v58  ;;  %v12403_v9 = vpop.f32.mrb[66].mxu0 }
0x2219   : > { %v10006_v63 = vpop.f32.mrb[67].mxu0  ;;  %v10015_v39 = vadd.f32 %v12403_v9, %v11007_v2  ;;  %v10024_v8 = vadd.f32 %v10012_v15, %v15629_v60 }
0x221a   : > { %v10022_v47 = vadd.f32 %v10004_v54, %v15623_v41  ;;  %v10007_v46 = vadd.f32 %v11007_v2, %v10006_v63 }
0x221b   : > { %v10025_v25 = vadd.f32 %v10015_v39, %v15631_v18  ;;  %v10048_v34 = vsel %vm846_vm1, %v10024_v8, 0.0 }
0x221c   : > { %v10023_v45 = vadd.f32 %v10007_v46, %v15625_v7  ;;  %v10042_v37 = vsel %vm846_vm1, %v10022_v47, 0.0  ;;  %v11018_v46 = vld [vmem:[%s15842_s18 + $0x1] ss:$0 sm:$0xff] }
0x221d   : > { %10043 = vadd.xlane.f32.xlu0 %v10042_v37  ;;  %v10051_v56 = vsel %vm846_vm1, %v10025_v25, 0.0  ;;  %v11019_v37 = vld [vmem:[%s15843_s19 + $0x1] ss:$0 sm:$0xff] }
0x221e   : > { %v10045_v53 = vsel %vm846_vm1, %v10023_v45, 0.0 }
0x221f   : > { %10046 = vadd.xlane.f32.xlu1 %v10045_v53 }
0x2221   : > { %10049 = vadd.xlane.f32.xlu0 %v10048_v34 }
0x2223   : > { %10052 = vadd.xlane.f32.xlu1 %v10051_v56 }
0x2297   : > { %v10038_v41 = vpop.xlane.xlu0 %10037 }
0x2298   : > { %v10056_v59 = vmul.f32 0.03125, %v10038_v41 }
0x2299   : > { %v10041_v20 = vpop.xlane.xlu1 %10040 }
0x229a   : > { %v15677_v60 = vsub.f32 %v10020_v22, %v10056_v59  ;;  %v10057_v7 = vmul.f32 0.03125, %v10041_v20 }
0x229b   : > { %v10032_v24 = vpop.xlane.xlu0 %10031 }
0x229c   : > { %v15679_v55 = vsub.f32 %v10021_v32, %v10057_v7  ;;  %v10054_v21 = vmul.f32 0.03125, %v10032_v24  ;;  %v10072_v18 = vmul.f32 %v15677_v60, %v15677_v60  ;;  %v12660_v32 = vld [vmem:[%s15844_s20 + $0x8] sm:$0xff]  }
0x229d   : > { %v10035_v14 = vpop.xlane.xlu1 %10034 }
0x229e   : > { %v15683_v12 = vsub.f32 %v10018_v43, %v10054_v21  ;;  %v10055_v35 = vmul.f32 0.03125, %v10035_v14  ;;  %v10084_v62 = vsel %vm846_vm1, %v10072_v18, 0.0  ;;  %v10073_v52 = vmul.f32 %v15679_v55, %v15679_v55  ;;  %v12659_v43 = vld [vmem:[%s15844_s20] sm:$0xff]  }
0x229f   : > { %10085 = vadd.xlane.f32.xlu0 %v10084_v62  ;;  %12405 = vmatpush3.bf16.msra.mxu1 %v12659_v43 }
0x22a0   : > { %v15688_v29 = vsub.f32 %v10019_v10, %v10055_v35  ;;  %v10087_v1 = vsel %vm846_vm1, %v10073_v52, 0.0  ;;  %v10070_v48 = vmul.f32 %v15683_v12, %v15683_v12  ;;  %12406 = vmatprep.subr.bf16.mxu1 %v15896_v13 }
0x22a1   : > { %10088 = vadd.xlane.f32.xlu1 %v10087_v1 }
0x22a2   : > { %v10078_v42 = vsel %vm846_vm1, %v10070_v48, 0.0  ;;  %v10071_v57 = vmul.f32 %v15688_v29, %v15688_v29 }
0x22a3   : > { %10079 = vadd.xlane.f32.xlu0 %v10078_v42  ;;  %12407 = vmatpush3.bf16.msra.mxu1 %v12660_v32  ;;  %v12661_v32 = vld [vmem:[%s15844_s20 + $0x10] sm:$0xff]  }
0x22a4   : > { %v10081_v19 = vsel %vm846_vm1, %v10071_v57, 0.0  ;;  %12412 = vmatprep.subr.bf16.mxu1 %v15896_v13 }
0x22a5   : > { %10082 = vadd.xlane.f32.xlu1 %v10081_v19 }
0x22aa   : > { %v10044_v44 = vpop.xlane.xlu0 %10043 }
0x22ab   : > { %v10058_v50 = vmul.f32 0.03125, %v10044_v44 }
0x22ac   : > { %v10047_v6 = vpop.xlane.xlu1 %10046 }
0x22ad   : > { %v15697_v31 = vsub.f32 %v10022_v47, %v10058_v50  ;;  %v10059_v16 = vmul.f32 0.03125, %v10047_v6 }
0x22ae   : > { %v10050_v36 = vpop.xlane.xlu0 %10049 }
0x22af   : > { %v15699_v51 = vsub.f32 %v10023_v45, %v10059_v16  ;;  %v10060_v28 = vmul.f32 0.03125, %v10050_v36  ;;  %v10074_v5 = vmul.f32 %v15697_v31, %v15697_v31 }
0x22b0   : > { %v10053_v49 = vpop.xlane.xlu1 %10052 }
0x22b1   : > { %v15703_v2 = vsub.f32 %v10024_v8, %v10060_v28  ;;  %v10061_v61 = vmul.f32 0.03125, %v10053_v49  ;;  %v10090_v4 = vsel %vm846_vm1, %v10074_v5, 0.0  ;;  %v10075_v23 = vmul.f32 %v15699_v51, %v15699_v51 }
0x22b2   : > { %10091 = vadd.xlane.f32.xlu0 %v10090_v4 }
0x22b3   : > { %v15708_v17 = vsub.f32 %v10025_v25, %v10061_v61  ;;  %v10093_v30 = vsel %vm846_vm1, %v10075_v23, 0.0  ;;  %v10076_v22 = vmul.f32 %v15703_v2, %v15703_v2 }
0x22b4   : > { %10094 = vadd.xlane.f32.xlu1 %v10093_v30 }
0x22b5   : > { %v10096_v40 = vsel %vm846_vm1, %v10076_v22, 0.0  ;;  %v10077_v27 = vmul.f32 %v15708_v17, %v15708_v17 }
0x22b6   : > { %10097 = vadd.xlane.f32.xlu0 %v10096_v40 }
0x22b7   : > { %v10099_v33 = vsel %vm846_vm1, %v10077_v27, 0.0 }
0x22b8   : > { %10100 = vadd.xlane.f32.xlu1 %v10099_v33 }
0x232c   : > { %v10086_v11 = vpop.xlane.xlu0 %10085 }
0x232d   : > { %v10104_v10 = vmul.f32 0.03125, %v10086_v11 }
0x232e   : > { %v10089_v26 = vpop.xlane.xlu1 %10088 }
0x232f   : > { %v10112_v0 = vadd.f32 1e-05, %v10104_v10  ;;  %v10105_v38 = vmul.f32 0.03125, %v10089_v26 }
0x2330   : > { %v10080_v3 = vpop.xlane.xlu0 %10079 }
0x2331   : > { %13009 = vrsqrt.f32 %v10112_v0  ;;  %v10113_v58 = vadd.f32 1e-05, %v10105_v38  ;;  %v10102_v15 = vmul.f32 0.03125, %v10080_v3  ;;  %v12663_v38 = vld [vmem:[%s15844_s20 + $0x20] sm:$0xff]  }
0x2332   : > { %v10083_v54 = vpop.xlane.xlu1 %10082 }
0x2333   : > { %13011 = vrsqrt.f32 %v10113_v58  ;;  %v10110_v9 = vadd.f32 1e-05, %v10102_v15  ;;  %v10103_v63 = vmul.f32 0.03125, %v10083_v54  ;;  %v12664_v58 = vld [vmem:[%s15844_s20 + $0x28] sm:$0xff]  }
0x2335   : > { %13013 = vrsqrt.f32 %v10110_v9  ;;  %v10111_v47 = vadd.f32 1e-05, %v10103_v63  ;;  %v12665_v63 = vld [vmem:[%s15844_s20 + $0x30] sm:$0xff]  }
0x2337   : > { %13015 = vrsqrt.f32 %v10111_v47 }
0x233b   : > { %v13010_v39 = vpop.eup %13009 }
0x233c   : > { %v10128_v8 = vmul.f32 %v13010_v39, %v15677_v60  ;;  %v12666_v39 = vld [vmem:[%s15844_s20 + $0x38] sm:$0xff]  }
0x233d   : > { %v13012_v45 = vpop.eup %13011 }
0x233e   : > { %v10142_v25 = vmul.f32 %v11018_v46, %v10128_v8  ;;  %v10129_v53 = vmul.f32 %v13012_v45, %v15679_v55 }
0x233f   : > { %v13014_v34 = vpop.eup %13013  ;;  %v10092_v56 = vpop.xlane.xlu0 %10091 }
0x2340   : > { %v10156_v41 = vadd.f32 %v11019_v37, %v10142_v25  ;;  %v10143_v59 = vmul.f32 %v11018_v46, %v10129_v53  ;;  %v10126_v20 = vmul.f32 %v13014_v34, %v15683_v12  ;;  %v10106_v7 = vmul.f32 0.03125, %v10092_v56  ;;  %v12668_v53 = vld [vmem:[%s15844_s20 + $0x48] sm:$0xff]  }
0x2341   : > { %v13016_v24 = vpop.eup %13015  ;;  %v10095_v21 = vpop.xlane.xlu1 %10094 }
0x2342   : > { %10164 = vst.msk [vmem:[#allocation2 + $0x10] sm:$0xff] %vm846_vm1, %v10156_v41  ;;  %v10157_v60 = vadd.f32 %v11019_v37, %v10143_v59  ;;  %v10140_v18 = vmul.f32 %v11018_v46, %v10126_v20  ;;  %v10127_v14 = vmul.f32 %v13016_v24, %v15688_v29  ;;  %v10114_v35 = vadd.f32 1e-05, %v10106_v7  ;;  %v12669_v59 = vld [vmem:[%s15844_s20 + $0x50] sm:$0xff]   ;;  %v12670_v7 = vld [vmem:[%s15844_s20 + $0x58] sm:$0xff]  }
0x2343   : > { %v10107_v62 = vmul.f32 0.03125, %v10095_v21  ;;  %v10098_v52 = vpop.xlane.xlu0 %10097 }
0x2344   : > { %10165 = vst.msk [vmem:[#allocation2 + $0x18] sm:$0xff] %vm846_vm1, %v10157_v60  ;;  %v10154_v55 = vadd.f32 %v11019_v37, %v10140_v18  ;;  %v10141_v1 = vmul.f32 %v11018_v46, %v10127_v14  ;;  %13017 = vrsqrt.f32 %v10114_v35  ;;  %v10108_v48 = vmul.f32 0.03125, %v10098_v52  ;;  %v12671_v18 = vld [vmem:[%s15844_s20 + $0x60] sm:$0xff]   ;;  %v12672_v35 = vld [vmem:[%s15844_s20 + $0x68] sm:$0xff]  }
0x2345   : > { %v10115_v42 = vadd.f32 1e-05, %v10107_v62  ;;  %v10101_v12 = vpop.xlane.xlu1 %10100 }
0x2346   : > { %10162 = vst.msk [vmem:[#allocation2] sm:$0xff] %vm846_vm1, %v10154_v55  ;;  %v10155_v57 = vadd.f32 %v11019_v37, %v10141_v1  ;;  %v10116_v19 = vadd.f32 1e-05, %v10108_v48  ;;  %v10109_v44 = vmul.f32 0.03125, %v10101_v12  ;;  %v11020_v48 = vld [vmem:[%s15845_s21] ss:$0 sm:$0xff] }
0x2347   : > { %13019 = vrsqrt.f32 %v10115_v42 }
0x2348   : > { %10163 = vst.msk [vmem:[#allocation2 + $0x8] sm:$0xff] %vm846_vm1, %v10155_v57  ;;  %13021 = vrsqrt.f32 %v10116_v19  ;;  %v10117_v29 = vadd.f32 1e-05, %v10109_v44 }
0x234a   : > { %13023 = vrsqrt.f32 %v10117_v29 }
0x234e   : > { %v13018_v50 = vpop.eup %13017 }
0x234f   : > { %v10130_v6 = vmul.f32 %v13018_v50, %v15697_v31  ;;  %v10243_v26 = vld [vmem:[#allocation2 + $0x1] ss:$8 sm:$0xf]  ;;  %v10309_v54 = vld [vmem:[#allocation2 + $0x2] ss:$8 sm:$0xf] }
0x2350   : > { %v10375_v8 = vld [vmem:[#allocation2 + $0x3] ss:$8 sm:$0xf]  ;;  %v10441_v56 = vld [vmem:[#allocation2 + $0x4] ss:$8 sm:$0xf] }
0x2351   : > { %v13020_v16 = vpop.eup %13019  ;;  %v10144_v36 = vmul.f32 %v11018_v46, %v10130_v6  ;;  %v10507_v21 = vld [vmem:[#allocation2 + $0x5] ss:$8 sm:$0xf]  ;;  %v10573_v52 = vld [vmem:[#allocation2 + $0x6] ss:$8 sm:$0xf] }
0x2352   : > { %v13022_v28 = vpop.eup %13021  ;;  %v10131_v5 = vmul.f32 %v13020_v16, %v15699_v51  ;;  %v10178_v51 = vld [vmem:[#allocation2] ss:$8 sm:$0xf] }
0x2353   : > { %v10158_v49 = vadd.f32 %v11019_v37, %v10144_v36  ;;  %v10132_v61 = vmul.f32 %v13022_v28, %v15703_v2 }
0x2354   : > { %v13024_v4 = vpop.eup %13023  ;;  %v10145_v23 = vmul.f32 %v11018_v46, %v10131_v5 }
0x2355   : > { %10166 = vst.msk [vmem:[#allocation2 + $0x20] sm:$0xff] %vm846_vm1, %v10158_v49  ;;  %v10146_v30 = vmul.f32 %v11018_v46, %v10132_v61  ;;  %v10133_v22 = vmul.f32 %v13024_v4, %v15708_v17  ;;  %v12662_v17 = vld [vmem:[%s15844_s20 + $0x18] sm:$0xff]  }
0x2356   : > { %v10159_v40 = vadd.f32 %v11019_v37, %v10145_v23 }
0x2357   : > { %v10160_v27 = vadd.f32 %v11019_v37, %v10146_v30  ;;  %v10147_v33 = vmul.f32 %v11018_v46, %v10133_v22 }
0x2358   : > { %10167 = vst.msk [vmem:[#allocation2 + $0x28] sm:$0xff] %vm846_vm1, %v10159_v40 }
0x2359   : > { %10168 = vst.msk [vmem:[#allocation2 + $0x30] sm:$0xff] %vm846_vm1, %v10160_v27  ;;  %v10161_v31 = vadd.f32 %v11019_v37, %v10147_v33  ;;  %v12667_v37 = vld [vmem:[%s15844_s20 + $0x40] sm:$0xff]  }
0x235b   : > { %10169 = vst.msk [vmem:[#allocation2 + $0x38] sm:$0xff] %vm846_vm1, %v10161_v31 }
0x2362   : > { %v10179_v43 = vld [vmem:[#allocation2] ss:$8 sm:$0xf0]  ;;  %v10244_v10 = vld [vmem:[#allocation2 + $0x1] ss:$8 sm:$0xf0] }
0x2363   : > { %v10180_v2 = vor.u32 %v10179_v43, %v10178_v51  ;;  %v10245_v0 = vor.u32 %v10244_v10, %v10243_v26  ;;  %v10310_v15 = vld [vmem:[#allocation2 + $0x2] ss:$8 sm:$0xf0]  ;;  %v10376_v46 = vld [vmem:[#allocation2 + $0x3] ss:$8 sm:$0xf0] }
0x2364   : > { %v10311_v9 = vor.u32 %v10310_v15, %v10309_v54  ;;  %v10377_v45 = vor.u32 %v10376_v46, %v10375_v8  ;;  %v10442_v34 = vld [vmem:[#allocation2 + $0x4] ss:$8 sm:$0xf0]  ;;  %v10508_v24 = vld [vmem:[#allocation2 + $0x5] ss:$8 sm:$0xf0] }
0x2365   : > { %v10181_v11 = vpack.c.bf16 %v10180_v2, %v10180_v2  ;;  %v10246_v3 = vpack.c.bf16 %v10245_v0, %v10245_v0  ;;  %v10443_v41 = vor.u32 %v10442_v34, %v10441_v56  ;;  %v10509_v60 = vor.u32 %v10508_v24, %v10507_v21  ;;  %v10574_v62 = vld [vmem:[#allocation2 + $0x6] ss:$8 sm:$0xf0] }
0x2366   : > { %v10312_v47 = vpack.c.bf16 %v10311_v9, %v10311_v9  ;;  %v10378_v25 = vpack.c.bf16 %v10377_v45, %v10377_v45  ;;  %v10575_v55 = vor.u32 %v10574_v62, %v10573_v52 }
0x2367   : > { %12409 = vmatmul.mubr.msk.bf16.vlgmr.msra.gmra.mrb[36].mxu1 %vm846_vm1, %v10181_v11  ;;  %v10444_v20 = vpack.c.bf16 %v10443_v41, %v10443_v41  ;;  %v10510_v14 = vpack.c.bf16 %v10509_v60, %v10509_v60 }
0x2368   : > { %12413 = vmatpush3.bf16.msra.mxu1 %v12661_v32  ;;  %12416 = vmatprep.mubr.msk.bf16.mxu1 %vm13034_vm2, %v15896_v13  ;;  %v10576_v1 = vpack.c.bf16 %v10575_v55, %v10575_v55 }
0x2369   : > { %12414 = vmatprep.subr.bf16.mxu1 %v15896_v13 }
0x236c   : > { %12415 = vmatpush3.bf16.msra.mxu1 %v12662_v17 }
0x236d   : > { %12420 = vmatprep.subr.bf16.mxu1 %v15896_v13 }
0x2373   : > { %12417 = vmatmul.mubr.msk.bf16.vlgmr.msra.gmra.mrb[36].mxu1 %vm846_vm1, %v10246_v3 }
0x2374   : > { %12421 = vmatpush3.bf16.msra.mxu1 %v12663_v38  ;;  %12424 = vmatprep.mubr.msk.bf16.mxu1 %vm13034_vm2, %v15896_v13 }
0x2375   : > { %12422 = vmatprep.subr.bf16.mxu1 %v15896_v13 }
0x2378   : > { %12423 = vmatpush3.bf16.msra.mxu1 %v12664_v58 }
0x2379   : > { %12428 = vmatprep.subr.bf16.mxu1 %v15896_v13 }
0x237f   : > { %12425 = vmatmul.mubr.msk.bf16.vlgmr.msra.gmra.mrb[36].mxu1 %vm846_vm1, %v10312_v47 }
0x2380   : > { %12429 = vmatpush3.bf16.msra.mxu1 %v12665_v63  ;;  %12432 = vmatprep.mubr.msk.bf16.mxu1 %vm13034_vm2, %v15896_v13 }
0x2381   : > { %12430 = vmatprep.subr.bf16.mxu1 %v15896_v13 }
0x2384   : > { %12431 = vmatpush3.bf16.msra.mxu1 %v12666_v39 }
0x2385   : > { %12436 = vmatprep.subr.bf16.mxu1 %v15896_v13 }
0x238b   : > { %12433 = vmatmul.mubr.msk.bf16.vlgmr.msra.gmra.mrb[36].mxu1 %vm846_vm1, %v10378_v25 }
0x238c   : > { %12437 = vmatpush3.bf16.msra.mxu1 %v12667_v37  ;;  %12440 = vmatprep.mubr.msk.bf16.mxu1 %vm13034_vm2, %v15896_v13 }
0x238d   : > { %12438 = vmatprep.subr.bf16.mxu1 %v15896_v13 }
0x2390   : > { %12439 = vmatpush3.bf16.msra.mxu1 %v12668_v53 }
0x2391   : > { %12444 = vmatprep.subr.bf16.mxu1 %v15896_v13 }
0x2397   : > { %12441 = vmatmul.mubr.msk.bf16.vlgmr.msra.gmra.mrb[36].mxu1 %vm846_vm1, %v10444_v20 }
0x2398   : > { %12445 = vmatpush3.bf16.msra.mxu1 %v12669_v59  ;;  %12448 = vmatprep.mubr.msk.bf16.mxu1 %vm13034_vm2, %v15896_v13 }
0x2399   : > { %12446 = vmatprep.subr.bf16.mxu1 %v15896_v13 }
0x239c   : > { %12447 = vmatpush3.bf16.msra.mxu1 %v12670_v7 }
0x239d   : > { %12452 = vmatprep.subr.bf16.mxu1 %v15896_v13 }
0x23a3   : > { %12449 = vmatmul.mubr.msk.bf16.vlgmr.msra.gmra.mrb[36].mxu1 %vm846_vm1, %v10510_v14 }
0x23a4   : > { %12453 = vmatpush3.bf16.msra.mxu1 %v12671_v18  ;;  %12456 = vmatprep.mubr.msk.bf16.mxu1 %vm13034_vm2, %v15896_v13 }
0x23a5   : > { %12454 = vmatprep.subr.bf16.mxu1 %v15896_v13 }
0x23a8   : > { %12455 = vmatpush3.bf16.msra.mxu1 %v12672_v35 }
0x23af   : > { %12457 = vmatmul.mubr.msk.bf16.vlgmr.msra.gmra.mrb[36].mxu1 %vm846_vm1, %v10576_v1 }
0x2482   : > { %v10631_v42 = vpop.f32.mrb[36].mxu1 }
0x2483   : > { %v12464_v13 = vadd.f32 %v11020_v48, %v10631_v42  ;;  %v12458_v12 = vpop.f32.mrb[37].mxu1 }
0x2484   : > { %v10634_v57 = vpop.f32.mrb[38].mxu1 }
0x2485   : > { %10638 = vst [vmem:[%s683_s5] sm:$0xff] %v12464_v13  ;;  %v12459_v19 = vpop.f32.mrb[39].mxu1 }
0x2486 PF: > { %s32_s3 = sadd.s32 1, %s13031_s3  }
0x2487   : > { %p29_p5 = scmp.ge.s32.totalorder %s32_s3, 4  }
0x2489   :  { %31 = sbr.rel (!%p29_p5) target bundleno = 8 (0x8), region = 166 }

</bundles_post_ra>
